<compile_context>
chip_gen: v5e
topology: v5e:2x2
jax: 0.10.0
libtpu: 0.0.40
codegen_flags: <defaults>
</compile_context>

<pallas_src>
import functools
import numpy as np

import jax
import jax.numpy as jnp
from jax.experimental import pallas as pl
from jax.experimental.pallas import tpu as pltpu

EPS = 1e-5
VMEM = pl.BlockSpec(memory_space=pltpu.MemorySpace.VMEM)


# ---------------------------------------------------------------------------
# Bilinear x2 upsample (align_corners=True) as two separable MXU matmuls.
# ---------------------------------------------------------------------------
def _interp_matrix(in_size, out_size):
    """(out_size, in_size) linear interpolation matrix (align_corners=True)."""
    if out_size == 1:
        src = np.zeros((1,), np.float64)
    else:
        src = np.arange(out_size) * (in_size - 1) / (out_size - 1)
    i0 = np.clip(np.floor(src).astype(np.int64), 0, in_size - 1)
    i1 = np.clip(i0 + 1, 0, in_size - 1)
    frac = (src - i0).astype(np.float32)
    m = np.zeros((out_size, in_size), np.float32)
    m[np.arange(out_size), i0] += 1.0 - frac
    m[np.arange(out_size), i1] += frac
    return m


def _left_matmul_kernel(a_ref, x_ref, o_ref):
    # o[n] = A @ x[n]
    o_ref[0] = jnp.dot(a_ref[...], x_ref[0], preferred_element_type=jnp.float32)


def _right_matmul_kernel(x_ref, b_ref, o_ref):
    # o[n] = x[n] @ B
    o_ref[0] = jnp.dot(x_ref[0], b_ref[...], preferred_element_type=jnp.float32)


def bilinear_up2(x_nchw):
    """NCHW input -> bilinearly x2-upsampled NHWC output (align_corners=True)."""
    N, C, H, W = x_nchw.shape
    H2, W2 = 2 * H, 2 * W
    a = jnp.asarray(_interp_matrix(H, H2))        # (H2, H)
    bt = jnp.asarray(_interp_matrix(W, W2).T)     # (W, W2)

    # H-axis interpolation: (H2, H) @ (H, C*W), one batch element per grid step.
    xh = jnp.transpose(x_nchw, (0, 2, 1, 3)).reshape(N, H, C * W)
    t1 = pl.pallas_call(
        _left_matmul_kernel,
        grid=(N,),
        in_specs=[
            pl.BlockSpec((H2, H), lambda n: (0, 0)),
            pl.BlockSpec((1, H, C * W), lambda n: (n, 0, 0)),
        ],
        out_specs=pl.BlockSpec((1, H2, C * W), lambda n: (n, 0, 0)),
        out_shape=jax.ShapeDtypeStruct((N, H2, C * W), jnp.float32),
        compiler_params=pltpu.CompilerParams(dimension_semantics=("parallel",)),
    )(a, xh)

    # W-axis interpolation: (H2*C, W) @ (W, W2), one batch element per grid step.
    t1 = t1.reshape(N, H2 * C, W)
    t2 = pl.pallas_call(
        _right_matmul_kernel,
        grid=(N,),
        in_specs=[
            pl.BlockSpec((1, H2 * C, W), lambda n: (n, 0, 0)),
            pl.BlockSpec((W, W2), lambda n: (0, 0)),
        ],
        out_specs=pl.BlockSpec((1, H2 * C, W2), lambda n: (n, 0, 0)),
        out_shape=jax.ShapeDtypeStruct((N, H2 * C, W2), jnp.float32),
        compiler_params=pltpu.CompilerParams(dimension_semantics=("parallel",)),
    )(t1, bt)

    # (N, H2, C, W2) -> NHWC
    return jnp.transpose(t2.reshape(N, H2, C, W2), (0, 1, 3, 2))


# ---------------------------------------------------------------------------
# Conv3x3 (pad=1) + BatchNorm (batch stats) + fused epilogue, two tiled passes.
# ---------------------------------------------------------------------------
def _conv_taps_kernel(xpad_ref, w_ref, b_ref, y_ref, sum_ref, ssq_ref, *, th, w_sz):
    """3x3 conv + bias for one (batch, row-tile); accumulates BN partial sums."""
    j = pl.program_id(1)
    cin = w_ref.shape[1]
    cout = w_ref.shape[2]
    r0 = pl.multiple_of(j * th, th)

    acc = jnp.zeros((th * w_sz, cout), jnp.float32)
    for dy in range(3):
        for dx in range(3):
            patch = xpad_ref[0, pl.ds(r0 + dy, th), pl.ds(dx, w_sz), :]
            acc = acc + jnp.dot(patch.reshape(th * w_sz, cin),
                                w_ref[dy * 3 + dx],
                                preferred_element_type=jnp.float32)
    acc = acc + b_ref[...]
    y_ref[0] = acc

    @pl.when(j == 0)
    def _():
        sum_ref[...] = jnp.zeros_like(sum_ref)
        ssq_ref[...] = jnp.zeros_like(ssq_ref)

    sum_ref[0] = sum_ref[0] + jnp.sum(acc, axis=0, keepdims=True)
    ssq_ref[0] = ssq_ref[0] + jnp.sum(acc * acc, axis=0, keepdims=True)


def _bn_finalize_kernel(*refs, count, mode):
    """BatchNorm with global batch stats + affine + fused epilogue."""
    if mode in ("res_relu", "emb"):
        y_ref, x_ref, s_ref, q_ref, g_ref, be_ref, o_ref = refs
    else:
        y_ref, s_ref, q_ref, g_ref, be_ref, o_ref = refs
        x_ref = None

    y = y_ref[0]                                  # (tile_rows, Cout)
    inv_n = 1.0 / count
    mean = s_ref[0] * inv_n                       # (1, Cout)
    var = q_ref[0] * inv_n - mean * mean
    scale = jax.lax.rsqrt(var + EPS) * g_ref[...]
    out = (y - mean) * scale + be_ref[...]
    if mode == "relu":
        out = jnp.maximum(out, 0.0)
    elif mode == "res_relu":
        out = jnp.maximum(out + x_ref[0], 0.0)    # fused residual + ReLU
    elif mode == "emb":
        out = out + x_ref[0]                      # fused (N, 1, Cout) emb add
    o_ref[0] = out.astype(o_ref.dtype)


def _pick_row_tile(h, w, c):
    """Largest divisor of h whose f32 tile fits ~1 MiB (and gives >=2 tiles)."""
    budget = 1 << 20
    cap = max(1, min(h, budget // max(1, w * c * 4)))
    cap = min(cap, max(1, h // 2))
    th = 1
    for cand in range(1, cap + 1):
        if h % cand == 0:
            th = cand
    return th


def conv3x3_bn(x_nhwc, w, b, gamma, beta, *, mode="relu", extra=None):
    """Conv2d(3x3, pad=1) + BatchNorm2d (training batch stats) + fused epilogue.

    mode: "relu"     -> ReLU(bn(conv(x)))
          "res_relu" -> ReLU(bn(conv(x)) + extra)   (extra: NHWC residual)
          "emb"      -> bn(conv(x)) + extra         (extra: (N, 1, Cout) embedding)
    """
    N, H, W, Cin = x_nhwc.shape
    Cout = w.shape[-1]
    th = _pick_row_tile(H, W, max(Cin, Cout))
    nh = H // th
    tm = th * W
    count = float(N * H * W)

    xpad = jnp.pad(x_nhwc, ((0, 0), (1, 1), (1, 1), (0, 0)))
    wt = w.reshape(9, Cin, Cout)
    b2 = b.reshape(1, Cout)
    g2 = gamma.reshape(1, Cout)
    be2 = beta.reshape(1, Cout)

    # Pass 1: conv taps + bias; per-batch-element column sum / sum-of-squares.
    y, psum, pssq = pl.pallas_call(
        functools.partial(_conv_taps_kernel, th=th, w_sz=W),
        grid=(N, nh),
        in_specs=[
            pl.BlockSpec((1, H + 2, W + 2, Cin), lambda n, j: (n, 0, 0, 0)),
            pl.BlockSpec((9, Cin, Cout), lambda n, j: (0, 0, 0)),
            pl.BlockSpec((1, Cout), lambda n, j: (0, 0)),
        ],
        out_specs=[
            pl.BlockSpec((1, tm, Cout), lambda n, j: (n, j, 0)),
            pl.BlockSpec((1, 1, Cout), lambda n, j: (n, 0, 0)),
            pl.BlockSpec((1, 1, Cout), lambda n, j: (n, 0, 0)),
        ],
        out_shape=[
            jax.ShapeDtypeStruct((N, H * W, Cout), jnp.float32),
            jax.ShapeDtypeStruct((N, 1, Cout), jnp.float32),
            jax.ShapeDtypeStruct((N, 1, Cout), jnp.float32),
        ],
        compiler_params=pltpu.CompilerParams(
            dimension_semantics=("parallel", "arbitrary")),
    )(xpad, wt, b2)

    # Tiny (N, 1, Cout) cross-batch reduction of the partial sums (plain-JAX glue).
    ssum = jnp.sum(psum, axis=0, keepdims=True)       # (1, 1, Cout)
    ssq = jnp.sum(pssq, axis=0, keepdims=True)        # (1, 1, Cout)

    # Pass 2: normalize with global stats, apply gamma/beta + fused epilogue.
    in_arrays = [y]
    in_specs = [pl.BlockSpec((1, tm, Cout), lambda n, j: (n, j, 0))]
    if mode == "res_relu":
        in_arrays.append(extra.reshape(N, H * W, Cout))
        in_specs.append(pl.BlockSpec((1, tm, Cout), lambda n, j: (n, j, 0)))
    elif mode == "emb":
        in_arrays.append(extra)                        # (N, 1, Cout)
        in_specs.append(pl.BlockSpec((1, 1, Cout), lambda n, j: (n, 0, 0)))
    in_arrays += [ssum, ssq, g2, be2]
    in_specs += [
        pl.BlockSpec((1, 1, Cout), lambda n, j: (0, 0, 0)),
        pl.BlockSpec((1, 1, Cout), lambda n, j: (0, 0, 0)),
        pl.BlockSpec((1, Cout), lambda n, j: (0, 0)),
        pl.BlockSpec((1, Cout), lambda n, j: (0, 0)),
    ]
    out = pl.pallas_call(
        functools.partial(_bn_finalize_kernel, count=count, mode=mode),
        grid=(N, nh),
        in_specs=in_specs,
        out_specs=pl.BlockSpec((1, tm, Cout), lambda n, j: (n, j, 0)),
        out_shape=jax.ShapeDtypeStruct((N, H * W, Cout), jnp.float32),
        compiler_params=pltpu.CompilerParams(
            dimension_semantics=("parallel", "arbitrary")),
    )(*in_arrays)
    return out.reshape(N, H, W, Cout)


# ---------------------------------------------------------------------------
# Time-embedding layer: emb = ReLU(t @ W + b), computed once (tiny).
# ---------------------------------------------------------------------------
def _emb_kernel(t_ref, w_ref, b_ref, o_ref):
    e = jnp.dot(t_ref[...], w_ref[...], preferred_element_type=jnp.float32)
    o_ref[...] = jnp.maximum(e + b_ref[...], 0.0)


def emb_layer(t, w_emb, b_emb):
    n = t.shape[0]
    cout = w_emb.shape[-1]
    out = pl.pallas_call(
        _emb_kernel,
        out_shape=jax.ShapeDtypeStruct((n, cout), jnp.float32),
        in_specs=[VMEM, VMEM, VMEM],
        out_specs=VMEM,
    )(t, w_emb, b_emb.reshape(1, cout))
    return out.reshape(n, 1, cout)


# ---------------------------------------------------------------------------
# Module: parameters + forward
# ---------------------------------------------------------------------------
def init_params(key, in_channels, out_channels, time_embd_dim):
    mid2 = in_channels // 2
    keys = iter(jax.random.split(key, 10))

    def conv_w(cin, cout):
        return 0.1 * jax.random.normal(next(keys), (3, 3, cin, cout), jnp.float32)

    def vec(c):
        return 0.1 * jax.random.normal(next(keys), (c,), jnp.float32)

    p = {}
    # ConvBlock 1 (residual): in -> in (mid = in)
    p["w1a"], p["b1a"] = conv_w(in_channels, in_channels), vec(in_channels)
    p["g1a"], p["be1a"] = jnp.ones((in_channels,), jnp.float32), jnp.zeros((in_channels,), jnp.float32)
    p["w1b"], p["b1b"] = conv_w(in_channels, in_channels), vec(in_channels)
    p["g1b"], p["be1b"] = jnp.ones((in_channels,), jnp.float32), jnp.zeros((in_channels,), jnp.float32)
    # ConvBlock 2: in -> out, mid = in // 2
    p["w2a"], p["b2a"] = conv_w(in_channels, mid2), vec(mid2)
    p["g2a"], p["be2a"] = jnp.ones((mid2,), jnp.float32), jnp.zeros((mid2,), jnp.float32)
    p["w2b"], p["b2b"] = conv_w(mid2, out_channels), vec(out_channels)
    p["g2b"], p["be2b"] = jnp.ones((out_channels,), jnp.float32), jnp.zeros((out_channels,), jnp.float32)
    # emb_layer: Linear(time_embd_dim, out_channels) then ReLU
    p["w_emb"] = 0.1 * jax.random.normal(next(keys), (time_embd_dim, out_channels), jnp.float32)
    p["b_emb"] = vec(out_channels)
    return p


def upsample_forward(params, x_nchw, skip_nchw, t):
    xu = bilinear_up2(x_nchw)                          # (N, 2H, 2W, Cx), NHWC
    skip = jnp.transpose(skip_nchw, (0, 2, 3, 1))      # NHWC
    h = jnp.concatenate([skip, xu], axis=-1)           # torch.cat([skip_x, x], dim=1)

    # ConvBlock(in, in, residual=True): relu(h + conv-bn-relu-conv-bn(h))
    y = conv3x3_bn(h, params["w1a"], params["b1a"], params["g1a"], params["be1a"],
                   mode="relu")
    h = conv3x3_bn(y, params["w1b"], params["b1b"], params["g1b"], params["be1b"],
                   mode="res_relu", extra=h)           # fused residual + ReLU

    # ConvBlock(in, out, mid=in//2)
    y = conv3x3_bn(h, params["w2a"], params["b2a"], params["g2a"], params["be2a"],
                   mode="relu")
    emb = emb_layer(t, params["w_emb"], params["b_emb"])      # (N, 1, Cout)
    out = conv3x3_bn(y, params["w2b"], params["b2b"], params["g2b"], params["be2b"],
                     mode="emb", extra=emb)            # fused emb broadcast add
    return jnp.transpose(out, (0, 3, 1, 2))            # back to NCHW


# ---------------------------------------------------------------------------
# Pure-JAX reference (for the numerical sanity check).
# ---------------------------------------------------------------------------
def _reference_forward(params, x_nchw, skip_nchw, t):
    N, C, H, W = x_nchw.shape
    a = jnp.asarray(_interp_matrix(H, 2 * H))
    b = jnp.asarray(_interp_matrix(W, 2 * W))
    xu = jnp.einsum("jh,iw,nchw->njic", a, b, x_nchw,
                    precision=jax.lax.Precision.HIGHEST)
    skip = jnp.transpose(skip_nchw, (0, 2, 3, 1))
    h = jnp.concatenate([skip, xu], axis=-1)

    def conv_bn(x, w, bia, g, be, relu):
        y = jax.lax.conv_general_dilated(
            x, w, (1, 1), "SAME",
            dimension_numbers=("NHWC", "HWIO", "NHWC"),
            precision=jax.lax.Precision.HIGHEST) + bia
        mean = jnp.mean(y, axis=(0, 1, 2), keepdims=True)
        var = jnp.mean(jnp.square(y - mean), axis=(0, 1, 2), keepdims=True)
        y = (y - mean) * jax.lax.rsqrt(var + EPS) * g + be
        return jnp.maximum(y, 0.0) if relu else y

    y = conv_bn(h, params["w1a"], params["b1a"], params["g1a"], params["be1a"], True)
    y = conv_bn(y, params["w1b"], params["b1b"], params["g1b"], params["be1b"], False)
    h = jnp.maximum(h + y, 0.0)
    y = conv_bn(h, params["w2a"], params["b2a"], params["g2a"], params["be2a"], True)
    y = conv_bn(y, params["w2b"], params["b2b"], params["g2b"], params["be2b"], False)
    emb = jnp.maximum(t @ params["w_emb"] + params["b_emb"], 0.0)
    out = y + emb[:, None, None, :]
    return jnp.transpose(out, (0, 3, 1, 2))


if __name__ == "__main__":
    N = 2
    in_channels, out_channels, time_embd_dim = 8, 8, 32
    Cx, H, W = in_channels // 2, 8, 8                # x channels + skip channels == in_channels

    key = jax.random.PRNGKey(0)
    kx, ks, kt, kp = jax.random.split(key, 4)
    x = jax.random.normal(kx, (N, Cx, H, W), jnp.float32)
    skip_x = jax.random.normal(ks, (N, in_channels - Cx, 2 * H, 2 * W), jnp.float32)
    t = jax.random.normal(kt, (N, time_embd_dim), jnp.float32)

    params = init_params(kp, in_channels, out_channels, time_embd_dim)

    fwd = jax.jit(upsample_forward)
    out = fwd(params, x, skip_x, t)
    out = jax.block_until_ready(out)

    assert out.shape == (N, out_channels, 2 * H, 2 * W), out.shape
    assert bool(jnp.all(jnp.isfinite(out)))

    ref = _reference_forward(params, x, skip_x, t)
    err = float(jnp.max(jnp.abs(out - ref)))
    assert err < 5e-2, f"max abs error vs reference = {err}"

    print("KERNEL_OK")
</pallas_src>

<mosaic_0001>
module attributes {stable_mosaic.version = 11 : i64} {
  func.func @_left_matmul_kernel(%arg0: i32, %arg1: memref<16x8xf32, #tpu.memory_space<vmem>>, %arg2: memref<1x8x32xf32, #tpu.memory_space<vmem>>, %arg3: memref<1x16x32xf32, #tpu.memory_space<vmem>>) attributes {dimension_semantics = [#tpu.dimension_semantics<parallel>], iteration_bounds = array<i64: 2>, scalar_prefetch = 0 : i64, scratch_operands = 0 : i64, tpu.core_type = #tpu.core_type<tc>, window_params = [{pipeline_mode = #tpu.pipeline_mode<synchronous>, transform_indices = @transform_0, window_bounds = array<i64: 16, 8>}, {transform_indices = @transform_1, window_bounds = array<i64: 1, 8, 32>}, {transform_indices = @transform_2, window_bounds = array<i64: 1, 16, 32>}]} {
    %c0 = arith.constant 0 : index
    %c0_0 = arith.constant 0 : index
    %0 = vector.load %arg1[%c0, %c0_0] : memref<16x8xf32, #tpu.memory_space<vmem>>, vector<16x8xf32>
    %c0_1 = arith.constant 0 : index
    %c0_2 = arith.constant 0 : index
    %c0_3 = arith.constant 0 : index
    %1 = vector.load %arg2[%c0_1, %c0_2, %c0_3] : memref<1x8x32xf32, #tpu.memory_space<vmem>>, vector<1x8x32xf32>
    %2 = vector.shape_cast %1 : vector<1x8x32xf32> to vector<8x32xf32>
    %cst = arith.constant dense<0.000000e+00> : vector<16x32xf32>
    %3 = tpu.matmul %0, %2, %cst {dimension_numbers = #tpu.dot_dimension_numbers<[1], [0], [0], [1], [0, 0, 1, 1], [], []>} : vector<16x8xf32>, vector<8x32xf32>, vector<16x32xf32> -> vector<16x32xf32>
    %c0_4 = arith.constant 0 : index
    %c0_5 = arith.constant 0 : index
    %c0_6 = arith.constant 0 : index
    %4 = vector.load %arg3[%c0_4, %c0_5, %c0_6] : memref<1x16x32xf32, #tpu.memory_space<vmem>>, vector<1x16x32xf32>
    %5 = vector.shape_cast %4 : vector<1x16x32xf32> to vector<16x32xf32>
    %6 = vector.shape_cast %3 : vector<16x32xf32> to vector<1x16x32xf32>
    tpu.vector_store %arg3[%c0_4, %c0_5, %c0_6], %6 {strides = array<i32>} : memref<1x16x32xf32, #tpu.memory_space<vmem>>, vector<1x16x32xf32>,
    return
  }
  func.func @transform_0(%arg0: i32) -> (i32, i32) {
    %c0_i32 = arith.constant 0 : i32
    %c0_i32_0 = arith.constant 0 : i32
    %c0_i32_1 = arith.constant 0 : i32
    return %c0_i32, %c0_i32_0 : i32, i32
  }
  func.func @transform_1(%arg0: i32) -> (i32, i32, i32) {
    %c0_i32 = arith.constant 0 : i32
    %c0_i32_0 = arith.constant 0 : i32
    %c0_i32_1 = arith.constant 0 : i32
    return %arg0, %c0_i32, %c0_i32_0 : i32, i32, i32
  }
  func.func @transform_2(%arg0: i32) -> (i32, i32, i32) {
    %c0_i32 = arith.constant 0 : i32
    %c0_i32_0 = arith.constant 0 : i32
    %c0_i32_1 = arith.constant 0 : i32
    return %arg0, %c0_i32, %c0_i32_0 : i32, i32, i32
  }
}

module attributes {stable_mosaic.version = 11 : i64} {
  func.func @_right_matmul_kernel(%arg0: i32, %arg1: memref<1x64x8xf32, #tpu.memory_space<vmem>>, %arg2: memref<8x16xf32, #tpu.memory_space<vmem>>, %arg3: memref<1x64x16xf32, #tpu.memory_space<vmem>>) attributes {dimension_semantics = [#tpu.dimension_semantics<parallel>], iteration_bounds = array<i64: 2>, scalar_prefetch = 0 : i64, scratch_operands = 0 : i64, tpu.core_type = #tpu.core_type<tc>, window_params = [{transform_indices = @transform_0, window_bounds = array<i64: 1, 64, 8>}, {pipeline_mode = #tpu.pipeline_mode<synchronous>, transform_indices = @transform_1, window_bounds = array<i64: 8, 16>}, {transform_indices = @transform_2, window_bounds = array<i64: 1, 64, 16>}]} {
    %c0 = arith.constant 0 : index
    %c0_0 = arith.constant 0 : index
    %c0_1 = arith.constant 0 : index
    %0 = vector.load %arg1[%c0, %c0_0, %c0_1] : memref<1x64x8xf32, #tpu.memory_space<vmem>>, vector<1x64x8xf32>
    %1 = vector.shape_cast %0 : vector<1x64x8xf32> to vector<64x8xf32>
    %c0_2 = arith.constant 0 : index
    %c0_3 = arith.constant 0 : index
    %2 = vector.load %arg2[%c0_2, %c0_3] : memref<8x16xf32, #tpu.memory_space<vmem>>, vector<8x16xf32>
    %cst = arith.constant dense<0.000000e+00> : vector<64x16xf32>
    %3 = tpu.matmul %1, %2, %cst {dimension_numbers = #tpu.dot_dimension_numbers<[1], [0], [0], [1], [0, 0, 1, 1], [], []>} : vector<64x8xf32>, vector<8x16xf32>, vector<64x16xf32> -> vector<64x16xf32>
    %c0_4 = arith.constant 0 : index
    %c0_5 = arith.constant 0 : index
    %c0_6 = arith.constant 0 : index
    %4 = vector.load %arg3[%c0_4, %c0_5, %c0_6] : memref<1x64x16xf32, #tpu.memory_space<vmem>>, vector<1x64x16xf32>
    %5 = vector.shape_cast %4 : vector<1x64x16xf32> to vector<64x16xf32>
    %6 = vector.shape_cast %3 : vector<64x16xf32> to vector<1x64x16xf32>
    tpu.vector_store %arg3[%c0_4, %c0_5, %c0_6], %6 {strides = array<i32>} : memref<1x64x16xf32, #tpu.memory_space<vmem>>, vector<1x64x16xf32>,
    return
  }
  func.func @transform_0(%arg0: i32) -> (i32, i32, i32) {
    %c0_i32 = arith.constant 0 : i32
    %c0_i32_0 = arith.constant 0 : i32
    %c0_i32_1 = arith.constant 0 : i32
    return %arg0, %c0_i32, %c0_i32_0 : i32, i32, i32
  }
  func.func @transform_1(%arg0: i32) -> (i32, i32) {
    %c0_i32 = arith.constant 0 : i32
    %c0_i32_0 = arith.constant 0 : i32
    %c0_i32_1 = arith.constant 0 : i32
    return %c0_i32, %c0_i32_0 : i32, i32
  }
  func.func @transform_2(%arg0: i32) -> (i32, i32, i32) {
    %c0_i32 = arith.constant 0 : i32
    %c0_i32_0 = arith.constant 0 : i32
    %c0_i32_1 = arith.constant 0 : i32
    return %arg0, %c0_i32, %c0_i32_0 : i32, i32, i32
  }
}

module attributes {stable_mosaic.version = 11 : i64} {
  func.func @_conv_taps_kernel(%arg0: i32, %arg1: i32, %arg2: memref<1x18x18x8xf32, #tpu.memory_space<vmem>>, %arg3: memref<9x8x8xf32, #tpu.memory_space<vmem>>, %arg4: memref<1x8xf32, #tpu.memory_space<vmem>>, %arg5: memref<1x128x8xf32, #tpu.memory_space<vmem>>, %arg6: memref<1x1x8xf32, #tpu.memory_space<vmem>>, %arg7: memref<1x1x8xf32, #tpu.memory_space<vmem>>) attributes {dimension_semantics = [#tpu.dimension_semantics<parallel>, #tpu.dimension_semantics<arbitrary>], iteration_bounds = array<i64: 2, 2>, scalar_prefetch = 0 : i64, scratch_operands = 0 : i64, tpu.core_type = #tpu.core_type<tc>, window_params = [{transform_indices = @transform_0, window_bounds = array<i64: 1, 18, 18, 8>}, {pipeline_mode = #tpu.pipeline_mode<synchronous>, transform_indices = @transform_1, window_bounds = array<i64: 9, 8, 8>}, {pipeline_mode = #tpu.pipeline_mode<synchronous>, transform_indices = @transform_2, window_bounds = array<i64: 1, 8>}, {transform_indices = @transform_3, window_bounds = array<i64: 1, 128, 8>}, {transform_indices = @transform_4, window_bounds = array<i64: 1, 1, 8>}, {transform_indices = @transform_5, window_bounds = array<i64: 1, 1, 8>}]} {
    %c8_i32 = arith.constant 8 : i32
    %0 = arith.muli %arg1, %c8_i32 : i32
    %1 = tpu.assume_multiple %0, 8 : i32
    %cst = arith.constant 0.000000e+00 : f32
    %2 = vector.broadcast %cst : f32 to vector<128x8xf32>
    %c0_i32 = arith.constant 0 : i32
    %3 = arith.addi %1, %c0_i32 : i32
    %c0 = arith.constant 0 : index
    %4 = arith.index_cast %3 : i32 to index
    %c0_0 = arith.constant 0 : index
    %c0_1 = arith.constant 0 : index
    %5 = vector.load %arg2[%c0, %4, %c0_0, %c0_1] : memref<1x18x18x8xf32, #tpu.memory_space<vmem>>, vector<1x8x16x8xf32>
    %6 = vector.shape_cast %5 : vector<1x8x16x8xf32> to vector<8x16x8xf32>
    %7 = vector.shape_cast %6 : vector<8x16x8xf32> to vector<128x8xf32>
    %c0_2 = arith.constant 0 : index
    %c0_3 = arith.constant 0 : index
    %c0_4 = arith.constant 0 : index
    %8 = vector.load %arg3[%c0_2, %c0_3, %c0_4] : memref<9x8x8xf32, #tpu.memory_space<vmem>>, vector<1x8x8xf32>
    %9 = vector.shape_cast %8 : vector<1x8x8xf32> to vector<8x8xf32>
    %cst_5 = arith.constant dense<0.000000e+00> : vector<128x8xf32>
    %10 = tpu.matmul %7, %9, %cst_5 {dimension_numbers = #tpu.dot_dimension_numbers<[1], [0], [0], [1], [0, 0, 1, 1], [], []>} : vector<128x8xf32>, vector<8x8xf32>, vector<128x8xf32> -> vector<128x8xf32>
    %11 = arith.addf %2, %10 : vector<128x8xf32>
    %c0_i32_6 = arith.constant 0 : i32
    %12 = arith.addi %1, %c0_i32_6 : i32
    %c0_7 = arith.constant 0 : index
    %13 = arith.index_cast %12 : i32 to index
    %c1 = arith.constant 1 : index
    %c0_8 = arith.constant 0 : index
    %14 = vector.load %arg2[%c0_7, %13, %c1, %c0_8] : memref<1x18x18x8xf32, #tpu.memory_space<vmem>>, vector<1x8x16x8xf32>
    %15 = vector.shape_cast %14 : vector<1x8x16x8xf32> to vector<8x16x8xf32>
    %16 = vector.shape_cast %15 : vector<8x16x8xf32> to vector<128x8xf32>
    %c1_9 = arith.constant 1 : index
    %c0_10 = arith.constant 0 : index
    %c0_11 = arith.constant 0 : index
    %17 = vector.load %arg3[%c1_9, %c0_10, %c0_11] : memref<9x8x8xf32, #tpu.memory_space<vmem>>, vector<1x8x8xf32>
    %18 = vector.shape_cast %17 : vector<1x8x8xf32> to vector<8x8xf32>
    %cst_12 = arith.constant dense<0.000000e+00> : vector<128x8xf32>
    %19 = tpu.matmul %16, %18, %cst_12 {dimension_numbers = #tpu.dot_dimension_numbers<[1], [0], [0], [1], [0, 0, 1, 1], [], []>} : vector<128x8xf32>, vector<8x8xf32>, vector<128x8xf32> -> vector<128x8xf32>
    %20 = arith.addf %11, %19 : vector<128x8xf32>
    %c0_i32_13 = arith.constant 0 : i32
    %21 = arith.addi %1, %c0_i32_13 : i32
    %c0_14 = arith.constant 0 : index
    %22 = arith.index_cast %21 : i32 to index
    %c2 = arith.constant 2 : index
    %c0_15 = arith.constant 0 : index
    %23 = vector.load %arg2[%c0_14, %22, %c2, %c0_15] : memref<1x18x18x8xf32, #tpu.memory_space<vmem>>, vector<1x8x16x8xf32>
    %24 = vector.shape_cast %23 : vector<1x8x16x8xf32> to vector<8x16x8xf32>
    %25 = vector.shape_cast %24 : vector<8x16x8xf32> to vector<128x8xf32>
    %c2_16 = arith.constant 2 : index
    %c0_17 = arith.constant 0 : index
    %c0_18 = arith.constant 0 : index
    %26 = vector.load %arg3[%c2_16, %c0_17, %c0_18] : memref<9x8x8xf32, #tpu.memory_space<vmem>>, vector<1x8x8xf32>
    %27 = vector.shape_cast %26 : vector<1x8x8xf32> to vector<8x8xf32>
    %cst_19 = arith.constant dense<0.000000e+00> : vector<128x8xf32>
    %28 = tpu.matmul %25, %27, %cst_19 {dimension_numbers = #tpu.dot_dimension_numbers<[1], [0], [0], [1], [0, 0, 1, 1], [], []>} : vector<128x8xf32>, vector<8x8xf32>, vector<128x8xf32> -> vector<128x8xf32>
    %29 = arith.addf %20, %28 : vector<128x8xf32>
    %c1_i32 = arith.constant 1 : i32
    %30 = arith.addi %1, %c1_i32 : i32
    %c0_20 = arith.constant 0 : index
    %31 = arith.index_cast %30 : i32 to index
    %c0_21 = arith.constant 0 : index
    %c0_22 = arith.constant 0 : index
    %32 = vector.load %arg2[%c0_20, %31, %c0_21, %c0_22] : memref<1x18x18x8xf32, #tpu.memory_space<vmem>>, vector<1x8x16x8xf32>
    %33 = vector.shape_cast %32 : vector<1x8x16x8xf32> to vector<8x16x8xf32>
    %34 = vector.shape_cast %33 : vector<8x16x8xf32> to vector<128x8xf32>
    %c3 = arith.constant 3 : index
    %c0_23 = arith.constant 0 : index
    %c0_24 = arith.constant 0 : index
    %35 = vector.load %arg3[%c3, %c0_23, %c0_24] : memref<9x8x8xf32, #tpu.memory_space<vmem>>, vector<1x8x8xf32>
    %36 = vector.shape_cast %35 : vector<1x8x8xf32> to vector<8x8xf32>
    %cst_25 = arith.constant dense<0.000000e+00> : vector<128x8xf32>
    %37 = tpu.matmul %34, %36, %cst_25 {dimension_numbers = #tpu.dot_dimension_numbers<[1], [0], [0], [1], [0, 0, 1, 1], [], []>} : vector<128x8xf32>, vector<8x8xf32>, vector<128x8xf32> -> vector<128x8xf32>
    %38 = arith.addf %29, %37 : vector<128x8xf32>
    %c1_i32_26 = arith.constant 1 : i32
    %39 = arith.addi %1, %c1_i32_26 : i32
    %c0_27 = arith.constant 0 : index
    %40 = arith.index_cast %39 : i32 to index
    %c1_28 = arith.constant 1 : index
    %c0_29 = arith.constant 0 : index
    %41 = vector.load %arg2[%c0_27, %40, %c1_28, %c0_29] : memref<1x18x18x8xf32, #tpu.memory_space<vmem>>, vector<1x8x16x8xf32>
    %42 = vector.shape_cast %41 : vector<1x8x16x8xf32> to vector<8x16x8xf32>
    %43 = vector.shape_cast %42 : vector<8x16x8xf32> to vector<128x8xf32>
    %c4 = arith.constant 4 : index
    %c0_30 = arith.constant 0 : index
    %c0_31 = arith.constant 0 : index
    %44 = vector.load %arg3[%c4, %c0_30, %c0_31] : memref<9x8x8xf32, #tpu.memory_space<vmem>>, vector<1x8x8xf32>
    %45 = vector.shape_cast %44 : vector<1x8x8xf32> to vector<8x8xf32>
    %cst_32 = arith.constant dense<0.000000e+00> : vector<128x8xf32>
    %46 = tpu.matmul %43, %45, %cst_32 {dimension_numbers = #tpu.dot_dimension_numbers<[1], [0], [0], [1], [0, 0, 1, 1], [], []>} : vector<128x8xf32>, vector<8x8xf32>, vector<128x8xf32> -> vector<128x8xf32>
    %47 = arith.addf %38, %46 : vector<128x8xf32>
    %c1_i32_33 = arith.constant 1 : i32
    %48 = arith.addi %1, %c1_i32_33 : i32
    %c0_34 = arith.constant 0 : index
    %49 = arith.index_cast %48 : i32 to index
    %c2_35 = arith.constant 2 : index
    %c0_36 = arith.constant 0 : index
    %50 = vector.load %arg2[%c0_34, %49, %c2_35, %c0_36] : memref<1x18x18x8xf32, #tpu.memory_space<vmem>>, vector<1x8x16x8xf32>
    %51 = vector.shape_cast %50 : vector<1x8x16x8xf32> to vector<8x16x8xf32>
    %52 = vector.shape_cast %51 : vector<8x16x8xf32> to vector<128x8xf32>
    %c5 = arith.constant 5 : index
    %c0_37 = arith.constant 0 : index
    %c0_38 = arith.constant 0 : index
    %53 = vector.load %arg3[%c5, %c0_37, %c0_38] : memref<9x8x8xf32, #tpu.memory_space<vmem>>, vector<1x8x8xf32>
    %54 = vector.shape_cast %53 : vector<1x8x8xf32> to vector<8x8xf32>
    %cst_39 = arith.constant dense<0.000000e+00> : vector<128x8xf32>
    %55 = tpu.matmul %52, %54, %cst_39 {dimension_numbers = #tpu.dot_dimension_numbers<[1], [0], [0], [1], [0, 0, 1, 1], [], []>} : vector<128x8xf32>, vector<8x8xf32>, vector<128x8xf32> -> vector<128x8xf32>
    %56 = arith.addf %47, %55 : vector<128x8xf32>
    %c2_i32 = arith.constant 2 : i32
    %57 = arith.addi %1, %c2_i32 : i32
    %c0_40 = arith.constant 0 : index
    %58 = arith.index_cast %57 : i32 to index
    %c0_41 = arith.constant 0 : index
    %c0_42 = arith.constant 0 : index
    %59 = vector.load %arg2[%c0_40, %58, %c0_41, %c0_42] : memref<1x18x18x8xf32, #tpu.memory_space<vmem>>, vector<1x8x16x8xf32>
    %60 = vector.shape_cast %59 : vector<1x8x16x8xf32> to vector<8x16x8xf32>
    %61 = vector.shape_cast %60 : vector<8x16x8xf32> to vector<128x8xf32>
    %c6 = arith.constant 6 : index
    %c0_43 = arith.constant 0 : index
    %c0_44 = arith.constant 0 : index
    %62 = vector.load %arg3[%c6, %c0_43, %c0_44] : memref<9x8x8xf32, #tpu.memory_space<vmem>>, vector<1x8x8xf32>
    %63 = vector.shape_cast %62 : vector<1x8x8xf32> to vector<8x8xf32>
    %cst_45 = arith.constant dense<0.000000e+00> : vector<128x8xf32>
    %64 = tpu.matmul %61, %63, %cst_45 {dimension_numbers = #tpu.dot_dimension_numbers<[1], [0], [0], [1], [0, 0, 1, 1], [], []>} : vector<128x8xf32>, vector<8x8xf32>, vector<128x8xf32> -> vector<128x8xf32>
    %65 = arith.addf %56, %64 : vector<128x8xf32>
    %c2_i32_46 = arith.constant 2 : i32
    %66 = arith.addi %1, %c2_i32_46 : i32
    %c0_47 = arith.constant 0 : index
    %67 = arith.index_cast %66 : i32 to index
    %c1_48 = arith.constant 1 : index
    %c0_49 = arith.constant 0 : index
    %68 = vector.load %arg2[%c0_47, %67, %c1_48, %c0_49] : memref<1x18x18x8xf32, #tpu.memory_space<vmem>>, vector<1x8x16x8xf32>
    %69 = vector.shape_cast %68 : vector<1x8x16x8xf32> to vector<8x16x8xf32>
    %70 = vector.shape_cast %69 : vector<8x16x8xf32> to vector<128x8xf32>
    %c7 = arith.constant 7 : index
    %c0_50 = arith.constant 0 : index
    %c0_51 = arith.constant 0 : index
    %71 = vector.load %arg3[%c7, %c0_50, %c0_51] : memref<9x8x8xf32, #tpu.memory_space<vmem>>, vector<1x8x8xf32>
    %72 = vector.shape_cast %71 : vector<1x8x8xf32> to vector<8x8xf32>
    %cst_52 = arith.constant dense<0.000000e+00> : vector<128x8xf32>
    %73 = tpu.matmul %70, %72, %cst_52 {dimension_numbers = #tpu.dot_dimension_numbers<[1], [0], [0], [1], [0, 0, 1, 1], [], []>} : vector<128x8xf32>, vector<8x8xf32>, vector<128x8xf32> -> vector<128x8xf32>
    %74 = arith.addf %65, %73 : vector<128x8xf32>
    %c2_i32_53 = arith.constant 2 : i32
    %75 = arith.addi %1, %c2_i32_53 : i32
    %c0_54 = arith.constant 0 : index
    %76 = arith.index_cast %75 : i32 to index
    %c2_55 = arith.constant 2 : index
    %c0_56 = arith.constant 0 : index
    %77 = vector.load %arg2[%c0_54, %76, %c2_55, %c0_56] : memref<1x18x18x8xf32, #tpu.memory_space<vmem>>, vector<1x8x16x8xf32>
    %78 = vector.shape_cast %77 : vector<1x8x16x8xf32> to vector<8x16x8xf32>
    %79 = vector.shape_cast %78 : vector<8x16x8xf32> to vector<128x8xf32>
    %c8 = arith.constant 8 : index
    %c0_57 = arith.constant 0 : index
    %c0_58 = arith.constant 0 : index
    %80 = vector.load %arg3[%c8, %c0_57, %c0_58] : memref<9x8x8xf32, #tpu.memory_space<vmem>>, vector<1x8x8xf32>
    %81 = vector.shape_cast %80 : vector<1x8x8xf32> to vector<8x8xf32>
    %cst_59 = arith.constant dense<0.000000e+00> : vector<128x8xf32>
    %82 = tpu.matmul %79, %81, %cst_59 {dimension_numbers = #tpu.dot_dimension_numbers<[1], [0], [0], [1], [0, 0, 1, 1], [], []>} : vector<128x8xf32>, vector<8x8xf32>, vector<128x8xf32> -> vector<128x8xf32>
    %83 = arith.addf %74, %82 : vector<128x8xf32>
    %c0_60 = arith.constant 0 : index
    %c0_61 = arith.constant 0 : index
    %84 = vector.load %arg4[%c0_60, %c0_61] : memref<1x8xf32, #tpu.memory_space<vmem>>, vector<1x8xf32>
    %85 = vector.broadcast %84 : vector<1x8xf32> to vector<128x8xf32>
    %86 = arith.addf %83, %85 : vector<128x8xf32>
    %c0_62 = arith.constant 0 : index
    %c0_63 = arith.constant 0 : index
    %c0_64 = arith.constant 0 : index
    %87 = vector.load %arg5[%c0_62, %c0_63, %c0_64] : memref<1x128x8xf32, #tpu.memory_space<vmem>>, vector<1x128x8xf32>
    %88 = vector.shape_cast %87 : vector<1x128x8xf32> to vector<128x8xf32>
    %89 = vector.shape_cast %86 : vector<128x8xf32> to vector<1x128x8xf32>
    tpu.vector_store %arg5[%c0_62, %c0_63, %c0_64], %89 {strides = array<i32>} : memref<1x128x8xf32, #tpu.memory_space<vmem>>, vector<1x128x8xf32>,
    %c0_i32_65 = arith.constant 0 : i32
    %90 = arith.cmpi eq, %arg1, %c0_i32_65 : i32
    %91 = arith.extui %90 : i1 to i32
    %c0_i32_66 = arith.constant 0 : i32
    %92 = arith.cmpi ne, %91, %c0_i32_66 : i32
    scf.if %92 {
      %cst_81 = arith.constant 0.000000e+00 : f32
      %110 = vector.broadcast %cst_81 : f32 to vector<1x1x8xf32>
      %c0_82 = arith.constant 0 : index
      %c0_83 = arith.constant 0 : index
      %c0_84 = arith.constant 0 : index
      %111 = vector.load %arg6[%c0_82, %c0_83, %c0_84] : memref<1x1x8xf32, #tpu.memory_space<vmem>>, vector<1x1x8xf32>
      tpu.vector_store %arg6[%c0_82, %c0_83, %c0_84], %110 {strides = array<i32>} : memref<1x1x8xf32, #tpu.memory_space<vmem>>, vector<1x1x8xf32>,
      %cst_85 = arith.constant 0.000000e+00 : f32
      %112 = vector.broadcast %cst_85 : f32 to vector<1x1x8xf32>
      %c0_86 = arith.constant 0 : index
      %c0_87 = arith.constant 0 : index
      %c0_88 = arith.constant 0 : index
      %113 = vector.load %arg7[%c0_86, %c0_87, %c0_88] : memref<1x1x8xf32, #tpu.memory_space<vmem>>, vector<1x1x8xf32>
      tpu.vector_store %arg7[%c0_86, %c0_87, %c0_88], %112 {strides = array<i32>} : memref<1x1x8xf32, #tpu.memory_space<vmem>>, vector<1x1x8xf32>,
    } else {
    }
    %c0_67 = arith.constant 0 : index
    %c0_68 = arith.constant 0 : index
    %c0_69 = arith.constant 0 : index
    %93 = vector.load %arg6[%c0_67, %c0_68, %c0_69] : memref<1x1x8xf32, #tpu.memory_space<vmem>>, vector<1x1x8xf32>
    %94 = vector.shape_cast %93 : vector<1x1x8xf32> to vector<1x8xf32>
    %cst_70 = arith.constant dense<0.000000e+00> : vector<8xf32>
    %95 = vector.multi_reduction <add>, %86, %cst_70 [0] : vector<128x8xf32> to vector<8xf32>
    %96 = vector.shape_cast %95 : vector<8xf32> to vector<1x8xf32>
    %97 = arith.addf %94, %96 : vector<1x8xf32>
    %c0_71 = arith.constant 0 : index
    %c0_72 = arith.constant 0 : index
    %c0_73 = arith.constant 0 : index
    %98 = vector.load %arg6[%c0_71, %c0_72, %c0_73] : memref<1x1x8xf32, #tpu.memory_space<vmem>>, vector<1x1x8xf32>
    %99 = vector.shape_cast %98 : vector<1x1x8xf32> to vector<1x8xf32>
    %100 = vector.shape_cast %97 : vector<1x8xf32> to vector<1x1x8xf32>
    tpu.vector_store %arg6[%c0_71, %c0_72, %c0_73], %100 {strides = array<i32>} : memref<1x1x8xf32, #tpu.memory_space<vmem>>, vector<1x1x8xf32>,
    %c0_74 = arith.constant 0 : index
    %c0_75 = arith.constant 0 : index
    %c0_76 = arith.constant 0 : index
    %101 = vector.load %arg7[%c0_74, %c0_75, %c0_76] : memref<1x1x8xf32, #tpu.memory_space<vmem>>, vector<1x1x8xf32>
    %102 = vector.shape_cast %101 : vector<1x1x8xf32> to vector<1x8xf32>
    %103 = arith.mulf %86, %86 : vector<128x8xf32>
    %cst_77 = arith.constant dense<0.000000e+00> : vector<8xf32>
    %104 = vector.multi_reduction <add>, %103, %cst_77 [0] : vector<128x8xf32> to vector<8xf32>
    %105 = vector.shape_cast %104 : vector<8xf32> to vector<1x8xf32>
    %106 = arith.addf %102, %105 : vector<1x8xf32>
    %c0_78 = arith.constant 0 : index
    %c0_79 = arith.constant 0 : index
    %c0_80 = arith.constant 0 : index
    %107 = vector.load %arg7[%c0_78, %c0_79, %c0_80] : memref<1x1x8xf32, #tpu.memory_space<vmem>>, vector<1x1x8xf32>
    %108 = vector.shape_cast %107 : vector<1x1x8xf32> to vector<1x8xf32>
    %109 = vector.shape_cast %106 : vector<1x8xf32> to vector<1x1x8xf32>
    tpu.vector_store %arg7[%c0_78, %c0_79, %c0_80], %109 {strides = array<i32>} : memref<1x1x8xf32, #tpu.memory_space<vmem>>, vector<1x1x8xf32>,
    return
  }
  func.func @transform_0(%arg0: i32, %arg1: i32) -> (i32, i32, i32, i32) {
    %c0_i32 = arith.constant 0 : i32
    %c0_i32_0 = arith.constant 0 : i32
    %c0_i32_1 = arith.constant 0 : i32
    %c0_i32_2 = arith.constant 0 : i32
    return %arg0, %c0_i32, %c0_i32_0, %c0_i32_1 : i32, i32, i32, i32
  }
  func.func @transform_1(%arg0: i32, %arg1: i32) -> (i32, i32, i32) {
    %c0_i32 = arith.constant 0 : i32
    %c0_i32_0 = arith.constant 0 : i32
    %c0_i32_1 = arith.constant 0 : i32
    %c0_i32_2 = arith.constant 0 : i32
    return %c0_i32, %c0_i32_0, %c0_i32_1 : i32, i32, i32
  }
  func.func @transform_2(%arg0: i32, %arg1: i32) -> (i32, i32) {
    %c0_i32 = arith.constant 0 : i32
    %c0_i32_0 = arith.constant 0 : i32
    %c0_i32_1 = arith.constant 0 : i32
    return %c0_i32, %c0_i32_0 : i32, i32
  }
  func.func @transform_3(%arg0: i32, %arg1: i32) -> (i32, i32, i32) {
    %c0_i32 = arith.constant 0 : i32
    %c0_i32_0 = arith.constant 0 : i32
    return %arg0, %arg1, %c0_i32 : i32, i32, i32
  }
  func.func @transform_4(%arg0: i32, %arg1: i32) -> (i32, i32, i32) {
    %c0_i32 = arith.constant 0 : i32
    %c0_i32_0 = arith.constant 0 : i32
    %c0_i32_1 = arith.constant 0 : i32
    return %arg0, %c0_i32, %c0_i32_0 : i32, i32, i32
  }
  func.func @transform_5(%arg0: i32, %arg1: i32) -> (i32, i32, i32) {
    %c0_i32 = arith.constant 0 : i32
    %c0_i32_0 = arith.constant 0 : i32
    %c0_i32_1 = arith.constant 0 : i32
    return %arg0, %c0_i32, %c0_i32_0 : i32, i32, i32
  }
}

module attributes {stable_mosaic.version = 11 : i64} {
  func.func @_bn_finalize_kernel(%arg0: i32, %arg1: i32, %arg2: memref<1x128x8xf32, #tpu.memory_space<vmem>>, %arg3: memref<1x1x8xf32, #tpu.memory_space<vmem>>, %arg4: memref<1x1x8xf32, #tpu.memory_space<vmem>>, %arg5: memref<1x8xf32, #tpu.memory_space<vmem>>, %arg6: memref<1x8xf32, #tpu.memory_space<vmem>>, %arg7: memref<1x128x8xf32, #tpu.memory_space<vmem>>) attributes {dimension_semantics = [#tpu.dimension_semantics<parallel>, #tpu.dimension_semantics<arbitrary>], iteration_bounds = array<i64: 2, 2>, scalar_prefetch = 0 : i64, scratch_operands = 0 : i64, tpu.core_type = #tpu.core_type<tc>, window_params = [{transform_indices = @transform_0, window_bounds = array<i64: 1, 128, 8>}, {pipeline_mode = #tpu.pipeline_mode<synchronous>, transform_indices = @transform_1, window_bounds = array<i64: 1, 1, 8>}, {pipeline_mode = #tpu.pipeline_mode<synchronous>, transform_indices = @transform_2, window_bounds = array<i64: 1, 1, 8>}, {pipeline_mode = #tpu.pipeline_mode<synchronous>, transform_indices = @transform_3, window_bounds = array<i64: 1, 8>}, {pipeline_mode = #tpu.pipeline_mode<synchronous>, transform_indices = @transform_4, window_bounds = array<i64: 1, 8>}, {transform_indices = @transform_5, window_bounds = array<i64: 1, 128, 8>}]} {
    %c0 = arith.constant 0 : index
    %c0_0 = arith.constant 0 : index
    %c0_1 = arith.constant 0 : index
    %0 = vector.load %arg2[%c0, %c0_0, %c0_1] : memref<1x128x8xf32, #tpu.memory_space<vmem>>, vector<1x128x8xf32>
    %1 = vector.shape_cast %0 : vector<1x128x8xf32> to vector<128x8xf32>
    %c0_2 = arith.constant 0 : index
    %c0_3 = arith.constant 0 : index
    %c0_4 = arith.constant 0 : index
    %2 = vector.load %arg3[%c0_2, %c0_3, %c0_4] : memref<1x1x8xf32, #tpu.memory_space<vmem>>, vector<1x1x8xf32>
    %3 = vector.shape_cast %2 : vector<1x1x8xf32> to vector<1x8xf32>
    %cst = arith.constant 0.001953125 : f32
    %4 = vector.broadcast %cst : f32 to vector<1x8xf32>
    %5 = arith.mulf %3, %4 : vector<1x8xf32>
    %c0_5 = arith.constant 0 : index
    %c0_6 = arith.constant 0 : index
    %c0_7 = arith.constant 0 : index
    %6 = vector.load %arg4[%c0_5, %c0_6, %c0_7] : memref<1x1x8xf32, #tpu.memory_space<vmem>>, vector<1x1x8xf32>
    %7 = vector.shape_cast %6 : vector<1x1x8xf32> to vector<1x8xf32>
    %cst_8 = arith.constant 0.001953125 : f32
    %8 = vector.broadcast %cst_8 : f32 to vector<1x8xf32>
    %9 = arith.mulf %7, %8 : vector<1x8xf32>
    %10 = arith.mulf %5, %5 : vector<1x8xf32>
    %11 = arith.subf %9, %10 : vector<1x8xf32>
    %cst_9 = arith.constant 9.99999974E-6 : f32
    %12 = vector.broadcast %cst_9 : f32 to vector<1x8xf32>
    %13 = arith.addf %11, %12 : vector<1x8xf32>
    %14 = math.rsqrt %13 : vector<1x8xf32>
    %c0_10 = arith.constant 0 : index
    %c0_11 = arith.constant 0 : index
    %15 = vector.load %arg5[%c0_10, %c0_11] : memref<1x8xf32, #tpu.memory_space<vmem>>, vector<1x8xf32>
    %16 = arith.mulf %14, %15 : vector<1x8xf32>
    %17 = vector.broadcast %5 : vector<1x8xf32> to vector<128x8xf32>
    %18 = arith.subf %1, %17 : vector<128x8xf32>
    %19 = vector.broadcast %16 : vector<1x8xf32> to vector<128x8xf32>
    %20 = arith.mulf %18, %19 : vector<128x8xf32>
    %c0_12 = arith.constant 0 : index
    %c0_13 = arith.constant 0 : index
    %21 = vector.load %arg6[%c0_12, %c0_13] : memref<1x8xf32, #tpu.memory_space<vmem>>, vector<1x8xf32>
    %22 = vector.broadcast %21 : vector<1x8xf32> to vector<128x8xf32>
    %23 = arith.addf %20, %22 : vector<128x8xf32>
    %cst_14 = arith.constant 0.000000e+00 : f32
    %24 = vector.broadcast %cst_14 : f32 to vector<128x8xf32>
    %25 = arith.maximumf %23, %24 : vector<128x8xf32>
    %c0_15 = arith.constant 0 : index
    %c0_16 = arith.constant 0 : index
    %c0_17 = arith.constant 0 : index
    %26 = vector.load %arg7[%c0_15, %c0_16, %c0_17] : memref<1x128x8xf32, #tpu.memory_space<vmem>>, vector<1x128x8xf32>
    %27 = vector.shape_cast %26 : vector<1x128x8xf32> to vector<128x8xf32>
    %28 = vector.shape_cast %25 : vector<128x8xf32> to vector<1x128x8xf32>
    tpu.vector_store %arg7[%c0_15, %c0_16, %c0_17], %28 {strides = array<i32>} : memref<1x128x8xf32, #tpu.memory_space<vmem>>, vector<1x128x8xf32>,
    return
  }
  func.func @transform_0(%arg0: i32, %arg1: i32) -> (i32, i32, i32) {
    %c0_i32 = arith.constant 0 : i32
    %c0_i32_0 = arith.constant 0 : i32
    return %arg0, %arg1, %c0_i32 : i32, i32, i32
  }
  func.func @transform_1(%arg0: i32, %arg1: i32) -> (i32, i32, i32) {
    %c0_i32 = arith.constant 0 : i32
    %c0_i32_0 = arith.constant 0 : i32
    %c0_i32_1 = arith.constant 0 : i32
    %c0_i32_2 = arith.constant 0 : i32
    return %c0_i32, %c0_i32_0, %c0_i32_1 : i32, i32, i32
  }
  func.func @transform_2(%arg0: i32, %arg1: i32) -> (i32, i32, i32) {
    %c0_i32 = arith.constant 0 : i32
    %c0_i32_0 = arith.constant 0 : i32
    %c0_i32_1 = arith.constant 0 : i32
    %c0_i32_2 = arith.constant 0 : i32
    return %c0_i32, %c0_i32_0, %c0_i32_1 : i32, i32, i32
  }
  func.func @transform_3(%arg0: i32, %arg1: i32) -> (i32, i32) {
    %c0_i32 = arith.constant 0 : i32
    %c0_i32_0 = arith.constant 0 : i32
    %c0_i32_1 = arith.constant 0 : i32
    return %c0_i32, %c0_i32_0 : i32, i32
  }
  func.func @transform_4(%arg0: i32, %arg1: i32) -> (i32, i32) {
    %c0_i32 = arith.constant 0 : i32
    %c0_i32_0 = arith.constant 0 : i32
    %c0_i32_1 = arith.constant 0 : i32
    return %c0_i32, %c0_i32_0 : i32, i32
  }
  func.func @transform_5(%arg0: i32, %arg1: i32) -> (i32, i32, i32) {
    %c0_i32 = arith.constant 0 : i32
    %c0_i32_0 = arith.constant 0 : i32
    return %arg0, %arg1, %c0_i32 : i32, i32, i32
  }
}

module attributes {stable_mosaic.version = 11 : i64} {
  func.func @_bn_finalize_kernel(%arg0: i32, %arg1: i32, %arg2: memref<1x128x8xf32, #tpu.memory_space<vmem>>, %arg3: memref<1x128x8xf32, #tpu.memory_space<vmem>>, %arg4: memref<1x1x8xf32, #tpu.memory_space<vmem>>, %arg5: memref<1x1x8xf32, #tpu.memory_space<vmem>>, %arg6: memref<1x8xf32, #tpu.memory_space<vmem>>, %arg7: memref<1x8xf32, #tpu.memory_space<vmem>>, %arg8: memref<1x128x8xf32, #tpu.memory_space<vmem>>) attributes {dimension_semantics = [#tpu.dimension_semantics<parallel>, #tpu.dimension_semantics<arbitrary>], iteration_bounds = array<i64: 2, 2>, scalar_prefetch = 0 : i64, scratch_operands = 0 : i64, tpu.core_type = #tpu.core_type<tc>, window_params = [{transform_indices = @transform_0, window_bounds = array<i64: 1, 128, 8>}, {transform_indices = @transform_1, window_bounds = array<i64: 1, 128, 8>}, {pipeline_mode = #tpu.pipeline_mode<synchronous>, transform_indices = @transform_2, window_bounds = array<i64: 1, 1, 8>}, {pipeline_mode = #tpu.pipeline_mode<synchronous>, transform_indices = @transform_3, window_bounds = array<i64: 1, 1, 8>}, {pipeline_mode = #tpu.pipeline_mode<synchronous>, transform_indices = @transform_4, window_bounds = array<i64: 1, 8>}, {pipeline_mode = #tpu.pipeline_mode<synchronous>, transform_indices = @transform_5, window_bounds = array<i64: 1, 8>}, {transform_indices = @transform_6, window_bounds = array<i64: 1, 128, 8>}]} {
    %c0 = arith.constant 0 : index
    %c0_0 = arith.constant 0 : index
    %c0_1 = arith.constant 0 : index
    %0 = vector.load %arg2[%c0, %c0_0, %c0_1] : memref<1x128x8xf32, #tpu.memory_space<vmem>>, vector<1x128x8xf32>
    %1 = vector.shape_cast %0 : vector<1x128x8xf32> to vector<128x8xf32>
    %c0_2 = arith.constant 0 : index
    %c0_3 = arith.constant 0 : index
    %c0_4 = arith.constant 0 : index
    %2 = vector.load %arg4[%c0_2, %c0_3, %c0_4] : memref<1x1x8xf32, #tpu.memory_space<vmem>>, vector<1x1x8xf32>
    %3 = vector.shape_cast %2 : vector<1x1x8xf32> to vector<1x8xf32>
    %cst = arith.constant 0.001953125 : f32
    %4 = vector.broadcast %cst : f32 to vector<1x8xf32>
    %5 = arith.mulf %3, %4 : vector<1x8xf32>
    %c0_5 = arith.constant 0 : index
    %c0_6 = arith.constant 0 : index
    %c0_7 = arith.constant 0 : index
    %6 = vector.load %arg5[%c0_5, %c0_6, %c0_7] : memref<1x1x8xf32, #tpu.memory_space<vmem>>, vector<1x1x8xf32>
    %7 = vector.shape_cast %6 : vector<1x1x8xf32> to vector<1x8xf32>
    %cst_8 = arith.constant 0.001953125 : f32
    %8 = vector.broadcast %cst_8 : f32 to vector<1x8xf32>
    %9 = arith.mulf %7, %8 : vector<1x8xf32>
    %10 = arith.mulf %5, %5 : vector<1x8xf32>
    %11 = arith.subf %9, %10 : vector<1x8xf32>
    %cst_9 = arith.constant 9.99999974E-6 : f32
    %12 = vector.broadcast %cst_9 : f32 to vector<1x8xf32>
    %13 = arith.addf %11, %12 : vector<1x8xf32>
    %14 = math.rsqrt %13 : vector<1x8xf32>
    %c0_10 = arith.constant 0 : index
    %c0_11 = arith.constant 0 : index
    %15 = vector.load %arg6[%c0_10, %c0_11] : memref<1x8xf32, #tpu.memory_space<vmem>>, vector<1x8xf32>
    %16 = arith.mulf %14, %15 : vector<1x8xf32>
    %17 = vector.broadcast %5 : vector<1x8xf32> to vector<128x8xf32>
    %18 = arith.subf %1, %17 : vector<128x8xf32>
    %19 = vector.broadcast %16 : vector<1x8xf32> to vector<128x8xf32>
    %20 = arith.mulf %18, %19 : vector<128x8xf32>
    %c0_12 = arith.constant 0 : index
    %c0_13 = arith.constant 0 : index
    %21 = vector.load %arg7[%c0_12, %c0_13] : memref<1x8xf32, #tpu.memory_space<vmem>>, vector<1x8xf32>
    %22 = vector.broadcast %21 : vector<1x8xf32> to vector<128x8xf32>
    %23 = arith.addf %20, %22 : vector<128x8xf32>
    %c0_14 = arith.constant 0 : index
    %c0_15 = arith.constant 0 : index
    %c0_16 = arith.constant 0 : index
    %24 = vector.load %arg3[%c0_14, %c0_15, %c0_16] : memref<1x128x8xf32, #tpu.memory_space<vmem>>, vector<1x128x8xf32>
    %25 = vector.shape_cast %24 : vector<1x128x8xf32> to vector<128x8xf32>
    %26 = arith.addf %23, %25 : vector<128x8xf32>
    %cst_17 = arith.constant 0.000000e+00 : f32
    %27 = vector.broadcast %cst_17 : f32 to vector<128x8xf32>
    %28 = arith.maximumf %26, %27 : vector<128x8xf32>
    %c0_18 = arith.constant 0 : index
    %c0_19 = arith.constant 0 : index
    %c0_20 = arith.constant 0 : index
    %29 = vector.load %arg8[%c0_18, %c0_19, %c0_20] : memref<1x128x8xf32, #tpu.memory_space<vmem>>, vector<1x128x8xf32>
    %30 = vector.shape_cast %29 : vector<1x128x8xf32> to vector<128x8xf32>
    %31 = vector.shape_cast %28 : vector<128x8xf32> to vector<1x128x8xf32>
    tpu.vector_store %arg8[%c0_18, %c0_19, %c0_20], %31 {strides = array<i32>} : memref<1x128x8xf32, #tpu.memory_space<vmem>>, vector<1x128x8xf32>,
    return
  }
  func.func @transform_0(%arg0: i32, %arg1: i32) -> (i32, i32, i32) {
    %c0_i32 = arith.constant 0 : i32
    %c0_i32_0 = arith.constant 0 : i32
    return %arg0, %arg1, %c0_i32 : i32, i32, i32
  }
  func.func @transform_1(%arg0: i32, %arg1: i32) -> (i32, i32, i32) {
    %c0_i32 = arith.constant 0 : i32
    %c0_i32_0 = arith.constant 0 : i32
    return %arg0, %arg1, %c0_i32 : i32, i32, i32
  }
  func.func @transform_2(%arg0: i32, %arg1: i32) -> (i32, i32, i32) {
    %c0_i32 = arith.constant 0 : i32
    %c0_i32_0 = arith.constant 0 : i32
    %c0_i32_1 = arith.constant 0 : i32
    %c0_i32_2 = arith.constant 0 : i32
    return %c0_i32, %c0_i32_0, %c0_i32_1 : i32, i32, i32
  }
  func.func @transform_3(%arg0: i32, %arg1: i32) -> (i32, i32, i32) {
    %c0_i32 = arith.constant 0 : i32
    %c0_i32_0 = arith.constant 0 : i32
    %c0_i32_1 = arith.constant 0 : i32
    %c0_i32_2 = arith.constant 0 : i32
    return %c0_i32, %c0_i32_0, %c0_i32_1 : i32, i32, i32
  }
  func.func @transform_4(%arg0: i32, %arg1: i32) -> (i32, i32) {
    %c0_i32 = arith.constant 0 : i32
    %c0_i32_0 = arith.constant 0 : i32
    %c0_i32_1 = arith.constant 0 : i32
    return %c0_i32, %c0_i32_0 : i32, i32
  }
  func.func @transform_5(%arg0: i32, %arg1: i32) -> (i32, i32) {
    %c0_i32 = arith.constant 0 : i32
    %c0_i32_0 = arith.constant 0 : i32
    %c0_i32_1 = arith.constant 0 : i32
    return %c0_i32, %c0_i32_0 : i32, i32
  }
  func.func @transform_6(%arg0: i32, %arg1: i32) -> (i32, i32, i32) {
    %c0_i32 = arith.constant 0 : i32
    %c0_i32_0 = arith.constant 0 : i32
    return %arg0, %arg1, %c0_i32 : i32, i32, i32
  }
}

module attributes {stable_mosaic.version = 11 : i64} {
  func.func @_conv_taps_kernel(%arg0: i32, %arg1: i32, %arg2: memref<1x18x18x8xf32, #tpu.memory_space<vmem>>, %arg3: memref<9x8x4xf32, #tpu.memory_space<vmem>>, %arg4: memref<1x4xf32, #tpu.memory_space<vmem>>, %arg5: memref<1x128x4xf32, #tpu.memory_space<vmem>>, %arg6: memref<1x1x4xf32, #tpu.memory_space<vmem>>, %arg7: memref<1x1x4xf32, #tpu.memory_space<vmem>>) attributes {dimension_semantics = [#tpu.dimension_semantics<parallel>, #tpu.dimension_semantics<arbitrary>], iteration_bounds = array<i64: 2, 2>, scalar_prefetch = 0 : i64, scratch_operands = 0 : i64, tpu.core_type = #tpu.core_type<tc>, window_params = [{transform_indices = @transform_0, window_bounds = array<i64: 1, 18, 18, 8>}, {pipeline_mode = #tpu.pipeline_mode<synchronous>, transform_indices = @transform_1, window_bounds = array<i64: 9, 8, 4>}, {pipeline_mode = #tpu.pipeline_mode<synchronous>, transform_indices = @transform_2, window_bounds = array<i64: 1, 4>}, {transform_indices = @transform_3, window_bounds = array<i64: 1, 128, 4>}, {transform_indices = @transform_4, window_bounds = array<i64: 1, 1, 4>}, {transform_indices = @transform_5, window_bounds = array<i64: 1, 1, 4>}]} {
    %c8_i32 = arith.constant 8 : i32
    %0 = arith.muli %arg1, %c8_i32 : i32
    %1 = tpu.assume_multiple %0, 8 : i32
    %cst = arith.constant 0.000000e+00 : f32
    %2 = vector.broadcast %cst : f32 to vector<128x4xf32>
    %c0_i32 = arith.constant 0 : i32
    %3 = arith.addi %1, %c0_i32 : i32
    %c0 = arith.constant 0 : index
    %4 = arith.index_cast %3 : i32 to index
    %c0_0 = arith.constant 0 : index
    %c0_1 = arith.constant 0 : index
    %5 = vector.load %arg2[%c0, %4, %c0_0, %c0_1] : memref<1x18x18x8xf32, #tpu.memory_space<vmem>>, vector<1x8x16x8xf32>
    %6 = vector.shape_cast %5 : vector<1x8x16x8xf32> to vector<8x16x8xf32>
    %7 = vector.shape_cast %6 : vector<8x16x8xf32> to vector<128x8xf32>
    %c0_2 = arith.constant 0 : index
    %c0_3 = arith.constant 0 : index
    %c0_4 = arith.constant 0 : index
    %8 = vector.load %arg3[%c0_2, %c0_3, %c0_4] : memref<9x8x4xf32, #tpu.memory_space<vmem>>, vector<1x8x4xf32>
    %9 = vector.shape_cast %8 : vector<1x8x4xf32> to vector<8x4xf32>
    %cst_5 = arith.constant dense<0.000000e+00> : vector<128x4xf32>
    %10 = tpu.matmul %7, %9, %cst_5 {dimension_numbers = #tpu.dot_dimension_numbers<[1], [0], [0], [1], [0, 0, 1, 1], [], []>} : vector<128x8xf32>, vector<8x4xf32>, vector<128x4xf32> -> vector<128x4xf32>
    %11 = arith.addf %2, %10 : vector<128x4xf32>
    %c0_i32_6 = arith.constant 0 : i32
    %12 = arith.addi %1, %c0_i32_6 : i32
    %c0_7 = arith.constant 0 : index
    %13 = arith.index_cast %12 : i32 to index
    %c1 = arith.constant 1 : index
    %c0_8 = arith.constant 0 : index
    %14 = vector.load %arg2[%c0_7, %13, %c1, %c0_8] : memref<1x18x18x8xf32, #tpu.memory_space<vmem>>, vector<1x8x16x8xf32>
    %15 = vector.shape_cast %14 : vector<1x8x16x8xf32> to vector<8x16x8xf32>
    %16 = vector.shape_cast %15 : vector<8x16x8xf32> to vector<128x8xf32>
    %c1_9 = arith.constant 1 : index
    %c0_10 = arith.constant 0 : index
    %c0_11 = arith.constant 0 : index
    %17 = vector.load %arg3[%c1_9, %c0_10, %c0_11] : memref<9x8x4xf32, #tpu.memory_space<vmem>>, vector<1x8x4xf32>
    %18 = vector.shape_cast %17 : vector<1x8x4xf32> to vector<8x4xf32>
    %cst_12 = arith.constant dense<0.000000e+00> : vector<128x4xf32>
    %19 = tpu.matmul %16, %18, %cst_12 {dimension_numbers = #tpu.dot_dimension_numbers<[1], [0], [0], [1], [0, 0, 1, 1], [], []>} : vector<128x8xf32>, vector<8x4xf32>, vector<128x4xf32> -> vector<128x4xf32>
    %20 = arith.addf %11, %19 : vector<128x4xf32>
    %c0_i32_13 = arith.constant 0 : i32
    %21 = arith.addi %1, %c0_i32_13 : i32
    %c0_14 = arith.constant 0 : index
    %22 = arith.index_cast %21 : i32 to index
    %c2 = arith.constant 2 : index
    %c0_15 = arith.constant 0 : index
    %23 = vector.load %arg2[%c0_14, %22, %c2, %c0_15] : memref<1x18x18x8xf32, #tpu.memory_space<vmem>>, vector<1x8x16x8xf32>
    %24 = vector.shape_cast %23 : vector<1x8x16x8xf32> to vector<8x16x8xf32>
    %25 = vector.shape_cast %24 : vector<8x16x8xf32> to vector<128x8xf32>
    %c2_16 = arith.constant 2 : index
    %c0_17 = arith.constant 0 : index
    %c0_18 = arith.constant 0 : index
    %26 = vector.load %arg3[%c2_16, %c0_17, %c0_18] : memref<9x8x4xf32, #tpu.memory_space<vmem>>, vector<1x8x4xf32>
    %27 = vector.shape_cast %26 : vector<1x8x4xf32> to vector<8x4xf32>
    %cst_19 = arith.constant dense<0.000000e+00> : vector<128x4xf32>
    %28 = tpu.matmul %25, %27, %cst_19 {dimension_numbers = #tpu.dot_dimension_numbers<[1], [0], [0], [1], [0, 0, 1, 1], [], []>} : vector<128x8xf32>, vector<8x4xf32>, vector<128x4xf32> -> vector<128x4xf32>
    %29 = arith.addf %20, %28 : vector<128x4xf32>
    %c1_i32 = arith.constant 1 : i32
    %30 = arith.addi %1, %c1_i32 : i32
    %c0_20 = arith.constant 0 : index
    %31 = arith.index_cast %30 : i32 to index
    %c0_21 = arith.constant 0 : index
    %c0_22 = arith.constant 0 : index
    %32 = vector.load %arg2[%c0_20, %31, %c0_21, %c0_22] : memref<1x18x18x8xf32, #tpu.memory_space<vmem>>, vector<1x8x16x8xf32>
    %33 = vector.shape_cast %32 : vector<1x8x16x8xf32> to vector<8x16x8xf32>
    %34 = vector.shape_cast %33 : vector<8x16x8xf32> to vector<128x8xf32>
    %c3 = arith.constant 3 : index
    %c0_23 = arith.constant 0 : index
    %c0_24 = arith.constant 0 : index
    %35 = vector.load %arg3[%c3, %c0_23, %c0_24] : memref<9x8x4xf32, #tpu.memory_space<vmem>>, vector<1x8x4xf32>
    %36 = vector.shape_cast %35 : vector<1x8x4xf32> to vector<8x4xf32>
    %cst_25 = arith.constant dense<0.000000e+00> : vector<128x4xf32>
    %37 = tpu.matmul %34, %36, %cst_25 {dimension_numbers = #tpu.dot_dimension_numbers<[1], [0], [0], [1], [0, 0, 1, 1], [], []>} : vector<128x8xf32>, vector<8x4xf32>, vector<128x4xf32> -> vector<128x4xf32>
    %38 = arith.addf %29, %37 : vector<128x4xf32>
    %c1_i32_26 = arith.constant 1 : i32
    %39 = arith.addi %1, %c1_i32_26 : i32
    %c0_27 = arith.constant 0 : index
    %40 = arith.index_cast %39 : i32 to index
    %c1_28 = arith.constant 1 : index
    %c0_29 = arith.constant 0 : index
    %41 = vector.load %arg2[%c0_27, %40, %c1_28, %c0_29] : memref<1x18x18x8xf32, #tpu.memory_space<vmem>>, vector<1x8x16x8xf32>
    %42 = vector.shape_cast %41 : vector<1x8x16x8xf32> to vector<8x16x8xf32>
    %43 = vector.shape_cast %42 : vector<8x16x8xf32> to vector<128x8xf32>
    %c4 = arith.constant 4 : index
    %c0_30 = arith.constant 0 : index
    %c0_31 = arith.constant 0 : index
    %44 = vector.load %arg3[%c4, %c0_30, %c0_31] : memref<9x8x4xf32, #tpu.memory_space<vmem>>, vector<1x8x4xf32>
    %45 = vector.shape_cast %44 : vector<1x8x4xf32> to vector<8x4xf32>
    %cst_32 = arith.constant dense<0.000000e+00> : vector<128x4xf32>
    %46 = tpu.matmul %43, %45, %cst_32 {dimension_numbers = #tpu.dot_dimension_numbers<[1], [0], [0], [1], [0, 0, 1, 1], [], []>} : vector<128x8xf32>, vector<8x4xf32>, vector<128x4xf32> -> vector<128x4xf32>
    %47 = arith.addf %38, %46 : vector<128x4xf32>
    %c1_i32_33 = arith.constant 1 : i32
    %48 = arith.addi %1, %c1_i32_33 : i32
    %c0_34 = arith.constant 0 : index
    %49 = arith.index_cast %48 : i32 to index
    %c2_35 = arith.constant 2 : index
    %c0_36 = arith.constant 0 : index
    %50 = vector.load %arg2[%c0_34, %49, %c2_35, %c0_36] : memref<1x18x18x8xf32, #tpu.memory_space<vmem>>, vector<1x8x16x8xf32>
    %51 = vector.shape_cast %50 : vector<1x8x16x8xf32> to vector<8x16x8xf32>
    %52 = vector.shape_cast %51 : vector<8x16x8xf32> to vector<128x8xf32>
    %c5 = arith.constant 5 : index
    %c0_37 = arith.constant 0 : index
    %c0_38 = arith.constant 0 : index
    %53 = vector.load %arg3[%c5, %c0_37, %c0_38] : memref<9x8x4xf32, #tpu.memory_space<vmem>>, vector<1x8x4xf32>
    %54 = vector.shape_cast %53 : vector<1x8x4xf32> to vector<8x4xf32>
    %cst_39 = arith.constant dense<0.000000e+00> : vector<128x4xf32>
    %55 = tpu.matmul %52, %54, %cst_39 {dimension_numbers = #tpu.dot_dimension_numbers<[1], [0], [0], [1], [0, 0, 1, 1], [], []>} : vector<128x8xf32>, vector<8x4xf32>, vector<128x4xf32> -> vector<128x4xf32>
    %56 = arith.addf %47, %55 : vector<128x4xf32>
    %c2_i32 = arith.constant 2 : i32
    %57 = arith.addi %1, %c2_i32 : i32
    %c0_40 = arith.constant 0 : index
    %58 = arith.index_cast %57 : i32 to index
    %c0_41 = arith.constant 0 : index
    %c0_42 = arith.constant 0 : index
    %59 = vector.load %arg2[%c0_40, %58, %c0_41, %c0_42] : memref<1x18x18x8xf32, #tpu.memory_space<vmem>>, vector<1x8x16x8xf32>
    %60 = vector.shape_cast %59 : vector<1x8x16x8xf32> to vector<8x16x8xf32>
    %61 = vector.shape_cast %60 : vector<8x16x8xf32> to vector<128x8xf32>
    %c6 = arith.constant 6 : index
    %c0_43 = arith.constant 0 : index
    %c0_44 = arith.constant 0 : index
    %62 = vector.load %arg3[%c6, %c0_43, %c0_44] : memref<9x8x4xf32, #tpu.memory_space<vmem>>, vector<1x8x4xf32>
    %63 = vector.shape_cast %62 : vector<1x8x4xf32> to vector<8x4xf32>
    %cst_45 = arith.constant dense<0.000000e+00> : vector<128x4xf32>
    %64 = tpu.matmul %61, %63, %cst_45 {dimension_numbers = #tpu.dot_dimension_numbers<[1], [0], [0], [1], [0, 0, 1, 1], [], []>} : vector<128x8xf32>, vector<8x4xf32>, vector<128x4xf32> -> vector<128x4xf32>
    %65 = arith.addf %56, %64 : vector<128x4xf32>
    %c2_i32_46 = arith.constant 2 : i32
    %66 = arith.addi %1, %c2_i32_46 : i32
    %c0_47 = arith.constant 0 : index
    %67 = arith.index_cast %66 : i32 to index
    %c1_48 = arith.constant 1 : index
    %c0_49 = arith.constant 0 : index
    %68 = vector.load %arg2[%c0_47, %67, %c1_48, %c0_49] : memref<1x18x18x8xf32, #tpu.memory_space<vmem>>, vector<1x8x16x8xf32>
    %69 = vector.shape_cast %68 : vector<1x8x16x8xf32> to vector<8x16x8xf32>
    %70 = vector.shape_cast %69 : vector<8x16x8xf32> to vector<128x8xf32>
    %c7 = arith.constant 7 : index
    %c0_50 = arith.constant 0 : index
    %c0_51 = arith.constant 0 : index
    %71 = vector.load %arg3[%c7, %c0_50, %c0_51] : memref<9x8x4xf32, #tpu.memory_space<vmem>>, vector<1x8x4xf32>
    %72 = vector.shape_cast %71 : vector<1x8x4xf32> to vector<8x4xf32>
    %cst_52 = arith.constant dense<0.000000e+00> : vector<128x4xf32>
    %73 = tpu.matmul %70, %72, %cst_52 {dimension_numbers = #tpu.dot_dimension_numbers<[1], [0], [0], [1], [0, 0, 1, 1], [], []>} : vector<128x8xf32>, vector<8x4xf32>, vector<128x4xf32> -> vector<128x4xf32>
    %74 = arith.addf %65, %73 : vector<128x4xf32>
    %c2_i32_53 = arith.constant 2 : i32
    %75 = arith.addi %1, %c2_i32_53 : i32
    %c0_54 = arith.constant 0 : index
    %76 = arith.index_cast %75 : i32 to index
    %c2_55 = arith.constant 2 : index
    %c0_56 = arith.constant 0 : index
    %77 = vector.load %arg2[%c0_54, %76, %c2_55, %c0_56] : memref<1x18x18x8xf32, #tpu.memory_space<vmem>>, vector<1x8x16x8xf32>
    %78 = vector.shape_cast %77 : vector<1x8x16x8xf32> to vector<8x16x8xf32>
    %79 = vector.shape_cast %78 : vector<8x16x8xf32> to vector<128x8xf32>
    %c8 = arith.constant 8 : index
    %c0_57 = arith.constant 0 : index
    %c0_58 = arith.constant 0 : index
    %80 = vector.load %arg3[%c8, %c0_57, %c0_58] : memref<9x8x4xf32, #tpu.memory_space<vmem>>, vector<1x8x4xf32>
    %81 = vector.shape_cast %80 : vector<1x8x4xf32> to vector<8x4xf32>
    %cst_59 = arith.constant dense<0.000000e+00> : vector<128x4xf32>
    %82 = tpu.matmul %79, %81, %cst_59 {dimension_numbers = #tpu.dot_dimension_numbers<[1], [0], [0], [1], [0, 0, 1, 1], [], []>} : vector<128x8xf32>, vector<8x4xf32>, vector<128x4xf32> -> vector<128x4xf32>
    %83 = arith.addf %74, %82 : vector<128x4xf32>
    %c0_60 = arith.constant 0 : index
    %c0_61 = arith.constant 0 : index
    %84 = vector.load %arg4[%c0_60, %c0_61] : memref<1x4xf32, #tpu.memory_space<vmem>>, vector<1x4xf32>
    %85 = vector.broadcast %84 : vector<1x4xf32> to vector<128x4xf32>
    %86 = arith.addf %83, %85 : vector<128x4xf32>
    %c0_62 = arith.constant 0 : index
    %c0_63 = arith.constant 0 : index
    %c0_64 = arith.constant 0 : index
    %87 = vector.load %arg5[%c0_62, %c0_63, %c0_64] : memref<1x128x4xf32, #tpu.memory_space<vmem>>, vector<1x128x4xf32>
    %88 = vector.shape_cast %87 : vector<1x128x4xf32> to vector<128x4xf32>
    %89 = vector.shape_cast %86 : vector<128x4xf32> to vector<1x128x4xf32>
    tpu.vector_store %arg5[%c0_62, %c0_63, %c0_64], %89 {strides = array<i32>} : memref<1x128x4xf32, #tpu.memory_space<vmem>>, vector<1x128x4xf32>,
    %c0_i32_65 = arith.constant 0 : i32
    %90 = arith.cmpi eq, %arg1, %c0_i32_65 : i32
    %91 = arith.extui %90 : i1 to i32
    %c0_i32_66 = arith.constant 0 : i32
    %92 = arith.cmpi ne, %91, %c0_i32_66 : i32
    scf.if %92 {
      %cst_81 = arith.constant 0.000000e+00 : f32
      %110 = vector.broadcast %cst_81 : f32 to vector<1x1x4xf32>
      %c0_82 = arith.constant 0 : index
      %c0_83 = arith.constant 0 : index
      %c0_84 = arith.constant 0 : index
      %111 = vector.load %arg6[%c0_82, %c0_83, %c0_84] : memref<1x1x4xf32, #tpu.memory_space<vmem>>, vector<1x1x4xf32>
      tpu.vector_store %arg6[%c0_82, %c0_83, %c0_84], %110 {strides = array<i32>} : memref<1x1x4xf32, #tpu.memory_space<vmem>>, vector<1x1x4xf32>,
      %cst_85 = arith.constant 0.000000e+00 : f32
      %112 = vector.broadcast %cst_85 : f32 to vector<1x1x4xf32>
      %c0_86 = arith.constant 0 : index
      %c0_87 = arith.constant 0 : index
      %c0_88 = arith.constant 0 : index
      %113 = vector.load %arg7[%c0_86, %c0_87, %c0_88] : memref<1x1x4xf32, #tpu.memory_space<vmem>>, vector<1x1x4xf32>
      tpu.vector_store %arg7[%c0_86, %c0_87, %c0_88], %112 {strides = array<i32>} : memref<1x1x4xf32, #tpu.memory_space<vmem>>, vector<1x1x4xf32>,
    } else {
    }
    %c0_67 = arith.constant 0 : index
    %c0_68 = arith.constant 0 : index
    %c0_69 = arith.constant 0 : index
    %93 = vector.load %arg6[%c0_67, %c0_68, %c0_69] : memref<1x1x4xf32, #tpu.memory_space<vmem>>, vector<1x1x4xf32>
    %94 = vector.shape_cast %93 : vector<1x1x4xf32> to vector<1x4xf32>
    %cst_70 = arith.constant dense<0.000000e+00> : vector<4xf32>
    %95 = vector.multi_reduction <add>, %86, %cst_70 [0] : vector<128x4xf32> to vector<4xf32>
    %96 = vector.shape_cast %95 : vector<4xf32> to vector<1x4xf32>
    %97 = arith.addf %94, %96 : vector<1x4xf32>
    %c0_71 = arith.constant 0 : index
    %c0_72 = arith.constant 0 : index
    %c0_73 = arith.constant 0 : index
    %98 = vector.load %arg6[%c0_71, %c0_72, %c0_73] : memref<1x1x4xf32, #tpu.memory_space<vmem>>, vector<1x1x4xf32>
    %99 = vector.shape_cast %98 : vector<1x1x4xf32> to vector<1x4xf32>
    %100 = vector.shape_cast %97 : vector<1x4xf32> to vector<1x1x4xf32>
    tpu.vector_store %arg6[%c0_71, %c0_72, %c0_73], %100 {strides = array<i32>} : memref<1x1x4xf32, #tpu.memory_space<vmem>>, vector<1x1x4xf32>,
    %c0_74 = arith.constant 0 : index
    %c0_75 = arith.constant 0 : index
    %c0_76 = arith.constant 0 : index
    %101 = vector.load %arg7[%c0_74, %c0_75, %c0_76] : memref<1x1x4xf32, #tpu.memory_space<vmem>>, vector<1x1x4xf32>
    %102 = vector.shape_cast %101 : vector<1x1x4xf32> to vector<1x4xf32>
    %103 = arith.mulf %86, %86 : vector<128x4xf32>
    %cst_77 = arith.constant dense<0.000000e+00> : vector<4xf32>
    %104 = vector.multi_reduction <add>, %103, %cst_77 [0] : vector<128x4xf32> to vector<4xf32>
    %105 = vector.shape_cast %104 : vector<4xf32> to vector<1x4xf32>
    %106 = arith.addf %102, %105 : vector<1x4xf32>
    %c0_78 = arith.constant 0 : index
    %c0_79 = arith.constant 0 : index
    %c0_80 = arith.constant 0 : index
    %107 = vector.load %arg7[%c0_78, %c0_79, %c0_80] : memref<1x1x4xf32, #tpu.memory_space<vmem>>, vector<1x1x4xf32>
    %108 = vector.shape_cast %107 : vector<1x1x4xf32> to vector<1x4xf32>
    %109 = vector.shape_cast %106 : vector<1x4xf32> to vector<1x1x4xf32>
    tpu.vector_store %arg7[%c0_78, %c0_79, %c0_80], %109 {strides = array<i32>} : memref<1x1x4xf32, #tpu.memory_space<vmem>>, vector<1x1x4xf32>,
    return
  }
  func.func @transform_0(%arg0: i32, %arg1: i32) -> (i32, i32, i32, i32) {
    %c0_i32 = arith.constant 0 : i32
    %c0_i32_0 = arith.constant 0 : i32
    %c0_i32_1 = arith.constant 0 : i32
    %c0_i32_2 = arith.constant 0 : i32
    return %arg0, %c0_i32, %c0_i32_0, %c0_i32_1 : i32, i32, i32, i32
  }
  func.func @transform_1(%arg0: i32, %arg1: i32) -> (i32, i32, i32) {
    %c0_i32 = arith.constant 0 : i32
    %c0_i32_0 = arith.constant 0 : i32
    %c0_i32_1 = arith.constant 0 : i32
    %c0_i32_2 = arith.constant 0 : i32
    return %c0_i32, %c0_i32_0, %c0_i32_1 : i32, i32, i32
  }
  func.func @transform_2(%arg0: i32, %arg1: i32) -> (i32, i32) {
    %c0_i32 = arith.constant 0 : i32
    %c0_i32_0 = arith.constant 0 : i32
    %c0_i32_1 = arith.constant 0 : i32
    return %c0_i32, %c0_i32_0 : i32, i32
  }
  func.func @transform_3(%arg0: i32, %arg1: i32) -> (i32, i32, i32) {
    %c0_i32 = arith.constant 0 : i32
    %c0_i32_0 = arith.constant 0 : i32
    return %arg0, %arg1, %c0_i32 : i32, i32, i32
  }
  func.func @transform_4(%arg0: i32, %arg1: i32) -> (i32, i32, i32) {
    %c0_i32 = arith.constant 0 : i32
    %c0_i32_0 = arith.constant 0 : i32
    %c0_i32_1 = arith.constant 0 : i32
    return %arg0, %c0_i32, %c0_i32_0 : i32, i32, i32
  }
  func.func @transform_5(%arg0: i32, %arg1: i32) -> (i32, i32, i32) {
    %c0_i32 = arith.constant 0 : i32
    %c0_i32_0 = arith.constant 0 : i32
    %c0_i32_1 = arith.constant 0 : i32
    return %arg0, %c0_i32, %c0_i32_0 : i32, i32, i32
  }
}

module attributes {stable_mosaic.version = 11 : i64} {
  func.func @_bn_finalize_kernel(%arg0: i32, %arg1: i32, %arg2: memref<1x128x4xf32, #tpu.memory_space<vmem>>, %arg3: memref<1x1x4xf32, #tpu.memory_space<vmem>>, %arg4: memref<1x1x4xf32, #tpu.memory_space<vmem>>, %arg5: memref<1x4xf32, #tpu.memory_space<vmem>>, %arg6: memref<1x4xf32, #tpu.memory_space<vmem>>, %arg7: memref<1x128x4xf32, #tpu.memory_space<vmem>>) attributes {dimension_semantics = [#tpu.dimension_semantics<parallel>, #tpu.dimension_semantics<arbitrary>], iteration_bounds = array<i64: 2, 2>, scalar_prefetch = 0 : i64, scratch_operands = 0 : i64, tpu.core_type = #tpu.core_type<tc>, window_params = [{transform_indices = @transform_0, window_bounds = array<i64: 1, 128, 4>}, {pipeline_mode = #tpu.pipeline_mode<synchronous>, transform_indices = @transform_1, window_bounds = array<i64: 1, 1, 4>}, {pipeline_mode = #tpu.pipeline_mode<synchronous>, transform_indices = @transform_2, window_bounds = array<i64: 1, 1, 4>}, {pipeline_mode = #tpu.pipeline_mode<synchronous>, transform_indices = @transform_3, window_bounds = array<i64: 1, 4>}, {pipeline_mode = #tpu.pipeline_mode<synchronous>, transform_indices = @transform_4, window_bounds = array<i64: 1, 4>}, {transform_indices = @transform_5, window_bounds = array<i64: 1, 128, 4>}]} {
    %c0 = arith.constant 0 : index
    %c0_0 = arith.constant 0 : index
    %c0_1 = arith.constant 0 : index
    %0 = vector.load %arg2[%c0, %c0_0, %c0_1] : memref<1x128x4xf32, #tpu.memory_space<vmem>>, vector<1x128x4xf32>
    %1 = vector.shape_cast %0 : vector<1x128x4xf32> to vector<128x4xf32>
    %c0_2 = arith.constant 0 : index
    %c0_3 = arith.constant 0 : index
    %c0_4 = arith.constant 0 : index
    %2 = vector.load %arg3[%c0_2, %c0_3, %c0_4] : memref<1x1x4xf32, #tpu.memory_space<vmem>>, vector<1x1x4xf32>
    %3 = vector.shape_cast %2 : vector<1x1x4xf32> to vector<1x4xf32>
    %cst = arith.constant 0.001953125 : f32
    %4 = vector.broadcast %cst : f32 to vector<1x4xf32>
    %5 = arith.mulf %3, %4 : vector<1x4xf32>
    %c0_5 = arith.constant 0 : index
    %c0_6 = arith.constant 0 : index
    %c0_7 = arith.constant 0 : index
    %6 = vector.load %arg4[%c0_5, %c0_6, %c0_7] : memref<1x1x4xf32, #tpu.memory_space<vmem>>, vector<1x1x4xf32>
    %7 = vector.shape_cast %6 : vector<1x1x4xf32> to vector<1x4xf32>
    %cst_8 = arith.constant 0.001953125 : f32
    %8 = vector.broadcast %cst_8 : f32 to vector<1x4xf32>
    %9 = arith.mulf %7, %8 : vector<1x4xf32>
    %10 = arith.mulf %5, %5 : vector<1x4xf32>
    %11 = arith.subf %9, %10 : vector<1x4xf32>
    %cst_9 = arith.constant 9.99999974E-6 : f32
    %12 = vector.broadcast %cst_9 : f32 to vector<1x4xf32>
    %13 = arith.addf %11, %12 : vector<1x4xf32>
    %14 = math.rsqrt %13 : vector<1x4xf32>
    %c0_10 = arith.constant 0 : index
    %c0_11 = arith.constant 0 : index
    %15 = vector.load %arg5[%c0_10, %c0_11] : memref<1x4xf32, #tpu.memory_space<vmem>>, vector<1x4xf32>
    %16 = arith.mulf %14, %15 : vector<1x4xf32>
    %17 = vector.broadcast %5 : vector<1x4xf32> to vector<128x4xf32>
    %18 = arith.subf %1, %17 : vector<128x4xf32>
    %19 = vector.broadcast %16 : vector<1x4xf32> to vector<128x4xf32>
    %20 = arith.mulf %18, %19 : vector<128x4xf32>
    %c0_12 = arith.constant 0 : index
    %c0_13 = arith.constant 0 : index
    %21 = vector.load %arg6[%c0_12, %c0_13] : memref<1x4xf32, #tpu.memory_space<vmem>>, vector<1x4xf32>
    %22 = vector.broadcast %21 : vector<1x4xf32> to vector<128x4xf32>
    %23 = arith.addf %20, %22 : vector<128x4xf32>
    %cst_14 = arith.constant 0.000000e+00 : f32
    %24 = vector.broadcast %cst_14 : f32 to vector<128x4xf32>
    %25 = arith.maximumf %23, %24 : vector<128x4xf32>
    %c0_15 = arith.constant 0 : index
    %c0_16 = arith.constant 0 : index
    %c0_17 = arith.constant 0 : index
    %26 = vector.load %arg7[%c0_15, %c0_16, %c0_17] : memref<1x128x4xf32, #tpu.memory_space<vmem>>, vector<1x128x4xf32>
    %27 = vector.shape_cast %26 : vector<1x128x4xf32> to vector<128x4xf32>
    %28 = vector.shape_cast %25 : vector<128x4xf32> to vector<1x128x4xf32>
    tpu.vector_store %arg7[%c0_15, %c0_16, %c0_17], %28 {strides = array<i32>} : memref<1x128x4xf32, #tpu.memory_space<vmem>>, vector<1x128x4xf32>,
    return
  }
  func.func @transform_0(%arg0: i32, %arg1: i32) -> (i32, i32, i32) {
    %c0_i32 = arith.constant 0 : i32
    %c0_i32_0 = arith.constant 0 : i32
    return %arg0, %arg1, %c0_i32 : i32, i32, i32
  }
  func.func @transform_1(%arg0: i32, %arg1: i32) -> (i32, i32, i32) {
    %c0_i32 = arith.constant 0 : i32
    %c0_i32_0 = arith.constant 0 : i32
    %c0_i32_1 = arith.constant 0 : i32
    %c0_i32_2 = arith.constant 0 : i32
    return %c0_i32, %c0_i32_0, %c0_i32_1 : i32, i32, i32
  }
  func.func @transform_2(%arg0: i32, %arg1: i32) -> (i32, i32, i32) {
    %c0_i32 = arith.constant 0 : i32
    %c0_i32_0 = arith.constant 0 : i32
    %c0_i32_1 = arith.constant 0 : i32
    %c0_i32_2 = arith.constant 0 : i32
    return %c0_i32, %c0_i32_0, %c0_i32_1 : i32, i32, i32
  }
  func.func @transform_3(%arg0: i32, %arg1: i32) -> (i32, i32) {
    %c0_i32 = arith.constant 0 : i32
    %c0_i32_0 = arith.constant 0 : i32
    %c0_i32_1 = arith.constant 0 : i32
    return %c0_i32, %c0_i32_0 : i32, i32
  }
  func.func @transform_4(%arg0: i32, %arg1: i32) -> (i32, i32) {
    %c0_i32 = arith.constant 0 : i32
    %c0_i32_0 = arith.constant 0 : i32
    %c0_i32_1 = arith.constant 0 : i32
    return %c0_i32, %c0_i32_0 : i32, i32
  }
  func.func @transform_5(%arg0: i32, %arg1: i32) -> (i32, i32, i32) {
    %c0_i32 = arith.constant 0 : i32
    %c0_i32_0 = arith.constant 0 : i32
    return %arg0, %arg1, %c0_i32 : i32, i32, i32
  }
}

module attributes {stable_mosaic.version = 11 : i64} {
  func.func @_emb_kernel(%arg0: memref<2x32xf32, #tpu.memory_space<vmem>>, %arg1: memref<32x8xf32, #tpu.memory_space<vmem>>, %arg2: memref<1x8xf32, #tpu.memory_space<vmem>>, %arg3: memref<2x8xf32, #tpu.memory_space<vmem>>) attributes {dimension_semantics = [], scalar_prefetch = 0 : i64, scratch_operands = 0 : i64, tpu.core_type = #tpu.core_type<tc>} {
    %c0 = arith.constant 0 : index
    %c0_0 = arith.constant 0 : index
    %0 = vector.load %arg0[%c0, %c0_0] : memref<2x32xf32, #tpu.memory_space<vmem>>, vector<2x32xf32>
    %c0_1 = arith.constant 0 : index
    %c0_2 = arith.constant 0 : index
    %1 = vector.load %arg1[%c0_1, %c0_2] : memref<32x8xf32, #tpu.memory_space<vmem>>, vector<32x8xf32>
    %cst = arith.constant dense<0.000000e+00> : vector<2x8xf32>
    %2 = tpu.matmul %0, %1, %cst {dimension_numbers = #tpu.dot_dimension_numbers<[1], [0], [0], [1], [0, 0, 1, 1], [], []>} : vector<2x32xf32>, vector<32x8xf32>, vector<2x8xf32> -> vector<2x8xf32>
    %c0_3 = arith.constant 0 : index
    %c0_4 = arith.constant 0 : index
    %3 = vector.load %arg2[%c0_3, %c0_4] : memref<1x8xf32, #tpu.memory_space<vmem>>, vector<1x8xf32>
    %4 = vector.broadcast %3 : vector<1x8xf32> to vector<2x8xf32>
    %5 = arith.addf %2, %4 : vector<2x8xf32>
    %cst_5 = arith.constant 0.000000e+00 : f32
    %6 = vector.broadcast %cst_5 : f32 to vector<2x8xf32>
    %7 = arith.maximumf %5, %6 : vector<2x8xf32>
    %c0_6 = arith.constant 0 : index
    %c0_7 = arith.constant 0 : index
    %8 = vector.load %arg3[%c0_6, %c0_7] : memref<2x8xf32, #tpu.memory_space<vmem>>, vector<2x8xf32>
    tpu.vector_store %arg3[%c0_6, %c0_7], %7 {strides = array<i32>} : memref<2x8xf32, #tpu.memory_space<vmem>>, vector<2x8xf32>,
    return
  }
}

module attributes {stable_mosaic.version = 11 : i64} {
  func.func @_conv_taps_kernel(%arg0: i32, %arg1: i32, %arg2: memref<1x18x18x4xf32, #tpu.memory_space<vmem>>, %arg3: memref<9x4x8xf32, #tpu.memory_space<vmem>>, %arg4: memref<1x8xf32, #tpu.memory_space<vmem>>, %arg5: memref<1x128x8xf32, #tpu.memory_space<vmem>>, %arg6: memref<1x1x8xf32, #tpu.memory_space<vmem>>, %arg7: memref<1x1x8xf32, #tpu.memory_space<vmem>>) attributes {dimension_semantics = [#tpu.dimension_semantics<parallel>, #tpu.dimension_semantics<arbitrary>], iteration_bounds = array<i64: 2, 2>, scalar_prefetch = 0 : i64, scratch_operands = 0 : i64, tpu.core_type = #tpu.core_type<tc>, window_params = [{transform_indices = @transform_0, window_bounds = array<i64: 1, 18, 18, 4>}, {pipeline_mode = #tpu.pipeline_mode<synchronous>, transform_indices = @transform_1, window_bounds = array<i64: 9, 4, 8>}, {pipeline_mode = #tpu.pipeline_mode<synchronous>, transform_indices = @transform_2, window_bounds = array<i64: 1, 8>}, {transform_indices = @transform_3, window_bounds = array<i64: 1, 128, 8>}, {transform_indices = @transform_4, window_bounds = array<i64: 1, 1, 8>}, {transform_indices = @transform_5, window_bounds = array<i64: 1, 1, 8>}]} {
    %c8_i32 = arith.constant 8 : i32
    %0 = arith.muli %arg1, %c8_i32 : i32
    %1 = tpu.assume_multiple %0, 8 : i32
    %cst = arith.constant 0.000000e+00 : f32
    %2 = vector.broadcast %cst : f32 to vector<128x8xf32>
    %c0_i32 = arith.constant 0 : i32
    %3 = arith.addi %1, %c0_i32 : i32
    %c0 = arith.constant 0 : index
    %4 = arith.index_cast %3 : i32 to index
    %c0_0 = arith.constant 0 : index
    %c0_1 = arith.constant 0 : index
    %5 = vector.load %arg2[%c0, %4, %c0_0, %c0_1] : memref<1x18x18x4xf32, #tpu.memory_space<vmem>>, vector<1x8x16x4xf32>
    %6 = vector.shape_cast %5 : vector<1x8x16x4xf32> to vector<8x16x4xf32>
    %7 = vector.shape_cast %6 : vector<8x16x4xf32> to vector<128x4xf32>
    %c0_2 = arith.constant 0 : index
    %c0_3 = arith.constant 0 : index
    %c0_4 = arith.constant 0 : index
    %8 = vector.load %arg3[%c0_2, %c0_3, %c0_4] : memref<9x4x8xf32, #tpu.memory_space<vmem>>, vector<1x4x8xf32>
    %9 = vector.shape_cast %8 : vector<1x4x8xf32> to vector<4x8xf32>
    %cst_5 = arith.constant dense<0.000000e+00> : vector<128x8xf32>
    %10 = tpu.matmul %7, %9, %cst_5 {dimension_numbers = #tpu.dot_dimension_numbers<[1], [0], [0], [1], [0, 0, 1, 1], [], []>} : vector<128x4xf32>, vector<4x8xf32>, vector<128x8xf32> -> vector<128x8xf32>
    %11 = arith.addf %2, %10 : vector<128x8xf32>
    %c0_i32_6 = arith.constant 0 : i32
    %12 = arith.addi %1, %c0_i32_6 : i32
    %c0_7 = arith.constant 0 : index
    %13 = arith.index_cast %12 : i32 to index
    %c1 = arith.constant 1 : index
    %c0_8 = arith.constant 0 : index
    %14 = vector.load %arg2[%c0_7, %13, %c1, %c0_8] : memref<1x18x18x4xf32, #tpu.memory_space<vmem>>, vector<1x8x16x4xf32>
    %15 = vector.shape_cast %14 : vector<1x8x16x4xf32> to vector<8x16x4xf32>
    %16 = vector.shape_cast %15 : vector<8x16x4xf32> to vector<128x4xf32>
    %c1_9 = arith.constant 1 : index
    %c0_10 = arith.constant 0 : index
    %c0_11 = arith.constant 0 : index
    %17 = vector.load %arg3[%c1_9, %c0_10, %c0_11] : memref<9x4x8xf32, #tpu.memory_space<vmem>>, vector<1x4x8xf32>
    %18 = vector.shape_cast %17 : vector<1x4x8xf32> to vector<4x8xf32>
    %cst_12 = arith.constant dense<0.000000e+00> : vector<128x8xf32>
    %19 = tpu.matmul %16, %18, %cst_12 {dimension_numbers = #tpu.dot_dimension_numbers<[1], [0], [0], [1], [0, 0, 1, 1], [], []>} : vector<128x4xf32>, vector<4x8xf32>, vector<128x8xf32> -> vector<128x8xf32>
    %20 = arith.addf %11, %19 : vector<128x8xf32>
    %c0_i32_13 = arith.constant 0 : i32
    %21 = arith.addi %1, %c0_i32_13 : i32
    %c0_14 = arith.constant 0 : index
    %22 = arith.index_cast %21 : i32 to index
    %c2 = arith.constant 2 : index
    %c0_15 = arith.constant 0 : index
    %23 = vector.load %arg2[%c0_14, %22, %c2, %c0_15] : memref<1x18x18x4xf32, #tpu.memory_space<vmem>>, vector<1x8x16x4xf32>
    %24 = vector.shape_cast %23 : vector<1x8x16x4xf32> to vector<8x16x4xf32>
    %25 = vector.shape_cast %24 : vector<8x16x4xf32> to vector<128x4xf32>
    %c2_16 = arith.constant 2 : index
    %c0_17 = arith.constant 0 : index
    %c0_18 = arith.constant 0 : index
    %26 = vector.load %arg3[%c2_16, %c0_17, %c0_18] : memref<9x4x8xf32, #tpu.memory_space<vmem>>, vector<1x4x8xf32>
    %27 = vector.shape_cast %26 : vector<1x4x8xf32> to vector<4x8xf32>
    %cst_19 = arith.constant dense<0.000000e+00> : vector<128x8xf32>
    %28 = tpu.matmul %25, %27, %cst_19 {dimension_numbers = #tpu.dot_dimension_numbers<[1], [0], [0], [1], [0, 0, 1, 1], [], []>} : vector<128x4xf32>, vector<4x8xf32>, vector<128x8xf32> -> vector<128x8xf32>
    %29 = arith.addf %20, %28 : vector<128x8xf32>
    %c1_i32 = arith.constant 1 : i32
    %30 = arith.addi %1, %c1_i32 : i32
    %c0_20 = arith.constant 0 : index
    %31 = arith.index_cast %30 : i32 to index
    %c0_21 = arith.constant 0 : index
    %c0_22 = arith.constant 0 : index
    %32 = vector.load %arg2[%c0_20, %31, %c0_21, %c0_22] : memref<1x18x18x4xf32, #tpu.memory_space<vmem>>, vector<1x8x16x4xf32>
    %33 = vector.shape_cast %32 : vector<1x8x16x4xf32> to vector<8x16x4xf32>
    %34 = vector.shape_cast %33 : vector<8x16x4xf32> to vector<128x4xf32>
    %c3 = arith.constant 3 : index
    %c0_23 = arith.constant 0 : index
    %c0_24 = arith.constant 0 : index
    %35 = vector.load %arg3[%c3, %c0_23, %c0_24] : memref<9x4x8xf32, #tpu.memory_space<vmem>>, vector<1x4x8xf32>
    %36 = vector.shape_cast %35 : vector<1x4x8xf32> to vector<4x8xf32>
    %cst_25 = arith.constant dense<0.000000e+00> : vector<128x8xf32>
    %37 = tpu.matmul %34, %36, %cst_25 {dimension_numbers = #tpu.dot_dimension_numbers<[1], [0], [0], [1], [0, 0, 1, 1], [], []>} : vector<128x4xf32>, vector<4x8xf32>, vector<128x8xf32> -> vector<128x8xf32>
    %38 = arith.addf %29, %37 : vector<128x8xf32>
    %c1_i32_26 = arith.constant 1 : i32
    %39 = arith.addi %1, %c1_i32_26 : i32
    %c0_27 = arith.constant 0 : index
    %40 = arith.index_cast %39 : i32 to index
    %c1_28 = arith.constant 1 : index
    %c0_29 = arith.constant 0 : index
    %41 = vector.load %arg2[%c0_27, %40, %c1_28, %c0_29] : memref<1x18x18x4xf32, #tpu.memory_space<vmem>>, vector<1x8x16x4xf32>
    %42 = vector.shape_cast %41 : vector<1x8x16x4xf32> to vector<8x16x4xf32>
    %43 = vector.shape_cast %42 : vector<8x16x4xf32> to vector<128x4xf32>
    %c4 = arith.constant 4 : index
    %c0_30 = arith.constant 0 : index
    %c0_31 = arith.constant 0 : index
    %44 = vector.load %arg3[%c4, %c0_30, %c0_31] : memref<9x4x8xf32, #tpu.memory_space<vmem>>, vector<1x4x8xf32>
    %45 = vector.shape_cast %44 : vector<1x4x8xf32> to vector<4x8xf32>
    %cst_32 = arith.constant dense<0.000000e+00> : vector<128x8xf32>
    %46 = tpu.matmul %43, %45, %cst_32 {dimension_numbers = #tpu.dot_dimension_numbers<[1], [0], [0], [1], [0, 0, 1, 1], [], []>} : vector<128x4xf32>, vector<4x8xf32>, vector<128x8xf32> -> vector<128x8xf32>
    %47 = arith.addf %38, %46 : vector<128x8xf32>
    %c1_i32_33 = arith.constant 1 : i32
    %48 = arith.addi %1, %c1_i32_33 : i32
    %c0_34 = arith.constant 0 : index
    %49 = arith.index_cast %48 : i32 to index
    %c2_35 = arith.constant 2 : index
    %c0_36 = arith.constant 0 : index
    %50 = vector.load %arg2[%c0_34, %49, %c2_35, %c0_36] : memref<1x18x18x4xf32, #tpu.memory_space<vmem>>, vector<1x8x16x4xf32>
    %51 = vector.shape_cast %50 : vector<1x8x16x4xf32> to vector<8x16x4xf32>
    %52 = vector.shape_cast %51 : vector<8x16x4xf32> to vector<128x4xf32>
    %c5 = arith.constant 5 : index
    %c0_37 = arith.constant 0 : index
    %c0_38 = arith.constant 0 : index
    %53 = vector.load %arg3[%c5, %c0_37, %c0_38] : memref<9x4x8xf32, #tpu.memory_space<vmem>>, vector<1x4x8xf32>
    %54 = vector.shape_cast %53 : vector<1x4x8xf32> to vector<4x8xf32>
    %cst_39 = arith.constant dense<0.000000e+00> : vector<128x8xf32>
    %55 = tpu.matmul %52, %54, %cst_39 {dimension_numbers = #tpu.dot_dimension_numbers<[1], [0], [0], [1], [0, 0, 1, 1], [], []>} : vector<128x4xf32>, vector<4x8xf32>, vector<128x8xf32> -> vector<128x8xf32>
    %56 = arith.addf %47, %55 : vector<128x8xf32>
    %c2_i32 = arith.constant 2 : i32
    %57 = arith.addi %1, %c2_i32 : i32
    %c0_40 = arith.constant 0 : index
    %58 = arith.index_cast %57 : i32 to index
    %c0_41 = arith.constant 0 : index
    %c0_42 = arith.constant 0 : index
    %59 = vector.load %arg2[%c0_40, %58, %c0_41, %c0_42] : memref<1x18x18x4xf32, #tpu.memory_space<vmem>>, vector<1x8x16x4xf32>
    %60 = vector.shape_cast %59 : vector<1x8x16x4xf32> to vector<8x16x4xf32>
    %61 = vector.shape_cast %60 : vector<8x16x4xf32> to vector<128x4xf32>
    %c6 = arith.constant 6 : index
    %c0_43 = arith.constant 0 : index
    %c0_44 = arith.constant 0 : index
    %62 = vector.load %arg3[%c6, %c0_43, %c0_44] : memref<9x4x8xf32, #tpu.memory_space<vmem>>, vector<1x4x8xf32>
    %63 = vector.shape_cast %62 : vector<1x4x8xf32> to vector<4x8xf32>
    %cst_45 = arith.constant dense<0.000000e+00> : vector<128x8xf32>
    %64 = tpu.matmul %61, %63, %cst_45 {dimension_numbers = #tpu.dot_dimension_numbers<[1], [0], [0], [1], [0, 0, 1, 1], [], []>} : vector<128x4xf32>, vector<4x8xf32>, vector<128x8xf32> -> vector<128x8xf32>
    %65 = arith.addf %56, %64 : vector<128x8xf32>
    %c2_i32_46 = arith.constant 2 : i32
    %66 = arith.addi %1, %c2_i32_46 : i32
    %c0_47 = arith.constant 0 : index
    %67 = arith.index_cast %66 : i32 to index
    %c1_48 = arith.constant 1 : index
    %c0_49 = arith.constant 0 : index
    %68 = vector.load %arg2[%c0_47, %67, %c1_48, %c0_49] : memref<1x18x18x4xf32, #tpu.memory_space<vmem>>, vector<1x8x16x4xf32>
    %69 = vector.shape_cast %68 : vector<1x8x16x4xf32> to vector<8x16x4xf32>
    %70 = vector.shape_cast %69 : vector<8x16x4xf32> to vector<128x4xf32>
    %c7 = arith.constant 7 : index
    %c0_50 = arith.constant 0 : index
    %c0_51 = arith.constant 0 : index
    %71 = vector.load %arg3[%c7, %c0_50, %c0_51] : memref<9x4x8xf32, #tpu.memory_space<vmem>>, vector<1x4x8xf32>
    %72 = vector.shape_cast %71 : vector<1x4x8xf32> to vector<4x8xf32>
    %cst_52 = arith.constant dense<0.000000e+00> : vector<128x8xf32>
    %73 = tpu.matmul %70, %72, %cst_52 {dimension_numbers = #tpu.dot_dimension_numbers<[1], [0], [0], [1], [0, 0, 1, 1], [], []>} : vector<128x4xf32>, vector<4x8xf32>, vector<128x8xf32> -> vector<128x8xf32>
    %74 = arith.addf %65, %73 : vector<128x8xf32>
    %c2_i32_53 = arith.constant 2 : i32
    %75 = arith.addi %1, %c2_i32_53 : i32
    %c0_54 = arith.constant 0 : index
    %76 = arith.index_cast %75 : i32 to index
    %c2_55 = arith.constant 2 : index
    %c0_56 = arith.constant 0 : index
    %77 = vector.load %arg2[%c0_54, %76, %c2_55, %c0_56] : memref<1x18x18x4xf32, #tpu.memory_space<vmem>>, vector<1x8x16x4xf32>
    %78 = vector.shape_cast %77 : vector<1x8x16x4xf32> to vector<8x16x4xf32>
    %79 = vector.shape_cast %78 : vector<8x16x4xf32> to vector<128x4xf32>
    %c8 = arith.constant 8 : index
    %c0_57 = arith.constant 0 : index
    %c0_58 = arith.constant 0 : index
    %80 = vector.load %arg3[%c8, %c0_57, %c0_58] : memref<9x4x8xf32, #tpu.memory_space<vmem>>, vector<1x4x8xf32>
    %81 = vector.shape_cast %80 : vector<1x4x8xf32> to vector<4x8xf32>
    %cst_59 = arith.constant dense<0.000000e+00> : vector<128x8xf32>
    %82 = tpu.matmul %79, %81, %cst_59 {dimension_numbers = #tpu.dot_dimension_numbers<[1], [0], [0], [1], [0, 0, 1, 1], [], []>} : vector<128x4xf32>, vector<4x8xf32>, vector<128x8xf32> -> vector<128x8xf32>
    %83 = arith.addf %74, %82 : vector<128x8xf32>
    %c0_60 = arith.constant 0 : index
    %c0_61 = arith.constant 0 : index
    %84 = vector.load %arg4[%c0_60, %c0_61] : memref<1x8xf32, #tpu.memory_space<vmem>>, vector<1x8xf32>
    %85 = vector.broadcast %84 : vector<1x8xf32> to vector<128x8xf32>
    %86 = arith.addf %83, %85 : vector<128x8xf32>
    %c0_62 = arith.constant 0 : index
    %c0_63 = arith.constant 0 : index
    %c0_64 = arith.constant 0 : index
    %87 = vector.load %arg5[%c0_62, %c0_63, %c0_64] : memref<1x128x8xf32, #tpu.memory_space<vmem>>, vector<1x128x8xf32>
    %88 = vector.shape_cast %87 : vector<1x128x8xf32> to vector<128x8xf32>
    %89 = vector.shape_cast %86 : vector<128x8xf32> to vector<1x128x8xf32>
    tpu.vector_store %arg5[%c0_62, %c0_63, %c0_64], %89 {strides = array<i32>} : memref<1x128x8xf32, #tpu.memory_space<vmem>>, vector<1x128x8xf32>,
    %c0_i32_65 = arith.constant 0 : i32
    %90 = arith.cmpi eq, %arg1, %c0_i32_65 : i32
    %91 = arith.extui %90 : i1 to i32
    %c0_i32_66 = arith.constant 0 : i32
    %92 = arith.cmpi ne, %91, %c0_i32_66 : i32
    scf.if %92 {
      %cst_81 = arith.constant 0.000000e+00 : f32
      %110 = vector.broadcast %cst_81 : f32 to vector<1x1x8xf32>
      %c0_82 = arith.constant 0 : index
      %c0_83 = arith.constant 0 : index
      %c0_84 = arith.constant 0 : index
      %111 = vector.load %arg6[%c0_82, %c0_83, %c0_84] : memref<1x1x8xf32, #tpu.memory_space<vmem>>, vector<1x1x8xf32>
      tpu.vector_store %arg6[%c0_82, %c0_83, %c0_84], %110 {strides = array<i32>} : memref<1x1x8xf32, #tpu.memory_space<vmem>>, vector<1x1x8xf32>,
      %cst_85 = arith.constant 0.000000e+00 : f32
      %112 = vector.broadcast %cst_85 : f32 to vector<1x1x8xf32>
      %c0_86 = arith.constant 0 : index
      %c0_87 = arith.constant 0 : index
      %c0_88 = arith.constant 0 : index
      %113 = vector.load %arg7[%c0_86, %c0_87, %c0_88] : memref<1x1x8xf32, #tpu.memory_space<vmem>>, vector<1x1x8xf32>
      tpu.vector_store %arg7[%c0_86, %c0_87, %c0_88], %112 {strides = array<i32>} : memref<1x1x8xf32, #tpu.memory_space<vmem>>, vector<1x1x8xf32>,
    } else {
    }
    %c0_67 = arith.constant 0 : index
    %c0_68 = arith.constant 0 : index
    %c0_69 = arith.constant 0 : index
    %93 = vector.load %arg6[%c0_67, %c0_68, %c0_69] : memref<1x1x8xf32, #tpu.memory_space<vmem>>, vector<1x1x8xf32>
    %94 = vector.shape_cast %93 : vector<1x1x8xf32> to vector<1x8xf32>
    %cst_70 = arith.constant dense<0.000000e+00> : vector<8xf32>
    %95 = vector.multi_reduction <add>, %86, %cst_70 [0] : vector<128x8xf32> to vector<8xf32>
    %96 = vector.shape_cast %95 : vector<8xf32> to vector<1x8xf32>
    %97 = arith.addf %94, %96 : vector<1x8xf32>
    %c0_71 = arith.constant 0 : index
    %c0_72 = arith.constant 0 : index
    %c0_73 = arith.constant 0 : index
    %98 = vector.load %arg6[%c0_71, %c0_72, %c0_73] : memref<1x1x8xf32, #tpu.memory_space<vmem>>, vector<1x1x8xf32>
    %99 = vector.shape_cast %98 : vector<1x1x8xf32> to vector<1x8xf32>
    %100 = vector.shape_cast %97 : vector<1x8xf32> to vector<1x1x8xf32>
    tpu.vector_store %arg6[%c0_71, %c0_72, %c0_73], %100 {strides = array<i32>} : memref<1x1x8xf32, #tpu.memory_space<vmem>>, vector<1x1x8xf32>,
    %c0_74 = arith.constant 0 : index
    %c0_75 = arith.constant 0 : index
    %c0_76 = arith.constant 0 : index
    %101 = vector.load %arg7[%c0_74, %c0_75, %c0_76] : memref<1x1x8xf32, #tpu.memory_space<vmem>>, vector<1x1x8xf32>
    %102 = vector.shape_cast %101 : vector<1x1x8xf32> to vector<1x8xf32>
    %103 = arith.mulf %86, %86 : vector<128x8xf32>
    %cst_77 = arith.constant dense<0.000000e+00> : vector<8xf32>
    %104 = vector.multi_reduction <add>, %103, %cst_77 [0] : vector<128x8xf32> to vector<8xf32>
    %105 = vector.shape_cast %104 : vector<8xf32> to vector<1x8xf32>
    %106 = arith.addf %102, %105 : vector<1x8xf32>
    %c0_78 = arith.constant 0 : index
    %c0_79 = arith.constant 0 : index
    %c0_80 = arith.constant 0 : index
    %107 = vector.load %arg7[%c0_78, %c0_79, %c0_80] : memref<1x1x8xf32, #tpu.memory_space<vmem>>, vector<1x1x8xf32>
    %108 = vector.shape_cast %107 : vector<1x1x8xf32> to vector<1x8xf32>
    %109 = vector.shape_cast %106 : vector<1x8xf32> to vector<1x1x8xf32>
    tpu.vector_store %arg7[%c0_78, %c0_79, %c0_80], %109 {strides = array<i32>} : memref<1x1x8xf32, #tpu.memory_space<vmem>>, vector<1x1x8xf32>,
    return
  }
  func.func @transform_0(%arg0: i32, %arg1: i32) -> (i32, i32, i32, i32) {
    %c0_i32 = arith.constant 0 : i32
    %c0_i32_0 = arith.constant 0 : i32
    %c0_i32_1 = arith.constant 0 : i32
    %c0_i32_2 = arith.constant 0 : i32
    return %arg0, %c0_i32, %c0_i32_0, %c0_i32_1 : i32, i32, i32, i32
  }
  func.func @transform_1(%arg0: i32, %arg1: i32) -> (i32, i32, i32) {
    %c0_i32 = arith.constant 0 : i32
    %c0_i32_0 = arith.constant 0 : i32
    %c0_i32_1 = arith.constant 0 : i32
    %c0_i32_2 = arith.constant 0 : i32
    return %c0_i32, %c0_i32_0, %c0_i32_1 : i32, i32, i32
  }
  func.func @transform_2(%arg0: i32, %arg1: i32) -> (i32, i32) {
    %c0_i32 = arith.constant 0 : i32
    %c0_i32_0 = arith.constant 0 : i32
    %c0_i32_1 = arith.constant 0 : i32
    return %c0_i32, %c0_i32_0 : i32, i32
  }
  func.func @transform_3(%arg0: i32, %arg1: i32) -> (i32, i32, i32) {
    %c0_i32 = arith.constant 0 : i32
    %c0_i32_0 = arith.constant 0 : i32
    return %arg0, %arg1, %c0_i32 : i32, i32, i32
  }
  func.func @transform_4(%arg0: i32, %arg1: i32) -> (i32, i32, i32) {
    %c0_i32 = arith.constant 0 : i32
    %c0_i32_0 = arith.constant 0 : i32
    %c0_i32_1 = arith.constant 0 : i32
    return %arg0, %c0_i32, %c0_i32_0 : i32, i32, i32
  }
  func.func @transform_5(%arg0: i32, %arg1: i32) -> (i32, i32, i32) {
    %c0_i32 = arith.constant 0 : i32
    %c0_i32_0 = arith.constant 0 : i32
    %c0_i32_1 = arith.constant 0 : i32
    return %arg0, %c0_i32, %c0_i32_0 : i32, i32, i32
  }
}

module attributes {stable_mosaic.version = 11 : i64} {
  func.func @_bn_finalize_kernel(%arg0: i32, %arg1: i32, %arg2: memref<1x128x8xf32, #tpu.memory_space<vmem>>, %arg3: memref<1x1x8xf32, #tpu.memory_space<vmem>>, %arg4: memref<1x1x8xf32, #tpu.memory_space<vmem>>, %arg5: memref<1x1x8xf32, #tpu.memory_space<vmem>>, %arg6: memref<1x8xf32, #tpu.memory_space<vmem>>, %arg7: memref<1x8xf32, #tpu.memory_space<vmem>>, %arg8: memref<1x128x8xf32, #tpu.memory_space<vmem>>) attributes {dimension_semantics = [#tpu.dimension_semantics<parallel>, #tpu.dimension_semantics<arbitrary>], iteration_bounds = array<i64: 2, 2>, scalar_prefetch = 0 : i64, scratch_operands = 0 : i64, tpu.core_type = #tpu.core_type<tc>, window_params = [{transform_indices = @transform_0, window_bounds = array<i64: 1, 128, 8>}, {transform_indices = @transform_1, window_bounds = array<i64: 1, 1, 8>}, {pipeline_mode = #tpu.pipeline_mode<synchronous>, transform_indices = @transform_2, window_bounds = array<i64: 1, 1, 8>}, {pipeline_mode = #tpu.pipeline_mode<synchronous>, transform_indices = @transform_3, window_bounds = array<i64: 1, 1, 8>}, {pipeline_mode = #tpu.pipeline_mode<synchronous>, transform_indices = @transform_4, window_bounds = array<i64: 1, 8>}, {pipeline_mode = #tpu.pipeline_mode<synchronous>, transform_indices = @transform_5, window_bounds = array<i64: 1, 8>}, {transform_indices = @transform_6, window_bounds = array<i64: 1, 128, 8>}]} {
    %c0 = arith.constant 0 : index
    %c0_0 = arith.constant 0 : index
    %c0_1 = arith.constant 0 : index
    %0 = vector.load %arg2[%c0, %c0_0, %c0_1] : memref<1x128x8xf32, #tpu.memory_space<vmem>>, vector<1x128x8xf32>
    %1 = vector.shape_cast %0 : vector<1x128x8xf32> to vector<128x8xf32>
    %c0_2 = arith.constant 0 : index
    %c0_3 = arith.constant 0 : index
    %c0_4 = arith.constant 0 : index
    %2 = vector.load %arg4[%c0_2, %c0_3, %c0_4] : memref<1x1x8xf32, #tpu.memory_space<vmem>>, vector<1x1x8xf32>
    %3 = vector.shape_cast %2 : vector<1x1x8xf32> to vector<1x8xf32>
    %cst = arith.constant 0.001953125 : f32
    %4 = vector.broadcast %cst : f32 to vector<1x8xf32>
    %5 = arith.mulf %3, %4 : vector<1x8xf32>
    %c0_5 = arith.constant 0 : index
    %c0_6 = arith.constant 0 : index
    %c0_7 = arith.constant 0 : index
    %6 = vector.load %arg5[%c0_5, %c0_6, %c0_7] : memref<1x1x8xf32, #tpu.memory_space<vmem>>, vector<1x1x8xf32>
    %7 = vector.shape_cast %6 : vector<1x1x8xf32> to vector<1x8xf32>
    %cst_8 = arith.constant 0.001953125 : f32
    %8 = vector.broadcast %cst_8 : f32 to vector<1x8xf32>
    %9 = arith.mulf %7, %8 : vector<1x8xf32>
    %10 = arith.mulf %5, %5 : vector<1x8xf32>
    %11 = arith.subf %9, %10 : vector<1x8xf32>
    %cst_9 = arith.constant 9.99999974E-6 : f32
    %12 = vector.broadcast %cst_9 : f32 to vector<1x8xf32>
    %13 = arith.addf %11, %12 : vector<1x8xf32>
    %14 = math.rsqrt %13 : vector<1x8xf32>
    %c0_10 = arith.constant 0 : index
    %c0_11 = arith.constant 0 : index
    %15 = vector.load %arg6[%c0_10, %c0_11] : memref<1x8xf32, #tpu.memory_space<vmem>>, vector<1x8xf32>
    %16 = arith.mulf %14, %15 : vector<1x8xf32>
    %17 = vector.broadcast %5 : vector<1x8xf32> to vector<128x8xf32>
    %18 = arith.subf %1, %17 : vector<128x8xf32>
    %19 = vector.broadcast %16 : vector<1x8xf32> to vector<128x8xf32>
    %20 = arith.mulf %18, %19 : vector<128x8xf32>
    %c0_12 = arith.constant 0 : index
    %c0_13 = arith.constant 0 : index
    %21 = vector.load %arg7[%c0_12, %c0_13] : memref<1x8xf32, #tpu.memory_space<vmem>>, vector<1x8xf32>
    %22 = vector.broadcast %21 : vector<1x8xf32> to vector<128x8xf32>
    %23 = arith.addf %20, %22 : vector<128x8xf32>
    %c0_14 = arith.constant 0 : index
    %c0_15 = arith.constant 0 : index
    %c0_16 = arith.constant 0 : index
    %24 = vector.load %arg3[%c0_14, %c0_15, %c0_16] : memref<1x1x8xf32, #tpu.memory_space<vmem>>, vector<1x1x8xf32>
    %25 = vector.shape_cast %24 : vector<1x1x8xf32> to vector<1x8xf32>
    %26 = vector.broadcast %25 : vector<1x8xf32> to vector<128x8xf32>
    %27 = arith.addf %23, %26 : vector<128x8xf32>
    %c0_17 = arith.constant 0 : index
    %c0_18 = arith.constant 0 : index
    %c0_19 = arith.constant 0 : index
    %28 = vector.load %arg8[%c0_17, %c0_18, %c0_19] : memref<1x128x8xf32, #tpu.memory_space<vmem>>, vector<1x128x8xf32>
    %29 = vector.shape_cast %28 : vector<1x128x8xf32> to vector<128x8xf32>
    %30 = vector.shape_cast %27 : vector<128x8xf32> to vector<1x128x8xf32>
    tpu.vector_store %arg8[%c0_17, %c0_18, %c0_19], %30 {strides = array<i32>} : memref<1x128x8xf32, #tpu.memory_space<vmem>>, vector<1x128x8xf32>,
    return
  }
  func.func @transform_0(%arg0: i32, %arg1: i32) -> (i32, i32, i32) {
    %c0_i32 = arith.constant 0 : i32
    %c0_i32_0 = arith.constant 0 : i32
    return %arg0, %arg1, %c0_i32 : i32, i32, i32
  }
  func.func @transform_1(%arg0: i32, %arg1: i32) -> (i32, i32, i32) {
    %c0_i32 = arith.constant 0 : i32
    %c0_i32_0 = arith.constant 0 : i32
    %c0_i32_1 = arith.constant 0 : i32
    return %arg0, %c0_i32, %c0_i32_0 : i32, i32, i32
  }
  func.func @transform_2(%arg0: i32, %arg1: i32) -> (i32, i32, i32) {
    %c0_i32 = arith.constant 0 : i32
    %c0_i32_0 = arith.constant 0 : i32
    %c0_i32_1 = arith.constant 0 : i32
    %c0_i32_2 = arith.constant 0 : i32
    return %c0_i32, %c0_i32_0, %c0_i32_1 : i32, i32, i32
  }
  func.func @transform_3(%arg0: i32, %arg1: i32) -> (i32, i32, i32) {
    %c0_i32 = arith.constant 0 : i32
    %c0_i32_0 = arith.constant 0 : i32
    %c0_i32_1 = arith.constant 0 : i32
    %c0_i32_2 = arith.constant 0 : i32
    return %c0_i32, %c0_i32_0, %c0_i32_1 : i32, i32, i32
  }
  func.func @transform_4(%arg0: i32, %arg1: i32) -> (i32, i32) {
    %c0_i32 = arith.constant 0 : i32
    %c0_i32_0 = arith.constant 0 : i32
    %c0_i32_1 = arith.constant 0 : i32
    return %c0_i32, %c0_i32_0 : i32, i32
  }
  func.func @transform_5(%arg0: i32, %arg1: i32) -> (i32, i32) {
    %c0_i32 = arith.constant 0 : i32
    %c0_i32_0 = arith.constant 0 : i32
    %c0_i32_1 = arith.constant 0 : i32
    return %c0_i32, %c0_i32_0 : i32, i32
  }
  func.func @transform_6(%arg0: i32, %arg1: i32) -> (i32, i32, i32) {
    %c0_i32 = arith.constant 0 : i32
    %c0_i32_0 = arith.constant 0 : i32
    return %arg0, %arg1, %c0_i32 : i32, i32, i32
  }
}

</mosaic_0001>

<bundles_post_ra>
// kernel: upsample_forward.11
= control target key start
LH: loop header
LB: loop body
LE: loop exit
PB: predicated region body
PF: predicated region fallthrough
CT: control target
= control target key end

     0   :  { %s277_s9 = smov 0   ;;  %s294_s0 = inlined_call_operand.vmem [shape: f32[16,8], index: 0, kind: input, shape index: {}]   ;;  %s295_s1 = inlined_call_operand.vmem [shape: f32[2,8,32], index: 1, kind: input, shape index: {}]   ;;  %s296_s2 = inlined_call_operand.vmem [shape: f32[2,16,32], index: 2, kind: output, shape index: {}]  }
   0x1 LB: > { %s232_s10 = sadd.s32 4294967295, %s260_s9   ;;  %p236_p0 = scmp.ge.s32.totalorder %s260_s9, 1  ;;  %s260_s9 = sphi %s277_s9, %s12_s9  }
   0x2   : > { %p111_p1 = scmp.lt.s32.totalorder %s260_s9, 3 }
   0x4   : > { %p112_p2 = pnand %p236_p0, %p111_p1 }
   0x5   : > { %p132_p3 = scmp.lt.s32.totalorder (!%p112_p2), %s232_s10, 1 }
   0x6   : > { %115 = sbr.rel (%p112_p2) target bundleno = 144 (0x90), region = 28 }
   0xb   : > { %s298_s10 = smov (!%p132_p3, %s232_s10), 1  ;;  %v141_v0 = vld [vmem:[%s294_s0] sm:$0xff]  ;;  %vm144_vm0 = vcmask 64512   ;;  %v142_v1 = vld [vmem:[%s294_s0 + $0x8] sm:$0xff]  ;;  %vm174_vm1 = vcmask 261120  }
   0xc   : > { %s237_s11 = sshll.u32 %s298_s10, 3  ;;  %s244_s19 = sshll.u32 %s298_s10, 4 }
   0xd   : > { %s135_s14 = scalar_lea.vmem %s295_s1, %s237_s11  ;;  %s140_s22 = scalar_lea.vmem %s296_s2, %s244_s19 }
   0xe   : > { %v143_v2 = vld [vmem:[%s135_s14] sm:$0xff] }
   0xf   : > { %166 = vmatpush.msra.mxu0 %v143_v2  ;;  %245 = vmatpush.msra.mxu1 %v143_v2 }
  0x10   : > { %240 = vmatmul.msk.f32.vlgmr.msra.gmra.mxu0 %vm144_vm0, %v141_v0  ;;  %241 = vmatmul.msk.f32.vlgmr.msra.gmra.mxu1 %vm144_vm0, %v142_v1 }
  0x8d   : > { %v168_v3 = vpop.f32.mrf.mxu0  ;;  %v171_v4 = vpop.f32.mrf.mxu1 }
  0x8e   : > { %175 = vst.msk [vmem:[%s140_s22] sm:$0xff] %vm174_vm1, %v168_v3 }
  0x8f   : > { %176 = vst.msk [vmem:[%s140_s22 + $0x8] sm:$0xff] %vm174_vm1, %v171_v4 }
  0x90 PF: > { %s12_s9 = sadd.s32 1, %s260_s9  }
  0x91   : > { %p9_p4 = scmp.ge.s32.totalorder %s12_s9, 4  }
  0x93   :  { %11 = sbr.rel (!%p9_p4) target bundleno = 1 (0x1), region = 58 }

// kernel: upsample_forward.12
= control target key start
LH: loop header
LB: loop body
LE: loop exit
PB: predicated region body
PF: predicated region fallthrough
CT: control target
= control target key end

     0   :  { %s338_s9 = smov 0   ;;  %s374_s0 = inlined_call_operand.vmem [shape: f32[2,64,8], index: 0, kind: input, shape index: {}]   ;;  %s375_s1 = inlined_call_operand.vmem [shape: f32[8,16], index: 1, kind: input, shape index: {}]   ;;  %s376_s2 = inlined_call_operand.vmem [shape: f32[2,64,16], index: 2, kind: output, shape index: {}]  }
   0x1 LB: > { %s283_s10 = sadd.s32 4294967295, %s321_s9   ;;  %p287_p0 = scmp.ge.s32.totalorder %s321_s9, 1  ;;  %s321_s9 = sphi %s338_s9, %s12_s9  }
   0x2   : > { %p112_p1 = scmp.lt.s32.totalorder %s321_s9, 3 }
   0x4   : > { %p113_p2 = pnand %p287_p0, %p112_p1 }
   0x5   : > { %p134_p3 = scmp.lt.s32.totalorder (!%p113_p2), %s283_s10, 1 }
   0x6   : > { %116 = sbr.rel (%p113_p2) target bundleno = 157 (0x9d), region = 28 }
   0xb   : > { %v152_v0 = vld [vmem:[%s375_s1] sm:$0xff]  ;;  %s378_s10 = smov (!%p134_p3, %s283_s10), 1  ;;  %vm153_vm0 = vcmask 64512   ;;  %vm219_vm1 = vcmask 130048  }
   0xc   : > { %305 = vmatpush.msra.mxu2 %v152_v0  ;;  %306 = vmatpush.msra.mxu3 %v152_v0  ;;  %s302_s13 = sshll.u32 %s378_s10, 6 }
   0xd   : > { %193 = vmatpush.msra.mxu0 %v152_v0  ;;  %304 = vmatpush.msra.mxu1 %v152_v0  ;;  %s138_s16 = scalar_lea.vmem %s374_s0, %s302_s13  ;;  %s143_s19 = scalar_lea.vmem %s376_s2, %s302_s13 }
   0xe   : > { %v148_v1 = vld [vmem:[%s138_s16 + $0x20] sm:$0xff]  ;;  %v150_v2 = vld [vmem:[%s138_s16 + $0x30] sm:$0xff]  ;;  %v149_v5 = vld [vmem:[%s138_s16 + $0x28] sm:$0xff] }
   0xf   : > { %v144_v3 = vld [vmem:[%s138_s16] sm:$0xff]  ;;  %296 = vmatmul.msk.f32.vlgmr.msra.gmra.mxu2 %vm153_vm0, %v148_v1  ;;  %298 = vmatmul.msk.f32.vlgmr.msra.gmra.mxu3 %vm153_vm0, %v150_v2  ;;  %v146_v4 = vld [vmem:[%s138_s16 + $0x10] sm:$0xff]  ;;  %v151_v6 = vld [vmem:[%s138_s16 + $0x38] sm:$0xff] }
  0x10   : > { %292 = vmatmul.msk.f32.vlgmr.msra.gmra.mxu0 %vm153_vm0, %v144_v3  ;;  %294 = vmatmul.msk.f32.vlgmr.msra.gmra.mxu1 %vm153_vm0, %v146_v4  ;;  %v145_v7 = vld [vmem:[%s138_s16 + $0x8] sm:$0xff]  ;;  %v147_v8 = vld [vmem:[%s138_s16 + $0x18] sm:$0xff] }
  0x17   : > { %297 = vmatmul.msk.f32.gmra.mxu2 %vm153_vm0, %v149_v5  ;;  %299 = vmatmul.msk.f32.gmra.mxu3 %vm153_vm0, %v151_v6 }
  0x18   : > { %293 = vmatmul.msk.f32.gmra.mxu0 %vm153_vm0, %v145_v7  ;;  %295 = vmatmul.msk.f32.gmra.mxu1 %vm153_vm0, %v147_v8 }
  0x8d   : > { %v195_v9 = vpop.f32.mrf.mxu0  ;;  %v201_v10 = vpop.f32.mrf.mxu1 }
  0x8e   : > { %220 = vst.msk [vmem:[%s143_s19] sm:$0xff] %vm219_vm1, %v195_v9 }
  0x8f   : > { %222 = vst.msk [vmem:[%s143_s19 + $0x10] sm:$0xff] %vm219_vm1, %v201_v10 }
  0x92   : > { %v207_v11 = vpop.f32.mrf.mxu2  ;;  %v213_v12 = vpop.f32.mrf.mxu3 }
  0x93   : > { %224 = vst.msk [vmem:[%s143_s19 + $0x20] sm:$0xff] %vm219_vm1, %v207_v11 }
  0x94   : > { %226 = vst.msk [vmem:[%s143_s19 + $0x30] sm:$0xff] %vm219_vm1, %v213_v12 }
  0x95   : > { %v198_v13 = vpop.f32.mrf.mxu0  ;;  %v204_v14 = vpop.f32.mrf.mxu1 }
  0x96   : > { %221 = vst.msk [vmem:[%s143_s19 + $0x8] sm:$0xff] %vm219_vm1, %v198_v13 }
  0x97   : > { %223 = vst.msk [vmem:[%s143_s19 + $0x18] sm:$0xff] %vm219_vm1, %v204_v14 }
  0x9a   : > { %v210_v15 = vpop.f32.mrf.mxu2  ;;  %v216_v16 = vpop.f32.mrf.mxu3 }
  0x9b   : > { %225 = vst.msk [vmem:[%s143_s19 + $0x28] sm:$0xff] %vm219_vm1, %v210_v15 }
  0x9c   : > { %227 = vst.msk [vmem:[%s143_s19 + $0x38] sm:$0xff] %vm219_vm1, %v216_v16 }
  0x9d PF: > { %s12_s9 = sadd.s32 1, %s321_s9  }
  0x9e   : > { %p9_p4 = scmp.ge.s32.totalorder %s12_s9, 4  }
  0xa0   :  { %11 = sbr.rel (!%p9_p4) target bundleno = 1 (0x1), region = 58 }

// kernel: upsample_forward.14
= control target key start
LH: loop header
LB: loop body
LE: loop exit
PB: predicated region body
PF: predicated region fallthrough
CT: control target
= control target key end

     0   :  { %s606_s18 = smov 0   ;;  %s608_s19 = smov 0   ;;  %s764_s0 = inlined_call_operand.vmem [shape: f32[2,256,8], index: 0, kind: input, shape index: {}]   ;;  %s765_s1 = inlined_call_operand.vmem [shape: f32[1,1,8], index: 1, kind: input, shape index: {}]   ;;  %s766_s2 = inlined_call_operand.vmem [shape: f32[1,1,8], index: 2, kind: input, shape index: {}]   ;;  %s767_s3 = inlined_call_operand.vmem [shape: f32[1,8], index: 3, kind: input, shape index: {}]   ;;  %s768_s4 = inlined_call_operand.vmem [shape: f32[1,8], index: 4, kind: input, shape index: {}]   ;;  %s769_s5 = inlined_call_operand.vmem [shape: f32[2,256,8], index: 5, kind: output, shape index: {}]  }
   0x1   :  { %s610_s20 = smov 0   ;;  %s612_s21 = smov 0  }
   0x2   :  { %s614_s22 = smov 0  }
   0x3 LB: > { %s24_s23 = sadd.s32 1, %s566_s20  ;;  %s27_s24 = sadd.s32 1, %s570_s21  ;;  %s574_s22 = sphi %s614_s22, %s15_s22   ;;  %s570_s21 = sphi %s612_s21, %s773_s21   ;;  %s566_s20 = sphi %s610_s20, %s772_s20   ;;  %s562_s19 = sphi %s608_s19, %s771_s19   ;;  %s558_s18 = sphi %s606_s18, %s770_s18  }
   0x4   : > { %p25_p0 = scmp.ge.s32.totalorder %s24_s23, 2  ;;  %p484_p1 = scmp.ge.s32.totalorder %s574_s22, 1 }
   0x5   : > { %p208_p2 = scmp.lt.s32.totalorder %s574_s22, 5 }
   0x6   : > { %s775_s23 = smov (%p25_p0, %s24_s23), 0  ;;  %s777_s24 = smov (!%p25_p0, %s27_s24), %s570_s21 }
   0x7   : > { %p209_p3 = pnand %p484_p1, %p208_p2  ;;  %p29_p4 = scmp.ge.s32.totalorder %s777_s24, 2 }
   0x8   : > { %s485_s29 = sshll.u32 (!%p209_p3), %s558_s18, 4  ;;  %p245_p5 = scmp.lt.s32.totalorder (!%p209_p3), %s562_s19, 1 }
   0x9   : > { %s779_s24 = smov (%p29_p4, %s777_s24), 0  ;;  %212 = sbr.rel (%p209_p3) target bundleno = 67 (0x43), region = 40 }
   0xa   : > { %p247_p6 = scmp.lt.s32.totalorder (!%p209_p3), %s485_s29, 31 }
   0xe   : > { %v280_v0 = vld [vmem:[%s765_s1] sm:$0x1]  ;;  %s781_s19 = smov (!%p245_p5, %s562_s19), 1  ;;  %s783_s29 = smov (!%p247_p6, %s485_s29), 31  ;;  %vm373_vm3 = vcmask 64512  }
   0xf   : > { %v282_v1 = vld [vmem:[%s766_s2] sm:$0x1]  ;;  %v281_v2 = vmul.f32 0.001953125, %v280_v0  ;;  %s486_s30 = sshll.u32 %s781_s19, 5 }
  0x10   : > { %v283_v3 = vmul.f32 0.001953125, %v282_v1  ;;  %s642_s6 = sadd.s32 %s486_s30, %s783_s29  ;;  %v297_v12 = vld [vmem:[%s767_s3] sm:$0x1] }
  0x11   : > { %v284_v4 = vmul.f32 %v281_v2, %v281_v2  ;;  %s487_s7 = sshll.u32 %s642_s6, 3  ;;  %v655_v13 = vperm.slane %v281_v2, 0  ;;  %v681_v39 = vld [vmem:[%s768_s4] ss:$0 sm:$0xff] }
  0x12   : > { %s650_s10 = scalar_lea.vmem %s764_s0, %s487_s7  ;;  %s700_s17 = scalar_lea.vmem %s769_s5, %s487_s7 }
  0x13   : > { %v285_v5 = vsub.f32 %v283_v3, %v284_v4  ;;  %v264_v14 = vld [vmem:[%s650_s10] sm:$0xff]  ;;  %v265_v15 = vld [vmem:[%s650_s10 + $0x8] sm:$0xff]  ;;  %v266_v17 = vld [vmem:[%s650_s10 + $0x10] sm:$0xff] }
  0x14   : > { %v267_v18 = vld [vmem:[%s650_s10 + $0x18] sm:$0xff]  ;;  %v268_v19 = vld [vmem:[%s650_s10 + $0x20] sm:$0xff]  ;;  %v269_v20 = vld [vmem:[%s650_s10 + $0x28] sm:$0xff]  ;;  %v302_v24 = vsub.f32 %v264_v14, %v655_v13  ;;  %v303_v28 = vsub.f32 %v265_v15, %v655_v13  ;;  %v304_v29 = vsub.f32 %v266_v17, %v655_v13 }
  0x15   : > { %v286_v6 = vadd.f32 1e-05, %v285_v5  ;;  %v270_v21 = vld [vmem:[%s650_s10 + $0x30] sm:$0xff]  ;;  %v271_v22 = vld [vmem:[%s650_s10 + $0x38] sm:$0xff]  ;;  %v272_v25 = vld [vmem:[%s650_s10 + $0x40] sm:$0xff]  ;;  %v305_v30 = vsub.f32 %v267_v18, %v655_v13  ;;  %v306_v34 = vsub.f32 %v268_v19, %v655_v13  ;;  %v307_v35 = vsub.f32 %v269_v20, %v655_v13 }
  0x16   : > { %v273_v26 = vld [vmem:[%s650_s10 + $0x48] sm:$0xff]  ;;  %v274_v31 = vld [vmem:[%s650_s10 + $0x50] sm:$0xff]  ;;  %v275_v32 = vld [vmem:[%s650_s10 + $0x58] sm:$0xff]  ;;  %v308_v36 = vsub.f32 %v270_v21, %v655_v13  ;;  %v309_v37 = vsub.f32 %v271_v22, %v655_v13  ;;  %v310_v40 = vsub.f32 %v272_v25, %v655_v13 }
  0x17   : > { %534 = vrsqrt.f32 %v286_v6  ;;  %vm293_vm0 = vweird.f32 %v286_v6  ;;  %v276_v33 = vld [vmem:[%s650_s10 + $0x60] sm:$0xff]  ;;  %v311_v41 = vsub.f32 %v273_v26, %v655_v13  ;;  %v312_v42 = vsub.f32 %v274_v31, %v655_v13  ;;  %v277_v49 = vld [vmem:[%s650_s10 + $0x68] sm:$0xff]  ;;  %v278_v54 = vld [vmem:[%s650_s10 + $0x70] sm:$0xff] }
  0x18   : > { %v313_v43 = vsub.f32 %v275_v32, %v655_v13  ;;  %v314_v44 = vsub.f32 %v276_v33, %v655_v13  ;;  %v279_v59 = vld [vmem:[%s650_s10 + $0x78] sm:$0xff]  ;;  %v315_v63 = vsub.f32 %v277_v49, %v655_v13  ;;  %v316_v3 = vsub.f32 %v278_v54, %v655_v13 }
  0x1d   : > { %v535_v7 = vpop.eup %534 }
  0x1e   : > { %v288_v8 = vmul.f32 %v535_v7, %v286_v6  ;;  %vm294_vm1 = vweird.f32 %v535_v7 }
  0x1f   : > { %vm295_vm2 = vmor %vm293_vm0, %vm294_vm1 }
  0x20   : > { %v289_v9 = vmul.f32 %v535_v7, %v288_v8 }
  0x22   : > { %v290_v10 = vmul.f32 0.5, %v289_v9 }
  0x24   : > { %v291_v11 = vsub.f32 1.5, %v290_v10 }
  0x26   : > { %v292_v16 = vmul.f32 %v535_v7, %v291_v11 }
  0x28   : > { %v296_v23 = vsel %vm295_vm2, %v535_v7, %v292_v16  ;;  %v317_v7 = vsub.f32 %v279_v59, %v655_v13 }
  0x29   : > { %v298_v27 = vmul.f32 %v297_v12, %v296_v23 }
  0x2b   : > { %v319_v38 = vperm.slane %v298_v27, 0 }
  0x2d   : > { %v321_v45 = vmul.f32 %v319_v38, %v302_v24  ;;  %v322_v46 = vmul.f32 %v319_v38, %v303_v28  ;;  %v323_v47 = vmul.f32 %v319_v38, %v304_v29  ;;  %v324_v48 = vmul.f32 %v319_v38, %v305_v30 }
  0x2e   : > { %v325_v50 = vmul.f32 %v319_v38, %v306_v34  ;;  %v326_v51 = vmul.f32 %v319_v38, %v307_v35  ;;  %v327_v52 = vmul.f32 %v319_v38, %v308_v36  ;;  %v328_v53 = vmul.f32 %v319_v38, %v309_v37 }
  0x2f   : > { %v341_v55 = vadd.f32 %v681_v39, %v321_v45  ;;  %v342_v56 = vadd.f32 %v681_v39, %v322_v46  ;;  %v343_v57 = vadd.f32 %v681_v39, %v323_v47  ;;  %v344_v58 = vadd.f32 %v681_v39, %v324_v48 }
  0x30   : > { %v345_v60 = vadd.f32 %v681_v39, %v325_v50  ;;  %v346_v61 = vadd.f32 %v681_v39, %v326_v51  ;;  %v347_v62 = vadd.f32 %v681_v39, %v327_v52  ;;  %v348_v6 = vadd.f32 %v681_v39, %v328_v53 }
  0x31   : > { %v357_v0 = vmax.f32 %v341_v55, 0.0  ;;  %v358_v1 = vmax.f32 %v342_v56, 0.0  ;;  %v359_v2 = vmax.f32 %v343_v57, 0.0  ;;  %v360_v4 = vmax.f32 %v344_v58, 0.0 }
  0x32   : > { %v361_v5 = vmax.f32 %v345_v60, 0.0  ;;  %v329_v8 = vmul.f32 %v319_v38, %v310_v40  ;;  %v330_v9 = vmul.f32 %v319_v38, %v311_v41  ;;  %v331_v10 = vmul.f32 %v319_v38, %v312_v42 }
  0x33   : > { %374 = vst.msk [vmem:[%s700_s17] sm:$0xff] %vm373_vm3, %v357_v0  ;;  %v332_v11 = vmul.f32 %v319_v38, %v313_v43  ;;  %v362_v12 = vmax.f32 %v346_v61, 0.0  ;;  %v363_v14 = vmax.f32 %v347_v62, 0.0  ;;  %v333_v15 = vmul.f32 %v319_v38, %v314_v44 }
  0x34   : > { %375 = vst.msk [vmem:[%s700_s17 + $0x8] sm:$0xff] %vm373_vm3, %v358_v1  ;;  %v334_v16 = vmul.f32 %v319_v38, %v315_v63  ;;  %v349_v13 = vadd.f32 %v681_v39, %v329_v8  ;;  %v350_v17 = vadd.f32 %v681_v39, %v330_v9  ;;  %v351_v18 = vadd.f32 %v681_v39, %v331_v10 }
  0x35   : > { %376 = vst.msk [vmem:[%s700_s17 + $0x10] sm:$0xff] %vm373_vm3, %v359_v2  ;;  %v335_v19 = vmul.f32 %v319_v38, %v316_v3  ;;  %v364_v20 = vmax.f32 %v348_v6, 0.0  ;;  %v352_v21 = vadd.f32 %v681_v39, %v332_v11  ;;  %v336_v22 = vmul.f32 %v319_v38, %v317_v7 }
  0x36   : > { %377 = vst.msk [vmem:[%s700_s17 + $0x18] sm:$0xff] %vm373_vm3, %v360_v4  ;;  %v365_v23 = vmax.f32 %v349_v13, 0.0  ;;  %v353_v24 = vadd.f32 %v681_v39, %v333_v15  ;;  %v366_v25 = vmax.f32 %v350_v17, 0.0  ;;  %v354_v26 = vadd.f32 %v681_v39, %v334_v16 }
  0x37   : > { %378 = vst.msk [vmem:[%s700_s17 + $0x20] sm:$0xff] %vm373_vm3, %v361_v5  ;;  %v367_v27 = vmax.f32 %v351_v18, 0.0  ;;  %v355_v28 = vadd.f32 %v681_v39, %v335_v19  ;;  %v368_v29 = vmax.f32 %v352_v21, 0.0  ;;  %v356_v30 = vadd.f32 %v681_v39, %v336_v22 }
  0x38   : > { %379 = vst.msk [vmem:[%s700_s17 + $0x28] sm:$0xff] %vm373_vm3, %v362_v12  ;;  %v369_v31 = vmax.f32 %v353_v24, 0.0  ;;  %v370_v32 = vmax.f32 %v354_v26, 0.0 }
  0x39   : > { %380 = vst.msk [vmem:[%s700_s17 + $0x30] sm:$0xff] %vm373_vm3, %v363_v14  ;;  %v371_v33 = vmax.f32 %v355_v28, 0.0  ;;  %v372_v34 = vmax.f32 %v356_v30, 0.0 }
  0x3a   : > { %381 = vst.msk [vmem:[%s700_s17 + $0x38] sm:$0xff] %vm373_vm3, %v364_v20 }
  0x3b   : > { %382 = vst.msk [vmem:[%s700_s17 + $0x40] sm:$0xff] %vm373_vm3, %v365_v23 }
  0x3c   : > { %383 = vst.msk [vmem:[%s700_s17 + $0x48] sm:$0xff] %vm373_vm3, %v366_v25 }
  0x3d   : > { %384 = vst.msk [vmem:[%s700_s17 + $0x50] sm:$0xff] %vm373_vm3, %v367_v27 }
  0x3e   : > { %385 = vst.msk [vmem:[%s700_s17 + $0x58] sm:$0xff] %vm373_vm3, %v368_v29 }
  0x3f   : > { %386 = vst.msk [vmem:[%s700_s17 + $0x60] sm:$0xff] %vm373_vm3, %v369_v31 }
  0x40   : > { %387 = vst.msk [vmem:[%s700_s17 + $0x68] sm:$0xff] %vm373_vm3, %v370_v32 }
  0x41   : > { %388 = vst.msk [vmem:[%s700_s17 + $0x70] sm:$0xff] %vm373_vm3, %v371_v33 }
  0x42   : > { %389 = vst.msk [vmem:[%s700_s17 + $0x78] sm:$0xff] %vm373_vm3, %v372_v34 }
  0x43 PF: > { %s15_s22 = sadd.s32 1, %s574_s22   ;;  %s770_s18 = smov %s566_s20 }
  0x44   : > { %p12_p7 = scmp.ge.s32.totalorder %s15_s22, 6   ;;  %s771_s19 = smov %s570_s21 }
  0x45   : > { %s772_s20 = smov %s775_s23  ;;  %s773_s21 = smov %s779_s24 }
  0x46   :  { %14 = sbr.rel (!%p12_p7) target bundleno = 3 (0x3), region = 70 }

// kernel: upsample_forward.16
= control target key start
LH: loop header
LB: loop body
LE: loop exit
PB: predicated region body
PF: predicated region fallthrough
CT: control target
= control target key end

     0   :  { %s727_s21 = smov 0   ;;  %s729_s22 = smov 0   ;;  %s952_s0 = inlined_call_operand.vmem [shape: f32[2,256,8], index: 0, kind: input, shape index: {}]   ;;  %s953_s1 = inlined_call_operand.vmem [shape: f32[2,256,8], index: 1, kind: input, shape index: {}]   ;;  %s954_s2 = inlined_call_operand.vmem [shape: f32[1,1,8], index: 2, kind: input, shape index: {}]   ;;  %s955_s3 = inlined_call_operand.vmem [shape: f32[1,1,8], index: 3, kind: input, shape index: {}]   ;;  %s956_s4 = inlined_call_operand.vmem [shape: f32[1,8], index: 4, kind: input, shape index: {}]   ;;  %s957_s5 = inlined_call_operand.vmem [shape: f32[1,8], index: 5, kind: input, shape index: {}]   ;;  %s958_s6 = inlined_call_operand.vmem [shape: f32[2,256,8], index: 6, kind: output, shape index: {}]  }
   0x1   :  { %s731_s23 = smov 0   ;;  %s733_s24 = smov 0  }
   0x2   :  { %s735_s25 = smov 0  }
   0x3 LB: > { %s25_s26 = sadd.s32 1, %s682_s23  ;;  %s28_s27 = sadd.s32 1, %s686_s24  ;;  %s690_s25 = sphi %s735_s25, %s16_s25   ;;  %s686_s24 = sphi %s733_s24, %s964_s24   ;;  %s682_s23 = sphi %s731_s23, %s963_s23   ;;  %s678_s22 = sphi %s729_s22, %s962_s22   ;;  %s674_s21 = sphi %s727_s21, %s961_s21  }
   0x4   : > { %p26_p0 = scmp.ge.s32.totalorder %s25_s26, 2  ;;  %p597_p1 = scmp.ge.s32.totalorder %s690_s25, 1 }
   0x5   : > { %p250_p2 = scmp.lt.s32.totalorder %s690_s25, 5 }
   0x6   : > { %s966_s26 = smov (%p26_p0, %s25_s26), 0  ;;  %s968_s27 = smov (!%p26_p0, %s28_s27), %s686_s24 }
   0x7   : > { %p251_p3 = pnand %p597_p1, %p250_p2  ;;  %p30_p4 = scmp.ge.s32.totalorder %s968_s27, 2 }
   0x8   : > { %s598_s8 = sshll.u32 (!%p251_p3), %s674_s21, 4  ;;  %p298_p5 = scmp.lt.s32.totalorder (!%p251_p3), %s678_s22, 1 }
   0x9   : > { %s970_s27 = smov (%p30_p4, %s968_s27), 0  ;;  %254 = sbr.rel (%p251_p3) target bundleno = 69 (0x45), region = 44 }
   0xa   : > { %p300_p6 = scmp.lt.s32.totalorder (!%p251_p3), %s598_s8, 31 }
   0xe   : > { %v343_v0 = vld [vmem:[%s954_s2] sm:$0x1]  ;;  %s972_s22 = smov (!%p298_p5, %s678_s22), 1  ;;  %s974_s8 = smov (!%p300_p6, %s598_s8), 31  ;;  %vm468_vm3 = vcmask 64512  }
   0xf   : > { %v345_v1 = vld [vmem:[%s955_s3] sm:$0x1]  ;;  %v344_v2 = vmul.f32 0.001953125, %v343_v0  ;;  %s599_s9 = sshll.u32 %s972_s22, 5 }
  0x10   : > { %v346_v3 = vmul.f32 0.001953125, %v345_v1  ;;  %s303_s10 = sadd.s32 %s599_s9, %s974_s8  ;;  %v360_v13 = vld [vmem:[%s956_s4] sm:$0x1] }
  0x11   : > { %v347_v4 = vmul.f32 %v344_v2, %v344_v2  ;;  %s763_s11 = sshll.u32 %s303_s10, 3  ;;  %v775_v14 = vperm.slane %v344_v2, 0  ;;  %v835_v44 = vld [vmem:[%s957_s5] ss:$0 sm:$0xff] }
  0x12   : > { %s769_s14 = scalar_lea.vmem %s952_s0, %s763_s11  ;;  %s823_s19 = scalar_lea.vmem %s953_s1, %s763_s11 }
  0x13   : > { %v348_v5 = vsub.f32 %v346_v3, %v347_v4  ;;  %v327_v11 = vld [vmem:[%s769_s14] sm:$0xff]  ;;  %v328_v15 = vld [vmem:[%s769_s14 + $0x8] sm:$0xff]  ;;  %v329_v17 = vld [vmem:[%s769_s14 + $0x10] sm:$0xff]  ;;  %s879_s29 = scalar_lea.vmem %s958_s6, %s763_s11 }
  0x14   : > { %v330_v18 = vld [vmem:[%s769_s14 + $0x18] sm:$0xff]  ;;  %v331_v20 = vld [vmem:[%s769_s14 + $0x20] sm:$0xff]  ;;  %v332_v21 = vld [vmem:[%s769_s14 + $0x28] sm:$0xff]  ;;  %v365_v27 = vsub.f32 %v327_v11, %v775_v14  ;;  %v366_v28 = vsub.f32 %v328_v15, %v775_v14  ;;  %v367_v33 = vsub.f32 %v329_v17, %v775_v14 }
  0x15   : > { %v349_v6 = vadd.f32 1e-05, %v348_v5  ;;  %v333_v22 = vld [vmem:[%s769_s14 + $0x30] sm:$0xff]  ;;  %v334_v23 = vld [vmem:[%s769_s14 + $0x38] sm:$0xff]  ;;  %v789_v24 = vld [vmem:[%s769_s14 + $0x40] sm:$0xff]  ;;  %v368_v34 = vsub.f32 %v330_v18, %v775_v14  ;;  %v369_v35 = vsub.f32 %v331_v20, %v775_v14  ;;  %v370_v39 = vsub.f32 %v332_v21, %v775_v14 }
  0x16   : > { %v792_v25 = vld [vmem:[%s769_s14 + $0x48] sm:$0xff]  ;;  %v799_v29 = vld [vmem:[%s769_s14 + $0x50] sm:$0xff]  ;;  %v802_v30 = vld [vmem:[%s769_s14 + $0x58] sm:$0xff]  ;;  %v371_v40 = vsub.f32 %v333_v22, %v775_v14  ;;  %v372_v41 = vsub.f32 %v334_v23, %v775_v14  ;;  %v373_v42 = vsub.f32 %v789_v24, %v775_v14 }
  0x17   : > { %650 = vrsqrt.f32 %v349_v6  ;;  %vm356_vm0 = vweird.f32 %v349_v6  ;;  %v805_v31 = vld [vmem:[%s769_s14 + $0x60] sm:$0xff]  ;;  %v811_v36 = vld [vmem:[%s769_s14 + $0x68] sm:$0xff]  ;;  %v814_v37 = vld [vmem:[%s769_s14 + $0x70] sm:$0xff]  ;;  %v374_v45 = vsub.f32 %v792_v25, %v775_v14  ;;  %v375_v46 = vsub.f32 %v799_v29, %v775_v14 }
  0x18   : > { %v817_v38 = vld [vmem:[%s769_s14 + $0x78] sm:$0xff]  ;;  %v376_v47 = vsub.f32 %v802_v30, %v775_v14  ;;  %v377_v48 = vsub.f32 %v805_v31, %v775_v14  ;;  %v378_v49 = vsub.f32 %v811_v36, %v775_v14  ;;  %v379_v50 = vsub.f32 %v814_v37, %v775_v14  ;;  %v420_v53 = vld [vmem:[%s823_s19] sm:$0xff]  ;;  %v421_v55 = vld [vmem:[%s823_s19 + $0x8] sm:$0xff] }
  0x19   : > { %v380_v51 = vsub.f32 %v817_v38, %v775_v14  ;;  %v422_v58 = vld [vmem:[%s823_s19 + $0x10] sm:$0xff]  ;;  %v423_v59 = vld [vmem:[%s823_s19 + $0x18] sm:$0xff]  ;;  %v424_v61 = vld [vmem:[%s823_s19 + $0x20] sm:$0xff] }
  0x1a   : > { %v425_v5 = vld [vmem:[%s823_s19 + $0x28] sm:$0xff]  ;;  %v428_v29 = vld [vmem:[%s823_s19 + $0x40] sm:$0xff] }
  0x1d   : > { %v651_v7 = vpop.eup %650 }
  0x1e   : > { %v351_v8 = vmul.f32 %v651_v7, %v349_v6  ;;  %vm357_vm1 = vweird.f32 %v651_v7  ;;  %v426_v6 = vld [vmem:[%s823_s19 + $0x30] sm:$0xff] }
  0x1f   : > { %vm778_vm2 = vmor %vm356_vm0, %vm357_vm1 }
  0x20   : > { %v352_v9 = vmul.f32 %v651_v7, %v351_v8 }
  0x22   : > { %v353_v10 = vmul.f32 0.5, %v352_v9 }
  0x24   : > { %v354_v12 = vsub.f32 1.5, %v353_v10 }
  0x26   : > { %v355_v19 = vmul.f32 %v651_v7, %v354_v12 }
  0x28   : > { %v359_v26 = vsel %vm778_vm2, %v651_v7, %v355_v19  ;;  %v427_v7 = vld [vmem:[%s823_s19 + $0x38] sm:$0xff] }
  0x29   : > { %v361_v32 = vmul.f32 %v360_v13, %v359_v26 }
  0x2b   : > { %v830_v43 = vperm.slane %v361_v32, 0 }
  0x2d   : > { %v384_v52 = vmul.f32 %v830_v43, %v365_v27  ;;  %v385_v54 = vmul.f32 %v830_v43, %v366_v28  ;;  %v386_v56 = vmul.f32 %v830_v43, %v367_v33  ;;  %v387_v57 = vmul.f32 %v830_v43, %v368_v34  ;;  %v429_v33 = vld [vmem:[%s823_s19 + $0x48] sm:$0xff]  ;;  %v430_v34 = vld [vmem:[%s823_s19 + $0x50] sm:$0xff] }
  0x2e   : > { %v388_v60 = vmul.f32 %v830_v43, %v369_v35  ;;  %v389_v62 = vmul.f32 %v830_v43, %v370_v39  ;;  %v390_v63 = vmul.f32 %v830_v43, %v371_v40  ;;  %v391_v0 = vmul.f32 %v830_v43, %v372_v41  ;;  %v431_v35 = vld [vmem:[%s823_s19 + $0x58] sm:$0xff] }
  0x2f   : > { %v404_v1 = vadd.f32 %v835_v44, %v384_v52  ;;  %v405_v2 = vadd.f32 %v835_v44, %v385_v54  ;;  %v406_v3 = vadd.f32 %v835_v44, %v386_v56  ;;  %v407_v4 = vadd.f32 %v835_v44, %v387_v57  ;;  %v435_v56 = vld [vmem:[%s823_s19 + $0x78] sm:$0xff] }
  0x30   : > { %v408_v8 = vadd.f32 %v835_v44, %v388_v60  ;;  %v409_v9 = vadd.f32 %v835_v44, %v389_v62  ;;  %v410_v10 = vadd.f32 %v835_v44, %v390_v63  ;;  %v411_v11 = vadd.f32 %v835_v44, %v391_v0 }
  0x31   : > { %v436_v12 = vadd.f32 %v420_v53, %v404_v1  ;;  %v437_v13 = vadd.f32 %v421_v55, %v405_v2  ;;  %v438_v14 = vadd.f32 %v422_v58, %v406_v3  ;;  %v439_v15 = vadd.f32 %v423_v59, %v407_v4 }
  0x32   : > { %v440_v16 = vadd.f32 %v424_v61, %v408_v8  ;;  %v441_v17 = vadd.f32 %v425_v5, %v409_v9  ;;  %v442_v18 = vadd.f32 %v426_v6, %v410_v10  ;;  %v443_v19 = vadd.f32 %v427_v7, %v411_v11 }
  0x33   : > { %v452_v20 = vmax.f32 %v436_v12, 0.0  ;;  %v453_v21 = vmax.f32 %v437_v13, 0.0  ;;  %v454_v22 = vmax.f32 %v438_v14, 0.0  ;;  %v455_v23 = vmax.f32 %v439_v15, 0.0 }
  0x34   : > { %v456_v24 = vmax.f32 %v440_v16, 0.0  ;;  %v457_v25 = vmax.f32 %v441_v17, 0.0  ;;  %v458_v26 = vmax.f32 %v442_v18, 0.0  ;;  %v459_v27 = vmax.f32 %v443_v19, 0.0 }
  0x35   : > { %469 = vst.msk [vmem:[%s879_s29] sm:$0xff] %vm468_vm3, %v452_v20  ;;  %v392_v28 = vmul.f32 %v830_v43, %v373_v42  ;;  %v393_v30 = vmul.f32 %v830_v43, %v374_v45  ;;  %v394_v31 = vmul.f32 %v830_v43, %v375_v46  ;;  %v395_v32 = vmul.f32 %v830_v43, %v376_v47  ;;  %v432_v46 = vld [vmem:[%s823_s19 + $0x60] sm:$0xff]  ;;  %v433_v47 = vld [vmem:[%s823_s19 + $0x68] sm:$0xff] }
  0x36   : > { %470 = vst.msk [vmem:[%s879_s29 + $0x8] sm:$0xff] %vm468_vm3, %v453_v21  ;;  %v396_v36 = vmul.f32 %v830_v43, %v377_v48  ;;  %v397_v37 = vmul.f32 %v830_v43, %v378_v49  ;;  %v398_v38 = vmul.f32 %v830_v43, %v379_v50  ;;  %v399_v39 = vmul.f32 %v830_v43, %v380_v51  ;;  %v434_v50 = vld [vmem:[%s823_s19 + $0x70] sm:$0xff] }
  0x37   : > { %471 = vst.msk [vmem:[%s879_s29 + $0x10] sm:$0xff] %vm468_vm3, %v454_v22  ;;  %v412_v40 = vadd.f32 %v835_v44, %v392_v28  ;;  %v413_v41 = vadd.f32 %v835_v44, %v393_v30  ;;  %v414_v42 = vadd.f32 %v835_v44, %v394_v31  ;;  %v415_v45 = vadd.f32 %v835_v44, %v395_v32 }
  0x38   : > { %472 = vst.msk [vmem:[%s879_s29 + $0x18] sm:$0xff] %vm468_vm3, %v455_v23  ;;  %v416_v48 = vadd.f32 %v835_v44, %v396_v36  ;;  %v417_v43 = vadd.f32 %v835_v44, %v397_v37  ;;  %v418_v49 = vadd.f32 %v835_v44, %v398_v38  ;;  %v419_v51 = vadd.f32 %v835_v44, %v399_v39 }
  0x39   : > { %473 = vst.msk [vmem:[%s879_s29 + $0x20] sm:$0xff] %vm468_vm3, %v456_v24  ;;  %v444_v52 = vadd.f32 %v428_v29, %v412_v40  ;;  %v445_v53 = vadd.f32 %v429_v33, %v413_v41  ;;  %v446_v54 = vadd.f32 %v430_v34, %v414_v42  ;;  %v447_v55 = vadd.f32 %v431_v35, %v415_v45 }
  0x3a   : > { %474 = vst.msk [vmem:[%s879_s29 + $0x28] sm:$0xff] %vm468_vm3, %v457_v25  ;;  %v448_v57 = vadd.f32 %v432_v46, %v416_v48  ;;  %v449_v58 = vadd.f32 %v433_v47, %v417_v43  ;;  %v450_v61 = vadd.f32 %v434_v50, %v418_v49  ;;  %v451_v63 = vadd.f32 %v435_v56, %v419_v51 }
  0x3b   : > { %475 = vst.msk [vmem:[%s879_s29 + $0x30] sm:$0xff] %vm468_vm3, %v458_v26  ;;  %v460_v59 = vmax.f32 %v444_v52, 0.0  ;;  %v461_v44 = vmax.f32 %v445_v53, 0.0  ;;  %v462_v60 = vmax.f32 %v446_v54, 0.0  ;;  %v463_v62 = vmax.f32 %v447_v55, 0.0 }
  0x3c   : > { %476 = vst.msk [vmem:[%s879_s29 + $0x38] sm:$0xff] %vm468_vm3, %v459_v27  ;;  %v464_v0 = vmax.f32 %v448_v57, 0.0  ;;  %v465_v1 = vmax.f32 %v449_v58, 0.0  ;;  %v466_v2 = vmax.f32 %v450_v61, 0.0  ;;  %v467_v3 = vmax.f32 %v451_v63, 0.0 }
  0x3d   : > { %477 = vst.msk [vmem:[%s879_s29 + $0x40] sm:$0xff] %vm468_vm3, %v460_v59 }
  0x3e   : > { %478 = vst.msk [vmem:[%s879_s29 + $0x48] sm:$0xff] %vm468_vm3, %v461_v44 }
  0x3f   : > { %479 = vst.msk [vmem:[%s879_s29 + $0x50] sm:$0xff] %vm468_vm3, %v462_v60 }
  0x40   : > { %480 = vst.msk [vmem:[%s879_s29 + $0x58] sm:$0xff] %vm468_vm3, %v463_v62 }
  0x41   : > { %481 = vst.msk [vmem:[%s879_s29 + $0x60] sm:$0xff] %vm468_vm3, %v464_v0 }
  0x42   : > { %482 = vst.msk [vmem:[%s879_s29 + $0x68] sm:$0xff] %vm468_vm3, %v465_v1 }
  0x43   : > { %483 = vst.msk [vmem:[%s879_s29 + $0x70] sm:$0xff] %vm468_vm3, %v466_v2 }
  0x44   : > { %484 = vst.msk [vmem:[%s879_s29 + $0x78] sm:$0xff] %vm468_vm3, %v467_v3 }
  0x45 PF: > { %s16_s25 = sadd.s32 1, %s690_s25   ;;  %s961_s21 = smov %s682_s23 }
  0x46   : > { %p13_p7 = scmp.ge.s32.totalorder %s16_s25, 6   ;;  %s962_s22 = smov %s686_s24 }
  0x47   : > { %s963_s23 = smov %s966_s26  ;;  %s964_s24 = smov %s970_s27 }
  0x48   :  { %15 = sbr.rel (!%p13_p7) target bundleno = 3 (0x3), region = 77 }

// kernel: upsample_forward.13
= control target key start
LH: loop header
LB: loop body
LE: loop exit
PB: predicated region body
PF: predicated region fallthrough
CT: control target
= control target key end

     0   :  { %s2232_s18 = smov 0   ;;  %s2234_s19 = smov 0   ;;  %s3014_s0 = inlined_call_operand.vmem [shape: f32[2,18,18,8], index: 0, kind: input, shape index: {}]   ;;  %s3015_s1 = inlined_call_operand.vmem [shape: f32[9,8,8], index: 1, kind: input, shape index: {}]   ;;  %s3016_s2 = inlined_call_operand.vmem [shape: f32[1,8], index: 2, kind: input, shape index: {}]   ;;  %s3017_s3 = inlined_call_operand.vmem [shape: f32[2,256,8], index: 3, kind: output, shape index: {0}]   ;;  %s3018_s4 = inlined_call_operand.vmem [shape: f32[2,1,8], index: 4, kind: output, shape index: {1}]   ;;  %s3019_s5 = inlined_call_operand.vmem [shape: f32[2,1,8], index: 5, kind: output, shape index: {2}]  }
   0x1   :  { %s2236_s20 = smov 0   ;;  %s2238_s21 = smov 0  }
   0x2   :  { %s2240_s22 = smov 0  }
   0x3 LB: > { %s25_s23 = sadd.s32 1, %s2191_s20  ;;  %s28_s24 = sadd.s32 1, %s2195_s21  ;;  %s2199_s22 = sphi %s2240_s22, %s16_s22   ;;  %s2195_s21 = sphi %s2238_s21, %s3032_s21   ;;  %s2191_s20 = sphi %s2236_s20, %s3031_s20   ;;  %s2187_s19 = sphi %s2234_s19, %s3030_s19   ;;  %s2183_s18 = sphi %s2232_s18, %s3029_s18  }
   0x4   : > { %p26_p0 = scmp.ge.s32.totalorder %s25_s23, 2  ;;  %p1853_p1 = scmp.ge.s32.totalorder %s2199_s22, 1 }
   0x5   : > { %p206_p2 = scmp.lt.s32.totalorder %s2199_s22, 5 }
   0x6   : > { %s3034_s23 = smov (%p26_p0, %s25_s23), 0  ;;  %s3036_s24 = smov (!%p26_p0, %s28_s24), %s2195_s21 }
   0x7   : > { %p207_p3 = pnand %p1853_p1, %p206_p2  ;;  %p30_p4 = scmp.ge.s32.totalorder %s3036_s24, 2 }
   0x9   : > { %s3038_s24 = smov (%p30_p4, %s3036_s24), 0  ;;  %210 = sbr.rel (%p207_p3) target bundleno = 495 (0x1ef), region = 32 }
   0xe   : > { %v1860_v0 = vld [vmem:[%s3015_s1 + $0x8] sm:$0xff]  ;;  %p244_p5 = scmp.lt.s32.totalorder %s2187_s19, 1  ;;  %v1893_v1 = vld [vmem:[%s3015_s1 + $0x10] sm:$0xff]  ;;  %v1928_v2 = vld [vmem:[%s3015_s1 + $0x18] sm:$0xff]  ;;  %s1859_s10 = smul.u32 192, %s2183_s18  ;;  %vm303_vm0 = vcmask 64512  }
   0xf   : > { %2115 = vmatpush.msra.mxu1 %v1860_v0  ;;  %2116 = vmatpush.msra.mxu2 %v1860_v0  ;;  %v284_v3 = vld [vmem:[%s3015_s1] sm:$0xff]  ;;  %v2029_v9 = vld [vmem:[%s3015_s1 + $0x30] sm:$0xff]  ;;  %v2062_v12 = vld [vmem:[%s3015_s1 + $0x38] sm:$0xff]  ;;  %s1855_s12 = sshll.u32 %s2183_s18, 4  ;;  %p2112_p7 = scmp.ne.s32.totalorder %s2183_s18, 0 }
  0x10   : > { %s3040_s19 = smov (!%p244_p5, %s2187_s19), 1  ;;  %2117 = vmatpush.msra.mxu3 %v1860_v0  ;;  %v1961_v4 = vld [vmem:[%s3015_s1 + $0x20] sm:$0xff]  ;;  %367 = vmatpush.msra.mxu0 %v1860_v0  ;;  %v1994_v15 = vld [vmem:[%s3015_s1 + $0x28] sm:$0xff]  ;;  %p252_p6 = scmp.lt.s32.totalorder %s1855_s12, 31 }
  0x11   : > { %611 = vmatpush.msrb.mxu2 %v1893_v1  ;;  %480 = vmatpush.msrb.mxu1 %v284_v3  ;;  %s2118_s11 = smul.u32 432, %s3040_s19  ;;  %s2287_s14 = scalar_lea.vmem %s3018_s4, %s3040_s19  ;;  %v2095_v16 = vld [vmem:[%s3015_s1 + $0x40] sm:$0xff] }
  0x12   : > { %761 = vmatpush.msrb.mxu3 %v1928_v2  ;;  %s2293_s17 = scalar_lea.vmem %s3019_s5, %s3040_s19  ;;  %908 = vmatpush.msrb.mxu0 %v1961_v4  ;;  %s3042_s12 = smov (!%p252_p6, %s1855_s12), 31 }
  0x13   : > { %s248_s27 = scalar_lea.vmem %s3014_s0, %s2118_s11  ;;  %s1856_s13 = sshll.u32 %s3040_s19, 5 }
  0x14   : > { %s2298_s28 = scalar_lea.vmem %s248_s27, %s1859_s10  ;;  %s255_s15 = sadd.s32 %s1856_s13, %s3042_s12 }
  0x15   : > { %v2301_v5 = vld [vmem:[%s2298_s28 + $0x31] sm:$0xff]  ;;  %v2304_v6 = vld [vmem:[%s2298_s28 + $0x61] sm:$0xff]  ;;  %v2321_v10 = vld [vmem:[%s2298_s28 + $0x39] sm:$0xff]  ;;  %s1857_s16 = sshll.u32 %s255_s15, 3 }
  0x16   : > { %v2307_v7 = vld [vmem:[%s2298_s28 + $0x91] sm:$0xff]  ;;  %1865 = vmatmul.msk.f32.vlgmr.msra.gmra.mxu1 %vm303_vm0, %v2301_v5  ;;  %1869 = vmatmul.msk.f32.vlgmr.msra.gmra.mxu2 %vm303_vm0, %v2304_v6  ;;  %v285_v8 = vld [vmem:[%s2298_s28 + $0x1] sm:$0xff]  ;;  %v2324_v11 = vld [vmem:[%s2298_s28 + $0x69] sm:$0xff]  ;;  %s2799_s19 = scalar_lea.vmem %s3017_s3, %s1857_s16 }
  0x17   : > { %1873 = vmatmul.msk.f32.vlgmr.msra.gmra.mxu3 %vm303_vm0, %v2307_v7  ;;  %1861 = vmatmul.msk.f32.vlgmr.msra.gmra.mxu0 %vm303_vm0, %v285_v8  ;;  %v2330_v13 = vld [vmem:[%s2298_s28 + $0x99] sm:$0xff]  ;;  %v286_v14 = vld [vmem:[%s2298_s28 + $0x9] sm:$0xff]  ;;  %v2364_v21 = vld [vmem:[%s2298_s28 + $0x51] sm:$0xff] }
  0x18   : > { %1205 = vmatpush.msra.mxu2 %v2029_v9  ;;  %1352 = vmatpush.msra.mxu3 %v2062_v12  ;;  %v2347_v17 = vld [vmem:[%s2298_s28 + $0x49] sm:$0xff]  ;;  %v2350_v18 = vld [vmem:[%s2298_s28 + $0x79] sm:$0xff]  ;;  %v2367_v22 = vld [vmem:[%s2298_s28 + $0x81] sm:$0xff] }
  0x19   : > { %1055 = vmatpush.msra.mxu1 %v1994_v15  ;;  %1499 = vmatpush.msra.mxu0 %v2095_v16  ;;  %v2353_v19 = vld [vmem:[%s2298_s28 + $0xa9] sm:$0xff]  ;;  %v287_v20 = vld [vmem:[%s2298_s28 + $0x19] sm:$0xff]  ;;  %v2370_v23 = vld [vmem:[%s2298_s28 + $0xb1] sm:$0xff] }
  0x1a   : > { %v288_v24 = vld [vmem:[%s2298_s28 + $0x21] sm:$0xff]  ;;  %v1912_v27 = vld [vmem:[%s2298_s28 + $0x18] sm:$0xff]  ;;  %v531_v29 = vld [vmem:[%s2298_s28 + $0xa] sm:$0xff] }
  0x1b   : > { %v268_v25 = vld [vmem:[%s2298_s28] sm:$0xff]  ;;  %v269_v28 = vld [vmem:[%s2298_s28 + $0x8] sm:$0xff]  ;;  %v2398_v32 = vld [vmem:[%s2298_s28 + $0x30] sm:$0xff] }
  0x1c   : > { %v530_v26 = vld [vmem:[%s2298_s28 + $0x2] sm:$0xff]  ;;  %v2395_v31 = vld [vmem:[%s2298_s28 + $0x1a] sm:$0xff]  ;;  %v2421_v35 = vld [vmem:[%s2298_s28 + $0x32] sm:$0xff] }
  0x1d   : > { %v1913_v30 = vld [vmem:[%s2298_s28 + $0x20] sm:$0xff]  ;;  %v2411_v34 = vld [vmem:[%s2298_s28 + $0x38] sm:$0xff]  ;;  %v2424_v36 = vld [vmem:[%s2298_s28 + $0x48] sm:$0xff] }
  0x1e   : > { %1866 = vmatmul.msk.f32.gmra.mxu1 %vm303_vm0, %v2321_v10  ;;  %1870 = vmatmul.msk.f32.gmra.mxu2 %vm303_vm0, %v2324_v11  ;;  %v2408_v33 = vld [vmem:[%s2298_s28 + $0x22] sm:$0xff]  ;;  %v2435_v37 = vld [vmem:[%s2298_s28 + $0x3a] sm:$0xff]  ;;  %v2438_v38 = vld [vmem:[%s2298_s28 + $0x50] sm:$0xff] }
  0x1f   : > { %1874 = vmatmul.msk.f32.gmra.mxu3 %vm303_vm0, %v2330_v13  ;;  %1862 = vmatmul.msk.f32.gmra.mxu0 %vm303_vm0, %v286_v14  ;;  %v2449_v39 = vld [vmem:[%s2298_s28 + $0x4a] sm:$0xff]  ;;  %v2452_v40 = vld [vmem:[%s2298_s28 + $0x60] sm:$0xff]  ;;  %v2463_v41 = vld [vmem:[%s2298_s28 + $0x52] sm:$0xff] }
  0x20   : > { %v2466_v42 = vld [vmem:[%s2298_s28 + $0x68] sm:$0xff]  ;;  %v2480_v44 = vld [vmem:[%s2298_s28 + $0x78] sm:$0xff]  ;;  %v2494_v46 = vld [vmem:[%s2298_s28 + $0x80] sm:$0xff] }
  0x21   : > { %v2477_v43 = vld [vmem:[%s2298_s28 + $0x62] sm:$0xff]  ;;  %v2491_v45 = vld [vmem:[%s2298_s28 + $0x6a] sm:$0xff]  ;;  %v2505_v47 = vld [vmem:[%s2298_s28 + $0x7a] sm:$0xff] }
  0x22   : > { %v2508_v48 = vld [vmem:[%s2298_s28 + $0x90] sm:$0xff]  ;;  %v2519_v49 = vld [vmem:[%s2298_s28 + $0x82] sm:$0xff]  ;;  %v2522_v50 = vld [vmem:[%s2298_s28 + $0x98] sm:$0xff] }
  0x23   : > { %v2535_v52 = vld [vmem:[%s2298_s28 + $0x92] sm:$0xff]  ;;  %v2538_v53 = vld [vmem:[%s2298_s28 + $0xa8] sm:$0xff]  ;;  %v2555_v58 = vld [vmem:[%s2298_s28 + $0x9a] sm:$0xff] }
  0x24   : > { %v2558_v59 = vld [vmem:[%s2298_s28 + $0xb0] sm:$0xff]  ;;  %v2578_v1 = vld [vmem:[%s2298_s28 + $0xc0] sm:$0xff]  ;;  %v2601_v14 = vld [vmem:[%s2298_s28 + $0xc8] sm:$0xff] }
  0x25   : > { %v2575_v0 = vld [vmem:[%s2298_s28 + $0xaa] sm:$0xff]  ;;  %v2581_v3 = vld [vmem:[%s2298_s28 + $0xc1] sm:$0xff]  ;;  %v2598_v12 = vld [vmem:[%s2298_s28 + $0xb2] sm:$0xff] }
  0x26   : > { %1867 = vmatmul.msk.f32.gmra.mxu1 %vm303_vm0, %v2347_v17  ;;  %1871 = vmatmul.msk.f32.gmra.mxu2 %vm303_vm0, %v2350_v18  ;;  %v2604_v16 = vld [vmem:[%s2298_s28 + $0xc9] sm:$0xff] }
  0x27   : > { %1875 = vmatmul.msk.f32.gmra.mxu3 %vm303_vm0, %v2353_v19  ;;  %1863 = vmatmul.msk.f32.gmra.mxu0 %vm303_vm0, %v287_v20  ;;  %3023 = vst [vmem:[#allocation4_spill] sm:$0xff] %v2604_v16 }
  0x2e   : > { %1868 = vmatmul.msk.f32.gmra.mxu1 %vm303_vm0, %v2364_v21  ;;  %1872 = vmatmul.msk.f32.gmra.mxu2 %vm303_vm0, %v2367_v22 }
  0x2f   : > { %1876 = vmatmul.msk.f32.gmra.mxu3 %vm303_vm0, %v2370_v23  ;;  %1864 = vmatmul.msk.f32.gmra.mxu0 %vm303_vm0, %v288_v24 }
  0x36   : > { %1877 = vmatmul.msk.f32.vlgmr.msrb.gmra.mxu1 %vm303_vm0, %v268_v25  ;;  %1894 = vmatmul.msk.f32.vlgmr.msrb.gmra.mxu2 %vm303_vm0, %v530_v26 }
  0x37   : > { %1929 = vmatmul.msk.f32.vlgmr.msrb.gmra.mxu3 %vm303_vm0, %v1912_v27  ;;  %1962 = vmatmul.msk.f32.vlgmr.msrb.gmra.mxu0 %vm303_vm0, %v287_v20 }
  0x3e   : > { %1878 = vmatmul.msk.f32.gmra.mxu1 %vm303_vm0, %v269_v28  ;;  %1895 = vmatmul.msk.f32.gmra.mxu2 %vm303_vm0, %v531_v29 }
  0x3f   : > { %1930 = vmatmul.msk.f32.gmra.mxu3 %vm303_vm0, %v1913_v30  ;;  %1963 = vmatmul.msk.f32.gmra.mxu0 %vm303_vm0, %v288_v24 }
  0x46   : > { %1879 = vmatmul.msk.f32.gmra.mxu1 %vm303_vm0, %v1912_v27  ;;  %1896 = vmatmul.msk.f32.gmra.mxu2 %vm303_vm0, %v2395_v31 }
  0x47   : > { %1931 = vmatmul.msk.f32.gmra.mxu3 %vm303_vm0, %v2398_v32  ;;  %1964 = vmatmul.msk.f32.gmra.mxu0 %vm303_vm0, %v2301_v5 }
  0x4e   : > { %1880 = vmatmul.msk.f32.gmra.mxu1 %vm303_vm0, %v1913_v30  ;;  %1897 = vmatmul.msk.f32.gmra.mxu2 %vm303_vm0, %v2408_v33 }
  0x4f   : > { %1932 = vmatmul.msk.f32.gmra.mxu3 %vm303_vm0, %v2411_v34  ;;  %1965 = vmatmul.msk.f32.gmra.mxu0 %vm303_vm0, %v2321_v10 }
  0x56   : > { %1881 = vmatmul.msk.f32.gmra.mxu1 %vm303_vm0, %v2398_v32  ;;  %1898 = vmatmul.msk.f32.gmra.mxu2 %vm303_vm0, %v2421_v35 }
  0x57   : > { %1933 = vmatmul.msk.f32.gmra.mxu3 %vm303_vm0, %v2424_v36  ;;  %1966 = vmatmul.msk.f32.gmra.mxu0 %vm303_vm0, %v2347_v17 }
  0x5e   : > { %1882 = vmatmul.msk.f32.gmra.mxu1 %vm303_vm0, %v2411_v34  ;;  %1899 = vmatmul.msk.f32.gmra.mxu2 %vm303_vm0, %v2435_v37 }
  0x5f   : > { %1934 = vmatmul.msk.f32.gmra.mxu3 %vm303_vm0, %v2438_v38  ;;  %1967 = vmatmul.msk.f32.gmra.mxu0 %vm303_vm0, %v2364_v21 }
  0x66   : > { %1883 = vmatmul.msk.f32.gmra.mxu1 %vm303_vm0, %v2424_v36  ;;  %1900 = vmatmul.msk.f32.gmra.mxu2 %vm303_vm0, %v2449_v39 }
  0x67   : > { %1935 = vmatmul.msk.f32.gmra.mxu3 %vm303_vm0, %v2452_v40  ;;  %1968 = vmatmul.msk.f32.gmra.mxu0 %vm303_vm0, %v2304_v6 }
  0x6e   : > { %1884 = vmatmul.msk.f32.gmra.mxu1 %vm303_vm0, %v2438_v38  ;;  %1901 = vmatmul.msk.f32.gmra.mxu2 %vm303_vm0, %v2463_v41 }
  0x6f   : > { %1936 = vmatmul.msk.f32.gmra.mxu3 %vm303_vm0, %v2466_v42  ;;  %1969 = vmatmul.msk.f32.gmra.mxu0 %vm303_vm0, %v2324_v11 }
  0x76   : > { %1885 = vmatmul.msk.f32.gmra.mxu1 %vm303_vm0, %v2452_v40  ;;  %1902 = vmatmul.msk.f32.gmra.mxu2 %vm303_vm0, %v2477_v43 }
  0x77   : > { %1937 = vmatmul.msk.f32.gmra.mxu3 %vm303_vm0, %v2480_v44  ;;  %1970 = vmatmul.msk.f32.gmra.mxu0 %vm303_vm0, %v2350_v18 }
  0x7e   : > { %1886 = vmatmul.msk.f32.gmra.mxu1 %vm303_vm0, %v2466_v42  ;;  %1903 = vmatmul.msk.f32.gmra.mxu2 %vm303_vm0, %v2491_v45 }
  0x7f   : > { %1938 = vmatmul.msk.f32.gmra.mxu3 %vm303_vm0, %v2494_v46  ;;  %1971 = vmatmul.msk.f32.gmra.mxu0 %vm303_vm0, %v2367_v22 }
  0x86   : > { %1887 = vmatmul.msk.f32.gmra.mxu1 %vm303_vm0, %v2480_v44  ;;  %1904 = vmatmul.msk.f32.gmra.mxu2 %vm303_vm0, %v2505_v47 }
  0x87   : > { %1939 = vmatmul.msk.f32.gmra.mxu3 %vm303_vm0, %v2508_v48  ;;  %1972 = vmatmul.msk.f32.gmra.mxu0 %vm303_vm0, %v2307_v7 }
  0x8e   : > { %1888 = vmatmul.msk.f32.gmra.mxu1 %vm303_vm0, %v2494_v46  ;;  %1905 = vmatmul.msk.f32.gmra.mxu2 %vm303_vm0, %v2519_v49 }
  0x8f   : > { %1940 = vmatmul.msk.f32.gmra.mxu3 %vm303_vm0, %v2522_v50  ;;  %1973 = vmatmul.msk.f32.gmra.mxu0 %vm303_vm0, %v2330_v13 }
  0x93   : > { %v2532_v51 = vpop.f32.mrf.mxu1 }
  0x94   : > { %v369_v54 = vpop.f32.mrf.mxu0 }
  0x96   : > { %1889 = vmatmul.msk.f32.gmra.mxu1 %vm303_vm0, %v2508_v48  ;;  %1906 = vmatmul.msk.f32.gmra.mxu2 %vm303_vm0, %v2535_v52 }
  0x97   : > { %1941 = vmatmul.msk.f32.gmra.mxu3 %vm303_vm0, %v2538_v53  ;;  %1974 = vmatmul.msk.f32.gmra.mxu0 %vm303_vm0, %v2353_v19 }
  0x99   : > { %v2548_v55 = vpop.f32.mrf.mxu2 }
  0x9a   : > { %v2550_v56 = vpop.f32.mrf.mxu3 }
  0x9b   : > { %v2552_v57 = vpop.f32.mrf.mxu1 }
  0x9c   : > { %v372_v60 = vpop.f32.mrf.mxu0 }
  0x9e   : > { %1890 = vmatmul.msk.f32.gmra.mxu1 %vm303_vm0, %v2522_v50  ;;  %1907 = vmatmul.msk.f32.gmra.mxu2 %vm303_vm0, %v2555_v58 }
  0x9f   : > { %1942 = vmatmul.msk.f32.gmra.mxu3 %vm303_vm0, %v2558_v59  ;;  %1975 = vmatmul.msk.f32.gmra.mxu0 %vm303_vm0, %v2370_v23 }
  0xa1   : > { %v2568_v61 = vpop.f32.mrf.mxu2 }
  0xa2   : > { %v2570_v62 = vpop.f32.mrf.mxu3 }
  0xa3   : > { %3021 = vst [vmem:[#allocation2_spill] sm:$0xff] %v2570_v62  ;;  %v2572_v63 = vpop.f32.mrf.mxu1 }
  0xa4   : > { %v375_v2 = vpop.f32.mrf.mxu0 }
  0xa6   : > { %1891 = vmatmul.msk.f32.gmra.mxu1 %vm303_vm0, %v2538_v53  ;;  %1908 = vmatmul.msk.f32.gmra.mxu2 %vm303_vm0, %v2575_v0 }
  0xa7   : > { %1943 = vmatmul.msk.f32.gmra.mxu3 %vm303_vm0, %v2578_v1  ;;  %1976 = vmatmul.msk.f32.gmra.mxu0 %vm303_vm0, %v2581_v3 }
  0xa9   : > { %v2591_v4 = vpop.f32.mrf.mxu2 }
  0xaa   : > { %v2593_v8 = vpop.f32.mrf.mxu3 }
  0xab   : > { %3022 = vst [vmem:[#allocation3_spill] sm:$0xff] %v2593_v8  ;;  %v2595_v9 = vpop.f32.mrf.mxu1 }
  0xac   : > { %v378_v15 = vpop.f32.mrf.mxu0 }
  0xae   : > { %1892 = vmatmul.msk.f32.gmra.mxu1 %vm303_vm0, %v2558_v59  ;;  %1909 = vmatmul.msk.f32.gmra.mxu2 %vm303_vm0, %v2598_v12 }
  0xaf   : > { %1944 = vmatmul.msk.f32.gmra.mxu3 %vm303_vm0, %v2601_v14  ;;  %1977 = vmatmul.msk.f32.gmra.mxu0 %vm303_vm0, %v2604_v16 }
  0xb1   : > { %v2614_v20 = vpop.f32.mrf.mxu2 }
  0xb2   : > { %v2616_v24 = vpop.f32.mrf.mxu3 }
  0xb3   : > { %3024 = vst [vmem:[#allocation5_spill] sm:$0xff] %v2616_v24  ;;  %v482_v25 = vpop.f32.mrf.mxu1 }
  0xb4   : > { %v910_v26 = vpop.f32.mrf.mxu0  ;;  %v483_v27 = vadd.f32 %v482_v25, %v369_v54 }
  0xb6   : > { %1995 = vmatmul.msk.f32.vlgmr.msra.gmra.mxu1 %vm303_vm0, %v2395_v31  ;;  %2030 = vmatmul.msk.f32.vlgmr.msra.gmra.mxu2 %vm303_vm0, %v2398_v32 }
  0xb7   : > { %2063 = vmatmul.msk.f32.vlgmr.msra.gmra.mxu3 %vm303_vm0, %v2301_v5  ;;  %2096 = vmatmul.msk.f32.vlgmr.msra.gmra.mxu0 %vm303_vm0, %v2421_v35 }
  0xb9   : > { %v613_v28 = vpop.f32.mrf.mxu2 }
  0xba   : > { %v661_v29 = vadd.f32 %v613_v28, %v483_v27  ;;  %v763_v30 = vpop.f32.mrf.mxu3 }
  0xbb   : > { %v485_v8 = vpop.f32.mrf.mxu1 }
  0xbc   : > { %v811_v24 = vadd.f32 %v763_v30, %v661_v29  ;;  %v913_v62 = vpop.f32.mrf.mxu0  ;;  %v486_v5 = vadd.f32 %v485_v8, %v372_v60 }
  0xbe   : > { %v2626_v16 = vadd.f32 %v910_v26, %v811_v24  ;;  %1996 = vmatmul.msk.f32.gmra.mxu1 %vm303_vm0, %v2408_v33  ;;  %2031 = vmatmul.msk.f32.gmra.mxu2 %vm303_vm0, %v2411_v34 }
  0xbf   : > { %2064 = vmatmul.msk.f32.gmra.mxu3 %vm303_vm0, %v2321_v10  ;;  %2097 = vmatmul.msk.f32.gmra.mxu0 %vm303_vm0, %v2435_v37 }
  0xc1   : > { %v616_v31 = vpop.f32.mrf.mxu2 }
  0xc2   : > { %v662_v32 = vadd.f32 %v616_v31, %v486_v5  ;;  %v766_v54 = vpop.f32.mrf.mxu3 }
  0xc3   : > { %v488_v25 = vpop.f32.mrf.mxu1 }
  0xc4   : > { %v812_v27 = vadd.f32 %v766_v54, %v662_v32  ;;  %v916_v24 = vpop.f32.mrf.mxu0  ;;  %v489_v10 = vadd.f32 %v488_v25, %v375_v2 }
  0xc6   : > { %v2636_v26 = vadd.f32 %v913_v62, %v812_v27  ;;  %1997 = vmatmul.msk.f32.gmra.mxu1 %vm303_vm0, %v2421_v35  ;;  %2032 = vmatmul.msk.f32.gmra.mxu2 %vm303_vm0, %v2424_v36 }
  0xc7   : > { %2065 = vmatmul.msk.f32.gmra.mxu3 %vm303_vm0, %v2347_v17  ;;  %2098 = vmatmul.msk.f32.gmra.mxu0 %vm303_vm0, %v2449_v39 }
  0xc9   : > { %v619_v33 = vpop.f32.mrf.mxu2 }
  0xca   : > { %v663_v34 = vadd.f32 %v619_v33, %v489_v10  ;;  %v769_v60 = vpop.f32.mrf.mxu3 }
  0xcb   : > { %v491_v8 = vpop.f32.mrf.mxu1 }
  0xcc   : > { %v813_v28 = vadd.f32 %v769_v60, %v663_v34  ;;  %v919_v62 = vpop.f32.mrf.mxu0  ;;  %v492_v17 = vadd.f32 %v491_v8, %v378_v15 }
  0xce   : > { %v2646_v29 = vadd.f32 %v916_v24, %v813_v28  ;;  %1998 = vmatmul.msk.f32.gmra.mxu1 %vm303_vm0, %v2435_v37  ;;  %2033 = vmatmul.msk.f32.gmra.mxu2 %vm303_vm0, %v2438_v38 }
  0xcf   : > { %2066 = vmatmul.msk.f32.gmra.mxu3 %vm303_vm0, %v2364_v21  ;;  %2099 = vmatmul.msk.f32.gmra.mxu0 %vm303_vm0, %v2463_v41 }
  0xd1   : > { %v622_v35 = vpop.f32.mrf.mxu2 }
  0xd2   : > { %v664_v36 = vadd.f32 %v622_v35, %v492_v17  ;;  %v772_v2 = vpop.f32.mrf.mxu3 }
  0xd3   : > { %v494_v30 = vpop.f32.mrf.mxu1 }
  0xd4   : > { %v814_v5 = vadd.f32 %v772_v2, %v664_v36  ;;  %v922_v31 = vpop.f32.mrf.mxu0  ;;  %v495_v21 = vadd.f32 %v494_v30, %v2532_v51 }
  0xd6   : > { %v2656_v32 = vadd.f32 %v919_v62, %v814_v5  ;;  %1999 = vmatmul.msk.f32.gmra.mxu1 %vm303_vm0, %v2449_v39  ;;  %2034 = vmatmul.msk.f32.gmra.mxu2 %vm303_vm0, %v2452_v40 }
  0xd7   : > { %2067 = vmatmul.msk.f32.gmra.mxu3 %vm303_vm0, %v2304_v6  ;;  %2100 = vmatmul.msk.f32.gmra.mxu0 %vm303_vm0, %v2477_v43 }
  0xd9   : > { %v625_v37 = vpop.f32.mrf.mxu2 }
  0xda   : > { %v665_v38 = vadd.f32 %v625_v37, %v495_v21  ;;  %v775_v15 = vpop.f32.mrf.mxu3 }
  0xdb   : > { %v497_v54 = vpop.f32.mrf.mxu1 }
  0xdc   : > { %v815_v25 = vadd.f32 %v775_v15, %v665_v38  ;;  %v925_v27 = vpop.f32.mrf.mxu0  ;;  %v498_v6 = vadd.f32 %v497_v54, %v2552_v57 }
  0xde   : > { %v2667_v24 = vadd.f32 %v922_v31, %v815_v25  ;;  %2000 = vmatmul.msk.f32.gmra.mxu1 %vm303_vm0, %v2463_v41  ;;  %2035 = vmatmul.msk.f32.gmra.mxu2 %vm303_vm0, %v2466_v42 }
  0xdf   : > { %2068 = vmatmul.msk.f32.gmra.mxu3 %vm303_vm0, %v2324_v11  ;;  %2101 = vmatmul.msk.f32.gmra.mxu0 %vm303_vm0, %v2491_v45 }
  0xe1   : > { %v628_v39 = vpop.f32.mrf.mxu2 }
  0xe2   : > { %v666_v40 = vadd.f32 %v628_v39, %v498_v6  ;;  %v778_v51 = vpop.f32.mrf.mxu3 }
  0xe3   : > { %v500_v10 = vpop.f32.mrf.mxu1 }
  0xe4   : > { %v816_v33 = vadd.f32 %v778_v51, %v666_v40  ;;  %v928_v34 = vpop.f32.mrf.mxu0  ;;  %v501_v11 = vadd.f32 %v500_v10, %v2572_v63 }
  0xe6   : > { %v2678_v60 = vadd.f32 %v925_v27, %v816_v33  ;;  %2001 = vmatmul.msk.f32.gmra.mxu1 %vm303_vm0, %v2477_v43  ;;  %2036 = vmatmul.msk.f32.gmra.mxu2 %vm303_vm0, %v2480_v44 }
  0xe7   : > { %2069 = vmatmul.msk.f32.gmra.mxu3 %vm303_vm0, %v2350_v18  ;;  %2102 = vmatmul.msk.f32.gmra.mxu0 %vm303_vm0, %v2505_v47 }
  0xe9   : > { %v631_v41 = vpop.f32.mrf.mxu2 }
  0xea   : > { %v667_v42 = vadd.f32 %v631_v41, %v501_v11  ;;  %v781_v57 = vpop.f32.mrf.mxu3 }
  0xeb   : > { %v503_v8 = vpop.f32.mrf.mxu1 }
  0xec   : > { %v817_v28 = vadd.f32 %v781_v57, %v667_v42  ;;  %v931_v62 = vpop.f32.mrf.mxu0  ;;  %v504_v18 = vadd.f32 %v503_v8, %v2595_v9 }
  0xee   : > { %v2689_v17 = vadd.f32 %v928_v34, %v817_v28  ;;  %2002 = vmatmul.msk.f32.gmra.mxu1 %vm303_vm0, %v2491_v45  ;;  %2037 = vmatmul.msk.f32.gmra.mxu2 %vm303_vm0, %v2494_v46  ;;  %v2091_v34 = vld [vmem:[%s2298_s28 + $0xc2] sm:$0xff] }
  0xef   : > { %2070 = vmatmul.msk.f32.gmra.mxu3 %vm303_vm0, %v2367_v22  ;;  %2103 = vmatmul.msk.f32.gmra.mxu0 %vm303_vm0, %v2519_v49 }
  0xf1   : > { %v634_v43 = vpop.f32.mrf.mxu2 }
  0xf2   : > { %v668_v44 = vadd.f32 %v634_v43, %v504_v18  ;;  %v784_v63 = vpop.f32.mrf.mxu3 }
  0xf3   : > { %v506_v35 = vpop.f32.mrf.mxu1 }
  0xf4   : > { %v818_v36 = vadd.f32 %v784_v63, %v668_v44  ;;  %v934_v2 = vpop.f32.mrf.mxu0  ;;  %v507_v22 = vadd.f32 %v506_v35, %v2548_v55  ;;  %v2027_v44 = vld [vmem:[%s2298_s28 + $0xd8] sm:$0xff] }
  0xf5   : > { %v2060_v35 = vld [vmem:[%s2298_s28 + $0xd9] sm:$0xff] }
  0xf6   : > { %v2700_v30 = vadd.f32 %v931_v62, %v818_v36  ;;  %2003 = vmatmul.msk.f32.gmra.mxu1 %vm303_vm0, %v2505_v47  ;;  %2038 = vmatmul.msk.f32.gmra.mxu2 %vm303_vm0, %v2508_v48  ;;  %v2093_v36 = vld [vmem:[%s2298_s28 + $0xda] sm:$0xff] }
  0xf7   : > { %2071 = vmatmul.msk.f32.gmra.mxu3 %vm303_vm0, %v2307_v7  ;;  %2104 = vmatmul.msk.f32.gmra.mxu0 %vm303_vm0, %v2535_v52 }
  0xf9   : > { %v637_v45 = vpop.f32.mrf.mxu2 }
  0xfa   : > { %v669_v46 = vadd.f32 %v637_v45, %v507_v22  ;;  %v787_v9 = vpop.f32.mrf.mxu3 }
  0xfb   : > { %v509_v5 = vpop.f32.mrf.mxu1 }
  0xfc   : > { %v819_v31 = vadd.f32 %v787_v9, %v669_v46  ;;  %v937_v21 = vpop.f32.mrf.mxu0  ;;  %v510_v7 = vadd.f32 %v509_v5, %v2568_v61 }
  0xfe   : > { %v2711_v37 = vadd.f32 %v934_v2, %v819_v31  ;;  %2004 = vmatmul.msk.f32.gmra.mxu1 %vm303_vm0, %v2519_v49  ;;  %2039 = vmatmul.msk.f32.gmra.mxu2 %vm303_vm0, %v2522_v50  ;;  %v3027_v2 = vld [vmem:[#allocation3_spill] sm:$0xff]  ;;  %v2028_v31 = vld [vmem:[%s2298_s28 + $0xe0] sm:$0xff] }
  0xff   : > { %2072 = vmatmul.msk.f32.gmra.mxu3 %vm303_vm0, %v2330_v13  ;;  %2105 = vmatmul.msk.f32.gmra.mxu0 %vm303_vm0, %v2555_v58 }
 0x101   : > { %v640_v47 = vpop.f32.mrf.mxu2 }
 0x102   : > { %v670_v48 = vadd.f32 %v640_v47, %v510_v7  ;;  %v790_v55 = vpop.f32.mrf.mxu3  ;;  %v2061_v7 = vld [vmem:[%s2298_s28 + $0xe1] sm:$0xff] }
 0x103   : > { %v512_v38 = vpop.f32.mrf.mxu1 }
 0x104   : > { %v820_v15 = vadd.f32 %v790_v55, %v670_v48  ;;  %v940_v54 = vpop.f32.mrf.mxu0  ;;  %v513_v13 = vadd.f32 %v512_v38, %v2591_v4  ;;  %v2094_v48 = vld [vmem:[%s2298_s28 + $0xe2] sm:$0xff]  ;;  %v3028_v38 = vld [vmem:[#allocation5_spill] sm:$0xff] }
 0x106   : > { %v2722_v25 = vadd.f32 %v937_v21, %v820_v15  ;;  %2005 = vmatmul.msk.f32.gmra.mxu1 %vm303_vm0, %v2535_v52  ;;  %2040 = vmatmul.msk.f32.gmra.mxu2 %vm303_vm0, %v2538_v53 }
 0x107   : > { %2073 = vmatmul.msk.f32.gmra.mxu3 %vm303_vm0, %v2353_v19  ;;  %2106 = vmatmul.msk.f32.gmra.mxu0 %vm303_vm0, %v2575_v0 }
 0x109   : > { %v643_v49 = vpop.f32.mrf.mxu2 }
 0x10a   : > { %v671_v50 = vadd.f32 %v643_v49, %v513_v13  ;;  %v793_v61 = vpop.f32.mrf.mxu3 }
 0x10b   : > { %v515_v27 = vpop.f32.mrf.mxu1 }
 0x10c   : > { %v821_v6 = vadd.f32 %v793_v61, %v671_v50  ;;  %v943_v39 = vpop.f32.mrf.mxu0  ;;  %v516_v19 = vadd.f32 %v515_v27, %v2614_v20 }
 0x10e   : > { %v2733_v40 = vadd.f32 %v940_v54, %v821_v6  ;;  %2006 = vmatmul.msk.f32.gmra.mxu1 %vm303_vm0, %v2555_v58  ;;  %2041 = vmatmul.msk.f32.gmra.mxu2 %vm303_vm0, %v2558_v59 }
 0x10f   : > { %2074 = vmatmul.msk.f32.gmra.mxu3 %vm303_vm0, %v2370_v23  ;;  %2107 = vmatmul.msk.f32.gmra.mxu0 %vm303_vm0, %v2598_v12 }
 0x111   : > { %v646_v52 = vpop.f32.mrf.mxu2 }
 0x112   : > { %v672_v53 = vadd.f32 %v646_v52, %v516_v19  ;;  %v796_v4 = vpop.f32.mrf.mxu3 }
 0x113   : > { %v518_v51 = vpop.f32.mrf.mxu1 }
 0x114   : > { %v822_v10 = vadd.f32 %v796_v4, %v672_v53  ;;  %v946_v33 = vpop.f32.mrf.mxu0  ;;  %v519_v23 = vadd.f32 %v518_v51, %v2550_v56  ;;  %v3026_v56 = vld [vmem:[#allocation2_spill] sm:$0xff] }
 0x116   : > { %v2745_v58 = vadd.f32 %v943_v39, %v822_v10  ;;  %2007 = vmatmul.msk.f32.gmra.mxu1 %vm303_vm0, %v2575_v0  ;;  %2042 = vmatmul.msk.f32.gmra.mxu2 %vm303_vm0, %v2578_v1  ;;  %v2092_v0 = vld [vmem:[%s2298_s28 + $0xca] sm:$0xff]  ;;  %v2794_v10 = vld [vmem:[%s3016_s2] ss:$0 sm:$0xff] }
 0x117   : > { %2075 = vmatmul.msk.f32.gmra.mxu3 %vm303_vm0, %v2581_v3  ;;  %2108 = vmatmul.msk.f32.gmra.mxu0 %vm303_vm0, %v2091_v34  ;;  %v3025_v1 = vld [vmem:[#allocation4_spill] sm:$0xff] }
 0x119   : > { %v649_v59 = vpop.f32.mrf.mxu2 }
 0x11a   : > { %v673_v20 = vadd.f32 %v649_v59, %v519_v23  ;;  %v799_v11 = vpop.f32.mrf.mxu3 }
 0x11b   : > { %v521_v41 = vpop.f32.mrf.mxu1 }
 0x11c   : > { %v823_v42 = vadd.f32 %v799_v11, %v673_v20  ;;  %v949_v57 = vpop.f32.mrf.mxu0  ;;  %v522_v3 = vadd.f32 %v521_v41, %v3026_v56 }
 0x11e   : > { %v2756_v8 = vadd.f32 %v946_v33, %v823_v42  ;;  %2008 = vmatmul.msk.f32.gmra.mxu1 %vm303_vm0, %v2598_v12  ;;  %2043 = vmatmul.msk.f32.gmra.mxu2 %vm303_vm0, %v2601_v14 }
 0x11f   : > { %2076 = vmatmul.msk.f32.gmra.mxu3 %vm303_vm0, %v3025_v1  ;;  %2109 = vmatmul.msk.f32.gmra.mxu0 %vm303_vm0, %v2092_v0 }
 0x121   : > { %v652_v28 = vpop.f32.mrf.mxu2 }
 0x122   : > { %v674_v62 = vadd.f32 %v652_v28, %v522_v3  ;;  %v802_v18 = vpop.f32.mrf.mxu3 }
 0x123   : > { %v524_v43 = vpop.f32.mrf.mxu1 }
 0x124   : > { %v824_v63 = vadd.f32 %v802_v18, %v674_v62  ;;  %v952_v12 = vpop.f32.mrf.mxu0  ;;  %v525_v22 = vadd.f32 %v524_v43, %v3027_v2 }
 0x126   : > { %v2769_v14 = vadd.f32 %v949_v57, %v824_v63  ;;  %2009 = vmatmul.msk.f32.gmra.mxu1 %vm303_vm0, %v2091_v34  ;;  %2044 = vmatmul.msk.f32.gmra.mxu2 %vm303_vm0, %v2027_v44 }
 0x127   : > { %2077 = vmatmul.msk.f32.gmra.mxu3 %vm303_vm0, %v2060_v35  ;;  %2110 = vmatmul.msk.f32.gmra.mxu0 %vm303_vm0, %v2093_v36 }
 0x129   : > { %v655_v45 = vpop.f32.mrf.mxu2 }
 0x12a   : > { %v675_v46 = vadd.f32 %v655_v45, %v525_v22  ;;  %v805_v9 = vpop.f32.mrf.mxu3 }
 0x12b   : > { %v527_v5 = vpop.f32.mrf.mxu1 }
 0x12c   : > { %v825_v21 = vadd.f32 %v805_v9, %v675_v46  ;;  %v955_v47 = vpop.f32.mrf.mxu0  ;;  %v528_v15 = vadd.f32 %v527_v5, %v3028_v38 }
 0x12e   : > { %v2779_v55 = vadd.f32 %v952_v12, %v825_v21  ;;  %2010 = vmatmul.msk.f32.gmra.mxu1 %vm303_vm0, %v2092_v0  ;;  %2045 = vmatmul.msk.f32.gmra.mxu2 %vm303_vm0, %v2028_v31 }
 0x12f   : > { %2078 = vmatmul.msk.f32.gmra.mxu3 %vm303_vm0, %v2061_v7  ;;  %2111 = vmatmul.msk.f32.gmra.mxu0 %vm303_vm0, %v2094_v48 }
 0x131   : > { %v658_v54 = vpop.f32.mrf.mxu2 }
 0x132   : > { %v676_v13 = vadd.f32 %v658_v54, %v528_v15  ;;  %v808_v49 = vpop.f32.mrf.mxu3 }
 0x133   : > { %v1057_v50 = vpop.f32.mrf.mxu1 }
 0x134   : > { %v826_v61 = vadd.f32 %v808_v49, %v676_v13  ;;  %v1501_v27 = vpop.f32.mrf.mxu0  ;;  %v1105_v39 = vadd.f32 %v1057_v50, %v2626_v16 }
 0x136   : > { %v2787_v6 = vadd.f32 %v955_v47, %v826_v61 }
 0x139   : > { %v1207_v19 = vpop.f32.mrf.mxu2 }
 0x13a   : > { %v1255_v52 = vadd.f32 %v1207_v19, %v1105_v39  ;;  %v1354_v53 = vpop.f32.mrf.mxu3 }
 0x13b   : > { %v1060_v4 = vpop.f32.mrf.mxu1 }
 0x13c   : > { %v1402_v51 = vadd.f32 %v1354_v53, %v1255_v52  ;;  %v1504_v33 = vpop.f32.mrf.mxu0  ;;  %v1106_v16 = vadd.f32 %v1060_v4, %v2636_v26 }
 0x13e   : > { %v1549_v34 = vadd.f32 %v1501_v27, %v1402_v51 }
 0x140   : > { %v2803_v23 = vadd.f32 %v2794_v10, %v1549_v34 }
 0x141   : > { %v1210_v59 = vpop.f32.mrf.mxu2 }
 0x142   : > { %1585 = vst.msk [vmem:[%s2799_s19] sm:$0xff] %vm303_vm0, %v2803_v23  ;;  %v1256_v20 = vadd.f32 %v1210_v59, %v1106_v16  ;;  %v1357_v11 = vpop.f32.mrf.mxu3 }
 0x143   : > { %v1063_v41 = vpop.f32.mrf.mxu1 }
 0x144   : > { %v1403_v42 = vadd.f32 %v1357_v11, %v1256_v20  ;;  %v1507_v57 = vpop.f32.mrf.mxu0  ;;  %v1107_v1 = vadd.f32 %v1063_v41, %v2646_v29 }
 0x146   : > { %v1550_v0 = vadd.f32 %v1504_v33, %v1403_v42 }
 0x148   : > { %v2810_v56 = vadd.f32 %v2794_v10, %v1550_v0 }
 0x149   : > { %v1213_v26 = vpop.f32.mrf.mxu2 }
 0x14a   : > { %1586 = vst.msk [vmem:[%s2799_s19 + $0x8] sm:$0xff] %vm303_vm0, %v2810_v56  ;;  %v1257_v3 = vadd.f32 %v1213_v26, %v1107_v1  ;;  %v1360_v28 = vpop.f32.mrf.mxu3 }
 0x14b   : > { %v1066_v62 = vpop.f32.mrf.mxu1 }
 0x14c   : > { %v1404_v18 = vadd.f32 %v1360_v28, %v1257_v3  ;;  %v1510_v43 = vpop.f32.mrf.mxu0  ;;  %v1108_v63 = vadd.f32 %v1066_v62, %v2656_v32 }
 0x14e   : > { %v1551_v44 = vadd.f32 %v1507_v57, %v1404_v18 }
 0x150   : > { %v2817_v35 = vadd.f32 %v2794_v10, %v1551_v44 }
 0x151   : > { %v1216_v29 = vpop.f32.mrf.mxu2 }
 0x152   : > { %1587 = vst.msk [vmem:[%s2799_s19 + $0x10] sm:$0xff] %vm303_vm0, %v2817_v35  ;;  %v1258_v12 = vadd.f32 %v1216_v29, %v1108_v63  ;;  %v1363_v36 = vpop.f32.mrf.mxu3 }
 0x153   : > { %v1069_v2 = vpop.f32.mrf.mxu1 }
 0x154   : > { %v1405_v22 = vadd.f32 %v1363_v36, %v1258_v12  ;;  %v1513_v45 = vpop.f32.mrf.mxu0  ;;  %v1109_v9 = vadd.f32 %v1069_v2, %v2667_v24 }
 0x156   : > { %v1552_v46 = vadd.f32 %v1510_v43, %v1405_v22 }
 0x158   : > { %v2824_v5 = vadd.f32 %v2794_v10, %v1552_v46 }
 0x159   : > { %v1219_v32 = vpop.f32.mrf.mxu2 }
 0x15a   : > { %1588 = vst.msk [vmem:[%s2799_s19 + $0x18] sm:$0xff] %vm303_vm0, %v2824_v5  ;;  %v1259_v31 = vadd.f32 %v1219_v32, %v1109_v9  ;;  %v1366_v21 = vpop.f32.mrf.mxu3 }
 0x15b   : > { %v1072_v7 = vpop.f32.mrf.mxu1 }
 0x15c   : > { %v1406_v47 = vadd.f32 %v1366_v21, %v1259_v31  ;;  %v1516_v48 = vpop.f32.mrf.mxu0  ;;  %v1110_v15 = vadd.f32 %v1072_v7, %v2678_v60 }
 0x15e   : > { %v1553_v38 = vadd.f32 %v1513_v45, %v1406_v47 }
 0x160   : > { %v2831_v54 = vadd.f32 %v2794_v10, %v1553_v38 }
 0x161   : > { %v1222_v24 = vpop.f32.mrf.mxu2 }
 0x162   : > { %1589 = vst.msk [vmem:[%s2799_s19 + $0x20] sm:$0xff] %vm303_vm0, %v2831_v54  ;;  %v1260_v13 = vadd.f32 %v1222_v24, %v1110_v15  ;;  %v1369_v49 = vpop.f32.mrf.mxu3 }
 0x163   : > { %v1075_v50 = vpop.f32.mrf.mxu1 }
 0x164   : > { %v1407_v61 = vadd.f32 %v1369_v49, %v1260_v13  ;;  %v1519_v27 = vpop.f32.mrf.mxu0  ;;  %v1111_v19 = vadd.f32 %v1075_v50, %v2689_v17 }
 0x166   : > { %v1554_v39 = vadd.f32 %v1516_v48, %v1407_v61 }
 0x168   : > { %v2838_v52 = vadd.f32 %v2794_v10, %v1554_v39 }
 0x169   : > { %v1225_v60 = vpop.f32.mrf.mxu2 }
 0x16a   : > { %1590 = vst.msk [vmem:[%s2799_s19 + $0x28] sm:$0xff] %vm303_vm0, %v2838_v52  ;;  %v1261_v53 = vadd.f32 %v1225_v60, %v1111_v19  ;;  %v1372_v4 = vpop.f32.mrf.mxu3 }
 0x16b   : > { %v1078_v51 = vpop.f32.mrf.mxu1 }
 0x16c   : > { %v1408_v33 = vadd.f32 %v1372_v4, %v1261_v53  ;;  %v1522_v34 = vpop.f32.mrf.mxu0  ;;  %v1112_v59 = vadd.f32 %v1078_v51, %v2700_v30 }
 0x16e   : > { %v1555_v16 = vadd.f32 %v1519_v27, %v1408_v33 }
 0x170   : > { %v2845_v20 = vadd.f32 %v2794_v10, %v1555_v16 }
 0x171   : > { %v1228_v17 = vpop.f32.mrf.mxu2 }
 0x172   : > { %1591 = vst.msk [vmem:[%s2799_s19 + $0x30] sm:$0xff] %vm303_vm0, %v2845_v20  ;;  %v1262_v11 = vadd.f32 %v1228_v17, %v1112_v59  ;;  %v1375_v41 = vpop.f32.mrf.mxu3 }
 0x173   : > { %v1081_v42 = vpop.f32.mrf.mxu1 }
 0x174   : > { %v1409_v57 = vadd.f32 %v1375_v41, %v1262_v11  ;;  %v1525_v0 = vpop.f32.mrf.mxu0  ;;  %v1113_v26 = vadd.f32 %v1081_v42, %v2711_v37 }
 0x176   : > { %v1556_v1 = vadd.f32 %v1522_v34, %v1409_v57 }
 0x178   : > { %v2852_v3 = vadd.f32 %v2794_v10, %v1556_v1 }
 0x179   : > { %v1231_v30 = vpop.f32.mrf.mxu2 }
 0x17a   : > { %1592 = vst.msk [vmem:[%s2799_s19 + $0x38] sm:$0xff] %vm303_vm0, %v2852_v3  ;;  %v1263_v28 = vadd.f32 %v1231_v30, %v1113_v26  ;;  %v1378_v62 = vpop.f32.mrf.mxu3 }
 0x17b   : > { %v1084_v18 = vpop.f32.mrf.mxu1 }
 0x17c   : > { %v1410_v43 = vadd.f32 %v1378_v62, %v1263_v28  ;;  %v1528_v44 = vpop.f32.mrf.mxu0  ;;  %v1114_v29 = vadd.f32 %v1084_v18, %v2722_v25 }
 0x17e   : > { %v1557_v63 = vadd.f32 %v1525_v0, %v1410_v43 }
 0x180   : > { %v2859_v12 = vadd.f32 %v2794_v10, %v1557_v63 }
 0x181   : > { %v1234_v37 = vpop.f32.mrf.mxu2 }
 0x182   : > { %1593 = vst.msk [vmem:[%s2799_s19 + $0x40] sm:$0xff] %vm303_vm0, %v2859_v12  ;;  %v1264_v36 = vadd.f32 %v1234_v37, %v1114_v29  ;;  %v1381_v2 = vpop.f32.mrf.mxu3 }
 0x183   : > { %v1087_v22 = vpop.f32.mrf.mxu1 }
 0x184   : > { %v1411_v45 = vadd.f32 %v1381_v2, %v1264_v36  ;;  %v1531_v46 = vpop.f32.mrf.mxu0  ;;  %v1115_v32 = vadd.f32 %v1087_v22, %v2733_v40 }
 0x186   : > { %v1558_v9 = vadd.f32 %v1528_v44, %v1411_v45 }
 0x188   : > { %v2866_v31 = vadd.f32 %v2794_v10, %v1558_v9 }
 0x189   : > { %v1237_v25 = vpop.f32.mrf.mxu2 }
 0x18a   : > { %1594 = vst.msk [vmem:[%s2799_s19 + $0x48] sm:$0xff] %vm303_vm0, %v2866_v31  ;;  %v1265_v21 = vadd.f32 %v1237_v25, %v1115_v32  ;;  %v1384_v7 = vpop.f32.mrf.mxu3 }
 0x18b   : > { %v1090_v47 = vpop.f32.mrf.mxu1 }
 0x18c   : > { %v1412_v48 = vadd.f32 %v1384_v7, %v1265_v21  ;;  %v1534_v38 = vpop.f32.mrf.mxu0  ;;  %v1116_v24 = vadd.f32 %v1090_v47, %v2745_v58 }
 0x18e   : > { %v1559_v15 = vadd.f32 %v1531_v46, %v1412_v48 }
 0x190   : > { %v2873_v13 = vadd.f32 %v2794_v10, %v1559_v15 }
 0x191   : > { %v1240_v40 = vpop.f32.mrf.mxu2 }
 0x192   : > { %1595 = vst.msk [vmem:[%s2799_s19 + $0x50] sm:$0xff] %vm303_vm0, %v2873_v13  ;;  %v1266_v49 = vadd.f32 %v1240_v40, %v1116_v24  ;;  %v1387_v50 = vpop.f32.mrf.mxu3 }
 0x193   : > { %v1093_v61 = vpop.f32.mrf.mxu1 }
 0x194   : > { %v1413_v27 = vadd.f32 %v1387_v50, %v1266_v49  ;;  %v1537_v39 = vpop.f32.mrf.mxu0  ;;  %v1117_v60 = vadd.f32 %v1093_v61, %v2756_v8 }
 0x196   : > { %v1560_v19 = vadd.f32 %v1534_v38, %v1413_v27 }
 0x198   : > { %v2880_v53 = vadd.f32 %v2794_v10, %v1560_v19 }
 0x199   : > { %v1243_v58 = vpop.f32.mrf.mxu2 }
 0x19a   : > { %1596 = vst.msk [vmem:[%s2799_s19 + $0x58] sm:$0xff] %vm303_vm0, %v2880_v53  ;;  %v1267_v4 = vadd.f32 %v1243_v58, %v1117_v60  ;;  %v1390_v51 = vpop.f32.mrf.mxu3 }
 0x19b   : > { %v1096_v33 = vpop.f32.mrf.mxu1 }
 0x19c   : > { %v1414_v34 = vadd.f32 %v1390_v51, %v1267_v4  ;;  %v1540_v59 = vpop.f32.mrf.mxu0  ;;  %v1118_v17 = vadd.f32 %v1096_v33, %v2769_v14 }
 0x19e   : > { %v1561_v16 = vadd.f32 %v1537_v39, %v1414_v34 }
 0x1a0   : > { %v2887_v11 = vadd.f32 %v2794_v10, %v1561_v16 }
 0x1a1   : > { %v1246_v8 = vpop.f32.mrf.mxu2 }
 0x1a2   : > { %1597 = vst.msk [vmem:[%s2799_s19 + $0x60] sm:$0xff] %vm303_vm0, %v2887_v11  ;;  %v1268_v41 = vadd.f32 %v1246_v8, %v1118_v17  ;;  %v1393_v42 = vpop.f32.mrf.mxu3 }
 0x1a3   : > { %v1099_v57 = vpop.f32.mrf.mxu1 }
 0x1a4   : > { %v1415_v0 = vadd.f32 %v1393_v42, %v1268_v41  ;;  %v1119_v26 = vadd.f32 %v1099_v57, %v2779_v55  ;;  %v1543_v14 = vpop.f32.mrf.mxu0 }
 0x1a6   : > { %v1562_v1 = vadd.f32 %v1540_v59, %v1415_v0 }
 0x1a8   : > { %v2894_v30 = vadd.f32 %v2794_v10, %v1562_v1 }
 0x1a9   : > { %v1249_v28 = vpop.f32.mrf.mxu2 }
 0x1aa   : > { %1598 = vst.msk [vmem:[%s2799_s19 + $0x68] sm:$0xff] %vm303_vm0, %v2894_v30  ;;  %v1269_v62 = vadd.f32 %v1249_v28, %v1119_v26  ;;  %v1396_v18 = vpop.f32.mrf.mxu3 }
 0x1ab   : > { %v1102_v44 = vpop.f32.mrf.mxu1 }
 0x1ac   : > { %v1416_v43 = vadd.f32 %v1396_v18, %v1269_v62  ;;  %v1120_v29 = vadd.f32 %v1102_v44, %v2787_v6  ;;  %v1546_v22 = vpop.f32.mrf.mxu0 }
 0x1ae   : > { %v1563_v63 = vadd.f32 %v1543_v14, %v1416_v43 }
 0x1b0   : > { %v2901_v37 = vadd.f32 %v2794_v10, %v1563_v63 }
 0x1b1   : > { %v1252_v55 = vpop.f32.mrf.mxu2 }
 0x1b2   : > { %1599 = vst.msk [vmem:[%s2799_s19 + $0x70] sm:$0xff] %vm303_vm0, %v2901_v37  ;;  %v1270_v36 = vadd.f32 %v1252_v55, %v1120_v29  ;;  %v1399_v2 = vpop.f32.mrf.mxu3 }
 0x1b4   : > { %v1417_v45 = vadd.f32 %v1399_v2, %v1270_v36 }
 0x1b6   : > { %v1564_v46 = vadd.f32 %v1546_v22, %v1417_v45  ;;  %1604 = sbr.rel (%p2112_p7) target bundleno = 446 (0x1be), region = 36 }
 0x1b8   : > { %v2907_v9 = vadd.f32 %v2794_v10, %v1564_v46 }
 0x1ba   : > { %1600 = vst.msk [vmem:[%s2799_s19 + $0x78] sm:$0xff] %vm303_vm0, %v2907_v9 }
 0x1bb   : > { %vm1605_vm1 = vcmask 57344   ;;  %v2201_v6 = vmov 0.0  }
 0x1bc   : > { %1606 = vst.msk [vmem:[%s2287_s14] sm:$0x1] %vm1605_vm1, %v2201_v6 }
 0x1bd   : > { %1607 = vst.msk [vmem:[%s2293_s17] sm:$0x1] %vm1605_vm1, %v2201_v6 }
 0x1be PF: > { %v1609_v32 = vsel %vm303_vm0, %v2803_v23, 0.0  ;;  %v1610_v10 = vsel %vm303_vm0, %v2810_v56, 0.0  ;;  %v1612_v25 = vsel %vm303_vm0, %v2817_v35, 0.0  ;;  %v1614_v7 = vsel %vm303_vm0, %v2824_v5, 0.0 }
 0x1bf   : > { %v1611_v21 = vadd.f32 %v1610_v10, %v1609_v32  ;;  %v1616_v48 = vsel %vm303_vm0, %v2831_v54, 0.0  ;;  %v1650_v15 = vmul.f32 %v2803_v23, %v2803_v23  ;;  %v1651_v24 = vmul.f32 %v2810_v56, %v2810_v56 }
 0x1c0   : > { %v1652_v40 = vmul.f32 %v2817_v35, %v2817_v35  ;;  %v1618_v49 = vsel %vm303_vm0, %v2838_v52, 0.0  ;;  %v1653_v61 = vmul.f32 %v2824_v5, %v2824_v5  ;;  %v1620_v27 = vsel %vm303_vm0, %v2845_v20, 0.0 }
 0x1c1   : > { %v1613_v47 = vadd.f32 %v1612_v25, %v1611_v21  ;;  %v1654_v39 = vmul.f32 %v2831_v54, %v2831_v54  ;;  %v1666_v19 = vsel %vm303_vm0, %v1650_v15, 0.0  ;;  %v1667_v56 = vsel %vm303_vm0, %v1651_v24, 0.0 }
 0x1c2   : > { %v1669_v35 = vsel %vm303_vm0, %v1652_v40, 0.0  ;;  %v1622_v60 = vsel %vm303_vm0, %v2852_v3, 0.0  ;;  %v1668_v58 = vadd.f32 %v1667_v56, %v1666_v19  ;;  %v1655_v5 = vmul.f32 %v2838_v52, %v2838_v52 }
 0x1c3   : > { %v1615_v38 = vadd.f32 %v1614_v7, %v1613_v47  ;;  %v1671_v51 = vsel %vm303_vm0, %v1653_v61, 0.0  ;;  %v1624_v54 = vsel %vm303_vm0, %v2859_v12, 0.0  ;;  %v1656_v16 = vmul.f32 %v2845_v20, %v2845_v20 }
 0x1c4   : > { %v1670_v33 = vadd.f32 %v1669_v35, %v1668_v58  ;;  %v1673_v59 = vsel %vm303_vm0, %v1654_v39, 0.0  ;;  %v1626_v17 = vsel %vm303_vm0, %v2866_v31, 0.0  ;;  %v1657_v52 = vmul.f32 %v2852_v3, %v2852_v3 }
 0x1c5   : > { %v1617_v50 = vadd.f32 %v1616_v48, %v1615_v38  ;;  %v1675_v42 = vsel %vm303_vm0, %v1655_v5, 0.0  ;;  %v1628_v57 = vsel %vm303_vm0, %v2873_v13, 0.0  ;;  %v1658_v20 = vmul.f32 %v2859_v12, %v2859_v12 }
 0x1c6   : > { %v1672_v8 = vadd.f32 %v1671_v51, %v1670_v33  ;;  %v1677_v26 = vsel %vm303_vm0, %v1656_v16, 0.0  ;;  %v1630_v28 = vsel %vm303_vm0, %v2880_v53, 0.0  ;;  %v1659_v3 = vmul.f32 %v2866_v31, %v2866_v31 }
 0x1c7   : > { %v1619_v23 = vadd.f32 %v1618_v49, %v1617_v50  ;;  %v1679_v18 = vsel %vm303_vm0, %v1657_v52, 0.0  ;;  %v1632_v43 = vsel %vm303_vm0, %v2887_v11, 0.0  ;;  %v1660_v12 = vmul.f32 %v2873_v13, %v2873_v13 }
 0x1c8   : > { %v1674_v0 = vadd.f32 %v1673_v59, %v1672_v8  ;;  %v1681_v29 = vsel %vm303_vm0, %v1658_v20, 0.0  ;;  %v1634_v55 = vsel %vm303_vm0, %v2894_v30, 0.0  ;;  %v1661_v31 = vmul.f32 %v2880_v53, %v2880_v53 }
 0x1c9   : > { %v1621_v4 = vadd.f32 %v1620_v27, %v1619_v23  ;;  %v1683_v22 = vsel %vm303_vm0, %v1659_v3, 0.0  ;;  %v1636_v45 = vsel %vm303_vm0, %v2901_v37, 0.0  ;;  %v1662_v13 = vmul.f32 %v2887_v11, %v2887_v11 }
 0x1ca   : > { %v1676_v14 = vadd.f32 %v1675_v42, %v1674_v0  ;;  %v1685_v32 = vsel %vm303_vm0, %v1660_v12, 0.0  ;;  %v1638_v10 = vsel %vm303_vm0, %v2907_v9, 0.0  ;;  %v1663_v53 = vmul.f32 %v2894_v30, %v2894_v30 }
 0x1cb   : > { %v1623_v34 = vadd.f32 %v1622_v60, %v1621_v4  ;;  %v1687_v7 = vsel %vm303_vm0, %v1661_v31, 0.0  ;;  %v1664_v38 = vmul.f32 %v2901_v37, %v2901_v37  ;;  %v1689_v11 = vsel %vm303_vm0, %v1662_v13, 0.0  ;;  %v1608_v60 = vld [vmem:[%s2287_s14] sm:$0x1] }
 0x1cc   : > { %v1678_v44 = vadd.f32 %v1677_v26, %v1676_v14  ;;  %v1665_v40 = vmul.f32 %v2907_v9, %v2907_v9  ;;  %v1691_v49 = vsel %vm303_vm0, %v1663_v53, 0.0  ;;  %vm1647_vm2 = vcmask 57344  }
 0x1cd   : > { %v1625_v41 = vadd.f32 %v1624_v54, %v1623_v34  ;;  %v1693_v30 = vsel %vm303_vm0, %v1664_v38, 0.0  ;;  %v1649_v34 = vld [vmem:[%s2293_s17] sm:$0x1] }
 0x1ce   : > { %v1680_v36 = vadd.f32 %v1679_v18, %v1678_v44  ;;  %v1695_v37 = vsel %vm303_vm0, %v1665_v40, 0.0 }
 0x1cf   : > { %v1627_v1 = vadd.f32 %v1626_v17, %v1625_v41 }
 0x1d0   : > { %v1682_v46 = vadd.f32 %v1681_v29, %v1680_v36 }
 0x1d1   : > { %v1629_v62 = vadd.f32 %v1628_v57, %v1627_v1 }
 0x1d2   : > { %v1684_v25 = vadd.f32 %v1683_v22, %v1682_v46 }
 0x1d3   : > { %v1631_v63 = vadd.f32 %v1630_v28, %v1629_v62 }
 0x1d4   : > { %v1686_v47 = vadd.f32 %v1685_v32, %v1684_v25 }
 0x1d5   : > { %v1633_v2 = vadd.f32 %v1632_v43, %v1631_v63 }
 0x1d6   : > { %v1688_v15 = vadd.f32 %v1687_v7, %v1686_v47 }
 0x1d7   : > { %v1635_v6 = vadd.f32 %v1634_v55, %v1633_v2 }
 0x1d8   : > { %v1690_v50 = vadd.f32 %v1689_v11, %v1688_v15 }
 0x1d9   : > { %v1637_v21 = vadd.f32 %v1636_v45, %v1635_v6 }
 0x1da   : > { %v1692_v27 = vadd.f32 %v1691_v49, %v1690_v50 }
 0x1db   : > { %v1639_v48 = vadd.f32 %v1638_v10, %v1637_v21 }
 0x1dc   : > { %v1694_v23 = vadd.f32 %v1693_v30, %v1692_v27 }
 0x1dd   : > { %v1640_v24 = vrot.slane %v1639_v48, 4 }
 0x1de   : > { %v1696_v56 = vadd.f32 %v1695_v37, %v1694_v23 }
 0x1df   : > { %v1641_v61 = vadd.f32 %v1640_v24, %v1639_v48 }
 0x1e0   : > { %v1697_v58 = vrot.slane %v1696_v56, 4 }
 0x1e1   : > { %v1642_v39 = vrot.slane %v1641_v61, 2 }
 0x1e2   : > { %v1698_v4 = vadd.f32 %v1697_v58, %v1696_v56 }
 0x1e3   : > { %v1643_v19 = vadd.f32 %v1642_v39, %v1641_v61 }
 0x1e4   : > { %v1699_v51 = vrot.slane %v1698_v4, 2 }
 0x1e5   : > { %v1644_v35 = vrot.slane %v1643_v19, 1 }
 0x1e6   : > { %v1700_v54 = vadd.f32 %v1699_v51, %v1698_v4 }
 0x1e7   : > { %v1645_v9 = vadd.f32 %v1644_v35, %v1643_v19 }
 0x1e8   : > { %v1701_v33 = vrot.slane %v1700_v54, 1 }
 0x1e9   : > { %v1646_v5 = vadd.f32 %v1645_v9, %v1608_v60 }
 0x1ea   : > { %v1702_v16 = vadd.f32 %v1701_v33, %v1700_v54 }
 0x1eb   : > { %1648 = vst.msk [vmem:[%s2287_s14] sm:$0x1] %vm1647_vm2, %v1646_v5 }
 0x1ec   : > { %v1703_v59 = vadd.f32 %v1702_v16, %v1649_v34 }
 0x1ee   : > { %1704 = vst.msk [vmem:[%s2293_s17] sm:$0x1] %vm1647_vm2, %v1703_v59 }
 0x1ef PF: > { %s16_s22 = sadd.s32 1, %s2199_s22   ;;  %s3029_s18 = smov %s2191_s20 }
 0x1f0   : > { %p13_p8 = scmp.ge.s32.totalorder %s16_s22, 6   ;;  %s3030_s19 = smov %s2195_s21 }
 0x1f1   : > { %s3031_s20 = smov %s3034_s23  ;;  %s3032_s21 = smov %s3038_s24 }
 0x1f2   :  { %15 = sbr.rel (!%p13_p8) target bundleno = 3 (0x3), region = 101 }

// kernel: upsample_forward.18
= control target key start
LH: loop header
LB: loop body
LE: loop exit
PB: predicated region body
PF: predicated region fallthrough
CT: control target
= control target key end

     0   :  { %s606_s18 = smov 0   ;;  %s608_s19 = smov 0   ;;  %s764_s0 = inlined_call_operand.vmem [shape: f32[2,256,4], index: 0, kind: input, shape index: {}]   ;;  %s765_s1 = inlined_call_operand.vmem [shape: f32[1,1,4], index: 1, kind: input, shape index: {}]   ;;  %s766_s2 = inlined_call_operand.vmem [shape: f32[1,1,4], index: 2, kind: input, shape index: {}]   ;;  %s767_s3 = inlined_call_operand.vmem [shape: f32[1,4], index: 3, kind: input, shape index: {}]   ;;  %s768_s4 = inlined_call_operand.vmem [shape: f32[1,4], index: 4, kind: input, shape index: {}]   ;;  %s769_s5 = inlined_call_operand.vmem [shape: f32[2,256,4], index: 5, kind: output, shape index: {}]  }
   0x1   :  { %s610_s20 = smov 0   ;;  %s612_s21 = smov 0  }
   0x2   :  { %s614_s22 = smov 0  }
   0x3 LB: > { %s24_s23 = sadd.s32 1, %s566_s20  ;;  %s27_s24 = sadd.s32 1, %s570_s21  ;;  %s574_s22 = sphi %s614_s22, %s15_s22   ;;  %s570_s21 = sphi %s612_s21, %s773_s21   ;;  %s566_s20 = sphi %s610_s20, %s772_s20   ;;  %s562_s19 = sphi %s608_s19, %s771_s19   ;;  %s558_s18 = sphi %s606_s18, %s770_s18  }
   0x4   : > { %p25_p0 = scmp.ge.s32.totalorder %s24_s23, 2  ;;  %p484_p1 = scmp.ge.s32.totalorder %s574_s22, 1 }
   0x5   : > { %p208_p2 = scmp.lt.s32.totalorder %s574_s22, 5 }
   0x6   : > { %s775_s23 = smov (%p25_p0, %s24_s23), 0  ;;  %s777_s24 = smov (!%p25_p0, %s27_s24), %s570_s21 }
   0x7   : > { %p209_p3 = pnand %p484_p1, %p208_p2  ;;  %p29_p4 = scmp.ge.s32.totalorder %s777_s24, 2 }
   0x8   : > { %s485_s29 = sshll.u32 (!%p209_p3), %s558_s18, 4  ;;  %p245_p5 = scmp.lt.s32.totalorder (!%p209_p3), %s562_s19, 1 }
   0x9   : > { %s779_s24 = smov (%p29_p4, %s777_s24), 0  ;;  %212 = sbr.rel (%p209_p3) target bundleno = 67 (0x43), region = 40 }
   0xa   : > { %p247_p6 = scmp.lt.s32.totalorder (!%p209_p3), %s485_s29, 31 }
   0xe   : > { %v280_v0 = vld [vmem:[%s765_s1] sm:$0x1]  ;;  %s781_s19 = smov (!%p245_p5, %s562_s19), 1  ;;  %s783_s29 = smov (!%p247_p6, %s485_s29), 31  ;;  %vm373_vm3 = vcmask 31744  }
   0xf   : > { %v282_v1 = vld [vmem:[%s766_s2] sm:$0x1]  ;;  %v281_v2 = vmul.f32 0.001953125, %v280_v0  ;;  %s486_s30 = sshll.u32 %s781_s19, 5 }
  0x10   : > { %v283_v3 = vmul.f32 0.001953125, %v282_v1  ;;  %s642_s6 = sadd.s32 %s486_s30, %s783_s29  ;;  %v297_v12 = vld [vmem:[%s767_s3] sm:$0x1] }
  0x11   : > { %v284_v4 = vmul.f32 %v281_v2, %v281_v2  ;;  %s487_s7 = sshll.u32 %s642_s6, 3  ;;  %v655_v13 = vperm.slane %v281_v2, 0  ;;  %v681_v39 = vld [vmem:[%s768_s4] ss:$0 sm:$0xff] }
  0x12   : > { %s650_s10 = scalar_lea.vmem %s764_s0, %s487_s7  ;;  %s700_s17 = scalar_lea.vmem %s769_s5, %s487_s7 }
  0x13   : > { %v285_v5 = vsub.f32 %v283_v3, %v284_v4  ;;  %v264_v14 = vld [vmem:[%s650_s10] sm:$0xff]  ;;  %v265_v15 = vld [vmem:[%s650_s10 + $0x8] sm:$0xff]  ;;  %v266_v17 = vld [vmem:[%s650_s10 + $0x10] sm:$0xff] }
  0x14   : > { %v267_v18 = vld [vmem:[%s650_s10 + $0x18] sm:$0xff]  ;;  %v268_v19 = vld [vmem:[%s650_s10 + $0x20] sm:$0xff]  ;;  %v269_v20 = vld [vmem:[%s650_s10 + $0x28] sm:$0xff]  ;;  %v302_v24 = vsub.f32 %v264_v14, %v655_v13  ;;  %v303_v28 = vsub.f32 %v265_v15, %v655_v13  ;;  %v304_v29 = vsub.f32 %v266_v17, %v655_v13 }
  0x15   : > { %v286_v6 = vadd.f32 1e-05, %v285_v5  ;;  %v270_v21 = vld [vmem:[%s650_s10 + $0x30] sm:$0xff]  ;;  %v271_v22 = vld [vmem:[%s650_s10 + $0x38] sm:$0xff]  ;;  %v272_v25 = vld [vmem:[%s650_s10 + $0x40] sm:$0xff]  ;;  %v305_v30 = vsub.f32 %v267_v18, %v655_v13  ;;  %v306_v34 = vsub.f32 %v268_v19, %v655_v13  ;;  %v307_v35 = vsub.f32 %v269_v20, %v655_v13 }
  0x16   : > { %v273_v26 = vld [vmem:[%s650_s10 + $0x48] sm:$0xff]  ;;  %v274_v31 = vld [vmem:[%s650_s10 + $0x50] sm:$0xff]  ;;  %v275_v32 = vld [vmem:[%s650_s10 + $0x58] sm:$0xff]  ;;  %v308_v36 = vsub.f32 %v270_v21, %v655_v13  ;;  %v309_v37 = vsub.f32 %v271_v22, %v655_v13  ;;  %v310_v40 = vsub.f32 %v272_v25, %v655_v13 }
  0x17   : > { %534 = vrsqrt.f32 %v286_v6  ;;  %vm293_vm0 = vweird.f32 %v286_v6  ;;  %v276_v33 = vld [vmem:[%s650_s10 + $0x60] sm:$0xff]  ;;  %v311_v41 = vsub.f32 %v273_v26, %v655_v13  ;;  %v312_v42 = vsub.f32 %v274_v31, %v655_v13  ;;  %v277_v49 = vld [vmem:[%s650_s10 + $0x68] sm:$0xff]  ;;  %v278_v54 = vld [vmem:[%s650_s10 + $0x70] sm:$0xff] }
  0x18   : > { %v313_v43 = vsub.f32 %v275_v32, %v655_v13  ;;  %v314_v44 = vsub.f32 %v276_v33, %v655_v13  ;;  %v279_v59 = vld [vmem:[%s650_s10 + $0x78] sm:$0xff]  ;;  %v315_v63 = vsub.f32 %v277_v49, %v655_v13  ;;  %v316_v3 = vsub.f32 %v278_v54, %v655_v13 }
  0x1d   : > { %v535_v7 = vpop.eup %534 }
  0x1e   : > { %v288_v8 = vmul.f32 %v535_v7, %v286_v6  ;;  %vm294_vm1 = vweird.f32 %v535_v7 }
  0x1f   : > { %vm295_vm2 = vmor %vm293_vm0, %vm294_vm1 }
  0x20   : > { %v289_v9 = vmul.f32 %v535_v7, %v288_v8 }
  0x22   : > { %v290_v10 = vmul.f32 0.5, %v289_v9 }
  0x24   : > { %v291_v11 = vsub.f32 1.5, %v290_v10 }
  0x26   : > { %v292_v16 = vmul.f32 %v535_v7, %v291_v11 }
  0x28   : > { %v296_v23 = vsel %vm295_vm2, %v535_v7, %v292_v16  ;;  %v317_v7 = vsub.f32 %v279_v59, %v655_v13 }
  0x29   : > { %v298_v27 = vmul.f32 %v297_v12, %v296_v23 }
  0x2b   : > { %v319_v38 = vperm.slane %v298_v27, 0 }
  0x2d   : > { %v321_v45 = vmul.f32 %v319_v38, %v302_v24  ;;  %v322_v46 = vmul.f32 %v319_v38, %v303_v28  ;;  %v323_v47 = vmul.f32 %v319_v38, %v304_v29  ;;  %v324_v48 = vmul.f32 %v319_v38, %v305_v30 }
  0x2e   : > { %v325_v50 = vmul.f32 %v319_v38, %v306_v34  ;;  %v326_v51 = vmul.f32 %v319_v38, %v307_v35  ;;  %v327_v52 = vmul.f32 %v319_v38, %v308_v36  ;;  %v328_v53 = vmul.f32 %v319_v38, %v309_v37 }
  0x2f   : > { %v341_v55 = vadd.f32 %v681_v39, %v321_v45  ;;  %v342_v56 = vadd.f32 %v681_v39, %v322_v46  ;;  %v343_v57 = vadd.f32 %v681_v39, %v323_v47  ;;  %v344_v58 = vadd.f32 %v681_v39, %v324_v48 }
  0x30   : > { %v345_v60 = vadd.f32 %v681_v39, %v325_v50  ;;  %v346_v61 = vadd.f32 %v681_v39, %v326_v51  ;;  %v347_v62 = vadd.f32 %v681_v39, %v327_v52  ;;  %v348_v6 = vadd.f32 %v681_v39, %v328_v53 }
  0x31   : > { %v357_v0 = vmax.f32 %v341_v55, 0.0  ;;  %v358_v1 = vmax.f32 %v342_v56, 0.0  ;;  %v359_v2 = vmax.f32 %v343_v57, 0.0  ;;  %v360_v4 = vmax.f32 %v344_v58, 0.0 }
  0x32   : > { %v361_v5 = vmax.f32 %v345_v60, 0.0  ;;  %v329_v8 = vmul.f32 %v319_v38, %v310_v40  ;;  %v330_v9 = vmul.f32 %v319_v38, %v311_v41  ;;  %v331_v10 = vmul.f32 %v319_v38, %v312_v42 }
  0x33   : > { %374 = vst.msk [vmem:[%s700_s17] sm:$0xff] %vm373_vm3, %v357_v0  ;;  %v332_v11 = vmul.f32 %v319_v38, %v313_v43  ;;  %v362_v12 = vmax.f32 %v346_v61, 0.0  ;;  %v363_v14 = vmax.f32 %v347_v62, 0.0  ;;  %v333_v15 = vmul.f32 %v319_v38, %v314_v44 }
  0x34   : > { %375 = vst.msk [vmem:[%s700_s17 + $0x8] sm:$0xff] %vm373_vm3, %v358_v1  ;;  %v334_v16 = vmul.f32 %v319_v38, %v315_v63  ;;  %v349_v13 = vadd.f32 %v681_v39, %v329_v8  ;;  %v350_v17 = vadd.f32 %v681_v39, %v330_v9  ;;  %v351_v18 = vadd.f32 %v681_v39, %v331_v10 }
  0x35   : > { %376 = vst.msk [vmem:[%s700_s17 + $0x10] sm:$0xff] %vm373_vm3, %v359_v2  ;;  %v335_v19 = vmul.f32 %v319_v38, %v316_v3  ;;  %v364_v20 = vmax.f32 %v348_v6, 0.0  ;;  %v352_v21 = vadd.f32 %v681_v39, %v332_v11  ;;  %v336_v22 = vmul.f32 %v319_v38, %v317_v7 }
  0x36   : > { %377 = vst.msk [vmem:[%s700_s17 + $0x18] sm:$0xff] %vm373_vm3, %v360_v4  ;;  %v365_v23 = vmax.f32 %v349_v13, 0.0  ;;  %v353_v24 = vadd.f32 %v681_v39, %v333_v15  ;;  %v366_v25 = vmax.f32 %v350_v17, 0.0  ;;  %v354_v26 = vadd.f32 %v681_v39, %v334_v16 }
  0x37   : > { %378 = vst.msk [vmem:[%s700_s17 + $0x20] sm:$0xff] %vm373_vm3, %v361_v5  ;;  %v367_v27 = vmax.f32 %v351_v18, 0.0  ;;  %v355_v28 = vadd.f32 %v681_v39, %v335_v19  ;;  %v368_v29 = vmax.f32 %v352_v21, 0.0  ;;  %v356_v30 = vadd.f32 %v681_v39, %v336_v22 }
  0x38   : > { %379 = vst.msk [vmem:[%s700_s17 + $0x28] sm:$0xff] %vm373_vm3, %v362_v12  ;;  %v369_v31 = vmax.f32 %v353_v24, 0.0  ;;  %v370_v32 = vmax.f32 %v354_v26, 0.0 }
  0x39   : > { %380 = vst.msk [vmem:[%s700_s17 + $0x30] sm:$0xff] %vm373_vm3, %v363_v14  ;;  %v371_v33 = vmax.f32 %v355_v28, 0.0  ;;  %v372_v34 = vmax.f32 %v356_v30, 0.0 }
  0x3a   : > { %381 = vst.msk [vmem:[%s700_s17 + $0x38] sm:$0xff] %vm373_vm3, %v364_v20 }
  0x3b   : > { %382 = vst.msk [vmem:[%s700_s17 + $0x40] sm:$0xff] %vm373_vm3, %v365_v23 }
  0x3c   : > { %383 = vst.msk [vmem:[%s700_s17 + $0x48] sm:$0xff] %vm373_vm3, %v366_v25 }
  0x3d   : > { %384 = vst.msk [vmem:[%s700_s17 + $0x50] sm:$0xff] %vm373_vm3, %v367_v27 }
  0x3e   : > { %385 = vst.msk [vmem:[%s700_s17 + $0x58] sm:$0xff] %vm373_vm3, %v368_v29 }
  0x3f   : > { %386 = vst.msk [vmem:[%s700_s17 + $0x60] sm:$0xff] %vm373_vm3, %v369_v31 }
  0x40   : > { %387 = vst.msk [vmem:[%s700_s17 + $0x68] sm:$0xff] %vm373_vm3, %v370_v32 }
  0x41   : > { %388 = vst.msk [vmem:[%s700_s17 + $0x70] sm:$0xff] %vm373_vm3, %v371_v33 }
  0x42   : > { %389 = vst.msk [vmem:[%s700_s17 + $0x78] sm:$0xff] %vm373_vm3, %v372_v34 }
  0x43 PF: > { %s15_s22 = sadd.s32 1, %s574_s22   ;;  %s770_s18 = smov %s566_s20 }
  0x44   : > { %p12_p7 = scmp.ge.s32.totalorder %s15_s22, 6   ;;  %s771_s19 = smov %s570_s21 }
  0x45   : > { %s772_s20 = smov %s775_s23  ;;  %s773_s21 = smov %s779_s24 }
  0x46   :  { %14 = sbr.rel (!%p12_p7) target bundleno = 3 (0x3), region = 70 }

// kernel: upsample_forward.17
= control target key start
LH: loop header
LB: loop body
LE: loop exit
PB: predicated region body
PF: predicated region fallthrough
CT: control target
= control target key end

     0   :  { %s2233_s18 = smov 0   ;;  %s2235_s19 = smov 0   ;;  %s3015_s0 = inlined_call_operand.vmem [shape: f32[2,18,18,8], index: 0, kind: input, shape index: {}]   ;;  %s3016_s1 = inlined_call_operand.vmem [shape: f32[9,8,4], index: 1, kind: input, shape index: {}]   ;;  %s3017_s2 = inlined_call_operand.vmem [shape: f32[1,4], index: 2, kind: input, shape index: {}]   ;;  %s3018_s3 = inlined_call_operand.vmem [shape: f32[2,256,4], index: 3, kind: output, shape index: {0}]   ;;  %s3019_s4 = inlined_call_operand.vmem [shape: f32[2,1,4], index: 4, kind: output, shape index: {1}]   ;;  %s3020_s5 = inlined_call_operand.vmem [shape: f32[2,1,4], index: 5, kind: output, shape index: {2}]  }
   0x1   :  { %s2237_s20 = smov 0   ;;  %s2239_s21 = smov 0  }
   0x2   :  { %s2241_s22 = smov 0  }
   0x3 LB: > { %s25_s23 = sadd.s32 1, %s2192_s20  ;;  %s28_s24 = sadd.s32 1, %s2196_s21  ;;  %s2200_s22 = sphi %s2241_s22, %s16_s22   ;;  %s2196_s21 = sphi %s2239_s21, %s3033_s21   ;;  %s2192_s20 = sphi %s2237_s20, %s3032_s20   ;;  %s2188_s19 = sphi %s2235_s19, %s3031_s19   ;;  %s2184_s18 = sphi %s2233_s18, %s3030_s18  }
   0x4   : > { %p26_p0 = scmp.ge.s32.totalorder %s25_s23, 2  ;;  %p1854_p1 = scmp.ge.s32.totalorder %s2200_s22, 1 }
   0x5   : > { %p206_p2 = scmp.lt.s32.totalorder %s2200_s22, 5 }
   0x6   : > { %s3035_s23 = smov (%p26_p0, %s25_s23), 0  ;;  %s3037_s24 = smov (!%p26_p0, %s28_s24), %s2196_s21 }
   0x7   : > { %p207_p3 = pnand %p1854_p1, %p206_p2  ;;  %p30_p4 = scmp.ge.s32.totalorder %s3037_s24, 2 }
   0x9   : > { %s3039_s24 = smov (%p30_p4, %s3037_s24), 0  ;;  %210 = sbr.rel (%p207_p3) target bundleno = 495 (0x1ef), region = 32 }
   0xe   : > { %v1861_v0 = vld [vmem:[%s3016_s1 + $0x8] sm:$0xff]  ;;  %p244_p5 = scmp.lt.s32.totalorder %s2188_s19, 1  ;;  %v1894_v1 = vld [vmem:[%s3016_s1 + $0x10] sm:$0xff]  ;;  %v1929_v2 = vld [vmem:[%s3016_s1 + $0x18] sm:$0xff]  ;;  %s1860_s10 = smul.u32 192, %s2184_s18  ;;  %vm303_vm0 = vcmask 64512  }
   0xf   : > { %2116 = vmatpush.msra.mxu1 %v1861_v0  ;;  %2117 = vmatpush.msra.mxu2 %v1861_v0  ;;  %v284_v3 = vld [vmem:[%s3016_s1] sm:$0xff]  ;;  %v2030_v9 = vld [vmem:[%s3016_s1 + $0x30] sm:$0xff]  ;;  %v2063_v12 = vld [vmem:[%s3016_s1 + $0x38] sm:$0xff]  ;;  %s1856_s12 = sshll.u32 %s2184_s18, 4  ;;  %vm1585_vm1 = vcmask 31744   ;;  %p2113_p7 = scmp.ne.s32.totalorder %s2184_s18, 0 }
  0x10   : > { %s3041_s19 = smov (!%p244_p5, %s2188_s19), 1  ;;  %2118 = vmatpush.msra.mxu3 %v1861_v0  ;;  %v1962_v4 = vld [vmem:[%s3016_s1 + $0x20] sm:$0xff]  ;;  %367 = vmatpush.msra.mxu0 %v1861_v0  ;;  %v1995_v15 = vld [vmem:[%s3016_s1 + $0x28] sm:$0xff]  ;;  %p252_p6 = scmp.lt.s32.totalorder %s1856_s12, 31 }
  0x11   : > { %611 = vmatpush.msrb.mxu2 %v1894_v1  ;;  %480 = vmatpush.msrb.mxu1 %v284_v3  ;;  %s2119_s11 = smul.u32 432, %s3041_s19  ;;  %s2288_s14 = scalar_lea.vmem %s3019_s4, %s3041_s19  ;;  %v2096_v16 = vld [vmem:[%s3016_s1 + $0x40] sm:$0xff] }
  0x12   : > { %761 = vmatpush.msrb.mxu3 %v1929_v2  ;;  %s2294_s17 = scalar_lea.vmem %s3020_s5, %s3041_s19  ;;  %908 = vmatpush.msrb.mxu0 %v1962_v4  ;;  %s3043_s12 = smov (!%p252_p6, %s1856_s12), 31 }
  0x13   : > { %s248_s27 = scalar_lea.vmem %s3015_s0, %s2119_s11  ;;  %s1857_s13 = sshll.u32 %s3041_s19, 5 }
  0x14   : > { %s2299_s28 = scalar_lea.vmem %s248_s27, %s1860_s10  ;;  %s255_s15 = sadd.s32 %s1857_s13, %s3043_s12 }
  0x15   : > { %v2302_v5 = vld [vmem:[%s2299_s28 + $0x31] sm:$0xff]  ;;  %v2305_v6 = vld [vmem:[%s2299_s28 + $0x61] sm:$0xff]  ;;  %v2322_v10 = vld [vmem:[%s2299_s28 + $0x39] sm:$0xff]  ;;  %s1858_s16 = sshll.u32 %s255_s15, 3 }
  0x16   : > { %v2308_v7 = vld [vmem:[%s2299_s28 + $0x91] sm:$0xff]  ;;  %1866 = vmatmul.msk.f32.vlgmr.msra.gmra.mxu1 %vm303_vm0, %v2302_v5  ;;  %1870 = vmatmul.msk.f32.vlgmr.msra.gmra.mxu2 %vm303_vm0, %v2305_v6  ;;  %v285_v8 = vld [vmem:[%s2299_s28 + $0x1] sm:$0xff]  ;;  %v2325_v11 = vld [vmem:[%s2299_s28 + $0x69] sm:$0xff]  ;;  %s2800_s19 = scalar_lea.vmem %s3018_s3, %s1858_s16 }
  0x17   : > { %1874 = vmatmul.msk.f32.vlgmr.msra.gmra.mxu3 %vm303_vm0, %v2308_v7  ;;  %1862 = vmatmul.msk.f32.vlgmr.msra.gmra.mxu0 %vm303_vm0, %v285_v8  ;;  %v2331_v13 = vld [vmem:[%s2299_s28 + $0x99] sm:$0xff]  ;;  %v286_v14 = vld [vmem:[%s2299_s28 + $0x9] sm:$0xff]  ;;  %v2365_v21 = vld [vmem:[%s2299_s28 + $0x51] sm:$0xff] }
  0x18   : > { %1205 = vmatpush.msra.mxu2 %v2030_v9  ;;  %1352 = vmatpush.msra.mxu3 %v2063_v12  ;;  %v2348_v17 = vld [vmem:[%s2299_s28 + $0x49] sm:$0xff]  ;;  %v2351_v18 = vld [vmem:[%s2299_s28 + $0x79] sm:$0xff]  ;;  %v2368_v22 = vld [vmem:[%s2299_s28 + $0x81] sm:$0xff] }
  0x19   : > { %1055 = vmatpush.msra.mxu1 %v1995_v15  ;;  %1499 = vmatpush.msra.mxu0 %v2096_v16  ;;  %v2354_v19 = vld [vmem:[%s2299_s28 + $0xa9] sm:$0xff]  ;;  %v287_v20 = vld [vmem:[%s2299_s28 + $0x19] sm:$0xff]  ;;  %v2371_v23 = vld [vmem:[%s2299_s28 + $0xb1] sm:$0xff] }
  0x1a   : > { %v288_v24 = vld [vmem:[%s2299_s28 + $0x21] sm:$0xff]  ;;  %v1913_v27 = vld [vmem:[%s2299_s28 + $0x18] sm:$0xff]  ;;  %v531_v29 = vld [vmem:[%s2299_s28 + $0xa] sm:$0xff] }
  0x1b   : > { %v268_v25 = vld [vmem:[%s2299_s28] sm:$0xff]  ;;  %v269_v28 = vld [vmem:[%s2299_s28 + $0x8] sm:$0xff]  ;;  %v2399_v32 = vld [vmem:[%s2299_s28 + $0x30] sm:$0xff] }
  0x1c   : > { %v530_v26 = vld [vmem:[%s2299_s28 + $0x2] sm:$0xff]  ;;  %v2396_v31 = vld [vmem:[%s2299_s28 + $0x1a] sm:$0xff]  ;;  %v2422_v35 = vld [vmem:[%s2299_s28 + $0x32] sm:$0xff] }
  0x1d   : > { %v1914_v30 = vld [vmem:[%s2299_s28 + $0x20] sm:$0xff]  ;;  %v2412_v34 = vld [vmem:[%s2299_s28 + $0x38] sm:$0xff]  ;;  %v2425_v36 = vld [vmem:[%s2299_s28 + $0x48] sm:$0xff] }
  0x1e   : > { %1867 = vmatmul.msk.f32.gmra.mxu1 %vm303_vm0, %v2322_v10  ;;  %1871 = vmatmul.msk.f32.gmra.mxu2 %vm303_vm0, %v2325_v11  ;;  %v2409_v33 = vld [vmem:[%s2299_s28 + $0x22] sm:$0xff]  ;;  %v2436_v37 = vld [vmem:[%s2299_s28 + $0x3a] sm:$0xff]  ;;  %v2439_v38 = vld [vmem:[%s2299_s28 + $0x50] sm:$0xff] }
  0x1f   : > { %1875 = vmatmul.msk.f32.gmra.mxu3 %vm303_vm0, %v2331_v13  ;;  %1863 = vmatmul.msk.f32.gmra.mxu0 %vm303_vm0, %v286_v14  ;;  %v2450_v39 = vld [vmem:[%s2299_s28 + $0x4a] sm:$0xff]  ;;  %v2453_v40 = vld [vmem:[%s2299_s28 + $0x60] sm:$0xff]  ;;  %v2464_v41 = vld [vmem:[%s2299_s28 + $0x52] sm:$0xff] }
  0x20   : > { %v2467_v42 = vld [vmem:[%s2299_s28 + $0x68] sm:$0xff]  ;;  %v2481_v44 = vld [vmem:[%s2299_s28 + $0x78] sm:$0xff]  ;;  %v2495_v46 = vld [vmem:[%s2299_s28 + $0x80] sm:$0xff] }
  0x21   : > { %v2478_v43 = vld [vmem:[%s2299_s28 + $0x62] sm:$0xff]  ;;  %v2492_v45 = vld [vmem:[%s2299_s28 + $0x6a] sm:$0xff]  ;;  %v2506_v47 = vld [vmem:[%s2299_s28 + $0x7a] sm:$0xff] }
  0x22   : > { %v2509_v48 = vld [vmem:[%s2299_s28 + $0x90] sm:$0xff]  ;;  %v2520_v49 = vld [vmem:[%s2299_s28 + $0x82] sm:$0xff]  ;;  %v2523_v50 = vld [vmem:[%s2299_s28 + $0x98] sm:$0xff] }
  0x23   : > { %v2536_v52 = vld [vmem:[%s2299_s28 + $0x92] sm:$0xff]  ;;  %v2539_v53 = vld [vmem:[%s2299_s28 + $0xa8] sm:$0xff]  ;;  %v2556_v58 = vld [vmem:[%s2299_s28 + $0x9a] sm:$0xff] }
  0x24   : > { %v2559_v59 = vld [vmem:[%s2299_s28 + $0xb0] sm:$0xff]  ;;  %v2579_v1 = vld [vmem:[%s2299_s28 + $0xc0] sm:$0xff]  ;;  %v2602_v14 = vld [vmem:[%s2299_s28 + $0xc8] sm:$0xff] }
  0x25   : > { %v2576_v0 = vld [vmem:[%s2299_s28 + $0xaa] sm:$0xff]  ;;  %v2582_v3 = vld [vmem:[%s2299_s28 + $0xc1] sm:$0xff]  ;;  %v2599_v12 = vld [vmem:[%s2299_s28 + $0xb2] sm:$0xff] }
  0x26   : > { %1868 = vmatmul.msk.f32.gmra.mxu1 %vm303_vm0, %v2348_v17  ;;  %1872 = vmatmul.msk.f32.gmra.mxu2 %vm303_vm0, %v2351_v18  ;;  %v2605_v16 = vld [vmem:[%s2299_s28 + $0xc9] sm:$0xff] }
  0x27   : > { %1876 = vmatmul.msk.f32.gmra.mxu3 %vm303_vm0, %v2354_v19  ;;  %1864 = vmatmul.msk.f32.gmra.mxu0 %vm303_vm0, %v287_v20  ;;  %3024 = vst [vmem:[#allocation4_spill] sm:$0xff] %v2605_v16 }
  0x2e   : > { %1869 = vmatmul.msk.f32.gmra.mxu1 %vm303_vm0, %v2365_v21  ;;  %1873 = vmatmul.msk.f32.gmra.mxu2 %vm303_vm0, %v2368_v22 }
  0x2f   : > { %1877 = vmatmul.msk.f32.gmra.mxu3 %vm303_vm0, %v2371_v23  ;;  %1865 = vmatmul.msk.f32.gmra.mxu0 %vm303_vm0, %v288_v24 }
  0x36   : > { %1878 = vmatmul.msk.f32.vlgmr.msrb.gmra.mxu1 %vm303_vm0, %v268_v25  ;;  %1895 = vmatmul.msk.f32.vlgmr.msrb.gmra.mxu2 %vm303_vm0, %v530_v26 }
  0x37   : > { %1930 = vmatmul.msk.f32.vlgmr.msrb.gmra.mxu3 %vm303_vm0, %v1913_v27  ;;  %1963 = vmatmul.msk.f32.vlgmr.msrb.gmra.mxu0 %vm303_vm0, %v287_v20 }
  0x3e   : > { %1879 = vmatmul.msk.f32.gmra.mxu1 %vm303_vm0, %v269_v28  ;;  %1896 = vmatmul.msk.f32.gmra.mxu2 %vm303_vm0, %v531_v29 }
  0x3f   : > { %1931 = vmatmul.msk.f32.gmra.mxu3 %vm303_vm0, %v1914_v30  ;;  %1964 = vmatmul.msk.f32.gmra.mxu0 %vm303_vm0, %v288_v24 }
  0x46   : > { %1880 = vmatmul.msk.f32.gmra.mxu1 %vm303_vm0, %v1913_v27  ;;  %1897 = vmatmul.msk.f32.gmra.mxu2 %vm303_vm0, %v2396_v31 }
  0x47   : > { %1932 = vmatmul.msk.f32.gmra.mxu3 %vm303_vm0, %v2399_v32  ;;  %1965 = vmatmul.msk.f32.gmra.mxu0 %vm303_vm0, %v2302_v5 }
  0x4e   : > { %1881 = vmatmul.msk.f32.gmra.mxu1 %vm303_vm0, %v1914_v30  ;;  %1898 = vmatmul.msk.f32.gmra.mxu2 %vm303_vm0, %v2409_v33 }
  0x4f   : > { %1933 = vmatmul.msk.f32.gmra.mxu3 %vm303_vm0, %v2412_v34  ;;  %1966 = vmatmul.msk.f32.gmra.mxu0 %vm303_vm0, %v2322_v10 }
  0x56   : > { %1882 = vmatmul.msk.f32.gmra.mxu1 %vm303_vm0, %v2399_v32  ;;  %1899 = vmatmul.msk.f32.gmra.mxu2 %vm303_vm0, %v2422_v35 }
  0x57   : > { %1934 = vmatmul.msk.f32.gmra.mxu3 %vm303_vm0, %v2425_v36  ;;  %1967 = vmatmul.msk.f32.gmra.mxu0 %vm303_vm0, %v2348_v17 }
  0x5e   : > { %1883 = vmatmul.msk.f32.gmra.mxu1 %vm303_vm0, %v2412_v34  ;;  %1900 = vmatmul.msk.f32.gmra.mxu2 %vm303_vm0, %v2436_v37 }
  0x5f   : > { %1935 = vmatmul.msk.f32.gmra.mxu3 %vm303_vm0, %v2439_v38  ;;  %1968 = vmatmul.msk.f32.gmra.mxu0 %vm303_vm0, %v2365_v21 }
  0x66   : > { %1884 = vmatmul.msk.f32.gmra.mxu1 %vm303_vm0, %v2425_v36  ;;  %1901 = vmatmul.msk.f32.gmra.mxu2 %vm303_vm0, %v2450_v39 }
  0x67   : > { %1936 = vmatmul.msk.f32.gmra.mxu3 %vm303_vm0, %v2453_v40  ;;  %1969 = vmatmul.msk.f32.gmra.mxu0 %vm303_vm0, %v2305_v6 }
  0x6e   : > { %1885 = vmatmul.msk.f32.gmra.mxu1 %vm303_vm0, %v2439_v38  ;;  %1902 = vmatmul.msk.f32.gmra.mxu2 %vm303_vm0, %v2464_v41 }
  0x6f   : > { %1937 = vmatmul.msk.f32.gmra.mxu3 %vm303_vm0, %v2467_v42  ;;  %1970 = vmatmul.msk.f32.gmra.mxu0 %vm303_vm0, %v2325_v11 }
  0x76   : > { %1886 = vmatmul.msk.f32.gmra.mxu1 %vm303_vm0, %v2453_v40  ;;  %1903 = vmatmul.msk.f32.gmra.mxu2 %vm303_vm0, %v2478_v43 }
  0x77   : > { %1938 = vmatmul.msk.f32.gmra.mxu3 %vm303_vm0, %v2481_v44  ;;  %1971 = vmatmul.msk.f32.gmra.mxu0 %vm303_vm0, %v2351_v18 }
  0x7e   : > { %1887 = vmatmul.msk.f32.gmra.mxu1 %vm303_vm0, %v2467_v42  ;;  %1904 = vmatmul.msk.f32.gmra.mxu2 %vm303_vm0, %v2492_v45 }
  0x7f   : > { %1939 = vmatmul.msk.f32.gmra.mxu3 %vm303_vm0, %v2495_v46  ;;  %1972 = vmatmul.msk.f32.gmra.mxu0 %vm303_vm0, %v2368_v22 }
  0x86   : > { %1888 = vmatmul.msk.f32.gmra.mxu1 %vm303_vm0, %v2481_v44  ;;  %1905 = vmatmul.msk.f32.gmra.mxu2 %vm303_vm0, %v2506_v47 }
  0x87   : > { %1940 = vmatmul.msk.f32.gmra.mxu3 %vm303_vm0, %v2509_v48  ;;  %1973 = vmatmul.msk.f32.gmra.mxu0 %vm303_vm0, %v2308_v7 }
  0x8e   : > { %1889 = vmatmul.msk.f32.gmra.mxu1 %vm303_vm0, %v2495_v46  ;;  %1906 = vmatmul.msk.f32.gmra.mxu2 %vm303_vm0, %v2520_v49 }
  0x8f   : > { %1941 = vmatmul.msk.f32.gmra.mxu3 %vm303_vm0, %v2523_v50  ;;  %1974 = vmatmul.msk.f32.gmra.mxu0 %vm303_vm0, %v2331_v13 }
  0x93   : > { %v2533_v51 = vpop.f32.mrf.mxu1 }
  0x94   : > { %v369_v54 = vpop.f32.mrf.mxu0 }
  0x96   : > { %1890 = vmatmul.msk.f32.gmra.mxu1 %vm303_vm0, %v2509_v48  ;;  %1907 = vmatmul.msk.f32.gmra.mxu2 %vm303_vm0, %v2536_v52 }
  0x97   : > { %1942 = vmatmul.msk.f32.gmra.mxu3 %vm303_vm0, %v2539_v53  ;;  %1975 = vmatmul.msk.f32.gmra.mxu0 %vm303_vm0, %v2354_v19 }
  0x99   : > { %v2549_v55 = vpop.f32.mrf.mxu2 }
  0x9a   : > { %v2551_v56 = vpop.f32.mrf.mxu3 }
  0x9b   : > { %v2553_v57 = vpop.f32.mrf.mxu1 }
  0x9c   : > { %v372_v60 = vpop.f32.mrf.mxu0 }
  0x9e   : > { %1891 = vmatmul.msk.f32.gmra.mxu1 %vm303_vm0, %v2523_v50  ;;  %1908 = vmatmul.msk.f32.gmra.mxu2 %vm303_vm0, %v2556_v58 }
  0x9f   : > { %1943 = vmatmul.msk.f32.gmra.mxu3 %vm303_vm0, %v2559_v59  ;;  %1976 = vmatmul.msk.f32.gmra.mxu0 %vm303_vm0, %v2371_v23 }
  0xa1   : > { %v2569_v61 = vpop.f32.mrf.mxu2 }
  0xa2   : > { %v2571_v62 = vpop.f32.mrf.mxu3 }
  0xa3   : > { %3022 = vst [vmem:[#allocation2_spill] sm:$0xff] %v2571_v62  ;;  %v2573_v63 = vpop.f32.mrf.mxu1 }
  0xa4   : > { %v375_v2 = vpop.f32.mrf.mxu0 }
  0xa6   : > { %1892 = vmatmul.msk.f32.gmra.mxu1 %vm303_vm0, %v2539_v53  ;;  %1909 = vmatmul.msk.f32.gmra.mxu2 %vm303_vm0, %v2576_v0 }
  0xa7   : > { %1944 = vmatmul.msk.f32.gmra.mxu3 %vm303_vm0, %v2579_v1  ;;  %1977 = vmatmul.msk.f32.gmra.mxu0 %vm303_vm0, %v2582_v3 }
  0xa9   : > { %v2592_v4 = vpop.f32.mrf.mxu2 }
  0xaa   : > { %v2594_v8 = vpop.f32.mrf.mxu3 }
  0xab   : > { %3023 = vst [vmem:[#allocation3_spill] sm:$0xff] %v2594_v8  ;;  %v2596_v9 = vpop.f32.mrf.mxu1 }
  0xac   : > { %v378_v15 = vpop.f32.mrf.mxu0 }
  0xae   : > { %1893 = vmatmul.msk.f32.gmra.mxu1 %vm303_vm0, %v2559_v59  ;;  %1910 = vmatmul.msk.f32.gmra.mxu2 %vm303_vm0, %v2599_v12 }
  0xaf   : > { %1945 = vmatmul.msk.f32.gmra.mxu3 %vm303_vm0, %v2602_v14  ;;  %1978 = vmatmul.msk.f32.gmra.mxu0 %vm303_vm0, %v2605_v16 }
  0xb1   : > { %v2615_v20 = vpop.f32.mrf.mxu2 }
  0xb2   : > { %v2617_v24 = vpop.f32.mrf.mxu3 }
  0xb3   : > { %3025 = vst [vmem:[#allocation5_spill] sm:$0xff] %v2617_v24  ;;  %v482_v25 = vpop.f32.mrf.mxu1 }
  0xb4   : > { %v910_v26 = vpop.f32.mrf.mxu0  ;;  %v483_v27 = vadd.f32 %v482_v25, %v369_v54 }
  0xb6   : > { %1996 = vmatmul.msk.f32.vlgmr.msra.gmra.mxu1 %vm303_vm0, %v2396_v31  ;;  %2031 = vmatmul.msk.f32.vlgmr.msra.gmra.mxu2 %vm303_vm0, %v2399_v32 }
  0xb7   : > { %2064 = vmatmul.msk.f32.vlgmr.msra.gmra.mxu3 %vm303_vm0, %v2302_v5  ;;  %2097 = vmatmul.msk.f32.vlgmr.msra.gmra.mxu0 %vm303_vm0, %v2422_v35 }
  0xb9   : > { %v613_v28 = vpop.f32.mrf.mxu2 }
  0xba   : > { %v661_v29 = vadd.f32 %v613_v28, %v483_v27  ;;  %v763_v30 = vpop.f32.mrf.mxu3 }
  0xbb   : > { %v485_v8 = vpop.f32.mrf.mxu1 }
  0xbc   : > { %v811_v24 = vadd.f32 %v763_v30, %v661_v29  ;;  %v913_v62 = vpop.f32.mrf.mxu0  ;;  %v486_v5 = vadd.f32 %v485_v8, %v372_v60 }
  0xbe   : > { %v2627_v16 = vadd.f32 %v910_v26, %v811_v24  ;;  %1997 = vmatmul.msk.f32.gmra.mxu1 %vm303_vm0, %v2409_v33  ;;  %2032 = vmatmul.msk.f32.gmra.mxu2 %vm303_vm0, %v2412_v34 }
  0xbf   : > { %2065 = vmatmul.msk.f32.gmra.mxu3 %vm303_vm0, %v2322_v10  ;;  %2098 = vmatmul.msk.f32.gmra.mxu0 %vm303_vm0, %v2436_v37 }
  0xc1   : > { %v616_v31 = vpop.f32.mrf.mxu2 }
  0xc2   : > { %v662_v32 = vadd.f32 %v616_v31, %v486_v5  ;;  %v766_v54 = vpop.f32.mrf.mxu3 }
  0xc3   : > { %v488_v25 = vpop.f32.mrf.mxu1 }
  0xc4   : > { %v812_v27 = vadd.f32 %v766_v54, %v662_v32  ;;  %v916_v24 = vpop.f32.mrf.mxu0  ;;  %v489_v10 = vadd.f32 %v488_v25, %v375_v2 }
  0xc6   : > { %v2637_v26 = vadd.f32 %v913_v62, %v812_v27  ;;  %1998 = vmatmul.msk.f32.gmra.mxu1 %vm303_vm0, %v2422_v35  ;;  %2033 = vmatmul.msk.f32.gmra.mxu2 %vm303_vm0, %v2425_v36 }
  0xc7   : > { %2066 = vmatmul.msk.f32.gmra.mxu3 %vm303_vm0, %v2348_v17  ;;  %2099 = vmatmul.msk.f32.gmra.mxu0 %vm303_vm0, %v2450_v39 }
  0xc9   : > { %v619_v33 = vpop.f32.mrf.mxu2 }
  0xca   : > { %v663_v34 = vadd.f32 %v619_v33, %v489_v10  ;;  %v769_v60 = vpop.f32.mrf.mxu3 }
  0xcb   : > { %v491_v8 = vpop.f32.mrf.mxu1 }
  0xcc   : > { %v813_v28 = vadd.f32 %v769_v60, %v663_v34  ;;  %v919_v62 = vpop.f32.mrf.mxu0  ;;  %v492_v17 = vadd.f32 %v491_v8, %v378_v15 }
  0xce   : > { %v2647_v29 = vadd.f32 %v916_v24, %v813_v28  ;;  %1999 = vmatmul.msk.f32.gmra.mxu1 %vm303_vm0, %v2436_v37  ;;  %2034 = vmatmul.msk.f32.gmra.mxu2 %vm303_vm0, %v2439_v38 }
  0xcf   : > { %2067 = vmatmul.msk.f32.gmra.mxu3 %vm303_vm0, %v2365_v21  ;;  %2100 = vmatmul.msk.f32.gmra.mxu0 %vm303_vm0, %v2464_v41 }
  0xd1   : > { %v622_v35 = vpop.f32.mrf.mxu2 }
  0xd2   : > { %v664_v36 = vadd.f32 %v622_v35, %v492_v17  ;;  %v772_v2 = vpop.f32.mrf.mxu3 }
  0xd3   : > { %v494_v30 = vpop.f32.mrf.mxu1 }
  0xd4   : > { %v814_v5 = vadd.f32 %v772_v2, %v664_v36  ;;  %v922_v31 = vpop.f32.mrf.mxu0  ;;  %v495_v21 = vadd.f32 %v494_v30, %v2533_v51 }
  0xd6   : > { %v2657_v32 = vadd.f32 %v919_v62, %v814_v5  ;;  %2000 = vmatmul.msk.f32.gmra.mxu1 %vm303_vm0, %v2450_v39  ;;  %2035 = vmatmul.msk.f32.gmra.mxu2 %vm303_vm0, %v2453_v40 }
  0xd7   : > { %2068 = vmatmul.msk.f32.gmra.mxu3 %vm303_vm0, %v2305_v6  ;;  %2101 = vmatmul.msk.f32.gmra.mxu0 %vm303_vm0, %v2478_v43 }
  0xd9   : > { %v625_v37 = vpop.f32.mrf.mxu2 }
  0xda   : > { %v665_v38 = vadd.f32 %v625_v37, %v495_v21  ;;  %v775_v15 = vpop.f32.mrf.mxu3 }
  0xdb   : > { %v497_v54 = vpop.f32.mrf.mxu1 }
  0xdc   : > { %v815_v25 = vadd.f32 %v775_v15, %v665_v38  ;;  %v925_v27 = vpop.f32.mrf.mxu0  ;;  %v498_v6 = vadd.f32 %v497_v54, %v2553_v57 }
  0xde   : > { %v2668_v24 = vadd.f32 %v922_v31, %v815_v25  ;;  %2001 = vmatmul.msk.f32.gmra.mxu1 %vm303_vm0, %v2464_v41  ;;  %2036 = vmatmul.msk.f32.gmra.mxu2 %vm303_vm0, %v2467_v42 }
  0xdf   : > { %2069 = vmatmul.msk.f32.gmra.mxu3 %vm303_vm0, %v2325_v11  ;;  %2102 = vmatmul.msk.f32.gmra.mxu0 %vm303_vm0, %v2492_v45 }
  0xe1   : > { %v628_v39 = vpop.f32.mrf.mxu2 }
  0xe2   : > { %v666_v40 = vadd.f32 %v628_v39, %v498_v6  ;;  %v778_v51 = vpop.f32.mrf.mxu3 }
  0xe3   : > { %v500_v10 = vpop.f32.mrf.mxu1 }
  0xe4   : > { %v816_v33 = vadd.f32 %v778_v51, %v666_v40  ;;  %v928_v34 = vpop.f32.mrf.mxu0  ;;  %v501_v11 = vadd.f32 %v500_v10, %v2573_v63 }
  0xe6   : > { %v2679_v60 = vadd.f32 %v925_v27, %v816_v33  ;;  %2002 = vmatmul.msk.f32.gmra.mxu1 %vm303_vm0, %v2478_v43  ;;  %2037 = vmatmul.msk.f32.gmra.mxu2 %vm303_vm0, %v2481_v44 }
  0xe7   : > { %2070 = vmatmul.msk.f32.gmra.mxu3 %vm303_vm0, %v2351_v18  ;;  %2103 = vmatmul.msk.f32.gmra.mxu0 %vm303_vm0, %v2506_v47 }
  0xe9   : > { %v631_v41 = vpop.f32.mrf.mxu2 }
  0xea   : > { %v667_v42 = vadd.f32 %v631_v41, %v501_v11  ;;  %v781_v57 = vpop.f32.mrf.mxu3 }
  0xeb   : > { %v503_v8 = vpop.f32.mrf.mxu1 }
  0xec   : > { %v817_v28 = vadd.f32 %v781_v57, %v667_v42  ;;  %v931_v62 = vpop.f32.mrf.mxu0  ;;  %v504_v18 = vadd.f32 %v503_v8, %v2596_v9 }
  0xee   : > { %v2690_v17 = vadd.f32 %v928_v34, %v817_v28  ;;  %2003 = vmatmul.msk.f32.gmra.mxu1 %vm303_vm0, %v2492_v45  ;;  %2038 = vmatmul.msk.f32.gmra.mxu2 %vm303_vm0, %v2495_v46  ;;  %v2092_v34 = vld [vmem:[%s2299_s28 + $0xc2] sm:$0xff] }
  0xef   : > { %2071 = vmatmul.msk.f32.gmra.mxu3 %vm303_vm0, %v2368_v22  ;;  %2104 = vmatmul.msk.f32.gmra.mxu0 %vm303_vm0, %v2520_v49 }
  0xf1   : > { %v634_v43 = vpop.f32.mrf.mxu2 }
  0xf2   : > { %v668_v44 = vadd.f32 %v634_v43, %v504_v18  ;;  %v784_v63 = vpop.f32.mrf.mxu3 }
  0xf3   : > { %v506_v35 = vpop.f32.mrf.mxu1 }
  0xf4   : > { %v818_v36 = vadd.f32 %v784_v63, %v668_v44  ;;  %v934_v2 = vpop.f32.mrf.mxu0  ;;  %v507_v22 = vadd.f32 %v506_v35, %v2549_v55  ;;  %v2028_v44 = vld [vmem:[%s2299_s28 + $0xd8] sm:$0xff] }
  0xf5   : > { %v2061_v35 = vld [vmem:[%s2299_s28 + $0xd9] sm:$0xff] }
  0xf6   : > { %v2701_v30 = vadd.f32 %v931_v62, %v818_v36  ;;  %2004 = vmatmul.msk.f32.gmra.mxu1 %vm303_vm0, %v2506_v47  ;;  %2039 = vmatmul.msk.f32.gmra.mxu2 %vm303_vm0, %v2509_v48  ;;  %v2094_v36 = vld [vmem:[%s2299_s28 + $0xda] sm:$0xff] }
  0xf7   : > { %2072 = vmatmul.msk.f32.gmra.mxu3 %vm303_vm0, %v2308_v7  ;;  %2105 = vmatmul.msk.f32.gmra.mxu0 %vm303_vm0, %v2536_v52 }
  0xf9   : > { %v637_v45 = vpop.f32.mrf.mxu2 }
  0xfa   : > { %v669_v46 = vadd.f32 %v637_v45, %v507_v22  ;;  %v787_v9 = vpop.f32.mrf.mxu3 }
  0xfb   : > { %v509_v5 = vpop.f32.mrf.mxu1 }
  0xfc   : > { %v819_v31 = vadd.f32 %v787_v9, %v669_v46  ;;  %v937_v21 = vpop.f32.mrf.mxu0  ;;  %v510_v7 = vadd.f32 %v509_v5, %v2569_v61 }
  0xfe   : > { %v2712_v37 = vadd.f32 %v934_v2, %v819_v31  ;;  %2005 = vmatmul.msk.f32.gmra.mxu1 %vm303_vm0, %v2520_v49  ;;  %2040 = vmatmul.msk.f32.gmra.mxu2 %vm303_vm0, %v2523_v50  ;;  %v3028_v2 = vld [vmem:[#allocation3_spill] sm:$0xff]  ;;  %v2029_v31 = vld [vmem:[%s2299_s28 + $0xe0] sm:$0xff] }
  0xff   : > { %2073 = vmatmul.msk.f32.gmra.mxu3 %vm303_vm0, %v2331_v13  ;;  %2106 = vmatmul.msk.f32.gmra.mxu0 %vm303_vm0, %v2556_v58 }
 0x101   : > { %v640_v47 = vpop.f32.mrf.mxu2 }
 0x102   : > { %v670_v48 = vadd.f32 %v640_v47, %v510_v7  ;;  %v790_v55 = vpop.f32.mrf.mxu3  ;;  %v2062_v7 = vld [vmem:[%s2299_s28 + $0xe1] sm:$0xff] }
 0x103   : > { %v512_v38 = vpop.f32.mrf.mxu1 }
 0x104   : > { %v820_v15 = vadd.f32 %v790_v55, %v670_v48  ;;  %v940_v54 = vpop.f32.mrf.mxu0  ;;  %v513_v13 = vadd.f32 %v512_v38, %v2592_v4  ;;  %v2095_v48 = vld [vmem:[%s2299_s28 + $0xe2] sm:$0xff]  ;;  %v3029_v38 = vld [vmem:[#allocation5_spill] sm:$0xff] }
 0x106   : > { %v2723_v25 = vadd.f32 %v937_v21, %v820_v15  ;;  %2006 = vmatmul.msk.f32.gmra.mxu1 %vm303_vm0, %v2536_v52  ;;  %2041 = vmatmul.msk.f32.gmra.mxu2 %vm303_vm0, %v2539_v53 }
 0x107   : > { %2074 = vmatmul.msk.f32.gmra.mxu3 %vm303_vm0, %v2354_v19  ;;  %2107 = vmatmul.msk.f32.gmra.mxu0 %vm303_vm0, %v2576_v0 }
 0x109   : > { %v643_v49 = vpop.f32.mrf.mxu2 }
 0x10a   : > { %v671_v50 = vadd.f32 %v643_v49, %v513_v13  ;;  %v793_v61 = vpop.f32.mrf.mxu3 }
 0x10b   : > { %v515_v27 = vpop.f32.mrf.mxu1 }
 0x10c   : > { %v821_v6 = vadd.f32 %v793_v61, %v671_v50  ;;  %v943_v39 = vpop.f32.mrf.mxu0  ;;  %v516_v19 = vadd.f32 %v515_v27, %v2615_v20 }
 0x10e   : > { %v2734_v40 = vadd.f32 %v940_v54, %v821_v6  ;;  %2007 = vmatmul.msk.f32.gmra.mxu1 %vm303_vm0, %v2556_v58  ;;  %2042 = vmatmul.msk.f32.gmra.mxu2 %vm303_vm0, %v2559_v59 }
 0x10f   : > { %2075 = vmatmul.msk.f32.gmra.mxu3 %vm303_vm0, %v2371_v23  ;;  %2108 = vmatmul.msk.f32.gmra.mxu0 %vm303_vm0, %v2599_v12 }
 0x111   : > { %v646_v52 = vpop.f32.mrf.mxu2 }
 0x112   : > { %v672_v53 = vadd.f32 %v646_v52, %v516_v19  ;;  %v796_v4 = vpop.f32.mrf.mxu3 }
 0x113   : > { %v518_v51 = vpop.f32.mrf.mxu1 }
 0x114   : > { %v822_v10 = vadd.f32 %v796_v4, %v672_v53  ;;  %v946_v33 = vpop.f32.mrf.mxu0  ;;  %v519_v23 = vadd.f32 %v518_v51, %v2551_v56  ;;  %v3027_v56 = vld [vmem:[#allocation2_spill] sm:$0xff] }
 0x116   : > { %v2746_v58 = vadd.f32 %v943_v39, %v822_v10  ;;  %2008 = vmatmul.msk.f32.gmra.mxu1 %vm303_vm0, %v2576_v0  ;;  %2043 = vmatmul.msk.f32.gmra.mxu2 %vm303_vm0, %v2579_v1  ;;  %v2093_v0 = vld [vmem:[%s2299_s28 + $0xca] sm:$0xff]  ;;  %v2795_v10 = vld [vmem:[%s3017_s2] ss:$0 sm:$0xff] }
 0x117   : > { %2076 = vmatmul.msk.f32.gmra.mxu3 %vm303_vm0, %v2582_v3  ;;  %2109 = vmatmul.msk.f32.gmra.mxu0 %vm303_vm0, %v2092_v34  ;;  %v3026_v1 = vld [vmem:[#allocation4_spill] sm:$0xff] }
 0x119   : > { %v649_v59 = vpop.f32.mrf.mxu2 }
 0x11a   : > { %v673_v20 = vadd.f32 %v649_v59, %v519_v23  ;;  %v799_v11 = vpop.f32.mrf.mxu3 }
 0x11b   : > { %v521_v41 = vpop.f32.mrf.mxu1 }
 0x11c   : > { %v823_v42 = vadd.f32 %v799_v11, %v673_v20  ;;  %v949_v57 = vpop.f32.mrf.mxu0  ;;  %v522_v3 = vadd.f32 %v521_v41, %v3027_v56 }
 0x11e   : > { %v2757_v8 = vadd.f32 %v946_v33, %v823_v42  ;;  %2009 = vmatmul.msk.f32.gmra.mxu1 %vm303_vm0, %v2599_v12  ;;  %2044 = vmatmul.msk.f32.gmra.mxu2 %vm303_vm0, %v2602_v14 }
 0x11f   : > { %2077 = vmatmul.msk.f32.gmra.mxu3 %vm303_vm0, %v3026_v1  ;;  %2110 = vmatmul.msk.f32.gmra.mxu0 %vm303_vm0, %v2093_v0 }
 0x121   : > { %v652_v28 = vpop.f32.mrf.mxu2 }
 0x122   : > { %v674_v62 = vadd.f32 %v652_v28, %v522_v3  ;;  %v802_v18 = vpop.f32.mrf.mxu3 }
 0x123   : > { %v524_v43 = vpop.f32.mrf.mxu1 }
 0x124   : > { %v824_v63 = vadd.f32 %v802_v18, %v674_v62  ;;  %v952_v12 = vpop.f32.mrf.mxu0  ;;  %v525_v22 = vadd.f32 %v524_v43, %v3028_v2 }
 0x126   : > { %v2770_v14 = vadd.f32 %v949_v57, %v824_v63  ;;  %2010 = vmatmul.msk.f32.gmra.mxu1 %vm303_vm0, %v2092_v34  ;;  %2045 = vmatmul.msk.f32.gmra.mxu2 %vm303_vm0, %v2028_v44 }
 0x127   : > { %2078 = vmatmul.msk.f32.gmra.mxu3 %vm303_vm0, %v2061_v35  ;;  %2111 = vmatmul.msk.f32.gmra.mxu0 %vm303_vm0, %v2094_v36 }
 0x129   : > { %v655_v45 = vpop.f32.mrf.mxu2 }
 0x12a   : > { %v675_v46 = vadd.f32 %v655_v45, %v525_v22  ;;  %v805_v9 = vpop.f32.mrf.mxu3 }
 0x12b   : > { %v527_v5 = vpop.f32.mrf.mxu1 }
 0x12c   : > { %v825_v21 = vadd.f32 %v805_v9, %v675_v46  ;;  %v955_v47 = vpop.f32.mrf.mxu0  ;;  %v528_v15 = vadd.f32 %v527_v5, %v3029_v38 }
 0x12e   : > { %v2780_v55 = vadd.f32 %v952_v12, %v825_v21  ;;  %2011 = vmatmul.msk.f32.gmra.mxu1 %vm303_vm0, %v2093_v0  ;;  %2046 = vmatmul.msk.f32.gmra.mxu2 %vm303_vm0, %v2029_v31 }
 0x12f   : > { %2079 = vmatmul.msk.f32.gmra.mxu3 %vm303_vm0, %v2062_v7  ;;  %2112 = vmatmul.msk.f32.gmra.mxu0 %vm303_vm0, %v2095_v48 }
 0x131   : > { %v658_v54 = vpop.f32.mrf.mxu2 }
 0x132   : > { %v676_v13 = vadd.f32 %v658_v54, %v528_v15  ;;  %v808_v49 = vpop.f32.mrf.mxu3 }
 0x133   : > { %v1057_v50 = vpop.f32.mrf.mxu1 }
 0x134   : > { %v826_v61 = vadd.f32 %v808_v49, %v676_v13  ;;  %v1501_v27 = vpop.f32.mrf.mxu0  ;;  %v1105_v39 = vadd.f32 %v1057_v50, %v2627_v16 }
 0x136   : > { %v2788_v6 = vadd.f32 %v955_v47, %v826_v61 }
 0x139   : > { %v1207_v19 = vpop.f32.mrf.mxu2 }
 0x13a   : > { %v1255_v52 = vadd.f32 %v1207_v19, %v1105_v39  ;;  %v1354_v53 = vpop.f32.mrf.mxu3 }
 0x13b   : > { %v1060_v4 = vpop.f32.mrf.mxu1 }
 0x13c   : > { %v1402_v51 = vadd.f32 %v1354_v53, %v1255_v52  ;;  %v1504_v33 = vpop.f32.mrf.mxu0  ;;  %v1106_v16 = vadd.f32 %v1060_v4, %v2637_v26 }
 0x13e   : > { %v1549_v34 = vadd.f32 %v1501_v27, %v1402_v51 }
 0x140   : > { %v2804_v23 = vadd.f32 %v2795_v10, %v1549_v34 }
 0x141   : > { %v1210_v59 = vpop.f32.mrf.mxu2 }
 0x142   : > { %1586 = vst.msk [vmem:[%s2800_s19] sm:$0xff] %vm1585_vm1, %v2804_v23  ;;  %v1256_v20 = vadd.f32 %v1210_v59, %v1106_v16  ;;  %v1357_v11 = vpop.f32.mrf.mxu3 }
 0x143   : > { %v1063_v41 = vpop.f32.mrf.mxu1 }
 0x144   : > { %v1403_v42 = vadd.f32 %v1357_v11, %v1256_v20  ;;  %v1507_v57 = vpop.f32.mrf.mxu0  ;;  %v1107_v1 = vadd.f32 %v1063_v41, %v2647_v29 }
 0x146   : > { %v1550_v0 = vadd.f32 %v1504_v33, %v1403_v42 }
 0x148   : > { %v2811_v56 = vadd.f32 %v2795_v10, %v1550_v0 }
 0x149   : > { %v1213_v26 = vpop.f32.mrf.mxu2 }
 0x14a   : > { %1587 = vst.msk [vmem:[%s2800_s19 + $0x8] sm:$0xff] %vm1585_vm1, %v2811_v56  ;;  %v1257_v3 = vadd.f32 %v1213_v26, %v1107_v1  ;;  %v1360_v28 = vpop.f32.mrf.mxu3 }
 0x14b   : > { %v1066_v62 = vpop.f32.mrf.mxu1 }
 0x14c   : > { %v1404_v18 = vadd.f32 %v1360_v28, %v1257_v3  ;;  %v1510_v43 = vpop.f32.mrf.mxu0  ;;  %v1108_v63 = vadd.f32 %v1066_v62, %v2657_v32 }
 0x14e   : > { %v1551_v44 = vadd.f32 %v1507_v57, %v1404_v18 }
 0x150   : > { %v2818_v35 = vadd.f32 %v2795_v10, %v1551_v44 }
 0x151   : > { %v1216_v29 = vpop.f32.mrf.mxu2 }
 0x152   : > { %1588 = vst.msk [vmem:[%s2800_s19 + $0x10] sm:$0xff] %vm1585_vm1, %v2818_v35  ;;  %v1258_v12 = vadd.f32 %v1216_v29, %v1108_v63  ;;  %v1363_v36 = vpop.f32.mrf.mxu3 }
 0x153   : > { %v1069_v2 = vpop.f32.mrf.mxu1 }
 0x154   : > { %v1405_v22 = vadd.f32 %v1363_v36, %v1258_v12  ;;  %v1513_v45 = vpop.f32.mrf.mxu0  ;;  %v1109_v9 = vadd.f32 %v1069_v2, %v2668_v24 }
 0x156   : > { %v1552_v46 = vadd.f32 %v1510_v43, %v1405_v22 }
 0x158   : > { %v2825_v5 = vadd.f32 %v2795_v10, %v1552_v46 }
 0x159   : > { %v1219_v32 = vpop.f32.mrf.mxu2 }
 0x15a   : > { %1589 = vst.msk [vmem:[%s2800_s19 + $0x18] sm:$0xff] %vm1585_vm1, %v2825_v5  ;;  %v1259_v31 = vadd.f32 %v1219_v32, %v1109_v9  ;;  %v1366_v21 = vpop.f32.mrf.mxu3 }
 0x15b   : > { %v1072_v7 = vpop.f32.mrf.mxu1 }
 0x15c   : > { %v1406_v47 = vadd.f32 %v1366_v21, %v1259_v31  ;;  %v1516_v48 = vpop.f32.mrf.mxu0  ;;  %v1110_v15 = vadd.f32 %v1072_v7, %v2679_v60 }
 0x15e   : > { %v1553_v38 = vadd.f32 %v1513_v45, %v1406_v47 }
 0x160   : > { %v2832_v54 = vadd.f32 %v2795_v10, %v1553_v38 }
 0x161   : > { %v1222_v24 = vpop.f32.mrf.mxu2 }
 0x162   : > { %1590 = vst.msk [vmem:[%s2800_s19 + $0x20] sm:$0xff] %vm1585_vm1, %v2832_v54  ;;  %v1260_v13 = vadd.f32 %v1222_v24, %v1110_v15  ;;  %v1369_v49 = vpop.f32.mrf.mxu3 }
 0x163   : > { %v1075_v50 = vpop.f32.mrf.mxu1 }
 0x164   : > { %v1407_v61 = vadd.f32 %v1369_v49, %v1260_v13  ;;  %v1519_v27 = vpop.f32.mrf.mxu0  ;;  %v1111_v19 = vadd.f32 %v1075_v50, %v2690_v17 }
 0x166   : > { %v1554_v39 = vadd.f32 %v1516_v48, %v1407_v61 }
 0x168   : > { %v2839_v52 = vadd.f32 %v2795_v10, %v1554_v39 }
 0x169   : > { %v1225_v60 = vpop.f32.mrf.mxu2 }
 0x16a   : > { %1591 = vst.msk [vmem:[%s2800_s19 + $0x28] sm:$0xff] %vm1585_vm1, %v2839_v52  ;;  %v1261_v53 = vadd.f32 %v1225_v60, %v1111_v19  ;;  %v1372_v4 = vpop.f32.mrf.mxu3 }
 0x16b   : > { %v1078_v51 = vpop.f32.mrf.mxu1 }
 0x16c   : > { %v1408_v33 = vadd.f32 %v1372_v4, %v1261_v53  ;;  %v1522_v34 = vpop.f32.mrf.mxu0  ;;  %v1112_v59 = vadd.f32 %v1078_v51, %v2701_v30 }
 0x16e   : > { %v1555_v16 = vadd.f32 %v1519_v27, %v1408_v33 }
 0x170   : > { %v2846_v20 = vadd.f32 %v2795_v10, %v1555_v16 }
 0x171   : > { %v1228_v17 = vpop.f32.mrf.mxu2 }
 0x172   : > { %1592 = vst.msk [vmem:[%s2800_s19 + $0x30] sm:$0xff] %vm1585_vm1, %v2846_v20  ;;  %v1262_v11 = vadd.f32 %v1228_v17, %v1112_v59  ;;  %v1375_v41 = vpop.f32.mrf.mxu3 }
 0x173   : > { %v1081_v42 = vpop.f32.mrf.mxu1 }
 0x174   : > { %v1409_v57 = vadd.f32 %v1375_v41, %v1262_v11  ;;  %v1525_v0 = vpop.f32.mrf.mxu0  ;;  %v1113_v26 = vadd.f32 %v1081_v42, %v2712_v37 }
 0x176   : > { %v1556_v1 = vadd.f32 %v1522_v34, %v1409_v57 }
 0x178   : > { %v2853_v3 = vadd.f32 %v2795_v10, %v1556_v1 }
 0x179   : > { %v1231_v30 = vpop.f32.mrf.mxu2 }
 0x17a   : > { %1593 = vst.msk [vmem:[%s2800_s19 + $0x38] sm:$0xff] %vm1585_vm1, %v2853_v3  ;;  %v1263_v28 = vadd.f32 %v1231_v30, %v1113_v26  ;;  %v1378_v62 = vpop.f32.mrf.mxu3 }
 0x17b   : > { %v1084_v18 = vpop.f32.mrf.mxu1 }
 0x17c   : > { %v1410_v43 = vadd.f32 %v1378_v62, %v1263_v28  ;;  %v1528_v44 = vpop.f32.mrf.mxu0  ;;  %v1114_v29 = vadd.f32 %v1084_v18, %v2723_v25 }
 0x17e   : > { %v1557_v63 = vadd.f32 %v1525_v0, %v1410_v43 }
 0x180   : > { %v2860_v12 = vadd.f32 %v2795_v10, %v1557_v63 }
 0x181   : > { %v1234_v37 = vpop.f32.mrf.mxu2 }
 0x182   : > { %1594 = vst.msk [vmem:[%s2800_s19 + $0x40] sm:$0xff] %vm1585_vm1, %v2860_v12  ;;  %v1264_v36 = vadd.f32 %v1234_v37, %v1114_v29  ;;  %v1381_v2 = vpop.f32.mrf.mxu3 }
 0x183   : > { %v1087_v22 = vpop.f32.mrf.mxu1 }
 0x184   : > { %v1411_v45 = vadd.f32 %v1381_v2, %v1264_v36  ;;  %v1531_v46 = vpop.f32.mrf.mxu0  ;;  %v1115_v32 = vadd.f32 %v1087_v22, %v2734_v40 }
 0x186   : > { %v1558_v9 = vadd.f32 %v1528_v44, %v1411_v45 }
 0x188   : > { %v2867_v31 = vadd.f32 %v2795_v10, %v1558_v9 }
 0x189   : > { %v1237_v25 = vpop.f32.mrf.mxu2 }
 0x18a   : > { %1595 = vst.msk [vmem:[%s2800_s19 + $0x48] sm:$0xff] %vm1585_vm1, %v2867_v31  ;;  %v1265_v21 = vadd.f32 %v1237_v25, %v1115_v32  ;;  %v1384_v7 = vpop.f32.mrf.mxu3 }
 0x18b   : > { %v1090_v47 = vpop.f32.mrf.mxu1 }
 0x18c   : > { %v1412_v48 = vadd.f32 %v1384_v7, %v1265_v21  ;;  %v1534_v38 = vpop.f32.mrf.mxu0  ;;  %v1116_v24 = vadd.f32 %v1090_v47, %v2746_v58 }
 0x18e   : > { %v1559_v15 = vadd.f32 %v1531_v46, %v1412_v48 }
 0x190   : > { %v2874_v13 = vadd.f32 %v2795_v10, %v1559_v15 }
 0x191   : > { %v1240_v40 = vpop.f32.mrf.mxu2 }
 0x192   : > { %1596 = vst.msk [vmem:[%s2800_s19 + $0x50] sm:$0xff] %vm1585_vm1, %v2874_v13  ;;  %v1266_v49 = vadd.f32 %v1240_v40, %v1116_v24  ;;  %v1387_v50 = vpop.f32.mrf.mxu3 }
 0x193   : > { %v1093_v61 = vpop.f32.mrf.mxu1 }
 0x194   : > { %v1413_v27 = vadd.f32 %v1387_v50, %v1266_v49  ;;  %v1537_v39 = vpop.f32.mrf.mxu0  ;;  %v1117_v60 = vadd.f32 %v1093_v61, %v2757_v8 }
 0x196   : > { %v1560_v19 = vadd.f32 %v1534_v38, %v1413_v27 }
 0x198   : > { %v2881_v53 = vadd.f32 %v2795_v10, %v1560_v19 }
 0x199   : > { %v1243_v58 = vpop.f32.mrf.mxu2 }
 0x19a   : > { %1597 = vst.msk [vmem:[%s2800_s19 + $0x58] sm:$0xff] %vm1585_vm1, %v2881_v53  ;;  %v1267_v4 = vadd.f32 %v1243_v58, %v1117_v60  ;;  %v1390_v51 = vpop.f32.mrf.mxu3 }
 0x19b   : > { %v1096_v33 = vpop.f32.mrf.mxu1 }
 0x19c   : > { %v1414_v34 = vadd.f32 %v1390_v51, %v1267_v4  ;;  %v1540_v59 = vpop.f32.mrf.mxu0  ;;  %v1118_v17 = vadd.f32 %v1096_v33, %v2770_v14 }
 0x19e   : > { %v1561_v16 = vadd.f32 %v1537_v39, %v1414_v34 }
 0x1a0   : > { %v2888_v11 = vadd.f32 %v2795_v10, %v1561_v16 }
 0x1a1   : > { %v1246_v8 = vpop.f32.mrf.mxu2 }
 0x1a2   : > { %1598 = vst.msk [vmem:[%s2800_s19 + $0x60] sm:$0xff] %vm1585_vm1, %v2888_v11  ;;  %v1268_v41 = vadd.f32 %v1246_v8, %v1118_v17  ;;  %v1393_v42 = vpop.f32.mrf.mxu3 }
 0x1a3   : > { %v1099_v57 = vpop.f32.mrf.mxu1 }
 0x1a4   : > { %v1415_v0 = vadd.f32 %v1393_v42, %v1268_v41  ;;  %v1119_v26 = vadd.f32 %v1099_v57, %v2780_v55  ;;  %v1543_v14 = vpop.f32.mrf.mxu0 }
 0x1a6   : > { %v1562_v1 = vadd.f32 %v1540_v59, %v1415_v0 }
 0x1a8   : > { %v2895_v30 = vadd.f32 %v2795_v10, %v1562_v1 }
 0x1a9   : > { %v1249_v28 = vpop.f32.mrf.mxu2 }
 0x1aa   : > { %1599 = vst.msk [vmem:[%s2800_s19 + $0x68] sm:$0xff] %vm1585_vm1, %v2895_v30  ;;  %v1269_v62 = vadd.f32 %v1249_v28, %v1119_v26  ;;  %v1396_v18 = vpop.f32.mrf.mxu3 }
 0x1ab   : > { %v1102_v44 = vpop.f32.mrf.mxu1 }
 0x1ac   : > { %v1416_v43 = vadd.f32 %v1396_v18, %v1269_v62  ;;  %v1120_v29 = vadd.f32 %v1102_v44, %v2788_v6  ;;  %v1546_v22 = vpop.f32.mrf.mxu0 }
 0x1ae   : > { %v1563_v63 = vadd.f32 %v1543_v14, %v1416_v43 }
 0x1b0   : > { %v2902_v37 = vadd.f32 %v2795_v10, %v1563_v63 }
 0x1b1   : > { %v1252_v55 = vpop.f32.mrf.mxu2 }
 0x1b2   : > { %1600 = vst.msk [vmem:[%s2800_s19 + $0x70] sm:$0xff] %vm1585_vm1, %v2902_v37  ;;  %v1270_v36 = vadd.f32 %v1252_v55, %v1120_v29  ;;  %v1399_v2 = vpop.f32.mrf.mxu3 }
 0x1b4   : > { %v1417_v45 = vadd.f32 %v1399_v2, %v1270_v36 }
 0x1b6   : > { %v1564_v46 = vadd.f32 %v1546_v22, %v1417_v45  ;;  %1605 = sbr.rel (%p2113_p7) target bundleno = 446 (0x1be), region = 36 }
 0x1b8   : > { %v2908_v9 = vadd.f32 %v2795_v10, %v1564_v46 }
 0x1ba   : > { %1601 = vst.msk [vmem:[%s2800_s19 + $0x78] sm:$0xff] %vm1585_vm1, %v2908_v9 }
 0x1bb   : > { %vm1606_vm2 = vcmask 24576   ;;  %v2202_v6 = vmov 0.0  }
 0x1bc   : > { %1607 = vst.msk [vmem:[%s2288_s14] sm:$0x1] %vm1606_vm2, %v2202_v6 }
 0x1bd   : > { %1608 = vst.msk [vmem:[%s2294_s17] sm:$0x1] %vm1606_vm2, %v2202_v6 }
 0x1be PF: > { %v1610_v32 = vsel %vm1585_vm1, %v2804_v23, 0.0  ;;  %v1611_v10 = vsel %vm1585_vm1, %v2811_v56, 0.0  ;;  %v1613_v25 = vsel %vm1585_vm1, %v2818_v35, 0.0  ;;  %v1615_v7 = vsel %vm1585_vm1, %v2825_v5, 0.0 }
 0x1bf   : > { %v1612_v21 = vadd.f32 %v1611_v10, %v1610_v32  ;;  %v1617_v48 = vsel %vm1585_vm1, %v2832_v54, 0.0  ;;  %v1651_v15 = vmul.f32 %v2804_v23, %v2804_v23  ;;  %v1652_v24 = vmul.f32 %v2811_v56, %v2811_v56 }
 0x1c0   : > { %v1653_v40 = vmul.f32 %v2818_v35, %v2818_v35  ;;  %v1619_v49 = vsel %vm1585_vm1, %v2839_v52, 0.0  ;;  %v1654_v61 = vmul.f32 %v2825_v5, %v2825_v5  ;;  %v1621_v27 = vsel %vm1585_vm1, %v2846_v20, 0.0 }
 0x1c1   : > { %v1614_v47 = vadd.f32 %v1613_v25, %v1612_v21  ;;  %v1655_v39 = vmul.f32 %v2832_v54, %v2832_v54  ;;  %v1667_v19 = vsel %vm1585_vm1, %v1651_v15, 0.0  ;;  %v1668_v56 = vsel %vm1585_vm1, %v1652_v24, 0.0 }
 0x1c2   : > { %v1670_v35 = vsel %vm1585_vm1, %v1653_v40, 0.0  ;;  %v1623_v60 = vsel %vm1585_vm1, %v2853_v3, 0.0  ;;  %v1669_v58 = vadd.f32 %v1668_v56, %v1667_v19  ;;  %v1656_v5 = vmul.f32 %v2839_v52, %v2839_v52 }
 0x1c3   : > { %v1616_v38 = vadd.f32 %v1615_v7, %v1614_v47  ;;  %v1672_v51 = vsel %vm1585_vm1, %v1654_v61, 0.0  ;;  %v1625_v54 = vsel %vm1585_vm1, %v2860_v12, 0.0  ;;  %v1657_v16 = vmul.f32 %v2846_v20, %v2846_v20 }
 0x1c4   : > { %v1671_v33 = vadd.f32 %v1670_v35, %v1669_v58  ;;  %v1674_v59 = vsel %vm1585_vm1, %v1655_v39, 0.0  ;;  %v1627_v17 = vsel %vm1585_vm1, %v2867_v31, 0.0  ;;  %v1658_v52 = vmul.f32 %v2853_v3, %v2853_v3 }
 0x1c5   : > { %v1618_v50 = vadd.f32 %v1617_v48, %v1616_v38  ;;  %v1676_v42 = vsel %vm1585_vm1, %v1656_v5, 0.0  ;;  %v1629_v57 = vsel %vm1585_vm1, %v2874_v13, 0.0  ;;  %v1659_v20 = vmul.f32 %v2860_v12, %v2860_v12 }
 0x1c6   : > { %v1673_v8 = vadd.f32 %v1672_v51, %v1671_v33  ;;  %v1678_v26 = vsel %vm1585_vm1, %v1657_v16, 0.0  ;;  %v1631_v28 = vsel %vm1585_vm1, %v2881_v53, 0.0  ;;  %v1660_v3 = vmul.f32 %v2867_v31, %v2867_v31 }
 0x1c7   : > { %v1620_v23 = vadd.f32 %v1619_v49, %v1618_v50  ;;  %v1680_v18 = vsel %vm1585_vm1, %v1658_v52, 0.0  ;;  %v1633_v43 = vsel %vm1585_vm1, %v2888_v11, 0.0  ;;  %v1661_v12 = vmul.f32 %v2874_v13, %v2874_v13 }
 0x1c8   : > { %v1675_v0 = vadd.f32 %v1674_v59, %v1673_v8  ;;  %v1682_v29 = vsel %vm1585_vm1, %v1659_v20, 0.0  ;;  %v1635_v55 = vsel %vm1585_vm1, %v2895_v30, 0.0  ;;  %v1662_v31 = vmul.f32 %v2881_v53, %v2881_v53 }
 0x1c9   : > { %v1622_v4 = vadd.f32 %v1621_v27, %v1620_v23  ;;  %v1684_v22 = vsel %vm1585_vm1, %v1660_v3, 0.0  ;;  %v1637_v45 = vsel %vm1585_vm1, %v2902_v37, 0.0  ;;  %v1663_v13 = vmul.f32 %v2888_v11, %v2888_v11 }
 0x1ca   : > { %v1677_v14 = vadd.f32 %v1676_v42, %v1675_v0  ;;  %v1686_v32 = vsel %vm1585_vm1, %v1661_v12, 0.0  ;;  %v1639_v10 = vsel %vm1585_vm1, %v2908_v9, 0.0  ;;  %v1664_v53 = vmul.f32 %v2895_v30, %v2895_v30 }
 0x1cb   : > { %v1624_v34 = vadd.f32 %v1623_v60, %v1622_v4  ;;  %v1688_v7 = vsel %vm1585_vm1, %v1662_v31, 0.0  ;;  %v1665_v38 = vmul.f32 %v2902_v37, %v2902_v37  ;;  %v1690_v11 = vsel %vm1585_vm1, %v1663_v13, 0.0  ;;  %v1609_v60 = vld [vmem:[%s2288_s14] sm:$0x1] }
 0x1cc   : > { %v1679_v44 = vadd.f32 %v1678_v26, %v1677_v14  ;;  %v1666_v40 = vmul.f32 %v2908_v9, %v2908_v9  ;;  %v1692_v49 = vsel %vm1585_vm1, %v1664_v53, 0.0  ;;  %vm1648_vm3 = vcmask 24576  }
 0x1cd   : > { %v1626_v41 = vadd.f32 %v1625_v54, %v1624_v34  ;;  %v1694_v30 = vsel %vm1585_vm1, %v1665_v38, 0.0  ;;  %v1650_v34 = vld [vmem:[%s2294_s17] sm:$0x1] }
 0x1ce   : > { %v1681_v36 = vadd.f32 %v1680_v18, %v1679_v44  ;;  %v1696_v37 = vsel %vm1585_vm1, %v1666_v40, 0.0 }
 0x1cf   : > { %v1628_v1 = vadd.f32 %v1627_v17, %v1626_v41 }
 0x1d0   : > { %v1683_v46 = vadd.f32 %v1682_v29, %v1681_v36 }
 0x1d1   : > { %v1630_v62 = vadd.f32 %v1629_v57, %v1628_v1 }
 0x1d2   : > { %v1685_v25 = vadd.f32 %v1684_v22, %v1683_v46 }
 0x1d3   : > { %v1632_v63 = vadd.f32 %v1631_v28, %v1630_v62 }
 0x1d4   : > { %v1687_v47 = vadd.f32 %v1686_v32, %v1685_v25 }
 0x1d5   : > { %v1634_v2 = vadd.f32 %v1633_v43, %v1632_v63 }
 0x1d6   : > { %v1689_v15 = vadd.f32 %v1688_v7, %v1687_v47 }
 0x1d7   : > { %v1636_v6 = vadd.f32 %v1635_v55, %v1634_v2 }
 0x1d8   : > { %v1691_v50 = vadd.f32 %v1690_v11, %v1689_v15 }
 0x1d9   : > { %v1638_v21 = vadd.f32 %v1637_v45, %v1636_v6 }
 0x1da   : > { %v1693_v27 = vadd.f32 %v1692_v49, %v1691_v50 }
 0x1db   : > { %v1640_v48 = vadd.f32 %v1639_v10, %v1638_v21 }
 0x1dc   : > { %v1695_v23 = vadd.f32 %v1694_v30, %v1693_v27 }
 0x1dd   : > { %v1641_v24 = vrot.slane %v1640_v48, 4 }
 0x1de   : > { %v1697_v56 = vadd.f32 %v1696_v37, %v1695_v23 }
 0x1df   : > { %v1642_v61 = vadd.f32 %v1641_v24, %v1640_v48 }
 0x1e0   : > { %v1698_v58 = vrot.slane %v1697_v56, 4 }
 0x1e1   : > { %v1643_v39 = vrot.slane %v1642_v61, 2 }
 0x1e2   : > { %v1699_v4 = vadd.f32 %v1698_v58, %v1697_v56 }
 0x1e3   : > { %v1644_v19 = vadd.f32 %v1643_v39, %v1642_v61 }
 0x1e4   : > { %v1700_v51 = vrot.slane %v1699_v4, 2 }
 0x1e5   : > { %v1645_v35 = vrot.slane %v1644_v19, 1 }
 0x1e6   : > { %v1701_v54 = vadd.f32 %v1700_v51, %v1699_v4 }
 0x1e7   : > { %v1646_v9 = vadd.f32 %v1645_v35, %v1644_v19 }
 0x1e8   : > { %v1702_v33 = vrot.slane %v1701_v54, 1 }
 0x1e9   : > { %v1647_v5 = vadd.f32 %v1646_v9, %v1609_v60 }
 0x1ea   : > { %v1703_v16 = vadd.f32 %v1702_v33, %v1701_v54 }
 0x1eb   : > { %1649 = vst.msk [vmem:[%s2288_s14] sm:$0x1] %vm1648_vm3, %v1647_v5 }
 0x1ec   : > { %v1704_v59 = vadd.f32 %v1703_v16, %v1650_v34 }
 0x1ee   : > { %1705 = vst.msk [vmem:[%s2294_s17] sm:$0x1] %vm1648_vm3, %v1704_v59 }
 0x1ef PF: > { %s16_s22 = sadd.s32 1, %s2200_s22   ;;  %s3030_s18 = smov %s2192_s20 }
 0x1f0   : > { %p13_p8 = scmp.ge.s32.totalorder %s16_s22, 6   ;;  %s3031_s19 = smov %s2196_s21 }
 0x1f1   : > { %s3032_s20 = smov %s3035_s23  ;;  %s3033_s21 = smov %s3039_s24 }
 0x1f2   :  { %15 = sbr.rel (!%p13_p8) target bundleno = 3 (0x3), region = 101 }

// kernel: upsample_forward.19
= control target key start
LH: loop header
LB: loop body
LE: loop exit
PB: predicated region body
PF: predicated region fallthrough
CT: control target
= control target key end

     0   :  { %vm23_vm0 = vcmask 261120   ;;  %vm48_vm1 = vcmask 58368   ;;  %s97_s1 = inlined_call_operand.vmem [shape: f32[32,8], index: 1, kind: input, shape index: {}]   ;;  %s98_s2 = inlined_call_operand.vmem [shape: f32[1,8], index: 2, kind: input, shape index: {}]   ;;  %s99_s0 = inlined_call_operand.vmem [shape: f32[2,32], index: 0, kind: input, shape index: {}]   ;;  %s100_s3 = inlined_call_operand.vmem [shape: f32[2,8], index: 3, kind: output, shape index: {}]  }
   0x1   :  { %v18_v0 = vld [vmem:[%s97_s1 + $0x18] sm:$0xff]  ;;  %v17_v1 = vld [vmem:[%s97_s1 + $0x10] sm:$0xff]  ;;  %v16_v2 = vld [vmem:[%s97_s1 + $0x8] sm:$0xff] }
   0x2   :  { %39 = vmatpush.msra.mxu0 %v18_v0  ;;  %v15_v3 = vld [vmem:[%s97_s1] sm:$0xff] }
   0x3   :  { %v14_v4 = vld [vmem:[%s99_s0] sm:$0x3] }
   0x4   :  { %40 = vmatpush.msra.mxu0 %v17_v1  ;;  %v55_v5 = vld [vmem:[%s98_s2] ss:$0 sm:$0xff] }
   0x6   :  { %41 = vmatpush.msra.mxu0 %v16_v2 }
   0x8   :  { %42 = vmatpush.msra.mxu0 %v15_v3 }
   0x9   :  { %54 = vmatmul.msk.f32.vlgmr.msra.gmra.mxu0 %vm23_vm0, %v14_v4 }
  0x86   :  { %v44_v6 = vpop.f32.mrf.mxu0 }
  0x87   :  { %v45_v7 = vadd.f32 %v55_v5, %v44_v6 }
  0x89   :  { %v47_v8 = vmax.f32 %v45_v7, 0.0 }
  0x8b   :  { %49 = vst.msk [vmem:[%s100_s3] sm:$0x3] %vm48_vm1, %v47_v8 }

// kernel: upsample_forward.21
= control target key start
LH: loop header
LB: loop body
LE: loop exit
PB: predicated region body
PF: predicated region fallthrough
CT: control target
= control target key end

     0   :  { %s666_s21 = smov 0   ;;  %s668_s22 = smov 0   ;;  %s857_s0 = inlined_call_operand.vmem [shape: f32[2,256,8], index: 0, kind: input, shape index: {}]   ;;  %s858_s1 = inlined_call_operand.vmem [shape: f32[2,1,8], index: 1, kind: input, shape index: {}]   ;;  %s859_s2 = inlined_call_operand.vmem [shape: f32[1,1,8], index: 2, kind: input, shape index: {}]   ;;  %s860_s3 = inlined_call_operand.vmem [shape: f32[1,1,8], index: 3, kind: input, shape index: {}]   ;;  %s861_s4 = inlined_call_operand.vmem [shape: f32[1,8], index: 4, kind: input, shape index: {}]   ;;  %s862_s5 = inlined_call_operand.vmem [shape: f32[1,8], index: 5, kind: input, shape index: {}]   ;;  %s863_s6 = inlined_call_operand.vmem [shape: f32[2,256,8], index: 6, kind: output, shape index: {}]  }
   0x1   :  { %s670_s23 = smov 0   ;;  %s672_s24 = smov 0  }
   0x2   :  { %s674_s25 = smov 0  }
   0x3 LB: > { %s25_s26 = sadd.s32 1, %s621_s23  ;;  %s28_s27 = sadd.s32 1, %s625_s24  ;;  %s629_s25 = sphi %s674_s25, %s16_s25   ;;  %s625_s24 = sphi %s672_s24, %s867_s24   ;;  %s621_s23 = sphi %s670_s23, %s866_s23   ;;  %s617_s22 = sphi %s668_s22, %s865_s22   ;;  %s613_s21 = sphi %s666_s21, %s864_s21  }
   0x4   : > { %p26_p0 = scmp.ge.s32.totalorder %s25_s26, 2  ;;  %p538_p1 = scmp.ge.s32.totalorder %s629_s25, 1 }
   0x5   : > { %p241_p2 = scmp.lt.s32.totalorder %s629_s25, 5 }
   0x6   : > { %s869_s26 = smov (%p26_p0, %s25_s26), 0  ;;  %s871_s27 = smov (!%p26_p0, %s28_s27), %s625_s24 }
   0x7   : > { %p242_p3 = pnand %p538_p1, %p241_p2  ;;  %p30_p4 = scmp.ge.s32.totalorder %s871_s27, 2 }
   0x8   : > { %p283_p5 = scmp.lt.s32.totalorder (!%p242_p3), %s617_s22, 1  ;;  %s539_s8 = sshll.u32 (!%p242_p3), %s613_s21, 4 }
   0x9   : > { %s873_s27 = smov (%p30_p4, %s871_s27), 0  ;;  %245 = sbr.rel (%p242_p3) target bundleno = 67 (0x43), region = 44 }
   0xa   : > { %p285_p6 = scmp.lt.s32.totalorder (!%p242_p3), %s539_s8, 31 }
   0xe   : > { %v321_v0 = vld [vmem:[%s859_s2] sm:$0x1]  ;;  %s875_s22 = smov (!%p283_p5, %s617_s22), 1  ;;  %s877_s8 = smov (!%p285_p6, %s539_s8), 31  ;;  %vm418_vm3 = vcmask 64512  }
   0xf   : > { %v323_v1 = vld [vmem:[%s860_s3] sm:$0x1]  ;;  %v322_v2 = vmul.f32 0.001953125, %v321_v0  ;;  %s294_s11 = scalar_lea.vmem %s858_s1, %s875_s22  ;;  %s540_s12 = sshll.u32 %s875_s22, 5 }
  0x10   : > { %v324_v3 = vmul.f32 0.001953125, %v323_v1  ;;  %s712_s13 = sadd.s32 %s540_s12, %s877_s8  ;;  %v338_v12 = vld [vmem:[%s861_s4] sm:$0x1] }
  0x11   : > { %v325_v4 = vmul.f32 %v322_v2, %v322_v2  ;;  %s541_s14 = sshll.u32 %s712_s13, 3  ;;  %v725_v13 = vperm.slane %v322_v2, 0  ;;  %v751_v39 = vld [vmem:[%s862_s5] ss:$0 sm:$0xff] }
  0x12   : > { %s720_s17 = scalar_lea.vmem %s857_s0, %s541_s14  ;;  %v763_v46 = vld [vmem:[%s294_s11] ss:$0 sm:$0xff]  ;;  %s777_s7 = scalar_lea.vmem %s863_s6, %s541_s14 }
  0x13   : > { %v326_v5 = vsub.f32 %v324_v3, %v325_v4  ;;  %v305_v14 = vld [vmem:[%s720_s17] sm:$0xff]  ;;  %v306_v15 = vld [vmem:[%s720_s17 + $0x8] sm:$0xff]  ;;  %v307_v17 = vld [vmem:[%s720_s17 + $0x10] sm:$0xff] }
  0x14   : > { %v308_v18 = vld [vmem:[%s720_s17 + $0x18] sm:$0xff]  ;;  %v309_v19 = vld [vmem:[%s720_s17 + $0x20] sm:$0xff]  ;;  %v310_v20 = vld [vmem:[%s720_s17 + $0x28] sm:$0xff]  ;;  %v343_v24 = vsub.f32 %v305_v14, %v725_v13  ;;  %v344_v28 = vsub.f32 %v306_v15, %v725_v13  ;;  %v345_v29 = vsub.f32 %v307_v17, %v725_v13 }
  0x15   : > { %v327_v6 = vadd.f32 1e-05, %v326_v5  ;;  %v311_v21 = vld [vmem:[%s720_s17 + $0x30] sm:$0xff]  ;;  %v312_v22 = vld [vmem:[%s720_s17 + $0x38] sm:$0xff]  ;;  %v313_v25 = vld [vmem:[%s720_s17 + $0x40] sm:$0xff]  ;;  %v346_v30 = vsub.f32 %v308_v18, %v725_v13  ;;  %v347_v34 = vsub.f32 %v309_v19, %v725_v13  ;;  %v348_v35 = vsub.f32 %v310_v20, %v725_v13 }
  0x16   : > { %v314_v26 = vld [vmem:[%s720_s17 + $0x48] sm:$0xff]  ;;  %v315_v31 = vld [vmem:[%s720_s17 + $0x50] sm:$0xff]  ;;  %v316_v32 = vld [vmem:[%s720_s17 + $0x58] sm:$0xff]  ;;  %v349_v36 = vsub.f32 %v311_v21, %v725_v13  ;;  %v350_v37 = vsub.f32 %v312_v22, %v725_v13  ;;  %v351_v40 = vsub.f32 %v313_v25, %v725_v13 }
  0x17   : > { %589 = vrsqrt.f32 %v327_v6  ;;  %vm334_vm0 = vweird.f32 %v327_v6  ;;  %v317_v33 = vld [vmem:[%s720_s17 + $0x60] sm:$0xff]  ;;  %v352_v41 = vsub.f32 %v314_v26, %v725_v13  ;;  %v353_v42 = vsub.f32 %v315_v31, %v725_v13  ;;  %v318_v50 = vld [vmem:[%s720_s17 + $0x68] sm:$0xff]  ;;  %v319_v55 = vld [vmem:[%s720_s17 + $0x70] sm:$0xff] }
  0x18   : > { %v354_v43 = vsub.f32 %v316_v32, %v725_v13  ;;  %v355_v44 = vsub.f32 %v317_v33, %v725_v13  ;;  %v320_v60 = vld [vmem:[%s720_s17 + $0x78] sm:$0xff]  ;;  %v356_v0 = vsub.f32 %v318_v50, %v725_v13  ;;  %v357_v4 = vsub.f32 %v319_v55, %v725_v13 }
  0x1d   : > { %v590_v7 = vpop.eup %589 }
  0x1e   : > { %v329_v8 = vmul.f32 %v590_v7, %v327_v6  ;;  %vm335_vm1 = vweird.f32 %v590_v7 }
  0x1f   : > { %vm336_vm2 = vmor %vm334_vm0, %vm335_vm1 }
  0x20   : > { %v330_v9 = vmul.f32 %v590_v7, %v329_v8  ;;  %v358_v8 = vsub.f32 %v320_v60, %v725_v13 }
  0x22   : > { %v331_v10 = vmul.f32 0.5, %v330_v9 }
  0x24   : > { %v332_v11 = vsub.f32 1.5, %v331_v10 }
  0x26   : > { %v333_v16 = vmul.f32 %v590_v7, %v332_v11 }
  0x28   : > { %v337_v23 = vsel %vm336_vm2, %v590_v7, %v333_v16 }
  0x29   : > { %v339_v27 = vmul.f32 %v338_v12, %v337_v23 }
  0x2b   : > { %v360_v38 = vperm.slane %v339_v27, 0 }
  0x2d   : > { %v362_v45 = vmul.f32 %v360_v38, %v343_v24  ;;  %v363_v47 = vmul.f32 %v360_v38, %v344_v28  ;;  %v364_v48 = vmul.f32 %v360_v38, %v345_v29  ;;  %v365_v49 = vmul.f32 %v360_v38, %v346_v30 }
  0x2e   : > { %v366_v51 = vmul.f32 %v360_v38, %v347_v34  ;;  %v367_v52 = vmul.f32 %v360_v38, %v348_v35  ;;  %v368_v53 = vmul.f32 %v360_v38, %v349_v36  ;;  %v369_v54 = vmul.f32 %v360_v38, %v350_v37 }
  0x2f   : > { %v382_v56 = vadd.f32 %v751_v39, %v362_v45  ;;  %v383_v57 = vadd.f32 %v751_v39, %v363_v47  ;;  %v384_v58 = vadd.f32 %v751_v39, %v364_v48  ;;  %v385_v59 = vadd.f32 %v751_v39, %v365_v49 }
  0x30   : > { %v386_v61 = vadd.f32 %v751_v39, %v366_v51  ;;  %v387_v62 = vadd.f32 %v751_v39, %v367_v52  ;;  %v388_v63 = vadd.f32 %v751_v39, %v368_v53  ;;  %v389_v7 = vadd.f32 %v751_v39, %v369_v54 }
  0x31   : > { %v402_v1 = vadd.f32 %v763_v46, %v382_v56  ;;  %v403_v2 = vadd.f32 %v763_v46, %v383_v57  ;;  %v404_v3 = vadd.f32 %v763_v46, %v384_v58  ;;  %v405_v5 = vadd.f32 %v763_v46, %v385_v59 }
  0x32   : > { %v406_v6 = vadd.f32 %v763_v46, %v386_v61  ;;  %v370_v9 = vmul.f32 %v360_v38, %v351_v40  ;;  %v371_v10 = vmul.f32 %v360_v38, %v352_v41  ;;  %v372_v11 = vmul.f32 %v360_v38, %v353_v42 }
  0x33   : > { %419 = vst.msk [vmem:[%s777_s7] sm:$0xff] %vm418_vm3, %v402_v1  ;;  %v373_v12 = vmul.f32 %v360_v38, %v354_v43  ;;  %v407_v14 = vadd.f32 %v763_v46, %v387_v62  ;;  %v408_v15 = vadd.f32 %v763_v46, %v388_v63  ;;  %v374_v16 = vmul.f32 %v360_v38, %v355_v44 }
  0x34   : > { %420 = vst.msk [vmem:[%s777_s7 + $0x8] sm:$0xff] %vm418_vm3, %v403_v2  ;;  %v375_v17 = vmul.f32 %v360_v38, %v356_v0  ;;  %v390_v13 = vadd.f32 %v751_v39, %v370_v9  ;;  %v391_v18 = vadd.f32 %v751_v39, %v371_v10  ;;  %v392_v19 = vadd.f32 %v751_v39, %v372_v11 }
  0x35   : > { %421 = vst.msk [vmem:[%s777_s7 + $0x10] sm:$0xff] %vm418_vm3, %v404_v3  ;;  %v376_v20 = vmul.f32 %v360_v38, %v357_v4  ;;  %v409_v21 = vadd.f32 %v763_v46, %v389_v7  ;;  %v393_v22 = vadd.f32 %v751_v39, %v373_v12  ;;  %v377_v23 = vmul.f32 %v360_v38, %v358_v8 }
  0x36   : > { %422 = vst.msk [vmem:[%s777_s7 + $0x18] sm:$0xff] %vm418_vm3, %v405_v5  ;;  %v410_v24 = vadd.f32 %v763_v46, %v390_v13  ;;  %v394_v25 = vadd.f32 %v751_v39, %v374_v16  ;;  %v411_v26 = vadd.f32 %v763_v46, %v391_v18  ;;  %v395_v27 = vadd.f32 %v751_v39, %v375_v17 }
  0x37   : > { %423 = vst.msk [vmem:[%s777_s7 + $0x20] sm:$0xff] %vm418_vm3, %v406_v6  ;;  %v412_v28 = vadd.f32 %v763_v46, %v392_v19  ;;  %v396_v29 = vadd.f32 %v751_v39, %v376_v20  ;;  %v413_v30 = vadd.f32 %v763_v46, %v393_v22  ;;  %v397_v31 = vadd.f32 %v751_v39, %v377_v23 }
  0x38   : > { %424 = vst.msk [vmem:[%s777_s7 + $0x28] sm:$0xff] %vm418_vm3, %v407_v14  ;;  %v414_v32 = vadd.f32 %v763_v46, %v394_v25  ;;  %v415_v33 = vadd.f32 %v763_v46, %v395_v27 }
  0x39   : > { %425 = vst.msk [vmem:[%s777_s7 + $0x30] sm:$0xff] %vm418_vm3, %v408_v15  ;;  %v416_v34 = vadd.f32 %v763_v46, %v396_v29  ;;  %v417_v35 = vadd.f32 %v763_v46, %v397_v31 }
  0x3a   : > { %426 = vst.msk [vmem:[%s777_s7 + $0x38] sm:$0xff] %vm418_vm3, %v409_v21 }
  0x3b   : > { %427 = vst.msk [vmem:[%s777_s7 + $0x40] sm:$0xff] %vm418_vm3, %v410_v24 }
  0x3c   : > { %428 = vst.msk [vmem:[%s777_s7 + $0x48] sm:$0xff] %vm418_vm3, %v411_v26 }
  0x3d   : > { %429 = vst.msk [vmem:[%s777_s7 + $0x50] sm:$0xff] %vm418_vm3, %v412_v28 }
  0x3e   : > { %430 = vst.msk [vmem:[%s777_s7 + $0x58] sm:$0xff] %vm418_vm3, %v413_v30 }
  0x3f   : > { %431 = vst.msk [vmem:[%s777_s7 + $0x60] sm:$0xff] %vm418_vm3, %v414_v32 }
  0x40   : > { %432 = vst.msk [vmem:[%s777_s7 + $0x68] sm:$0xff] %vm418_vm3, %v415_v33 }
  0x41   : > { %433 = vst.msk [vmem:[%s777_s7 + $0x70] sm:$0xff] %vm418_vm3, %v416_v34 }
  0x42   : > { %434 = vst.msk [vmem:[%s777_s7 + $0x78] sm:$0xff] %vm418_vm3, %v417_v35 }
  0x43 PF: > { %s16_s25 = sadd.s32 1, %s629_s25   ;;  %s864_s21 = smov %s621_s23 }
  0x44   : > { %p13_p7 = scmp.ge.s32.totalorder %s16_s25, 6   ;;  %s865_s22 = smov %s625_s24 }
  0x45   : > { %s866_s23 = smov %s869_s26  ;;  %s867_s24 = smov %s873_s27 }
  0x46   :  { %15 = sbr.rel (!%p13_p7) target bundleno = 3 (0x3), region = 77 }

// kernel: upsample_forward.20
= control target key start
LH: loop header
LB: loop body
LE: loop exit
PB: predicated region body
PF: predicated region fallthrough
CT: control target
= control target key end

     0   :  { %s2270_s18 = smov 0   ;;  %s2272_s19 = smov 0   ;;  %s3064_s0 = inlined_call_operand.vmem [shape: f32[2,18,18,4], index: 0, kind: input, shape index: {}]   ;;  %s3065_s1 = inlined_call_operand.vmem [shape: f32[9,4,8], index: 1, kind: input, shape index: {}]   ;;  %s3066_s2 = inlined_call_operand.vmem [shape: f32[1,8], index: 2, kind: input, shape index: {}]   ;;  %s3067_s3 = inlined_call_operand.vmem [shape: f32[2,256,8], index: 3, kind: output, shape index: {0}]   ;;  %s3068_s4 = inlined_call_operand.vmem [shape: f32[2,1,8], index: 4, kind: output, shape index: {1}]   ;;  %s3069_s5 = inlined_call_operand.vmem [shape: f32[2,1,8], index: 5, kind: output, shape index: {2}]  }
   0x1   :  { %s2274_s20 = smov 0   ;;  %s2276_s21 = smov 0  }
   0x2   :  { %s2278_s22 = smov 0  }
   0x3 LB: > { %s25_s23 = sadd.s32 1, %s2229_s20  ;;  %s28_s24 = sadd.s32 1, %s2233_s21  ;;  %s2237_s22 = sphi %s2278_s22, %s16_s22   ;;  %s2233_s21 = sphi %s2276_s21, %s3082_s21   ;;  %s2229_s20 = sphi %s2274_s20, %s3081_s20   ;;  %s2225_s19 = sphi %s2272_s19, %s3080_s19   ;;  %s2221_s18 = sphi %s2270_s18, %s3079_s18  }
   0x4   : > { %p26_p0 = scmp.ge.s32.totalorder %s25_s23, 2  ;;  %p1882_p1 = scmp.ge.s32.totalorder %s2237_s22, 1 }
   0x5   : > { %p206_p2 = scmp.lt.s32.totalorder %s2237_s22, 5 }
   0x6   : > { %s3084_s23 = smov (%p26_p0, %s25_s23), 0  ;;  %s3086_s24 = smov (!%p26_p0, %s28_s24), %s2233_s21 }
   0x7   : > { %p207_p3 = pnand %p1882_p1, %p206_p2  ;;  %p30_p4 = scmp.ge.s32.totalorder %s3086_s24, 2 }
   0x9   : > { %s3088_s24 = smov (%p30_p4, %s3086_s24), 0  ;;  %210 = sbr.rel (%p207_p3) target bundleno = 495 (0x1ef), region = 32 }
   0xe   : > { %v1889_v0 = vld [vmem:[%s3065_s1 + $0x4] sm:$0xf]  ;;  %vm352_vm0 = vcmask 1043456   ;;  %p244_p5 = scmp.lt.s32.totalorder %s2225_s19, 1  ;;  %v1924_v1 = vld [vmem:[%s3065_s1 + $0x8] sm:$0xf] }
   0xf   : > { %2153 = vmatpush.msk.msra.mxu1 %vm352_vm0, %v1889_v0  ;;  %2154 = vmatpush.msk.msra.mxu2 %vm352_vm0, %v1889_v0  ;;  %v1960_v2 = vld [vmem:[%s3065_s1 + $0xc] sm:$0xf]  ;;  %v284_v3 = vld [vmem:[%s3065_s1] sm:$0xf]  ;;  %v1994_v4 = vld [vmem:[%s3065_s1 + $0x10] sm:$0xf] }
  0x10   : > { %s3090_s19 = smov (!%p244_p5, %s2225_s19), 1  ;;  %2155 = vmatpush.msk.msra.mxu3 %vm352_vm0, %v1889_v0  ;;  %s1888_s10 = smul.u32 192, %s2221_s18  ;;  %1890 = vmatpush.msk.msra.mxu0 %vm352_vm0, %v1889_v0  ;;  %vm303_vm1 = vcmask 31744   ;;  %v2064_v9 = vld [vmem:[%s3065_s1 + $0x18] sm:$0xf]  ;;  %vm1613_vm2 = vcmask 64512  }
  0x11   : > { %1925 = vmatpush.msk.msrb.mxu2 %vm352_vm0, %v1924_v1  ;;  %1907 = vmatpush.msk.msrb.mxu1 %vm352_vm0, %v284_v3  ;;  %s2156_s11 = smul.u32 432, %s3090_s19  ;;  %s2331_s14 = scalar_lea.vmem %s3068_s4, %s3090_s19  ;;  %v2098_v12 = vld [vmem:[%s3065_s1 + $0x1c] sm:$0xf]  ;;  %v2028_v15 = vld [vmem:[%s3065_s1 + $0x14] sm:$0xf] }
  0x12   : > { %1961 = vmatpush.msk.msrb.mxu3 %vm352_vm0, %v1960_v2  ;;  %s2338_s17 = scalar_lea.vmem %s3069_s5, %s3090_s19  ;;  %1995 = vmatpush.msk.msrb.mxu0 %vm352_vm0, %v1994_v4  ;;  %v2132_v16 = vld [vmem:[%s3065_s1 + $0x20] sm:$0xf]  ;;  %s1884_s12 = sshll.u32 %s2221_s18, 4 }
  0x13   : > { %s248_s27 = scalar_lea.vmem %s3064_s0, %s2156_s11  ;;  %p252_p6 = scmp.lt.s32.totalorder %s1884_s12, 31 }
  0x14   : > { %s2344_s28 = scalar_lea.vmem %s248_s27, %s1888_s10  ;;  %s1885_s13 = sshll.u32 %s3090_s19, 5 }
  0x15   : > { %v2347_v5 = vld [vmem:[%s2344_s28 + $0x31] sm:$0xff]  ;;  %v2350_v6 = vld [vmem:[%s2344_s28 + $0x61] sm:$0xff]  ;;  %v2367_v10 = vld [vmem:[%s2344_s28 + $0x39] sm:$0xff]  ;;  %s3092_s12 = smov (!%p252_p6, %s1884_s12), 31  ;;  %p2150_p7 = scmp.ne.s32.totalorder %s2221_s18, 0 }
  0x16   : > { %v2353_v7 = vld [vmem:[%s2344_s28 + $0x91] sm:$0xff]  ;;  %1895 = vmatmul.msk.f32.vlgmr.msra.gmra.mxu1 %vm303_vm1, %v2347_v5  ;;  %1899 = vmatmul.msk.f32.vlgmr.msra.gmra.mxu2 %vm303_vm1, %v2350_v6  ;;  %v285_v8 = vld [vmem:[%s2344_s28 + $0x1] sm:$0xff]  ;;  %v2370_v11 = vld [vmem:[%s2344_s28 + $0x69] sm:$0xff]  ;;  %s255_s15 = sadd.s32 %s1885_s13, %s3092_s12 }
  0x17   : > { %1903 = vmatmul.msk.f32.vlgmr.msra.gmra.mxu3 %vm303_vm1, %v2353_v7  ;;  %1891 = vmatmul.msk.f32.vlgmr.msra.gmra.mxu0 %vm303_vm1, %v285_v8  ;;  %v2377_v13 = vld [vmem:[%s2344_s28 + $0x99] sm:$0xff]  ;;  %v286_v14 = vld [vmem:[%s2344_s28 + $0x9] sm:$0xff]  ;;  %v2414_v21 = vld [vmem:[%s2344_s28 + $0x51] sm:$0xff]  ;;  %s1886_s16 = sshll.u32 %s255_s15, 3 }
  0x18   : > { %2065 = vmatpush.msk.msra.mxu2 %vm352_vm0, %v2064_v9  ;;  %2099 = vmatpush.msk.msra.mxu3 %vm352_vm0, %v2098_v12  ;;  %v2397_v17 = vld [vmem:[%s2344_s28 + $0x49] sm:$0xff]  ;;  %v2400_v18 = vld [vmem:[%s2344_s28 + $0x79] sm:$0xff]  ;;  %v2417_v22 = vld [vmem:[%s2344_s28 + $0x81] sm:$0xff]  ;;  %s2849_s19 = scalar_lea.vmem %s3067_s3, %s1886_s16 }
  0x19   : > { %2029 = vmatpush.msk.msra.mxu1 %vm352_vm0, %v2028_v15  ;;  %2133 = vmatpush.msk.msra.mxu0 %vm352_vm0, %v2132_v16  ;;  %v2403_v19 = vld [vmem:[%s2344_s28 + $0xa9] sm:$0xff]  ;;  %v287_v20 = vld [vmem:[%s2344_s28 + $0x19] sm:$0xff]  ;;  %v2420_v23 = vld [vmem:[%s2344_s28 + $0xb1] sm:$0xff] }
  0x1a   : > { %v288_v24 = vld [vmem:[%s2344_s28 + $0x21] sm:$0xff]  ;;  %v1944_v27 = vld [vmem:[%s2344_s28 + $0x18] sm:$0xff]  ;;  %v538_v29 = vld [vmem:[%s2344_s28 + $0xa] sm:$0xff] }
  0x1b   : > { %v268_v25 = vld [vmem:[%s2344_s28] sm:$0xff]  ;;  %v269_v28 = vld [vmem:[%s2344_s28 + $0x8] sm:$0xff]  ;;  %v2448_v32 = vld [vmem:[%s2344_s28 + $0x30] sm:$0xff] }
  0x1c   : > { %v537_v26 = vld [vmem:[%s2344_s28 + $0x2] sm:$0xff]  ;;  %v2445_v31 = vld [vmem:[%s2344_s28 + $0x1a] sm:$0xff]  ;;  %v2471_v35 = vld [vmem:[%s2344_s28 + $0x32] sm:$0xff] }
  0x1d   : > { %v1945_v30 = vld [vmem:[%s2344_s28 + $0x20] sm:$0xff]  ;;  %v2461_v34 = vld [vmem:[%s2344_s28 + $0x38] sm:$0xff]  ;;  %v2474_v36 = vld [vmem:[%s2344_s28 + $0x48] sm:$0xff] }
  0x1e   : > { %1896 = vmatmul.msk.f32.gmra.mxu1 %vm303_vm1, %v2367_v10  ;;  %1900 = vmatmul.msk.f32.gmra.mxu2 %vm303_vm1, %v2370_v11  ;;  %v2458_v33 = vld [vmem:[%s2344_s28 + $0x22] sm:$0xff]  ;;  %v2485_v37 = vld [vmem:[%s2344_s28 + $0x3a] sm:$0xff]  ;;  %v2488_v38 = vld [vmem:[%s2344_s28 + $0x50] sm:$0xff] }
  0x1f   : > { %1904 = vmatmul.msk.f32.gmra.mxu3 %vm303_vm1, %v2377_v13  ;;  %1892 = vmatmul.msk.f32.gmra.mxu0 %vm303_vm1, %v286_v14  ;;  %v2499_v39 = vld [vmem:[%s2344_s28 + $0x4a] sm:$0xff]  ;;  %v2502_v40 = vld [vmem:[%s2344_s28 + $0x60] sm:$0xff]  ;;  %v2513_v41 = vld [vmem:[%s2344_s28 + $0x52] sm:$0xff] }
  0x20   : > { %v2516_v42 = vld [vmem:[%s2344_s28 + $0x68] sm:$0xff]  ;;  %v2530_v44 = vld [vmem:[%s2344_s28 + $0x78] sm:$0xff]  ;;  %v2544_v46 = vld [vmem:[%s2344_s28 + $0x80] sm:$0xff] }
  0x21   : > { %v2527_v43 = vld [vmem:[%s2344_s28 + $0x62] sm:$0xff]  ;;  %v2541_v45 = vld [vmem:[%s2344_s28 + $0x6a] sm:$0xff]  ;;  %v2555_v47 = vld [vmem:[%s2344_s28 + $0x7a] sm:$0xff] }
  0x22   : > { %v2558_v48 = vld [vmem:[%s2344_s28 + $0x90] sm:$0xff]  ;;  %v2569_v49 = vld [vmem:[%s2344_s28 + $0x82] sm:$0xff]  ;;  %v2572_v50 = vld [vmem:[%s2344_s28 + $0x98] sm:$0xff] }
  0x23   : > { %v2585_v52 = vld [vmem:[%s2344_s28 + $0x92] sm:$0xff]  ;;  %v2588_v53 = vld [vmem:[%s2344_s28 + $0xa8] sm:$0xff]  ;;  %v2605_v58 = vld [vmem:[%s2344_s28 + $0x9a] sm:$0xff] }
  0x24   : > { %v2608_v59 = vld [vmem:[%s2344_s28 + $0xb0] sm:$0xff]  ;;  %v2628_v1 = vld [vmem:[%s2344_s28 + $0xc0] sm:$0xff]  ;;  %v2651_v14 = vld [vmem:[%s2344_s28 + $0xc8] sm:$0xff] }
  0x25   : > { %v2625_v0 = vld [vmem:[%s2344_s28 + $0xaa] sm:$0xff]  ;;  %v2631_v3 = vld [vmem:[%s2344_s28 + $0xc1] sm:$0xff]  ;;  %v2648_v12 = vld [vmem:[%s2344_s28 + $0xb2] sm:$0xff] }
  0x26   : > { %1897 = vmatmul.msk.f32.gmra.mxu1 %vm303_vm1, %v2397_v17  ;;  %1901 = vmatmul.msk.f32.gmra.mxu2 %vm303_vm1, %v2400_v18  ;;  %v2654_v16 = vld [vmem:[%s2344_s28 + $0xc9] sm:$0xff] }
  0x27   : > { %1905 = vmatmul.msk.f32.gmra.mxu3 %vm303_vm1, %v2403_v19  ;;  %1893 = vmatmul.msk.f32.gmra.mxu0 %vm303_vm1, %v287_v20  ;;  %3073 = vst [vmem:[#allocation4_spill] sm:$0xff] %v2654_v16 }
  0x2e   : > { %1898 = vmatmul.msk.f32.gmra.mxu1 %vm303_vm1, %v2414_v21  ;;  %1902 = vmatmul.msk.f32.gmra.mxu2 %vm303_vm1, %v2417_v22 }
  0x2f   : > { %1906 = vmatmul.msk.f32.gmra.mxu3 %vm303_vm1, %v2420_v23  ;;  %1894 = vmatmul.msk.f32.gmra.mxu0 %vm303_vm1, %v288_v24 }
  0x36   : > { %1908 = vmatmul.msk.f32.vlgmr.msrb.gmra.mxu1 %vm303_vm1, %v268_v25  ;;  %1926 = vmatmul.msk.f32.vlgmr.msrb.gmra.mxu2 %vm303_vm1, %v537_v26 }
  0x37   : > { %1962 = vmatmul.msk.f32.vlgmr.msrb.gmra.mxu3 %vm303_vm1, %v1944_v27  ;;  %1996 = vmatmul.msk.f32.vlgmr.msrb.gmra.mxu0 %vm303_vm1, %v287_v20 }
  0x3e   : > { %1909 = vmatmul.msk.f32.gmra.mxu1 %vm303_vm1, %v269_v28  ;;  %1927 = vmatmul.msk.f32.gmra.mxu2 %vm303_vm1, %v538_v29 }
  0x3f   : > { %1963 = vmatmul.msk.f32.gmra.mxu3 %vm303_vm1, %v1945_v30  ;;  %1997 = vmatmul.msk.f32.gmra.mxu0 %vm303_vm1, %v288_v24 }
  0x46   : > { %1910 = vmatmul.msk.f32.gmra.mxu1 %vm303_vm1, %v1944_v27  ;;  %1928 = vmatmul.msk.f32.gmra.mxu2 %vm303_vm1, %v2445_v31 }
  0x47   : > { %1964 = vmatmul.msk.f32.gmra.mxu3 %vm303_vm1, %v2448_v32  ;;  %1998 = vmatmul.msk.f32.gmra.mxu0 %vm303_vm1, %v2347_v5 }
  0x4e   : > { %1911 = vmatmul.msk.f32.gmra.mxu1 %vm303_vm1, %v1945_v30  ;;  %1929 = vmatmul.msk.f32.gmra.mxu2 %vm303_vm1, %v2458_v33 }
  0x4f   : > { %1965 = vmatmul.msk.f32.gmra.mxu3 %vm303_vm1, %v2461_v34  ;;  %1999 = vmatmul.msk.f32.gmra.mxu0 %vm303_vm1, %v2367_v10 }
  0x56   : > { %1912 = vmatmul.msk.f32.gmra.mxu1 %vm303_vm1, %v2448_v32  ;;  %1930 = vmatmul.msk.f32.gmra.mxu2 %vm303_vm1, %v2471_v35 }
  0x57   : > { %1966 = vmatmul.msk.f32.gmra.mxu3 %vm303_vm1, %v2474_v36  ;;  %2000 = vmatmul.msk.f32.gmra.mxu0 %vm303_vm1, %v2397_v17 }
  0x5e   : > { %1913 = vmatmul.msk.f32.gmra.mxu1 %vm303_vm1, %v2461_v34  ;;  %1931 = vmatmul.msk.f32.gmra.mxu2 %vm303_vm1, %v2485_v37 }
  0x5f   : > { %1967 = vmatmul.msk.f32.gmra.mxu3 %vm303_vm1, %v2488_v38  ;;  %2001 = vmatmul.msk.f32.gmra.mxu0 %vm303_vm1, %v2414_v21 }
  0x66   : > { %1914 = vmatmul.msk.f32.gmra.mxu1 %vm303_vm1, %v2474_v36  ;;  %1932 = vmatmul.msk.f32.gmra.mxu2 %vm303_vm1, %v2499_v39 }
  0x67   : > { %1968 = vmatmul.msk.f32.gmra.mxu3 %vm303_vm1, %v2502_v40  ;;  %2002 = vmatmul.msk.f32.gmra.mxu0 %vm303_vm1, %v2350_v6 }
  0x6e   : > { %1915 = vmatmul.msk.f32.gmra.mxu1 %vm303_vm1, %v2488_v38  ;;  %1933 = vmatmul.msk.f32.gmra.mxu2 %vm303_vm1, %v2513_v41 }
  0x6f   : > { %1969 = vmatmul.msk.f32.gmra.mxu3 %vm303_vm1, %v2516_v42  ;;  %2003 = vmatmul.msk.f32.gmra.mxu0 %vm303_vm1, %v2370_v11 }
  0x76   : > { %1916 = vmatmul.msk.f32.gmra.mxu1 %vm303_vm1, %v2502_v40  ;;  %1934 = vmatmul.msk.f32.gmra.mxu2 %vm303_vm1, %v2527_v43 }
  0x77   : > { %1970 = vmatmul.msk.f32.gmra.mxu3 %vm303_vm1, %v2530_v44  ;;  %2004 = vmatmul.msk.f32.gmra.mxu0 %vm303_vm1, %v2400_v18 }
  0x7e   : > { %1917 = vmatmul.msk.f32.gmra.mxu1 %vm303_vm1, %v2516_v42  ;;  %1935 = vmatmul.msk.f32.gmra.mxu2 %vm303_vm1, %v2541_v45 }
  0x7f   : > { %1971 = vmatmul.msk.f32.gmra.mxu3 %vm303_vm1, %v2544_v46  ;;  %2005 = vmatmul.msk.f32.gmra.mxu0 %vm303_vm1, %v2417_v22 }
  0x86   : > { %1918 = vmatmul.msk.f32.gmra.mxu1 %vm303_vm1, %v2530_v44  ;;  %1936 = vmatmul.msk.f32.gmra.mxu2 %vm303_vm1, %v2555_v47 }
  0x87   : > { %1972 = vmatmul.msk.f32.gmra.mxu3 %vm303_vm1, %v2558_v48  ;;  %2006 = vmatmul.msk.f32.gmra.mxu0 %vm303_vm1, %v2353_v7 }
  0x8e   : > { %1919 = vmatmul.msk.f32.gmra.mxu1 %vm303_vm1, %v2544_v46  ;;  %1937 = vmatmul.msk.f32.gmra.mxu2 %vm303_vm1, %v2569_v49 }
  0x8f   : > { %1973 = vmatmul.msk.f32.gmra.mxu3 %vm303_vm1, %v2572_v50  ;;  %2007 = vmatmul.msk.f32.gmra.mxu0 %vm303_vm1, %v2377_v13 }
  0x93   : > { %v2582_v51 = vpop.f32.mrf.mxu1 }
  0x94   : > { %v373_v54 = vpop.f32.mrf.mxu0 }
  0x96   : > { %1920 = vmatmul.msk.f32.gmra.mxu1 %vm303_vm1, %v2558_v48  ;;  %1938 = vmatmul.msk.f32.gmra.mxu2 %vm303_vm1, %v2585_v52 }
  0x97   : > { %1974 = vmatmul.msk.f32.gmra.mxu3 %vm303_vm1, %v2588_v53  ;;  %2008 = vmatmul.msk.f32.gmra.mxu0 %vm303_vm1, %v2403_v19 }
  0x99   : > { %v2598_v55 = vpop.f32.mrf.mxu2 }
  0x9a   : > { %v2600_v56 = vpop.f32.mrf.mxu3 }
  0x9b   : > { %v2602_v57 = vpop.f32.mrf.mxu1 }
  0x9c   : > { %v376_v60 = vpop.f32.mrf.mxu0 }
  0x9e   : > { %1921 = vmatmul.msk.f32.gmra.mxu1 %vm303_vm1, %v2572_v50  ;;  %1939 = vmatmul.msk.f32.gmra.mxu2 %vm303_vm1, %v2605_v58 }
  0x9f   : > { %1975 = vmatmul.msk.f32.gmra.mxu3 %vm303_vm1, %v2608_v59  ;;  %2009 = vmatmul.msk.f32.gmra.mxu0 %vm303_vm1, %v2420_v23 }
  0xa1   : > { %v2618_v61 = vpop.f32.mrf.mxu2 }
  0xa2   : > { %v2620_v62 = vpop.f32.mrf.mxu3 }
  0xa3   : > { %3071 = vst [vmem:[#allocation2_spill] sm:$0xff] %v2620_v62  ;;  %v2622_v63 = vpop.f32.mrf.mxu1 }
  0xa4   : > { %v379_v2 = vpop.f32.mrf.mxu0 }
  0xa6   : > { %1922 = vmatmul.msk.f32.gmra.mxu1 %vm303_vm1, %v2588_v53  ;;  %1940 = vmatmul.msk.f32.gmra.mxu2 %vm303_vm1, %v2625_v0 }
  0xa7   : > { %1976 = vmatmul.msk.f32.gmra.mxu3 %vm303_vm1, %v2628_v1  ;;  %2010 = vmatmul.msk.f32.gmra.mxu0 %vm303_vm1, %v2631_v3 }
  0xa9   : > { %v2641_v4 = vpop.f32.mrf.mxu2 }
  0xaa   : > { %v2643_v8 = vpop.f32.mrf.mxu3 }
  0xab   : > { %3072 = vst [vmem:[#allocation3_spill] sm:$0xff] %v2643_v8  ;;  %v2645_v9 = vpop.f32.mrf.mxu1 }
  0xac   : > { %v382_v15 = vpop.f32.mrf.mxu0 }
  0xae   : > { %1923 = vmatmul.msk.f32.gmra.mxu1 %vm303_vm1, %v2608_v59  ;;  %1941 = vmatmul.msk.f32.gmra.mxu2 %vm303_vm1, %v2648_v12 }
  0xaf   : > { %1977 = vmatmul.msk.f32.gmra.mxu3 %vm303_vm1, %v2651_v14  ;;  %2011 = vmatmul.msk.f32.gmra.mxu0 %vm303_vm1, %v2654_v16 }
  0xb1   : > { %v2664_v20 = vpop.f32.mrf.mxu2 }
  0xb2   : > { %v2666_v24 = vpop.f32.mrf.mxu3 }
  0xb3   : > { %3074 = vst [vmem:[#allocation5_spill] sm:$0xff] %v2666_v24  ;;  %v489_v25 = vpop.f32.mrf.mxu1 }
  0xb4   : > { %v926_v26 = vpop.f32.mrf.mxu0  ;;  %v490_v27 = vadd.f32 %v489_v25, %v373_v54 }
  0xb6   : > { %2030 = vmatmul.msk.f32.vlgmr.msra.gmra.mxu1 %vm303_vm1, %v2445_v31  ;;  %2066 = vmatmul.msk.f32.vlgmr.msra.gmra.mxu2 %vm303_vm1, %v2448_v32 }
  0xb7   : > { %2100 = vmatmul.msk.f32.vlgmr.msra.gmra.mxu3 %vm303_vm1, %v2347_v5  ;;  %2134 = vmatmul.msk.f32.vlgmr.msra.gmra.mxu0 %vm303_vm1, %v2471_v35 }
  0xb9   : > { %v623_v28 = vpop.f32.mrf.mxu2 }
  0xba   : > { %v671_v29 = vadd.f32 %v623_v28, %v490_v27  ;;  %v776_v30 = vpop.f32.mrf.mxu3 }
  0xbb   : > { %v492_v8 = vpop.f32.mrf.mxu1 }
  0xbc   : > { %v824_v24 = vadd.f32 %v776_v30, %v671_v29  ;;  %v929_v62 = vpop.f32.mrf.mxu0  ;;  %v493_v5 = vadd.f32 %v492_v8, %v376_v60 }
  0xbe   : > { %v2676_v16 = vadd.f32 %v926_v26, %v824_v24  ;;  %2031 = vmatmul.msk.f32.gmra.mxu1 %vm303_vm1, %v2458_v33  ;;  %2067 = vmatmul.msk.f32.gmra.mxu2 %vm303_vm1, %v2461_v34 }
  0xbf   : > { %2101 = vmatmul.msk.f32.gmra.mxu3 %vm303_vm1, %v2367_v10  ;;  %2135 = vmatmul.msk.f32.gmra.mxu0 %vm303_vm1, %v2485_v37 }
  0xc1   : > { %v626_v31 = vpop.f32.mrf.mxu2 }
  0xc2   : > { %v672_v32 = vadd.f32 %v626_v31, %v493_v5  ;;  %v779_v54 = vpop.f32.mrf.mxu3 }
  0xc3   : > { %v495_v25 = vpop.f32.mrf.mxu1 }
  0xc4   : > { %v825_v27 = vadd.f32 %v779_v54, %v672_v32  ;;  %v932_v24 = vpop.f32.mrf.mxu0  ;;  %v496_v10 = vadd.f32 %v495_v25, %v379_v2 }
  0xc6   : > { %v2686_v26 = vadd.f32 %v929_v62, %v825_v27  ;;  %2032 = vmatmul.msk.f32.gmra.mxu1 %vm303_vm1, %v2471_v35  ;;  %2068 = vmatmul.msk.f32.gmra.mxu2 %vm303_vm1, %v2474_v36 }
  0xc7   : > { %2102 = vmatmul.msk.f32.gmra.mxu3 %vm303_vm1, %v2397_v17  ;;  %2136 = vmatmul.msk.f32.gmra.mxu0 %vm303_vm1, %v2499_v39 }
  0xc9   : > { %v629_v33 = vpop.f32.mrf.mxu2 }
  0xca   : > { %v673_v34 = vadd.f32 %v629_v33, %v496_v10  ;;  %v782_v60 = vpop.f32.mrf.mxu3 }
  0xcb   : > { %v498_v8 = vpop.f32.mrf.mxu1 }
  0xcc   : > { %v826_v28 = vadd.f32 %v782_v60, %v673_v34  ;;  %v935_v62 = vpop.f32.mrf.mxu0  ;;  %v499_v17 = vadd.f32 %v498_v8, %v382_v15 }
  0xce   : > { %v2696_v29 = vadd.f32 %v932_v24, %v826_v28  ;;  %2033 = vmatmul.msk.f32.gmra.mxu1 %vm303_vm1, %v2485_v37  ;;  %2069 = vmatmul.msk.f32.gmra.mxu2 %vm303_vm1, %v2488_v38 }
  0xcf   : > { %2103 = vmatmul.msk.f32.gmra.mxu3 %vm303_vm1, %v2414_v21  ;;  %2137 = vmatmul.msk.f32.gmra.mxu0 %vm303_vm1, %v2513_v41 }
  0xd1   : > { %v632_v35 = vpop.f32.mrf.mxu2 }
  0xd2   : > { %v674_v36 = vadd.f32 %v632_v35, %v499_v17  ;;  %v785_v2 = vpop.f32.mrf.mxu3 }
  0xd3   : > { %v501_v30 = vpop.f32.mrf.mxu1 }
  0xd4   : > { %v827_v5 = vadd.f32 %v785_v2, %v674_v36  ;;  %v938_v31 = vpop.f32.mrf.mxu0  ;;  %v502_v21 = vadd.f32 %v501_v30, %v2582_v51 }
  0xd6   : > { %v2706_v32 = vadd.f32 %v935_v62, %v827_v5  ;;  %2034 = vmatmul.msk.f32.gmra.mxu1 %vm303_vm1, %v2499_v39  ;;  %2070 = vmatmul.msk.f32.gmra.mxu2 %vm303_vm1, %v2502_v40 }
  0xd7   : > { %2104 = vmatmul.msk.f32.gmra.mxu3 %vm303_vm1, %v2350_v6  ;;  %2138 = vmatmul.msk.f32.gmra.mxu0 %vm303_vm1, %v2527_v43 }
  0xd9   : > { %v635_v37 = vpop.f32.mrf.mxu2 }
  0xda   : > { %v675_v38 = vadd.f32 %v635_v37, %v502_v21  ;;  %v788_v15 = vpop.f32.mrf.mxu3 }
  0xdb   : > { %v504_v54 = vpop.f32.mrf.mxu1 }
  0xdc   : > { %v828_v25 = vadd.f32 %v788_v15, %v675_v38  ;;  %v941_v27 = vpop.f32.mrf.mxu0  ;;  %v505_v6 = vadd.f32 %v504_v54, %v2602_v57 }
  0xde   : > { %v2717_v24 = vadd.f32 %v938_v31, %v828_v25  ;;  %2035 = vmatmul.msk.f32.gmra.mxu1 %vm303_vm1, %v2513_v41  ;;  %2071 = vmatmul.msk.f32.gmra.mxu2 %vm303_vm1, %v2516_v42 }
  0xdf   : > { %2105 = vmatmul.msk.f32.gmra.mxu3 %vm303_vm1, %v2370_v11  ;;  %2139 = vmatmul.msk.f32.gmra.mxu0 %vm303_vm1, %v2541_v45 }
  0xe1   : > { %v638_v39 = vpop.f32.mrf.mxu2 }
  0xe2   : > { %v676_v40 = vadd.f32 %v638_v39, %v505_v6  ;;  %v791_v51 = vpop.f32.mrf.mxu3 }
  0xe3   : > { %v507_v10 = vpop.f32.mrf.mxu1 }
  0xe4   : > { %v829_v33 = vadd.f32 %v791_v51, %v676_v40  ;;  %v944_v34 = vpop.f32.mrf.mxu0  ;;  %v508_v11 = vadd.f32 %v507_v10, %v2622_v63 }
  0xe6   : > { %v2728_v60 = vadd.f32 %v941_v27, %v829_v33  ;;  %2036 = vmatmul.msk.f32.gmra.mxu1 %vm303_vm1, %v2527_v43  ;;  %2072 = vmatmul.msk.f32.gmra.mxu2 %vm303_vm1, %v2530_v44 }
  0xe7   : > { %2106 = vmatmul.msk.f32.gmra.mxu3 %vm303_vm1, %v2400_v18  ;;  %2140 = vmatmul.msk.f32.gmra.mxu0 %vm303_vm1, %v2555_v47 }
  0xe9   : > { %v641_v41 = vpop.f32.mrf.mxu2 }
  0xea   : > { %v677_v42 = vadd.f32 %v641_v41, %v508_v11  ;;  %v794_v57 = vpop.f32.mrf.mxu3 }
  0xeb   : > { %v510_v8 = vpop.f32.mrf.mxu1 }
  0xec   : > { %v830_v28 = vadd.f32 %v794_v57, %v677_v42  ;;  %v947_v62 = vpop.f32.mrf.mxu0  ;;  %v511_v18 = vadd.f32 %v510_v8, %v2645_v9 }
  0xee   : > { %v2739_v17 = vadd.f32 %v944_v34, %v830_v28  ;;  %2037 = vmatmul.msk.f32.gmra.mxu1 %vm303_vm1, %v2541_v45  ;;  %2073 = vmatmul.msk.f32.gmra.mxu2 %vm303_vm1, %v2544_v46  ;;  %v2128_v34 = vld [vmem:[%s2344_s28 + $0xc2] sm:$0xff] }
  0xef   : > { %2107 = vmatmul.msk.f32.gmra.mxu3 %vm303_vm1, %v2417_v22  ;;  %2141 = vmatmul.msk.f32.gmra.mxu0 %vm303_vm1, %v2569_v49 }
  0xf1   : > { %v644_v43 = vpop.f32.mrf.mxu2 }
  0xf2   : > { %v678_v44 = vadd.f32 %v644_v43, %v511_v18  ;;  %v797_v63 = vpop.f32.mrf.mxu3 }
  0xf3   : > { %v513_v35 = vpop.f32.mrf.mxu1 }
  0xf4   : > { %v831_v36 = vadd.f32 %v797_v63, %v678_v44  ;;  %v950_v2 = vpop.f32.mrf.mxu0  ;;  %v514_v22 = vadd.f32 %v513_v35, %v2598_v55  ;;  %v2062_v44 = vld [vmem:[%s2344_s28 + $0xd8] sm:$0xff] }
  0xf5   : > { %v2096_v35 = vld [vmem:[%s2344_s28 + $0xd9] sm:$0xff] }
  0xf6   : > { %v2750_v30 = vadd.f32 %v947_v62, %v831_v36  ;;  %2038 = vmatmul.msk.f32.gmra.mxu1 %vm303_vm1, %v2555_v47  ;;  %2074 = vmatmul.msk.f32.gmra.mxu2 %vm303_vm1, %v2558_v48  ;;  %v2130_v36 = vld [vmem:[%s2344_s28 + $0xda] sm:$0xff] }
  0xf7   : > { %2108 = vmatmul.msk.f32.gmra.mxu3 %vm303_vm1, %v2353_v7  ;;  %2142 = vmatmul.msk.f32.gmra.mxu0 %vm303_vm1, %v2585_v52 }
  0xf9   : > { %v647_v45 = vpop.f32.mrf.mxu2 }
  0xfa   : > { %v679_v46 = vadd.f32 %v647_v45, %v514_v22  ;;  %v800_v9 = vpop.f32.mrf.mxu3 }
  0xfb   : > { %v516_v5 = vpop.f32.mrf.mxu1 }
  0xfc   : > { %v832_v31 = vadd.f32 %v800_v9, %v679_v46  ;;  %v953_v21 = vpop.f32.mrf.mxu0  ;;  %v517_v7 = vadd.f32 %v516_v5, %v2618_v61 }
  0xfe   : > { %v2761_v37 = vadd.f32 %v950_v2, %v832_v31  ;;  %2039 = vmatmul.msk.f32.gmra.mxu1 %vm303_vm1, %v2569_v49  ;;  %2075 = vmatmul.msk.f32.gmra.mxu2 %vm303_vm1, %v2572_v50  ;;  %v3077_v2 = vld [vmem:[#allocation3_spill] sm:$0xff]  ;;  %v2063_v31 = vld [vmem:[%s2344_s28 + $0xe0] sm:$0xff] }
  0xff   : > { %2109 = vmatmul.msk.f32.gmra.mxu3 %vm303_vm1, %v2377_v13  ;;  %2143 = vmatmul.msk.f32.gmra.mxu0 %vm303_vm1, %v2605_v58 }
 0x101   : > { %v650_v47 = vpop.f32.mrf.mxu2 }
 0x102   : > { %v680_v48 = vadd.f32 %v650_v47, %v517_v7  ;;  %v803_v55 = vpop.f32.mrf.mxu3  ;;  %v2097_v7 = vld [vmem:[%s2344_s28 + $0xe1] sm:$0xff] }
 0x103   : > { %v519_v38 = vpop.f32.mrf.mxu1 }
 0x104   : > { %v833_v15 = vadd.f32 %v803_v55, %v680_v48  ;;  %v956_v54 = vpop.f32.mrf.mxu0  ;;  %v520_v13 = vadd.f32 %v519_v38, %v2641_v4  ;;  %v2131_v48 = vld [vmem:[%s2344_s28 + $0xe2] sm:$0xff]  ;;  %v3078_v38 = vld [vmem:[#allocation5_spill] sm:$0xff] }
 0x106   : > { %v2772_v25 = vadd.f32 %v953_v21, %v833_v15  ;;  %2040 = vmatmul.msk.f32.gmra.mxu1 %vm303_vm1, %v2585_v52  ;;  %2076 = vmatmul.msk.f32.gmra.mxu2 %vm303_vm1, %v2588_v53 }
 0x107   : > { %2110 = vmatmul.msk.f32.gmra.mxu3 %vm303_vm1, %v2403_v19  ;;  %2144 = vmatmul.msk.f32.gmra.mxu0 %vm303_vm1, %v2625_v0 }
 0x109   : > { %v653_v49 = vpop.f32.mrf.mxu2 }
 0x10a   : > { %v681_v50 = vadd.f32 %v653_v49, %v520_v13  ;;  %v806_v61 = vpop.f32.mrf.mxu3 }
 0x10b   : > { %v522_v27 = vpop.f32.mrf.mxu1 }
 0x10c   : > { %v834_v6 = vadd.f32 %v806_v61, %v681_v50  ;;  %v959_v39 = vpop.f32.mrf.mxu0  ;;  %v523_v19 = vadd.f32 %v522_v27, %v2664_v20 }
 0x10e   : > { %v2783_v40 = vadd.f32 %v956_v54, %v834_v6  ;;  %2041 = vmatmul.msk.f32.gmra.mxu1 %vm303_vm1, %v2605_v58  ;;  %2077 = vmatmul.msk.f32.gmra.mxu2 %vm303_vm1, %v2608_v59 }
 0x10f   : > { %2111 = vmatmul.msk.f32.gmra.mxu3 %vm303_vm1, %v2420_v23  ;;  %2145 = vmatmul.msk.f32.gmra.mxu0 %vm303_vm1, %v2648_v12 }
 0x111   : > { %v656_v52 = vpop.f32.mrf.mxu2 }
 0x112   : > { %v682_v53 = vadd.f32 %v656_v52, %v523_v19  ;;  %v809_v4 = vpop.f32.mrf.mxu3 }
 0x113   : > { %v525_v51 = vpop.f32.mrf.mxu1 }
 0x114   : > { %v835_v10 = vadd.f32 %v809_v4, %v682_v53  ;;  %v962_v33 = vpop.f32.mrf.mxu0  ;;  %v526_v23 = vadd.f32 %v525_v51, %v2600_v56  ;;  %v3076_v56 = vld [vmem:[#allocation2_spill] sm:$0xff] }
 0x116   : > { %v2795_v58 = vadd.f32 %v959_v39, %v835_v10  ;;  %2042 = vmatmul.msk.f32.gmra.mxu1 %vm303_vm1, %v2625_v0  ;;  %2078 = vmatmul.msk.f32.gmra.mxu2 %vm303_vm1, %v2628_v1  ;;  %v2129_v0 = vld [vmem:[%s2344_s28 + $0xca] sm:$0xff]  ;;  %v2844_v10 = vld [vmem:[%s3066_s2] ss:$0 sm:$0xff] }
 0x117   : > { %2112 = vmatmul.msk.f32.gmra.mxu3 %vm303_vm1, %v2631_v3  ;;  %2146 = vmatmul.msk.f32.gmra.mxu0 %vm303_vm1, %v2128_v34  ;;  %v3075_v1 = vld [vmem:[#allocation4_spill] sm:$0xff] }
 0x119   : > { %v659_v59 = vpop.f32.mrf.mxu2 }
 0x11a   : > { %v683_v20 = vadd.f32 %v659_v59, %v526_v23  ;;  %v812_v11 = vpop.f32.mrf.mxu3 }
 0x11b   : > { %v528_v41 = vpop.f32.mrf.mxu1 }
 0x11c   : > { %v836_v42 = vadd.f32 %v812_v11, %v683_v20  ;;  %v965_v57 = vpop.f32.mrf.mxu0  ;;  %v529_v3 = vadd.f32 %v528_v41, %v3076_v56 }
 0x11e   : > { %v2806_v8 = vadd.f32 %v962_v33, %v836_v42  ;;  %2043 = vmatmul.msk.f32.gmra.mxu1 %vm303_vm1, %v2648_v12  ;;  %2079 = vmatmul.msk.f32.gmra.mxu2 %vm303_vm1, %v2651_v14 }
 0x11f   : > { %2113 = vmatmul.msk.f32.gmra.mxu3 %vm303_vm1, %v3075_v1  ;;  %2147 = vmatmul.msk.f32.gmra.mxu0 %vm303_vm1, %v2129_v0 }
 0x121   : > { %v662_v28 = vpop.f32.mrf.mxu2 }
 0x122   : > { %v684_v62 = vadd.f32 %v662_v28, %v529_v3  ;;  %v815_v18 = vpop.f32.mrf.mxu3 }
 0x123   : > { %v531_v43 = vpop.f32.mrf.mxu1 }
 0x124   : > { %v837_v63 = vadd.f32 %v815_v18, %v684_v62  ;;  %v968_v12 = vpop.f32.mrf.mxu0  ;;  %v532_v22 = vadd.f32 %v531_v43, %v3077_v2 }
 0x126   : > { %v2819_v14 = vadd.f32 %v965_v57, %v837_v63  ;;  %2044 = vmatmul.msk.f32.gmra.mxu1 %vm303_vm1, %v2128_v34  ;;  %2080 = vmatmul.msk.f32.gmra.mxu2 %vm303_vm1, %v2062_v44 }
 0x127   : > { %2114 = vmatmul.msk.f32.gmra.mxu3 %vm303_vm1, %v2096_v35  ;;  %2148 = vmatmul.msk.f32.gmra.mxu0 %vm303_vm1, %v2130_v36 }
 0x129   : > { %v665_v45 = vpop.f32.mrf.mxu2 }
 0x12a   : > { %v685_v46 = vadd.f32 %v665_v45, %v532_v22  ;;  %v818_v9 = vpop.f32.mrf.mxu3 }
 0x12b   : > { %v534_v5 = vpop.f32.mrf.mxu1 }
 0x12c   : > { %v838_v21 = vadd.f32 %v818_v9, %v685_v46  ;;  %v971_v47 = vpop.f32.mrf.mxu0  ;;  %v535_v15 = vadd.f32 %v534_v5, %v3078_v38 }
 0x12e   : > { %v2829_v55 = vadd.f32 %v968_v12, %v838_v21  ;;  %2045 = vmatmul.msk.f32.gmra.mxu1 %vm303_vm1, %v2129_v0  ;;  %2081 = vmatmul.msk.f32.gmra.mxu2 %vm303_vm1, %v2063_v31 }
 0x12f   : > { %2115 = vmatmul.msk.f32.gmra.mxu3 %vm303_vm1, %v2097_v7  ;;  %2149 = vmatmul.msk.f32.gmra.mxu0 %vm303_vm1, %v2131_v48 }
 0x131   : > { %v668_v54 = vpop.f32.mrf.mxu2 }
 0x132   : > { %v686_v13 = vadd.f32 %v668_v54, %v535_v15  ;;  %v821_v49 = vpop.f32.mrf.mxu3 }
 0x133   : > { %v1076_v50 = vpop.f32.mrf.mxu1 }
 0x134   : > { %v839_v61 = vadd.f32 %v821_v49, %v686_v13  ;;  %v1529_v27 = vpop.f32.mrf.mxu0  ;;  %v1124_v39 = vadd.f32 %v1076_v50, %v2676_v16 }
 0x136   : > { %v2837_v6 = vadd.f32 %v971_v47, %v839_v61 }
 0x139   : > { %v1229_v19 = vpop.f32.mrf.mxu2 }
 0x13a   : > { %v1277_v52 = vadd.f32 %v1229_v19, %v1124_v39  ;;  %v1379_v53 = vpop.f32.mrf.mxu3 }
 0x13b   : > { %v1079_v4 = vpop.f32.mrf.mxu1 }
 0x13c   : > { %v1427_v51 = vadd.f32 %v1379_v53, %v1277_v52  ;;  %v1532_v33 = vpop.f32.mrf.mxu0  ;;  %v1125_v16 = vadd.f32 %v1079_v4, %v2686_v26 }
 0x13e   : > { %v1577_v34 = vadd.f32 %v1529_v27, %v1427_v51 }
 0x140   : > { %v2853_v23 = vadd.f32 %v2844_v10, %v1577_v34 }
 0x141   : > { %v1232_v59 = vpop.f32.mrf.mxu2 }
 0x142   : > { %1614 = vst.msk [vmem:[%s2849_s19] sm:$0xff] %vm1613_vm2, %v2853_v23  ;;  %v1278_v20 = vadd.f32 %v1232_v59, %v1125_v16  ;;  %v1382_v11 = vpop.f32.mrf.mxu3 }
 0x143   : > { %v1082_v41 = vpop.f32.mrf.mxu1 }
 0x144   : > { %v1428_v42 = vadd.f32 %v1382_v11, %v1278_v20  ;;  %v1535_v57 = vpop.f32.mrf.mxu0  ;;  %v1126_v1 = vadd.f32 %v1082_v41, %v2696_v29 }
 0x146   : > { %v1578_v0 = vadd.f32 %v1532_v33, %v1428_v42 }
 0x148   : > { %v2860_v56 = vadd.f32 %v2844_v10, %v1578_v0 }
 0x149   : > { %v1235_v26 = vpop.f32.mrf.mxu2 }
 0x14a   : > { %1615 = vst.msk [vmem:[%s2849_s19 + $0x8] sm:$0xff] %vm1613_vm2, %v2860_v56  ;;  %v1279_v3 = vadd.f32 %v1235_v26, %v1126_v1  ;;  %v1385_v28 = vpop.f32.mrf.mxu3 }
 0x14b   : > { %v1085_v62 = vpop.f32.mrf.mxu1 }
 0x14c   : > { %v1429_v18 = vadd.f32 %v1385_v28, %v1279_v3  ;;  %v1538_v43 = vpop.f32.mrf.mxu0  ;;  %v1127_v63 = vadd.f32 %v1085_v62, %v2706_v32 }
 0x14e   : > { %v1579_v44 = vadd.f32 %v1535_v57, %v1429_v18 }
 0x150   : > { %v2867_v35 = vadd.f32 %v2844_v10, %v1579_v44 }
 0x151   : > { %v1238_v29 = vpop.f32.mrf.mxu2 }
 0x152   : > { %1616 = vst.msk [vmem:[%s2849_s19 + $0x10] sm:$0xff] %vm1613_vm2, %v2867_v35  ;;  %v1280_v12 = vadd.f32 %v1238_v29, %v1127_v63  ;;  %v1388_v36 = vpop.f32.mrf.mxu3 }
 0x153   : > { %v1088_v2 = vpop.f32.mrf.mxu1 }
 0x154   : > { %v1430_v22 = vadd.f32 %v1388_v36, %v1280_v12  ;;  %v1541_v45 = vpop.f32.mrf.mxu0  ;;  %v1128_v9 = vadd.f32 %v1088_v2, %v2717_v24 }
 0x156   : > { %v1580_v46 = vadd.f32 %v1538_v43, %v1430_v22 }
 0x158   : > { %v2874_v5 = vadd.f32 %v2844_v10, %v1580_v46 }
 0x159   : > { %v1241_v32 = vpop.f32.mrf.mxu2 }
 0x15a   : > { %1617 = vst.msk [vmem:[%s2849_s19 + $0x18] sm:$0xff] %vm1613_vm2, %v2874_v5  ;;  %v1281_v31 = vadd.f32 %v1241_v32, %v1128_v9  ;;  %v1391_v21 = vpop.f32.mrf.mxu3 }
 0x15b   : > { %v1091_v7 = vpop.f32.mrf.mxu1 }
 0x15c   : > { %v1431_v47 = vadd.f32 %v1391_v21, %v1281_v31  ;;  %v1544_v48 = vpop.f32.mrf.mxu0  ;;  %v1129_v15 = vadd.f32 %v1091_v7, %v2728_v60 }
 0x15e   : > { %v1581_v38 = vadd.f32 %v1541_v45, %v1431_v47 }
 0x160   : > { %v2881_v54 = vadd.f32 %v2844_v10, %v1581_v38 }
 0x161   : > { %v1244_v24 = vpop.f32.mrf.mxu2 }
 0x162   : > { %1618 = vst.msk [vmem:[%s2849_s19 + $0x20] sm:$0xff] %vm1613_vm2, %v2881_v54  ;;  %v1282_v13 = vadd.f32 %v1244_v24, %v1129_v15  ;;  %v1394_v49 = vpop.f32.mrf.mxu3 }
 0x163   : > { %v1094_v50 = vpop.f32.mrf.mxu1 }
 0x164   : > { %v1432_v61 = vadd.f32 %v1394_v49, %v1282_v13  ;;  %v1547_v27 = vpop.f32.mrf.mxu0  ;;  %v1130_v19 = vadd.f32 %v1094_v50, %v2739_v17 }
 0x166   : > { %v1582_v39 = vadd.f32 %v1544_v48, %v1432_v61 }
 0x168   : > { %v2888_v52 = vadd.f32 %v2844_v10, %v1582_v39 }
 0x169   : > { %v1247_v60 = vpop.f32.mrf.mxu2 }
 0x16a   : > { %1619 = vst.msk [vmem:[%s2849_s19 + $0x28] sm:$0xff] %vm1613_vm2, %v2888_v52  ;;  %v1283_v53 = vadd.f32 %v1247_v60, %v1130_v19  ;;  %v1397_v4 = vpop.f32.mrf.mxu3 }
 0x16b   : > { %v1097_v51 = vpop.f32.mrf.mxu1 }
 0x16c   : > { %v1433_v33 = vadd.f32 %v1397_v4, %v1283_v53  ;;  %v1550_v34 = vpop.f32.mrf.mxu0  ;;  %v1131_v59 = vadd.f32 %v1097_v51, %v2750_v30 }
 0x16e   : > { %v1583_v16 = vadd.f32 %v1547_v27, %v1433_v33 }
 0x170   : > { %v2895_v20 = vadd.f32 %v2844_v10, %v1583_v16 }
 0x171   : > { %v1250_v17 = vpop.f32.mrf.mxu2 }
 0x172   : > { %1620 = vst.msk [vmem:[%s2849_s19 + $0x30] sm:$0xff] %vm1613_vm2, %v2895_v20  ;;  %v1284_v11 = vadd.f32 %v1250_v17, %v1131_v59  ;;  %v1400_v41 = vpop.f32.mrf.mxu3 }
 0x173   : > { %v1100_v42 = vpop.f32.mrf.mxu1 }
 0x174   : > { %v1434_v57 = vadd.f32 %v1400_v41, %v1284_v11  ;;  %v1553_v0 = vpop.f32.mrf.mxu0  ;;  %v1132_v26 = vadd.f32 %v1100_v42, %v2761_v37 }
 0x176   : > { %v1584_v1 = vadd.f32 %v1550_v34, %v1434_v57 }
 0x178   : > { %v2902_v3 = vadd.f32 %v2844_v10, %v1584_v1 }
 0x179   : > { %v1253_v30 = vpop.f32.mrf.mxu2 }
 0x17a   : > { %1621 = vst.msk [vmem:[%s2849_s19 + $0x38] sm:$0xff] %vm1613_vm2, %v2902_v3  ;;  %v1285_v28 = vadd.f32 %v1253_v30, %v1132_v26  ;;  %v1403_v62 = vpop.f32.mrf.mxu3 }
 0x17b   : > { %v1103_v18 = vpop.f32.mrf.mxu1 }
 0x17c   : > { %v1435_v43 = vadd.f32 %v1403_v62, %v1285_v28  ;;  %v1556_v44 = vpop.f32.mrf.mxu0  ;;  %v1133_v29 = vadd.f32 %v1103_v18, %v2772_v25 }
 0x17e   : > { %v1585_v63 = vadd.f32 %v1553_v0, %v1435_v43 }
 0x180   : > { %v2909_v12 = vadd.f32 %v2844_v10, %v1585_v63 }
 0x181   : > { %v1256_v37 = vpop.f32.mrf.mxu2 }
 0x182   : > { %1622 = vst.msk [vmem:[%s2849_s19 + $0x40] sm:$0xff] %vm1613_vm2, %v2909_v12  ;;  %v1286_v36 = vadd.f32 %v1256_v37, %v1133_v29  ;;  %v1406_v2 = vpop.f32.mrf.mxu3 }
 0x183   : > { %v1106_v22 = vpop.f32.mrf.mxu1 }
 0x184   : > { %v1436_v45 = vadd.f32 %v1406_v2, %v1286_v36  ;;  %v1559_v46 = vpop.f32.mrf.mxu0  ;;  %v1134_v32 = vadd.f32 %v1106_v22, %v2783_v40 }
 0x186   : > { %v1586_v9 = vadd.f32 %v1556_v44, %v1436_v45 }
 0x188   : > { %v2916_v31 = vadd.f32 %v2844_v10, %v1586_v9 }
 0x189   : > { %v1259_v25 = vpop.f32.mrf.mxu2 }
 0x18a   : > { %1623 = vst.msk [vmem:[%s2849_s19 + $0x48] sm:$0xff] %vm1613_vm2, %v2916_v31  ;;  %v1287_v21 = vadd.f32 %v1259_v25, %v1134_v32  ;;  %v1409_v7 = vpop.f32.mrf.mxu3 }
 0x18b   : > { %v1109_v47 = vpop.f32.mrf.mxu1 }
 0x18c   : > { %v1437_v48 = vadd.f32 %v1409_v7, %v1287_v21  ;;  %v1562_v38 = vpop.f32.mrf.mxu0  ;;  %v1135_v24 = vadd.f32 %v1109_v47, %v2795_v58 }
 0x18e   : > { %v1587_v15 = vadd.f32 %v1559_v46, %v1437_v48 }
 0x190   : > { %v2923_v13 = vadd.f32 %v2844_v10, %v1587_v15 }
 0x191   : > { %v1262_v40 = vpop.f32.mrf.mxu2 }
 0x192   : > { %1624 = vst.msk [vmem:[%s2849_s19 + $0x50] sm:$0xff] %vm1613_vm2, %v2923_v13  ;;  %v1288_v49 = vadd.f32 %v1262_v40, %v1135_v24  ;;  %v1412_v50 = vpop.f32.mrf.mxu3 }
 0x193   : > { %v1112_v61 = vpop.f32.mrf.mxu1 }
 0x194   : > { %v1438_v27 = vadd.f32 %v1412_v50, %v1288_v49  ;;  %v1565_v39 = vpop.f32.mrf.mxu0  ;;  %v1136_v60 = vadd.f32 %v1112_v61, %v2806_v8 }
 0x196   : > { %v1588_v19 = vadd.f32 %v1562_v38, %v1438_v27 }
 0x198   : > { %v2930_v53 = vadd.f32 %v2844_v10, %v1588_v19 }
 0x199   : > { %v1265_v58 = vpop.f32.mrf.mxu2 }
 0x19a   : > { %1625 = vst.msk [vmem:[%s2849_s19 + $0x58] sm:$0xff] %vm1613_vm2, %v2930_v53  ;;  %v1289_v4 = vadd.f32 %v1265_v58, %v1136_v60  ;;  %v1415_v51 = vpop.f32.mrf.mxu3 }
 0x19b   : > { %v1115_v33 = vpop.f32.mrf.mxu1 }
 0x19c   : > { %v1439_v34 = vadd.f32 %v1415_v51, %v1289_v4  ;;  %v1568_v59 = vpop.f32.mrf.mxu0  ;;  %v1137_v17 = vadd.f32 %v1115_v33, %v2819_v14 }
 0x19e   : > { %v1589_v16 = vadd.f32 %v1565_v39, %v1439_v34 }
 0x1a0   : > { %v2937_v11 = vadd.f32 %v2844_v10, %v1589_v16 }
 0x1a1   : > { %v1268_v8 = vpop.f32.mrf.mxu2 }
 0x1a2   : > { %1626 = vst.msk [vmem:[%s2849_s19 + $0x60] sm:$0xff] %vm1613_vm2, %v2937_v11  ;;  %v1290_v41 = vadd.f32 %v1268_v8, %v1137_v17  ;;  %v1418_v42 = vpop.f32.mrf.mxu3 }
 0x1a3   : > { %v1118_v57 = vpop.f32.mrf.mxu1 }
 0x1a4   : > { %v1440_v0 = vadd.f32 %v1418_v42, %v1290_v41  ;;  %v1138_v26 = vadd.f32 %v1118_v57, %v2829_v55  ;;  %v1571_v14 = vpop.f32.mrf.mxu0 }
 0x1a6   : > { %v1590_v1 = vadd.f32 %v1568_v59, %v1440_v0 }
 0x1a8   : > { %v2944_v30 = vadd.f32 %v2844_v10, %v1590_v1 }
 0x1a9   : > { %v1271_v28 = vpop.f32.mrf.mxu2 }
 0x1aa   : > { %1627 = vst.msk [vmem:[%s2849_s19 + $0x68] sm:$0xff] %vm1613_vm2, %v2944_v30  ;;  %v1291_v62 = vadd.f32 %v1271_v28, %v1138_v26  ;;  %v1421_v18 = vpop.f32.mrf.mxu3 }
 0x1ab   : > { %v1121_v44 = vpop.f32.mrf.mxu1 }
 0x1ac   : > { %v1441_v43 = vadd.f32 %v1421_v18, %v1291_v62  ;;  %v1139_v29 = vadd.f32 %v1121_v44, %v2837_v6  ;;  %v1574_v22 = vpop.f32.mrf.mxu0 }
 0x1ae   : > { %v1591_v63 = vadd.f32 %v1571_v14, %v1441_v43 }
 0x1b0   : > { %v2951_v37 = vadd.f32 %v2844_v10, %v1591_v63 }
 0x1b1   : > { %v1274_v55 = vpop.f32.mrf.mxu2 }
 0x1b2   : > { %1628 = vst.msk [vmem:[%s2849_s19 + $0x70] sm:$0xff] %vm1613_vm2, %v2951_v37  ;;  %v1292_v36 = vadd.f32 %v1274_v55, %v1139_v29  ;;  %v1424_v2 = vpop.f32.mrf.mxu3 }
 0x1b4   : > { %v1442_v45 = vadd.f32 %v1424_v2, %v1292_v36 }
 0x1b6   : > { %v1592_v46 = vadd.f32 %v1574_v22, %v1442_v45  ;;  %1633 = sbr.rel (%p2150_p7) target bundleno = 446 (0x1be), region = 36 }
 0x1b8   : > { %v2957_v9 = vadd.f32 %v2844_v10, %v1592_v46 }
 0x1ba   : > { %1629 = vst.msk [vmem:[%s2849_s19 + $0x78] sm:$0xff] %vm1613_vm2, %v2957_v9 }
 0x1bb   : > { %vm1634_vm3 = vcmask 57344   ;;  %v2239_v6 = vmov 0.0  }
 0x1bc   : > { %1635 = vst.msk [vmem:[%s2331_s14] sm:$0x1] %vm1634_vm3, %v2239_v6 }
 0x1bd   : > { %1636 = vst.msk [vmem:[%s2338_s17] sm:$0x1] %vm1634_vm3, %v2239_v6 }
 0x1be PF: > { %v1638_v32 = vsel %vm1613_vm2, %v2853_v23, 0.0  ;;  %v1639_v10 = vsel %vm1613_vm2, %v2860_v56, 0.0  ;;  %v1641_v25 = vsel %vm1613_vm2, %v2867_v35, 0.0  ;;  %v1643_v7 = vsel %vm1613_vm2, %v2874_v5, 0.0 }
 0x1bf   : > { %v1640_v21 = vadd.f32 %v1639_v10, %v1638_v32  ;;  %v1645_v48 = vsel %vm1613_vm2, %v2881_v54, 0.0  ;;  %v1679_v15 = vmul.f32 %v2853_v23, %v2853_v23  ;;  %v1680_v24 = vmul.f32 %v2860_v56, %v2860_v56 }
 0x1c0   : > { %v1681_v40 = vmul.f32 %v2867_v35, %v2867_v35  ;;  %v1647_v49 = vsel %vm1613_vm2, %v2888_v52, 0.0  ;;  %v1682_v61 = vmul.f32 %v2874_v5, %v2874_v5  ;;  %v1649_v27 = vsel %vm1613_vm2, %v2895_v20, 0.0 }
 0x1c1   : > { %v1642_v47 = vadd.f32 %v1641_v25, %v1640_v21  ;;  %v1683_v39 = vmul.f32 %v2881_v54, %v2881_v54  ;;  %v1695_v19 = vsel %vm1613_vm2, %v1679_v15, 0.0  ;;  %v1696_v56 = vsel %vm1613_vm2, %v1680_v24, 0.0 }
 0x1c2   : > { %v1698_v35 = vsel %vm1613_vm2, %v1681_v40, 0.0  ;;  %v1651_v60 = vsel %vm1613_vm2, %v2902_v3, 0.0  ;;  %v1697_v58 = vadd.f32 %v1696_v56, %v1695_v19  ;;  %v1684_v5 = vmul.f32 %v2888_v52, %v2888_v52 }
 0x1c3   : > { %v1644_v38 = vadd.f32 %v1643_v7, %v1642_v47  ;;  %v1700_v51 = vsel %vm1613_vm2, %v1682_v61, 0.0  ;;  %v1653_v54 = vsel %vm1613_vm2, %v2909_v12, 0.0  ;;  %v1685_v16 = vmul.f32 %v2895_v20, %v2895_v20 }
 0x1c4   : > { %v1699_v33 = vadd.f32 %v1698_v35, %v1697_v58  ;;  %v1702_v59 = vsel %vm1613_vm2, %v1683_v39, 0.0  ;;  %v1655_v17 = vsel %vm1613_vm2, %v2916_v31, 0.0  ;;  %v1686_v52 = vmul.f32 %v2902_v3, %v2902_v3 }
 0x1c5   : > { %v1646_v50 = vadd.f32 %v1645_v48, %v1644_v38  ;;  %v1704_v42 = vsel %vm1613_vm2, %v1684_v5, 0.0  ;;  %v1657_v57 = vsel %vm1613_vm2, %v2923_v13, 0.0  ;;  %v1687_v20 = vmul.f32 %v2909_v12, %v2909_v12 }
 0x1c6   : > { %v1701_v8 = vadd.f32 %v1700_v51, %v1699_v33  ;;  %v1706_v26 = vsel %vm1613_vm2, %v1685_v16, 0.0  ;;  %v1659_v28 = vsel %vm1613_vm2, %v2930_v53, 0.0  ;;  %v1688_v3 = vmul.f32 %v2916_v31, %v2916_v31 }
 0x1c7   : > { %v1648_v23 = vadd.f32 %v1647_v49, %v1646_v50  ;;  %v1708_v18 = vsel %vm1613_vm2, %v1686_v52, 0.0  ;;  %v1661_v43 = vsel %vm1613_vm2, %v2937_v11, 0.0  ;;  %v1689_v12 = vmul.f32 %v2923_v13, %v2923_v13 }
 0x1c8   : > { %v1703_v0 = vadd.f32 %v1702_v59, %v1701_v8  ;;  %v1710_v29 = vsel %vm1613_vm2, %v1687_v20, 0.0  ;;  %v1663_v55 = vsel %vm1613_vm2, %v2944_v30, 0.0  ;;  %v1690_v31 = vmul.f32 %v2930_v53, %v2930_v53 }
 0x1c9   : > { %v1650_v4 = vadd.f32 %v1649_v27, %v1648_v23  ;;  %v1712_v22 = vsel %vm1613_vm2, %v1688_v3, 0.0  ;;  %v1665_v45 = vsel %vm1613_vm2, %v2951_v37, 0.0  ;;  %v1691_v13 = vmul.f32 %v2937_v11, %v2937_v11 }
 0x1ca   : > { %v1705_v14 = vadd.f32 %v1704_v42, %v1703_v0  ;;  %v1714_v32 = vsel %vm1613_vm2, %v1689_v12, 0.0  ;;  %v1667_v10 = vsel %vm1613_vm2, %v2957_v9, 0.0  ;;  %v1692_v53 = vmul.f32 %v2944_v30, %v2944_v30 }
 0x1cb   : > { %v1652_v34 = vadd.f32 %v1651_v60, %v1650_v4  ;;  %v1716_v7 = vsel %vm1613_vm2, %v1690_v31, 0.0  ;;  %v1693_v38 = vmul.f32 %v2951_v37, %v2951_v37  ;;  %v1718_v11 = vsel %vm1613_vm2, %v1691_v13, 0.0  ;;  %v1637_v60 = vld [vmem:[%s2331_s14] sm:$0x1] }
 0x1cc   : > { %v1707_v44 = vadd.f32 %v1706_v26, %v1705_v14  ;;  %v1694_v40 = vmul.f32 %v2957_v9, %v2957_v9  ;;  %v1720_v49 = vsel %vm1613_vm2, %v1692_v53, 0.0  ;;  %vm1676_vm4 = vcmask 57344  }
 0x1cd   : > { %v1654_v41 = vadd.f32 %v1653_v54, %v1652_v34  ;;  %v1722_v30 = vsel %vm1613_vm2, %v1693_v38, 0.0  ;;  %v1678_v34 = vld [vmem:[%s2338_s17] sm:$0x1] }
 0x1ce   : > { %v1709_v36 = vadd.f32 %v1708_v18, %v1707_v44  ;;  %v1724_v37 = vsel %vm1613_vm2, %v1694_v40, 0.0 }
 0x1cf   : > { %v1656_v1 = vadd.f32 %v1655_v17, %v1654_v41 }
 0x1d0   : > { %v1711_v46 = vadd.f32 %v1710_v29, %v1709_v36 }
 0x1d1   : > { %v1658_v62 = vadd.f32 %v1657_v57, %v1656_v1 }
 0x1d2   : > { %v1713_v25 = vadd.f32 %v1712_v22, %v1711_v46 }
 0x1d3   : > { %v1660_v63 = vadd.f32 %v1659_v28, %v1658_v62 }
 0x1d4   : > { %v1715_v47 = vadd.f32 %v1714_v32, %v1713_v25 }
 0x1d5   : > { %v1662_v2 = vadd.f32 %v1661_v43, %v1660_v63 }
 0x1d6   : > { %v1717_v15 = vadd.f32 %v1716_v7, %v1715_v47 }
 0x1d7   : > { %v1664_v6 = vadd.f32 %v1663_v55, %v1662_v2 }
 0x1d8   : > { %v1719_v50 = vadd.f32 %v1718_v11, %v1717_v15 }
 0x1d9   : > { %v1666_v21 = vadd.f32 %v1665_v45, %v1664_v6 }
 0x1da   : > { %v1721_v27 = vadd.f32 %v1720_v49, %v1719_v50 }
 0x1db   : > { %v1668_v48 = vadd.f32 %v1667_v10, %v1666_v21 }
 0x1dc   : > { %v1723_v23 = vadd.f32 %v1722_v30, %v1721_v27 }
 0x1dd   : > { %v1669_v24 = vrot.slane %v1668_v48, 4 }
 0x1de   : > { %v1725_v56 = vadd.f32 %v1724_v37, %v1723_v23 }
 0x1df   : > { %v1670_v61 = vadd.f32 %v1669_v24, %v1668_v48 }
 0x1e0   : > { %v1726_v58 = vrot.slane %v1725_v56, 4 }
 0x1e1   : > { %v1671_v39 = vrot.slane %v1670_v61, 2 }
 0x1e2   : > { %v1727_v4 = vadd.f32 %v1726_v58, %v1725_v56 }
 0x1e3   : > { %v1672_v19 = vadd.f32 %v1671_v39, %v1670_v61 }
 0x1e4   : > { %v1728_v51 = vrot.slane %v1727_v4, 2 }
 0x1e5   : > { %v1673_v35 = vrot.slane %v1672_v19, 1 }
 0x1e6   : > { %v1729_v54 = vadd.f32 %v1728_v51, %v1727_v4 }
 0x1e7   : > { %v1674_v9 = vadd.f32 %v1673_v35, %v1672_v19 }
 0x1e8   : > { %v1730_v33 = vrot.slane %v1729_v54, 1 }
 0x1e9   : > { %v1675_v5 = vadd.f32 %v1674_v9, %v1637_v60 }
 0x1ea   : > { %v1731_v16 = vadd.f32 %v1730_v33, %v1729_v54 }
 0x1eb   : > { %1677 = vst.msk [vmem:[%s2331_s14] sm:$0x1] %vm1676_vm4, %v1675_v5 }
 0x1ec   : > { %v1732_v59 = vadd.f32 %v1731_v16, %v1678_v34 }
 0x1ee   : > { %1733 = vst.msk [vmem:[%s2338_s17] sm:$0x1] %vm1676_vm4, %v1732_v59 }
 0x1ef PF: > { %s16_s22 = sadd.s32 1, %s2237_s22   ;;  %s3079_s18 = smov %s2229_s20 }
 0x1f0   : > { %p13_p8 = scmp.ge.s32.totalorder %s16_s22, 6   ;;  %s3080_s19 = smov %s2233_s21 }
 0x1f1   : > { %s3081_s20 = smov %s3084_s23  ;;  %s3082_s21 = smov %s3088_s24 }
 0x1f2   :  { %15 = sbr.rel (!%p13_p8) target bundleno = 3 (0x3), region = 101 }

</bundles_post_ra>
